<compile_context>
chip_gen: v6e
topology: v6e:2x2x1
jax: 0.10.0
libtpu: 0.0.40
codegen_flags: <defaults>
</compile_context>

<pallas_src>
import numpy as np
import jax
import jax.numpy as jnp
from jax import lax
from jax.experimental import pallas as pl
from jax.experimental.pallas import tpu as pltpu

jax.config.update("jax_default_matmul_precision", "highest")

# ------------------------- static shapes / config -------------------------
B = 2                     # batch
HIN = WIN = 28            # input spatial (required by fc1 = 64*4*4)
K = 5                     # conv kernel
C1, C2, NCLS = 16, 64, 10
HC1 = WC1 = 24            # conv1 output
HP1 = WP1 = 12            # after 2x2 avg pool
HC2 = WC2 = 8             # conv2 output
HP2 = WP2 = 4             # after 2x2 avg pool
S2 = HP2 * WP2            # 16 pooled spatial positions for fc
KKC1 = K * K * C1         # 400  (conv2 im2col contraction)
ROWS2 = B * HC2 * WC2     # 128  (conv2 matmul M)
POOL_ROWS = B * S2        # 32   (post-pool rows)

CFG = dict(threshold1=0.5, threshold2=0.4, threshold3=0.3,
           slope=25.0, beta=0.9, num_steps=6,
           enable_batch_norm=False,   # TODO(synk): BatchNorm2d (training-mode batch stats) not ported; disabled via config.
           dropout1=0.0,              # TODO(synk): stochastic Dropout not ported; p=0 makes it identity.
           binarize=False, binarize_input=False,
           enable_bias=True, on_spike_reset_to_zero=False)


# --------------------- Pallas kernel 1: conv1 matmul ----------------------
def _matmul_bias_kernel(a_ref, w_ref, b_ref, o_ref):
    o_ref[...] = jnp.dot(a_ref[...], w_ref[...],
                         preferred_element_type=jnp.float32) + b_ref[...]


def conv1_pool_pallas(x_nhwc, w1r, b1):
    """avg_pool2d(conv1(x), 2) — step-invariant, computed once. im2col is glue,
    the matmul runs on the MXU inside a Pallas kernel."""
    cols = []
    for di in range(K):
        for dj in range(K):
            cols.append(x_nhwc[:, di:di + HC1, dj:dj + WC1, 0])
    patches = jnp.stack(cols, axis=-1).reshape(B * HC1 * WC1, K * K)
    out = pl.pallas_call(
        _matmul_bias_kernel,
        out_shape=jax.ShapeDtypeStruct((B * HC1 * WC1, C1), jnp.float32),
    )(patches, w1r, b1.reshape(1, C1))
    conv1 = out.reshape(B, HC1, WC1, C1)
    # 2x2 average pool (step-invariant preprocessing glue)
    return conv1.reshape(B, HP1, 2, WP1, 2, C1).mean(axis=(2, 4))


# --------------- Pallas kernel 2: fused recurrent SNN loop -----------------
def _make_snn_kernel(beta, thr1, thr2, thr3, num_steps):
    def kernel(cur1_ref, w2_ref, b2_ref, p2_ref, wbig_ref, mask_ref,
               sel_ref, rmat_ref, bfc_ref,
               spk3_ref, mem3o_ref, mem1_s, mem2_s, mem3_s):
        # single invocation: init state once, run the whole recurrence in-kernel
        mem1_s[...] = jnp.zeros_like(mem1_s)
        mem2_s[...] = jnp.zeros_like(mem2_s)
        mem3_s[...] = jnp.zeros_like(mem3_s)

        for t in range(num_steps):   # fully unrolled (num_steps is small/static)
            # ---- LIF1 (reset-by-subtraction) on im2col-expanded state ----
            m1 = mem1_s[...]                                   # (128, 400)
            r1 = (m1 > thr1).astype(jnp.float32)
            m1 = beta * m1 + cur1_ref[...] - r1 * thr1
            spk1 = (m1 > thr1).astype(jnp.float32)             # already in patch form
            mem1_s[...] = m1

            # ---- conv2: ONE fused K=400 MXU matmul ----
            acc = jnp.dot(spk1, w2_ref[...],
                          preferred_element_type=jnp.float32)  # (128, 64)
            # ---- 2x2 avg pool via constant pooling matrix (MXU) + bias ----
            cur2 = jnp.dot(p2_ref[...], acc,
                           preferred_element_type=jnp.float32) + b2_ref[...]  # (32, 64)

            # ---- LIF2 ----
            m2 = mem2_s[...]
            r2 = (m2 > thr2).astype(jnp.float32)
            m2 = beta * m2 + cur2 - r2 * thr2
            spk2 = (m2 > thr2).astype(jnp.float32)             # (32, 64), row = b*16+s
            mem2_s[...] = m2

            # ---- fc1: contraction over (spatial, channel) without lane-axis
            #      reshapes: z[r, s*10+o] = sum_c spk2[r,c]*W[o, c*16+s]; the
            #      constant mask/select/reduce matmuls pick the s'==s diagonal,
            #      reduce rows per batch and columns per class. ----
            z = jnp.dot(spk2, wbig_ref[...],
                        preferred_element_type=jnp.float32)            # (32, 160)
            a = jnp.dot(sel_ref[...], z * mask_ref[...],
                        preferred_element_type=jnp.float32)            # (2, 160)
            cur3 = jnp.dot(a, rmat_ref[...],
                           preferred_element_type=jnp.float32) + bfc_ref[...]  # (2, 10)

            # ---- LIF3 ----
            m3 = mem3_s[...]
            r3 = (m3 > thr3).astype(jnp.float32)
            m3 = beta * m3 + cur3 - r3 * thr3
            spk3 = (m3 > thr3).astype(jnp.float32)
            mem3_s[...] = m3

            spk3_ref[t] = spk3
            mem3o_ref[t] = m3
    return kernel


def _build_pool_matrix():
    """[B*4*4, B*8*8] matrix implementing per-batch 2x2 average pooling."""
    p = np.zeros((POOL_ROWS, ROWS2), np.float32)
    for b in range(B):
        for io in range(HP2):
            for jo in range(WP2):
                r = b * S2 + io * WP2 + jo
                for pi in range(2):
                    for pj in range(2):
                        c = b * HC2 * WC2 + (2 * io + pi) * WC2 + (2 * jo + pj)
                        p[r, c] = 0.25
    return p


def _build_fc_selectors():
    """Constant 0/1 matrices that implement the (s,c)->fc contraction as matmuls."""
    mask = np.zeros((POOL_ROWS, S2 * NCLS), np.float32)   # keep only s'==s terms
    for b in range(B):
        for s in range(S2):
            mask[b * S2 + s, s * NCLS:(s + 1) * NCLS] = 1.0
    sel = np.zeros((B, POOL_ROWS), np.float32)            # reduce rows per batch
    for b in range(B):
        sel[b, b * S2:(b + 1) * S2] = 1.0
    rmat = np.zeros((S2 * NCLS, NCLS), np.float32)        # reduce over s per class
    for s in range(S2):
        for o in range(NCLS):
            rmat[s * NCLS + o, o] = 1.0
    return mask, sel, rmat


def snn_loop_pallas(cur1_ex, w2f, b2, p2, wbig, mask, sel, rmat, bfc, cfg):
    T = cfg['num_steps']
    kernel = _make_snn_kernel(cfg['beta'], cfg['threshold1'],
                              cfg['threshold2'], cfg['threshold3'], T)
    spk3_rec, mem3_rec = pl.pallas_call(
        kernel,
        out_shape=(jax.ShapeDtypeStruct((T, B, NCLS), jnp.float32),
                   jax.ShapeDtypeStruct((T, B, NCLS), jnp.float32)),
        scratch_shapes=[
            pltpu.VMEM((ROWS2, KKC1), jnp.float32),     # mem1 (im2col-expanded)
            pltpu.VMEM((POOL_ROWS, C2), jnp.float32),   # mem2
            pltpu.VMEM((B, NCLS), jnp.float32),         # mem3
        ],
    )(cur1_ex, w2f, b2.reshape(1, C2), p2, wbig, mask, sel, rmat,
      bfc.reshape(1, NCLS))
    return spk3_rec, mem3_rec


def netconv_forward(x_nchw, params, cfg):
    w1, b1, w2, b2, wfc, bfc = params
    x_nhwc = jnp.transpose(x_nchw, (0, 2, 3, 1))
    # conv1 weight [16,1,5,5] -> [25,16]
    w1r = jnp.transpose(w1, (2, 3, 1, 0)).reshape(K * K, C1)
    cur1 = conv1_pool_pallas(x_nhwc, w1r, b1)            # (B, 12, 12, 16)

    # im2col-expand the step-invariant cur1: row = (b, i, j), col = (di, dj, ci)
    cols = [cur1[:, di:di + HC2, dj:dj + WC2, :]
            for di in range(K) for dj in range(K)]
    cur1_ex = jnp.stack(cols, axis=3).reshape(ROWS2, KKC1)

    # conv2 weight [64,16,5,5] -> [400,64], row order (di, dj, ci)
    w2f = jnp.transpose(w2, (2, 3, 1, 0)).reshape(KKC1, C2)

    # fc weight [10,1024] (PyTorch flatten index = c*16 + s) -> wbig[c, s*10 + o]
    wbig = jnp.transpose(wfc.reshape(NCLS, C2, S2), (1, 2, 0)).reshape(C2, S2 * NCLS)

    p2 = jnp.asarray(_build_pool_matrix(), jnp.float32)
    mask_np, sel_np, rmat_np = _build_fc_selectors()
    mask = jnp.asarray(mask_np, jnp.float32)
    sel = jnp.asarray(sel_np, jnp.float32)
    rmat = jnp.asarray(rmat_np, jnp.float32)

    return snn_loop_pallas(cur1_ex, w2f, b2, p2, wbig, mask, sel, rmat, bfc, cfg)


# ----------------------------- pure-JAX reference --------------------------
def ref_forward(x, w1, b1, w2, b2, wfc, bfc, cfg):
    beta = cfg['beta']
    thr1, thr2, thr3 = cfg['threshold1'], cfg['threshold2'], cfg['threshold3']
    T = cfg['num_steps']
    dn = ('NCHW', 'OIHW', 'NCHW')

    def avgpool2(y):
        b_, c_, h_, w_ = y.shape
        return y.reshape(b_, c_, h_ // 2, 2, w_ // 2, 2).mean(axis=(3, 5))

    def conv(y, w, bb):
        out = lax.conv_general_dilated(y, w, (1, 1), 'VALID',
                                       dimension_numbers=dn,
                                       precision=lax.Precision.HIGHEST)
        return out + bb[None, :, None, None]

    cur1 = avgpool2(conv(x, w1, b1))
    mem1 = jnp.zeros_like(cur1)
    mem2 = jnp.zeros((B, C2, HP2, WP2), jnp.float32)
    mem3 = jnp.zeros((B, NCLS), jnp.float32)
    spk3s, mem3s = [], []
    for _ in range(T):
        r1 = (mem1 > thr1).astype(jnp.float32)
        mem1 = beta * mem1 + cur1 - r1 * thr1
        spk1 = (mem1 > thr1).astype(jnp.float32)
        cur2 = avgpool2(conv(spk1, w2, b2))
        r2 = (mem2 > thr2).astype(jnp.float32)
        mem2 = beta * mem2 + cur2 - r2 * thr2
        spk2 = (mem2 > thr2).astype(jnp.float32)
        cur3 = spk2.reshape(B, -1) @ wfc.T + bfc
        r3 = (mem3 > thr3).astype(jnp.float32)
        mem3 = beta * mem3 + cur3 - r3 * thr3
        spk3 = (mem3 > thr3).astype(jnp.float32)
        spk3s.append(spk3)
        mem3s.append(mem3)
    return jnp.stack(spk3s, 0), jnp.stack(mem3s, 0)


# ---------------------------------- main -----------------------------------
if __name__ == "__main__":
    key = jax.random.PRNGKey(0)
    kx, k1, k2, k3, k4, k5, k6 = jax.random.split(key, 7)
    x = jax.random.normal(kx, (B, 1, HIN, WIN), jnp.float32)
    w1 = jax.random.normal(k1, (C1, 1, K, K), jnp.float32) * 0.2
    b1 = jax.random.normal(k2, (C1,), jnp.float32) * 0.05
    w2 = jax.random.normal(k3, (C2, C1, K, K), jnp.float32) * 0.1
    b2 = jax.random.normal(k4, (C2,), jnp.float32) * 0.05
    wfc = jax.random.normal(k5, (NCLS, C2 * HP2 * WP2), jnp.float32) * 0.05
    bfc = jax.random.normal(k6, (NCLS,), jnp.float32) * 0.05
    params = (w1, b1, w2, b2, wfc, bfc)

    spk3_rec, mem3_rec = netconv_forward(x, params, CFG)
    spk3_rec, mem3_rec = jax.block_until_ready((spk3_rec, mem3_rec))

    spk3_ref, mem3_ref = ref_forward(x, w1, b1, w2, b2, wfc, bfc, CFG)
    np.testing.assert_allclose(np.asarray(mem3_rec), np.asarray(mem3_ref),
                               atol=1e-3, rtol=1e-3)
    np.testing.assert_allclose(np.asarray(spk3_rec), np.asarray(spk3_ref),
                               atol=1e-3, rtol=0)
    print("KERNEL_OK")
</pallas_src>

<mosaic_0001>
module attributes {stable_mosaic.version = 11 : i64} {
  func.func @_matmul_bias_kernel(%arg0: memref<1152x25xf32, #tpu.memory_space<vmem>>, %arg1: memref<25x16xf32, #tpu.memory_space<vmem>>, %arg2: memref<1x16xf32, #tpu.memory_space<vmem>>, %arg3: memref<1152x16xf32, #tpu.memory_space<vmem>>) attributes {dimension_semantics = [], scalar_prefetch = 0 : i64, scratch_operands = 0 : i64, tpu.core_type = #tpu.core_type<tc>} {
    %c0 = arith.constant 0 : index
    %c0_0 = arith.constant 0 : index
    %0 = vector.load %arg0[%c0, %c0_0] : memref<1152x25xf32, #tpu.memory_space<vmem>>, vector<1152x25xf32>
    %c0_1 = arith.constant 0 : index
    %c0_2 = arith.constant 0 : index
    %1 = vector.load %arg1[%c0_1, %c0_2] : memref<25x16xf32, #tpu.memory_space<vmem>>, vector<25x16xf32>
    %cst = arith.constant dense<0.000000e+00> : vector<1152x16xf32>
    %2 = tpu.matmul %0, %1, %cst {dimension_numbers = #tpu.dot_dimension_numbers<[1], [0], [0], [1], [0, 0, 1, 1], [], []>, precision = #tpu.contract_precision<fp32>} : vector<1152x25xf32>, vector<25x16xf32>, vector<1152x16xf32> -> vector<1152x16xf32>
    %c0_3 = arith.constant 0 : index
    %c0_4 = arith.constant 0 : index
    %3 = vector.load %arg2[%c0_3, %c0_4] : memref<1x16xf32, #tpu.memory_space<vmem>>, vector<1x16xf32>
    %4 = vector.broadcast %3 : vector<1x16xf32> to vector<1152x16xf32>
    %5 = arith.addf %2, %4 : vector<1152x16xf32>
    %c0_5 = arith.constant 0 : index
    %c0_6 = arith.constant 0 : index
    %6 = vector.load %arg3[%c0_5, %c0_6] : memref<1152x16xf32, #tpu.memory_space<vmem>>, vector<1152x16xf32>
    tpu.vector_store %arg3[%c0_5, %c0_6], %5 {strides = array<i32>} : memref<1152x16xf32, #tpu.memory_space<vmem>>, vector<1152x16xf32>,
    return
  }
}

</mosaic_0001>

<bundles_post_ra>
// kernel: tpu_custom_call.1
= control target key start
LH: loop header
LB: loop body
LE: loop exit
PB: predicated region body
PF: predicated region fallthrough
CT: control target
= control target key end

     0   :  { %vm602_vm0 = vcmask 1040384   ;;  %vm169_vm1 = vcmask 203776   ;;  %vm7240_vm2 = vcmask 130048   ;;  %s14080_s1 = inlined_call_operand.vmem [shape: f32[25,16], index: 1, kind: input, shape index: {}]   ;;  %s14081_s0 = inlined_call_operand.vmem [shape: f32[1152,25], index: 0, kind: input, shape index: {}]   ;;  %s14082_s2 = inlined_call_operand.vmem [shape: f32[1,16], index: 2, kind: input, shape index: {}]   ;;  %s14083_s3 = inlined_call_operand.vmem [shape: f32[1152,16], index: 3, kind: output, shape index: {}]  }
   0x1   :  { %v161_v0 = vld [vmem:[%s14080_s1 + $0x18] sm:$0x1]  ;;  %v160_v1 = vld [vmem:[%s14080_s1 + $0x10] sm:$0xff]  ;;  %v159_v2 = vld [vmem:[%s14080_s1 + $0x8] sm:$0xff] }
   0x2   :  { %v604_v3 = vsel %vm602_vm0, %v161_v0, 0  ;;  %v9653_v4 = vand.u32 4294901760, %v160_v1  ;;  %v9655_v5 = vand.u32 4294901760, %v159_v2  ;;  %v158_v6 = vld [vmem:[%s14080_s1] sm:$0xff]  ;;  %v15_v8 = vld [vmem:[%s14081_s0 + $0x8] sm:$0xff]  ;;  %v16_v13 = vld [vmem:[%s14081_s0 + $0x10] sm:$0xff] }
   0x3   :  { %v14_v7 = vld [vmem:[%s14081_s0] sm:$0xff]  ;;  %v9666_v9 = vand.u32 4294901760, %v604_v3  ;;  %v9668_v10 = vand.u32 4294901760, %v158_v6  ;;  %v174_v12 = vsel %vm169_vm1, %v15_v8, 0  ;;  %v17_v14 = vld [vmem:[%s14081_s0 + $0x18] sm:$0xff]  ;;  %v177_v18 = vsel %vm169_vm1, %v16_v13, 0 }
   0x4   :  { %v171_v11 = vsel %vm169_vm1, %v14_v7, 0  ;;  %v9680_v16 = vand.u32 4294901760, %v174_v12  ;;  %v9683_v17 = vsub.f32 %v160_v1, %v9653_v4  ;;  %v9690_v20 = vand.u32 4294901760, %v177_v18  ;;  %v18_v39 = vld [vmem:[%s14081_s0 + $0x20] sm:$0xff]  ;;  %v19_v44 = vld [vmem:[%s14081_s0 + $0x28] sm:$0xff]  ;;  %v20_v49 = vld [vmem:[%s14081_s0 + $0x30] sm:$0xff] }
   0x5   :  { %v9678_v15 = vand.u32 4294901760, %v171_v11  ;;  %8278 = vmatprep.subr.mxu0 %v9666_v9  ;;  %v9688_v19 = vsub.f32 %v604_v3, %v9666_v9  ;;  %v9693_v21 = vsub.f32 %v159_v2, %v9655_v5  ;;  %v180_v22 = vsel %vm169_vm1, %v17_v14, 0  ;;  %v21_v50 = vld [vmem:[%s14081_s0 + $0x38] sm:$0xff]  ;;  %v22_v55 = vld [vmem:[%s14081_s0 + $0x40] sm:$0xff]  ;;  %v23_v60 = vld [vmem:[%s14081_s0 + $0x48] sm:$0xff] }
   0x6   :  { %14649 = vst [vmem:[#allocation3_spill] sm:$0xff] %v9680_v16  ;;  %14650 = vst [vmem:[#allocation4_spill] sm:$0xff] %v9690_v20  ;;  %8279 = vmatpush3.msra.mxu0 %v9666_v9  ;;  %v9701_v24 = vsub.f32 %v174_v12, %v9680_v16  ;;  %v9704_v25 = vand.u32 4294901760, %v9683_v17  ;;  %v9706_v26 = vand.u32 4294901760, %v180_v22  ;;  %v9714_v28 = vsub.f32 %v177_v18, %v9690_v20  ;;  %v24_v61 = vld [vmem:[%s14081_s0 + $0x50] sm:$0xff]  ;;  %v25_v8 = vld [vmem:[%s14081_s0 + $0x58] sm:$0xff] }
   0x7   :  { %14648 = vst [vmem:[#allocation2_spill] sm:$0xff] %v9678_v15  ;;  %v9698_v23 = vsub.f32 %v171_v11, %v9678_v15  ;;  %8510 = vmatprep.mubr.f32.mxu1 %v9678_v15  ;;  %8280 = vmatprep.subr.mxu0 %v9653_v4  ;;  %v9711_v27 = vand.u32 4294901760, %v9688_v19  ;;  %v9717_v29 = vand.u32 4294901760, %v9693_v21  ;;  %v9720_v30 = vsub.f32 %v158_v6, %v9668_v10 }
   0x8   :  { %14651 = vst [vmem:[#allocation5_spill] sm:$0xff] %v9706_v26  ;;  %8281 = vmatpush3.msra.mxu0 %v9653_v4  ;;  %v14098_v32 = vand.u32 4294901760, %v9701_v24  ;;  %v2150_v33 = vsub.f32 %v9683_v17, %v9704_v25  ;;  %v9728_v34 = vsub.f32 %v180_v22, %v9706_v26  ;;  %v14096_v36 = vand.u32 4294901760, %v9714_v28 }
   0x9   :  { %v14099_v31 = vand.u32 4294901760, %v9698_v23  ;;  %8282 = vmatprep.subr.mxu0 %v9655_v5  ;;  %v2143_v35 = vsub.f32 %v9688_v19, %v9711_v27  ;;  %v2157_v37 = vsub.f32 %v9693_v21, %v9717_v29  ;;  %v9737_v38 = vand.u32 4294901760, %v9720_v30 }
   0xa   :  { %8283 = vmatpush3.msra.mxu0 %v9655_v5  ;;  %v688_v41 = vsub.f32 %v9701_v24, %v14098_v32  ;;  %v2151_v42 = vand.u32 4294901760, %v2150_v33  ;;  %v14093_v43 = vand.u32 4294901760, %v9728_v34  ;;  %v698_v46 = vsub.f32 %v9714_v28, %v14096_v36  ;;  %v37_v36 = vld [vmem:[%s14081_s0 + $0xb8] sm:$0xff] }
   0xb   :  { %v678_v40 = vsub.f32 %v9698_v23, %v14099_v31  ;;  %8284 = vmatprep.subr.mxu0 %v9668_v10  ;;  %v2144_v45 = vand.u32 4294901760, %v2143_v35  ;;  %v2158_v47 = vand.u32 4294901760, %v2157_v37  ;;  %v2164_v48 = vsub.f32 %v9720_v30, %v9737_v38 }
   0xc   :  { %8285 = vmatpush3.msra.mxu0 %v9668_v10  ;;  %v689_v52 = vand.u32 4294901760, %v688_v41  ;;  %v708_v53 = vsub.f32 %v9728_v34, %v14093_v43  ;;  %v183_v54 = vsel %vm169_vm1, %v18_v39, 0  ;;  %v699_v56 = vand.u32 4294901760, %v698_v46 }
   0xd   :  { %v679_v51 = vand.u32 4294901760, %v678_v40  ;;  %8502 = vmatprep.subr.mxu1 %v2144_v45  ;;  %v2165_v57 = vand.u32 4294901760, %v2164_v48  ;;  %8726 = vmatprep.subr.mxu0 %v9688_v19  ;;  %v9774_v58 = vand.u32 4294901760, %v183_v54  ;;  %v186_v59 = vsel %vm169_vm1, %v19_v44, 0 }
   0xe   :  { %8503 = vmatpush3.msra.mxu1 %v2144_v45  ;;  %v709_v62 = vand.u32 4294901760, %v708_v53  ;;  %v9783_v63 = vand.u32 4294901760, %v186_v59  ;;  %v189_v0 = vsel %vm169_vm1, %v20_v49, 0  ;;  %v192_v1 = vsel %vm169_vm1, %v21_v50, 0  ;;  %v26_v50 = vld [vmem:[%s14081_s0 + $0x60] sm:$0xff] }
   0xf   :  { %14652 = vst [vmem:[#allocation6_spill] sm:$0xff] %v9774_v58  ;;  %8286 = vmatprep.mubr.f32.mxu0 %v679_v51  ;;  %8504 = vmatprep.subr.mxu1 %v2151_v42  ;;  %v9788_v2 = vsub.f32 %v183_v54, %v9774_v58  ;;  %v9790_v3 = vand.u32 4294901760, %v189_v0  ;;  %v9792_v6 = vand.u32 4294901760, %v192_v1  ;;  %v195_v7 = vsel %vm169_vm1, %v22_v55, 0 }
  0x10   :  { %14653 = vst [vmem:[#allocation7_spill] sm:$0xff] %v9783_v63  ;;  %8287 = vmatmul.mubr.f32.vlgmr.msra.gmra.mxu0 %v689_v52  ;;  %8505 = vmatpush3.msra.mxu1 %v2151_v42  ;;  %v9799_v11 = vsub.f32 %v186_v59, %v9783_v63  ;;  %v9801_v12 = vand.u32 4294901760, %v195_v7  ;;  %v198_v13 = vsel %vm169_vm1, %v23_v60, 0  ;;  %v201_v14 = vsel %vm169_vm1, %v24_v61, 0  ;;  %v27_v59 = vld [vmem:[%s14081_s0 + $0x68] sm:$0xff]  ;;  %v28_v60 = vld [vmem:[%s14081_s0 + $0x70] sm:$0xff] }
  0x11   :  { %14654 = vst [vmem:[#allocation8_spill] sm:$0xff] %v9790_v3  ;;  %14655 = vst [vmem:[#allocation9_spill] sm:$0xff] %v9792_v6  ;;  %8289 = vmatprep.mubr.f32.mxu0 %v699_v56  ;;  %8506 = vmatprep.subr.mxu1 %v2158_v47  ;;  %v14092_v18 = vand.u32 4294901760, %v9788_v2  ;;  %v9808_v22 = vsub.f32 %v189_v0, %v9790_v3  ;;  %v9811_v33 = vsub.f32 %v192_v1, %v9792_v6  ;;  %v29_v61 = vld [vmem:[%s14081_s0 + $0x78] sm:$0xff] }
  0x12   :  { %14656 = vst [vmem:[#allocation10_spill] sm:$0xff] %v9801_v12  ;;  %8727 = vmatpush3.msra.mxu0 %v9688_v19  ;;  %v9813_v35 = vand.u32 4294901760, %v198_v13  ;;  %8507 = vmatpush3.msra.mxu1 %v2158_v47  ;;  %v14090_v37 = vand.u32 4294901760, %v9799_v11  ;;  %v9817_v39 = vsub.f32 %v195_v7, %v9801_v12  ;;  %v9819_v40 = vand.u32 4294901760, %v201_v14 }
  0x13   :  { %v204_v19 = vsel %vm169_vm1, %v25_v8, 0  ;;  %8728 = vmatprep.subr.mxu0 %v9683_v17  ;;  %8508 = vmatprep.subr.mxu1 %v2165_v57  ;;  %v718_v41 = vsub.f32 %v9788_v2, %v14092_v18  ;;  %v14089_v42 = vand.u32 4294901760, %v9808_v22  ;;  %v14088_v44 = vand.u32 4294901760, %v9811_v33 }
  0x14   :  { %14657 = vst [vmem:[#allocation11_spill] sm:$0xff] %v9813_v35  ;;  %14658 = vst [vmem:[#allocation12_spill] sm:$0xff] %v9819_v40  ;;  %8290 = vmatmul.mubr.f32.gmra.mxu0 %v709_v62  ;;  %v9829_v45 = vsub.f32 %v198_v13, %v9813_v35  ;;  %8509 = vmatpush3.msra.mxu1 %v2165_v57  ;;  %v728_v46 = vsub.f32 %v9799_v11, %v14090_v37  ;;  %v14086_v47 = vand.u32 4294901760, %v9817_v39 }
  0x15   :  { %v9836_v48 = vsub.f32 %v201_v14, %v9819_v40  ;;  %v9838_v49 = vand.u32 4294901760, %v204_v19  ;;  %8729 = vmatpush3.msra.mxu0 %v9683_v17  ;;  %v719_v51 = vand.u32 4294901760, %v718_v41  ;;  %8511 = vmatmul.mubr.f32.vlgmr.msra.gmra.mxu1 %v9680_v16  ;;  %v738_v52 = vsub.f32 %v9808_v22, %v14089_v42  ;;  %v31_v41 = vld [vmem:[%s14081_s0 + $0x88] sm:$0xff] }
  0x16   :  { %8950 = vmatprep.subr.mxu1 %v9666_v9  ;;  %v748_v53 = vsub.f32 %v9811_v33, %v14088_v44  ;;  %v14085_v54 = vand.u32 4294901760, %v9829_v45  ;;  %v729_v55 = vand.u32 4294901760, %v728_v46  ;;  %8513 = vmatprep.mubr.f32.mxu1 %v9690_v20  ;;  %v758_v17 = vsub.f32 %v9817_v39, %v14086_v47 }
  0x17   :  { %14659 = vst [vmem:[#allocation13_spill] sm:$0xff] %v9838_v49  ;;  %8951 = vmatpush3.msra.mxu1 %v9666_v9  ;;  %v14084_v56 = vand.u32 4294901760, %v9836_v48  ;;  %v9860_v57 = vsub.f32 %v204_v19, %v9838_v49  ;;  %8292 = vmatprep.mubr.f32.mxu0 %v719_v51  ;;  %v739_v62 = vand.u32 4294901760, %v738_v52  ;;  %v207_v1 = vsel %vm169_vm1, %v26_v50, 0  ;;  %v30_v19 = vld [vmem:[%s14081_s0 + $0x80] sm:$0xff] }
  0x18   :  { %v768_v0 = vsub.f32 %v9829_v45, %v14085_v54  ;;  %8952 = vmatprep.subr.mxu1 %v9653_v4  ;;  %8293 = vmatmul.mubr.f32.gmra.mxu0 %v729_v55  ;;  %v749_v7 = vand.u32 4294901760, %v748_v53  ;;  %v9880_v14 = vand.u32 4294901760, %v207_v1  ;;  %v759_v46 = vand.u32 4294901760, %v758_v17 }
  0x19   :  { %v778_v8 = vsub.f32 %v9836_v48, %v14084_v56  ;;  %v14087_v13 = vand.u32 4294901760, %v9860_v57  ;;  %8953 = vmatpush3.msra.mxu1 %v9653_v4  ;;  %8295 = vmatprep.mubr.f32.mxu0 %v739_v62  ;;  %v210_v50 = vsel %vm169_vm1, %v27_v59, 0  ;;  %v213_v51 = vsel %vm169_vm1, %v28_v60, 0  ;;  %v32_v62 = vld [vmem:[%s14081_s0 + $0x90] sm:$0xff] }
  0x1a   :  { %14660 = vst [vmem:[#allocation14_spill] sm:$0xff] %v9880_v14  ;;  %8514 = vmatmul.mubr.f32.gmra.mxu1 %v9706_v26  ;;  %v216_v52 = vsel %vm169_vm1, %v29_v61, 0  ;;  %v769_v53 = vand.u32 4294901760, %v768_v0  ;;  %v9895_v56 = vsub.f32 %v207_v1, %v9880_v14  ;;  %v9897_v54 = vand.u32 4294901760, %v210_v50  ;;  %8730 = vmatprep.subr.mxu0 %v9693_v21 }
  0x1b   :  { %8516 = vmatprep.mubr.f32.mxu1 %v9774_v58  ;;  %v779_v55 = vand.u32 4294901760, %v778_v8  ;;  %v9903_v17 = vand.u32 4294901760, %v213_v51  ;;  %v9905_v59 = vand.u32 4294901760, %v216_v52  ;;  %v219_v60 = vsel %vm169_vm1, %v30_v19, 0  ;;  %8731 = vmatpush3.msra.mxu0 %v9693_v21  ;;  %v33_v19 = vld [vmem:[%s14081_s0 + $0x98] sm:$0xff] }
  0x1c   :  { %14661 = vst [vmem:[#allocation15_spill] sm:$0xff] %v9895_v56  ;;  %14662 = vst [vmem:[#allocation16_spill] sm:$0xff] %v9897_v54  ;;  %v222_v61 = vsel %vm169_vm1, %v31_v41, 0  ;;  %8954 = vmatprep.subr.mxu1 %v9655_v5  ;;  %8296 = vmatmul.mubr.f32.gmra.mxu0 %v749_v7  ;;  %v788_v0 = vsub.f32 %v9860_v57, %v14087_v13  ;;  %v14091_v1 = vand.u32 4294901760, %v9895_v56  ;;  %v9918_v47 = vand.u32 4294901760, %v219_v60 }
  0x1d   :  { %14663 = vst [vmem:[#allocation17_spill] sm:$0xff] %v9903_v17  ;;  %14664 = vst [vmem:[#allocation18_spill] sm:$0xff] %v9905_v59  ;;  %v9916_v8 = vsub.f32 %v210_v50, %v9897_v54  ;;  %8955 = vmatpush3.msra.mxu1 %v9655_v5  ;;  %8298 = vmatprep.mubr.f32.mxu0 %v759_v46  ;;  %v9926_v21 = vsub.f32 %v213_v51, %v9903_v17  ;;  %v9931_v41 = vand.u32 4294901760, %v222_v61 }
  0x1e   :  { %14666 = vst [vmem:[#allocation20_spill] sm:$0xff] %v9918_v47  ;;  %8517 = vmatmul.mubr.f32.gmra.mxu1 %v9783_v63  ;;  %v9929_v7 = vsub.f32 %v216_v52, %v9905_v59  ;;  %v225_v50 = vsel %vm169_vm1, %v32_v62, 0  ;;  %v798_v13 = vsub.f32 %v9895_v56, %v14091_v1  ;;  %v9940_v44 = vsub.f32 %v219_v60, %v9918_v47  ;;  %v34_v1 = vld [vmem:[%s14081_s0 + $0xa0] sm:$0xff] }
  0x1f   :  { %14665 = vst [vmem:[#allocation19_spill] sm:$0xff] %v9916_v8  ;;  %14667 = vst [vmem:[#allocation21_spill] sm:$0xff] %v9926_v21  ;;  %8519 = vmatprep.mubr.f32.mxu1 %v9790_v3  ;;  %v14095_v46 = vand.u32 4294901760, %v9916_v8  ;;  %v9942_v51 = vand.u32 4294901760, %v225_v50  ;;  %8732 = vmatprep.subr.mxu0 %v9720_v30  ;;  %v14094_v52 = vand.u32 4294901760, %v9926_v21  ;;  %v9948_v62 = vsub.f32 %v222_v61, %v9931_v41 }
  0x20   :  { %14668 = vst [vmem:[#allocation22_spill] sm:$0xff] %v9929_v7  ;;  %14669 = vst [vmem:[#allocation23_spill] sm:$0xff] %v9931_v41  ;;  %v14097_v42 = vand.u32 4294901760, %v9929_v7  ;;  %v228_v37 = vsel %vm169_vm1, %v33_v19, 0  ;;  %8733 = vmatpush3.msra.mxu0 %v9720_v30  ;;  %8956 = vmatprep.subr.mxu1 %v9668_v10  ;;  %v789_v60 = vand.u32 4294901760, %v788_v0  ;;  %v14102_v43 = vand.u32 4294901760, %v9940_v44 }
  0x21   :  { %14670 = vst [vmem:[#allocation24_spill] sm:$0xff] %v9940_v44  ;;  %14671 = vst [vmem:[#allocation25_spill] sm:$0xff] %v9942_v51  ;;  %8299 = vmatmul.mubr.f32.gmra.mxu0 %v769_v53  ;;  %v808_v18 = vsub.f32 %v9916_v8, %v14095_v46  ;;  %8957 = vmatpush3.msra.mxu1 %v9668_v10  ;;  %v799_v61 = vand.u32 4294901760, %v798_v13  ;;  %v818_v30 = vsub.f32 %v9926_v21, %v14094_v52  ;;  %v35_v0 = vld [vmem:[%s14081_s0 + $0xa8] sm:$0xff]  ;;  %v36_v52 = vld [vmem:[%s14081_s0 + $0xb0] sm:$0xff] }
  0x22   :  { %14672 = vst [vmem:[#allocation26_spill] sm:$0xff] %v9948_v62  ;;  %8301 = vmatprep.mubr.f32.mxu0 %v779_v55  ;;  %8520 = vmatmul.mubr.f32.gmra.mxu1 %v9792_v6  ;;  %v9966_v19 = vsub.f32 %v225_v50, %v9942_v51  ;;  %v9968_v53 = vand.u32 4294901760, %v228_v37  ;;  %v828_v55 = vsub.f32 %v9929_v7, %v14097_v42  ;;  %v231_v13 = vsel %vm169_vm1, %v34_v1, 0 }
  0x23   :  { %8522 = vmatprep.mubr.f32.mxu1 %v9801_v12  ;;  %9174 = vmatprep.subr.mxu0 %v9711_v27  ;;  %v809_v42 = vand.u32 4294901760, %v808_v18  ;;  %v838_v1 = vsub.f32 %v9940_v44, %v14102_v43  ;;  %v9993_v32 = vand.u32 4294901760, %v231_v13  ;;  %v234_v31 = vsel %vm169_vm1, %v35_v0, 0  ;;  %v39_v43 = vld [vmem:[%s14081_s0 + $0xc8] sm:$0xff] }
  0x24   :  { %14673 = vst [vmem:[#allocation27_spill] sm:$0xff] %v9966_v19  ;;  %14674 = vst [vmem:[#allocation28_spill] sm:$0xff] %v9968_v53  ;;  %v9984_v46 = vsub.f32 %v228_v37, %v9968_v53  ;;  %9398 = vmatprep.subr.mxu1 %v9666_v9  ;;  %v38_v37 = vld [vmem:[%s14081_s0 + $0xc0] sm:$0xff]  ;;  %v819_v50 = vand.u32 4294901760, %v818_v30  ;;  %v237_v18 = vsel %vm169_vm1, %v36_v52, 0  ;;  %v829_v0 = vand.u32 4294901760, %v828_v55 }
  0x25   :  { %8302 = vmatmul.mubr.f32.gmra.mxu0 %v789_v60  ;;  %14676 = vst [vmem:[#allocation30_spill] sm:$0xff] %v9993_v32  ;;  %v10001_v60 = vand.u32 4294901760, %v234_v31  ;;  %v10009_v6 = vsub.f32 %v231_v13, %v9993_v32  ;;  %v240_v30 = vsel %vm169_vm1, %v37_v36, 0  ;;  %v14680_v12 = vand.u32 4294901760, %v9948_v62  ;;  %v40_v55 = vld [vmem:[%s14081_s0 + $0xd0] sm:$0xff] }
  0x26   :  { %14675 = vst [vmem:[#allocation29_spill] sm:$0xff] %v9984_v46  ;;  %8304 = vmatprep.mubr.f32.mxu0 %v799_v61  ;;  %8523 = vmatmul.mubr.f32.gmra.mxu1 %v9813_v35  ;;  %v10011_v61 = vand.u32 4294901760, %v237_v18  ;;  %v243_v63 = vsel %vm169_vm1, %v38_v37, 0  ;;  %v14684_v37 = vand.u32 4294901760, %v9966_v19 }
  0x27   :  { %14677 = vst [vmem:[#allocation31_spill] sm:$0xff] %v10001_v60  ;;  %8525 = vmatprep.mubr.f32.mxu1 %v9819_v40  ;;  %14678 = vst [vmem:[#allocation32_spill] sm:$0xff] %v10009_v6  ;;  %v848_v35 = vsub.f32 %v9948_v62, %v14680_v12  ;;  %v10019_v3 = vsub.f32 %v234_v31, %v10001_v60  ;;  %v10029_v40 = vand.u32 4294901760, %v240_v30  ;;  %v246_v12 = vsel %vm169_vm1, %v39_v43, 0 }
  0x28   :  { %14679 = vst [vmem:[#allocation33_spill] sm:$0xff] %v10011_v61  ;;  %v10027_v36 = vsub.f32 %v237_v18, %v10011_v61  ;;  %v839_v31 = vand.u32 4294901760, %v838_v1  ;;  %v858_v52 = vsub.f32 %v9966_v19, %v14684_v37  ;;  %v10036_v58 = vand.u32 4294901760, %v243_v63  ;;  %v42_v37 = vld [vmem:[%s14081_s0 + $0xe0] sm:$0xff] }
  0x29   :  { %14681 = vst [vmem:[#allocation34_spill] sm:$0xff] %v10019_v3  ;;  %8305 = vmatmul.mubr.f32.gmra.mxu0 %v809_v42  ;;  %14683 = vst [vmem:[#allocation36_spill] sm:$0xff] %v10029_v40  ;;  %v41_v42 = vld [vmem:[%s14081_s0 + $0xd8] sm:$0xff]  ;;  %v249_v18 = vsel %vm169_vm1, %v40_v55, 0  ;;  %v849_v13 = vand.u32 4294901760, %v848_v35  ;;  %v14686_v43 = vand.u32 4294901760, %v9984_v46  ;;  %v10057_v35 = vsub.f32 %v240_v30, %v10029_v40 }
  0x2a   :  { %14682 = vst [vmem:[#allocation35_spill] sm:$0xff] %v10027_v36  ;;  %8307 = vmatprep.mubr.f32.mxu0 %v819_v50  ;;  %8526 = vmatmul.mubr.f32.gmra.mxu1 %v9838_v49  ;;  %14685 = vst [vmem:[#allocation37_spill] sm:$0xff] %v10036_v58  ;;  %v10047_v49 = vand.u32 4294901760, %v246_v12  ;;  %v14688_v26 = vand.u32 4294901760, %v10009_v6  ;;  %v859_v1 = vand.u32 4294901760, %v858_v52  ;;  %v10062_v20 = vsub.f32 %v243_v63, %v10036_v58  ;;  %v44_v30 = vld [vmem:[%s14081_s0 + $0xf0] sm:$0xff] }
  0x2b   :  { %8528 = vmatprep.mubr.f32.mxu1 %v9880_v14  ;;  %v868_v50 = vsub.f32 %v9984_v46, %v14686_v43  ;;  %14689 = vst [vmem:[#allocation39_spill] sm:$0xff] %v10057_v35  ;;  %v252_v43 = vsel %vm169_vm1, %v41_v42, 0  ;;  %v10064_v16 = vand.u32 4294901760, %v249_v18  ;;  %v14692_v52 = vand.u32 4294901760, %v10019_v3 }
  0x2c   :  { %14687 = vst [vmem:[#allocation38_spill] sm:$0xff] %v10047_v49  ;;  %v878_v14 = vsub.f32 %v10009_v6, %v14688_v26  ;;  %14690 = vst [vmem:[#allocation40_spill] sm:$0xff] %v10062_v20  ;;  %v43_v26 = vld [vmem:[%s14081_s0 + $0xe8] sm:$0xff]  ;;  %v10078_v42 = vsub.f32 %v246_v12, %v10047_v49  ;;  %v10080_v55 = vand.u32 4294901760, %v252_v43  ;;  %v14139_v15 = vand.u32 4294901760, %v10057_v35 }
  0x2d   :  { %8308 = vmatmul.mubr.f32.gmra.mxu0 %v829_v0  ;;  %14691 = vst [vmem:[#allocation41_spill] sm:$0xff] %v10064_v16  ;;  %v255_v0 = vsel %vm169_vm1, %v42_v37, 0  ;;  %v888_v63 = vsub.f32 %v10019_v3, %v14692_v52  ;;  %v258_v6 = vsel %vm169_vm1, %v43_v26, 0  ;;  %v10090_v12 = vsub.f32 %v249_v18, %v10064_v16 }
  0x2e   :  { %8310 = vmatprep.mubr.f32.mxu0 %v839_v31  ;;  %8529 = vmatmul.mubr.f32.gmra.mxu1 %v9897_v54  ;;  %v869_v31 = vand.u32 4294901760, %v868_v50  ;;  %14693 = vst [vmem:[#allocation42_spill] sm:$0xff] %v10078_v42  ;;  %14694 = vst [vmem:[#allocation43_spill] sm:$0xff] %v10080_v55  ;;  %v879_v54 = vand.u32 4294901760, %v878_v14  ;;  %v10092_v52 = vand.u32 4294901760, %v255_v0  ;;  %v261_v14 = vsel %vm169_vm1, %v44_v30, 0 }
  0x2f   :  { %8531 = vmatprep.mubr.f32.mxu1 %v9903_v17  ;;  %v14695_v17 = vand.u32 4294901760, %v10027_v36  ;;  %14696 = vst [vmem:[#allocation44_spill] sm:$0xff] %v10090_v12  ;;  %v10104_v18 = vsub.f32 %v252_v43, %v10080_v55  ;;  %v10106_v50 = vand.u32 4294901760, %v258_v6 }
  0x30   :  { %14697 = vst [vmem:[#allocation45_spill] sm:$0xff] %v10092_v52 }
  0x31   :  { %8311 = vmatmul.mubr.f32.gmra.mxu0 %v849_v13  ;;  %v898_v37 = vsub.f32 %v10027_v36, %v14695_v17  ;;  %v45_v17 = vld [vmem:[%s14081_s0 + $0xf8] sm:$0xff]  ;;  %v46_v13 = vld [vmem:[%s14081_s0 + $0x100] sm:$0xff]  ;;  %14698 = vst [vmem:[#allocation46_spill] sm:$0xff] %v10104_v18  ;;  %14699 = vst [vmem:[#allocation47_spill] sm:$0xff] %v10106_v50  ;;  %v10111_v36 = vand.u32 4294901760, %v261_v14 }
  0x32   :  { %8313 = vmatprep.mubr.f32.mxu0 %v859_v1  ;;  %8532 = vmatmul.mubr.f32.gmra.mxu1 %v9905_v59  ;;  %v889_v1 = vand.u32 4294901760, %v888_v63  ;;  %v908_v59 = vsub.f32 %v10057_v35, %v14139_v15  ;;  %v14701_v63 = vand.u32 4294901760, %v10062_v20 }
  0x33   :  { %8534 = vmatprep.mubr.f32.mxu1 %v9918_v47  ;;  %v899_v30 = vand.u32 4294901760, %v898_v37  ;;  %14700 = vst [vmem:[#allocation48_spill] sm:$0xff] %v10111_v36  ;;  %v264_v47 = vsel %vm169_vm1, %v45_v17, 0  ;;  %v267_v37 = vsel %vm169_vm1, %v46_v13, 0  ;;  %v47_v17 = vld [vmem:[%s14081_s0 + $0x108] sm:$0xff] }
  0x34   :  { %v918_v43 = vsub.f32 %v10062_v20, %v14701_v63  ;;  %v10132_v63 = vsub.f32 %v258_v6, %v10106_v50  ;;  %v10134_v26 = vand.u32 4294901760, %v264_v47  ;;  %v909_v13 = vand.u32 4294901760, %v908_v59  ;;  %v49_v59 = vld [vmem:[%s14081_s0 + $0x118] sm:$0xff] }
  0x35   :  { %8314 = vmatmul.mubr.f32.gmra.mxu0 %v869_v31  ;;  %v10120_v31 = vsub.f32 %v255_v0, %v10092_v52  ;;  %v48_v0 = vld [vmem:[%s14081_s0 + $0x110] sm:$0xff]  ;;  %v10142_v20 = vand.u32 4294901760, %v267_v37  ;;  %v14708_v6 = vand.u32 4294901760, %v10090_v12  ;;  %v270_v35 = vsel %vm169_vm1, %v47_v17, 0  ;;  %v50_v17 = vld [vmem:[%s14081_s0 + $0x120] sm:$0xff] }
  0x36   :  { %8316 = vmatprep.mubr.f32.mxu0 %v879_v54  ;;  %8535 = vmatmul.mubr.f32.gmra.mxu1 %v9931_v41  ;;  %v14703_v54 = vand.u32 4294901760, %v10078_v42  ;;  %14704 = vst [vmem:[#allocation50_spill] sm:$0xff] %v10132_v63  ;;  %14705 = vst [vmem:[#allocation51_spill] sm:$0xff] %v10134_v26 }
  0x37   :  { %14702 = vst [vmem:[#allocation49_spill] sm:$0xff] %v10120_v31  ;;  %8537 = vmatprep.mubr.f32.mxu1 %v9942_v51  ;;  %v10140_v51 = vsub.f32 %v261_v14, %v10111_v36  ;;  %14707 = vst [vmem:[#allocation53_spill] sm:$0xff] %v10142_v20  ;;  %v938_v41 = vsub.f32 %v10090_v12, %v14708_v6  ;;  %v273_v14 = vsel %vm169_vm1, %v48_v0, 0  ;;  %v276_v0 = vsel %vm169_vm1, %v49_v59, 0 }
  0x38   :  { %v928_v15 = vsub.f32 %v10078_v42, %v14703_v54  ;;  %v919_v54 = vand.u32 4294901760, %v918_v43  ;;  %v10160_v6 = vsub.f32 %v264_v47, %v10134_v26  ;;  %v14713_v47 = vand.u32 4294901760, %v10120_v31 }
  0x39   :  { %8317 = vmatmul.mubr.f32.gmra.mxu0 %v889_v1  ;;  %14706 = vst [vmem:[#allocation52_spill] sm:$0xff] %v10140_v51 }
  0x3a   :  { %8319 = vmatprep.mubr.f32.mxu0 %v899_v30  ;;  %8538 = vmatmul.mubr.f32.gmra.mxu1 %v9968_v53  ;;  %v929_v1 = vand.u32 4294901760, %v928_v15  ;;  %v14709_v30 = vand.u32 4294901760, %v10104_v18  ;;  %14710 = vst [vmem:[#allocation54_spill] sm:$0xff] %v10160_v6  ;;  %v10169_v15 = vand.u32 4294901760, %v270_v35  ;;  %v958_v53 = vsub.f32 %v10120_v31, %v14713_v47  ;;  %v52_v47 = vld [vmem:[%s14081_s0 + $0x130] sm:$0xff] }
  0x3b   :  { %8540 = vmatprep.mubr.f32.mxu1 %v9993_v32  ;;  %v10167_v32 = vsub.f32 %v267_v37, %v10142_v20  ;;  %v279_v37 = vsel %vm169_vm1, %v50_v17, 0  ;;  %v14717_v31 = vand.u32 4294901760, %v10140_v51 }
  0x3c   :  { %v948_v43 = vsub.f32 %v10104_v18, %v14709_v30  ;;  %14712 = vst [vmem:[#allocation56_spill] sm:$0xff] %v10169_v15  ;;  %v939_v30 = vand.u32 4294901760, %v938_v41  ;;  %v10176_v18 = vand.u32 4294901760, %v273_v14  ;;  %v959_v41 = vand.u32 4294901760, %v958_v53 }
  0x3d   :  { %8320 = vmatmul.mubr.f32.gmra.mxu0 %v909_v13  ;;  %14711 = vst [vmem:[#allocation55_spill] sm:$0xff] %v10167_v32  ;;  %v51_v13 = vld [vmem:[%s14081_s0 + $0x128] sm:$0xff]  ;;  %v10204_v12 = vand.u32 4294901760, %v279_v37  ;;  %v14721_v53 = vand.u32 4294901760, %v10160_v6 }
  0x3e   :  { %8322 = vmatprep.mubr.f32.mxu0 %v919_v54  ;;  %8541 = vmatmul.mubr.f32.gmra.mxu1 %v10001_v60  ;;  %14714 = vst [vmem:[#allocation57_spill] sm:$0xff] %v10176_v18  ;;  %v949_v42 = vand.u32 4294901760, %v948_v43  ;;  %v14715_v54 = vand.u32 4294901760, %v10132_v63  ;;  %v10187_v60 = vand.u32 4294901760, %v276_v0  ;;  %v10197_v43 = vsub.f32 %v270_v35, %v10169_v15 }
  0x3f   :  { %8543 = vmatprep.mubr.f32.mxu1 %v10011_v61  ;;  %v978_v61 = vsub.f32 %v10140_v51, %v14717_v31  ;;  %14720 = vst [vmem:[#allocation61_spill] sm:$0xff] %v10204_v12  ;;  %v53_v31 = vld [vmem:[%s14081_s0 + $0x138] sm:$0xff]  ;;  %v285_v35 = vsel %vm169_vm1, %v52_v47, 0 }
  0x40   :  { %v968_v59 = vsub.f32 %v10132_v63, %v14715_v54  ;;  %14716 = vst [vmem:[#allocation58_spill] sm:$0xff] %v10187_v60  ;;  %14718 = vst [vmem:[#allocation59_spill] sm:$0xff] %v10197_v43  ;;  %v282_v54 = vsel %vm169_vm1, %v51_v13, 0  ;;  %v10202_v63 = vsub.f32 %v273_v14, %v10176_v18  ;;  %v988_v14 = vsub.f32 %v10160_v6, %v14721_v53 }
  0x41   :  { %8323 = vmatmul.mubr.f32.gmra.mxu0 %v929_v1  ;;  %v54_v1 = vld [vmem:[%s14081_s0 + $0x140] sm:$0xff]  ;;  %v10218_v13 = vsub.f32 %v276_v0, %v10187_v60  ;;  %v10220_v17 = vand.u32 4294901760, %v282_v54  ;;  %v14180_v51 = vand.u32 4294901760, %v10197_v43  ;;  %v288_v3 = vsel %vm169_vm1, %v53_v31, 0 }
  0x42   :  { %8325 = vmatprep.mubr.f32.mxu0 %v939_v30  ;;  %8544 = vmatmul.mubr.f32.gmra.mxu1 %v10029_v40  ;;  %14719 = vst [vmem:[#allocation60_spill] sm:$0xff] %v10202_v63  ;;  %v969_v30 = vand.u32 4294901760, %v968_v59  ;;  %v979_v40 = vand.u32 4294901760, %v978_v61  ;;  %v10230_v0 = vsub.f32 %v279_v37, %v10204_v12  ;;  %v10232_v53 = vand.u32 4294901760, %v285_v35 }
  0x43   :  { %8546 = vmatprep.mubr.f32.mxu1 %v10036_v58  ;;  %14722 = vst [vmem:[#allocation62_spill] sm:$0xff] %v10218_v13  ;;  %14723 = vst [vmem:[#allocation63_spill] sm:$0xff] %v10220_v17  ;;  %v14724_v58 = vand.u32 4294901760, %v10167_v32  ;;  %v291_v61 = vsel %vm169_vm1, %v54_v1, 0  ;;  %v10244_v37 = vsub.f32 %v282_v54, %v10220_v17  ;;  %v10246_v59 = vand.u32 4294901760, %v288_v3 }
  0x44   :  { %14725 = vst [vmem:[#allocation64_spill] sm:$0xff] %v10230_v0  ;;  %14726 = vst [vmem:[#allocation65_spill] sm:$0xff] %v10232_v53 }
  0x45   :  { %8326 = vmatmul.mubr.f32.gmra.mxu0 %v949_v42  ;;  %v998_v47 = vsub.f32 %v10167_v32, %v14724_v58  ;;  %v55_v58 = vld [vmem:[%s14081_s0 + $0x148] sm:$0xff]  ;;  %v56_v42 = vld [vmem:[%s14081_s0 + $0x150] sm:$0xff]  ;;  %14727 = vst [vmem:[#allocation66_spill] sm:$0xff] %v10244_v37  ;;  %14728 = vst [vmem:[#allocation67_spill] sm:$0xff] %v10246_v59  ;;  %v10251_v32 = vand.u32 4294901760, %v291_v61 }
  0x46   :  { %8328 = vmatprep.mubr.f32.mxu0 %v959_v41  ;;  %8547 = vmatmul.mubr.f32.gmra.mxu1 %v10047_v49  ;;  %v989_v41 = vand.u32 4294901760, %v988_v14  ;;  %v1008_v49 = vsub.f32 %v10197_v43, %v14180_v51  ;;  %v14730_v14 = vand.u32 4294901760, %v10202_v63 }
  0x47   :  { %8549 = vmatprep.mubr.f32.mxu1 %v10064_v16  ;;  %v999_v1 = vand.u32 4294901760, %v998_v47  ;;  %14729 = vst [vmem:[#allocation68_spill] sm:$0xff] %v10251_v32  ;;  %v294_v16 = vsel %vm169_vm1, %v55_v58, 0  ;;  %v297_v47 = vsel %vm169_vm1, %v56_v42, 0  ;;  %v57_v58 = vld [vmem:[%s14081_s0 + $0x158] sm:$0xff] }
  0x48   :  { %v1018_v54 = vsub.f32 %v10202_v63, %v14730_v14  ;;  %v10272_v14 = vsub.f32 %v288_v3, %v10246_v59  ;;  %v10274_v31 = vand.u32 4294901760, %v294_v16  ;;  %v1009_v42 = vand.u32 4294901760, %v1008_v49  ;;  %v59_v49 = vld [vmem:[%s14081_s0 + $0x168] sm:$0xff] }
  0x49   :  { %8329 = vmatmul.mubr.f32.gmra.mxu0 %v969_v30  ;;  %v10260_v30 = vsub.f32 %v285_v35, %v10232_v53  ;;  %v58_v35 = vld [vmem:[%s14081_s0 + $0x160] sm:$0xff]  ;;  %v10282_v63 = vand.u32 4294901760, %v297_v47  ;;  %v14737_v3 = vand.u32 4294901760, %v10230_v0  ;;  %v300_v43 = vsel %vm169_vm1, %v57_v58, 0  ;;  %v60_v58 = vld [vmem:[%s14081_s0 + $0x170] sm:$0xff] }
  0x4a   :  { %8331 = vmatprep.mubr.f32.mxu0 %v979_v40  ;;  %8550 = vmatmul.mubr.f32.gmra.mxu1 %v10080_v55  ;;  %v14732_v40 = vand.u32 4294901760, %v10218_v13  ;;  %14733 = vst [vmem:[#allocation70_spill] sm:$0xff] %v10272_v14  ;;  %14734 = vst [vmem:[#allocation71_spill] sm:$0xff] %v10274_v31 }
  0x4b   :  { %14731 = vst [vmem:[#allocation69_spill] sm:$0xff] %v10260_v30  ;;  %8552 = vmatprep.mubr.f32.mxu1 %v10092_v52  ;;  %v10280_v52 = vsub.f32 %v291_v61, %v10251_v32  ;;  %14736 = vst [vmem:[#allocation73_spill] sm:$0xff] %v10282_v63  ;;  %v1038_v55 = vsub.f32 %v10230_v0, %v14737_v3  ;;  %v303_v61 = vsel %vm169_vm1, %v58_v35, 0  ;;  %v306_v35 = vsel %vm169_vm1, %v59_v49, 0 }
  0x4c   :  { %v1028_v51 = vsub.f32 %v10218_v13, %v14732_v40  ;;  %v1019_v40 = vand.u32 4294901760, %v1018_v54  ;;  %v10300_v3 = vsub.f32 %v294_v16, %v10274_v31  ;;  %v14742_v16 = vand.u32 4294901760, %v10260_v30 }
  0x4d   :  { %8332 = vmatmul.mubr.f32.gmra.mxu0 %v989_v41  ;;  %14735 = vst [vmem:[#allocation72_spill] sm:$0xff] %v10280_v52 }
  0x4e   :  { %8334 = vmatprep.mubr.f32.mxu0 %v999_v1  ;;  %8553 = vmatmul.mubr.f32.gmra.mxu1 %v10106_v50  ;;  %v1029_v41 = vand.u32 4294901760, %v1028_v51  ;;  %v14738_v1 = vand.u32 4294901760, %v10244_v37  ;;  %14739 = vst [vmem:[#allocation74_spill] sm:$0xff] %v10300_v3  ;;  %v10309_v51 = vand.u32 4294901760, %v300_v43  ;;  %v1058_v50 = vsub.f32 %v10260_v30, %v14742_v16  ;;  %v62_v16 = vld [vmem:[%s14081_s0 + $0x180] sm:$0xff] }
  0x4f   :  { %8555 = vmatprep.mubr.f32.mxu1 %v10111_v36  ;;  %v10307_v36 = vsub.f32 %v297_v47, %v10282_v63  ;;  %v309_v47 = vsel %vm169_vm1, %v60_v58, 0  ;;  %v14746_v30 = vand.u32 4294901760, %v10280_v52 }
  0x50   :  { %v1048_v54 = vsub.f32 %v10244_v37, %v14738_v1  ;;  %14741 = vst [vmem:[#allocation76_spill] sm:$0xff] %v10309_v51  ;;  %v1039_v1 = vand.u32 4294901760, %v1038_v55  ;;  %v10316_v37 = vand.u32 4294901760, %v303_v61  ;;  %v1059_v55 = vand.u32 4294901760, %v1058_v50 }
  0x51   :  { %8335 = vmatmul.mubr.f32.gmra.mxu0 %v1009_v42  ;;  %14740 = vst [vmem:[#allocation75_spill] sm:$0xff] %v10307_v36  ;;  %v61_v42 = vld [vmem:[%s14081_s0 + $0x178] sm:$0xff]  ;;  %v10344_v0 = vand.u32 4294901760, %v309_v47  ;;  %v14750_v50 = vand.u32 4294901760, %v10300_v3 }
  0x52   :  { %8337 = vmatprep.mubr.f32.mxu0 %v1019_v40  ;;  %8556 = vmatmul.mubr.f32.gmra.mxu1 %v10134_v26  ;;  %14743 = vst [vmem:[#allocation77_spill] sm:$0xff] %v10316_v37  ;;  %v1049_v13 = vand.u32 4294901760, %v1048_v54  ;;  %v14744_v40 = vand.u32 4294901760, %v10272_v14  ;;  %v10327_v26 = vand.u32 4294901760, %v306_v35  ;;  %v10337_v54 = vsub.f32 %v300_v43, %v10309_v51 }
  0x53   :  { %8558 = vmatprep.mubr.f32.mxu1 %v10142_v20  ;;  %v1078_v20 = vsub.f32 %v10280_v52, %v14746_v30  ;;  %14749 = vst [vmem:[#allocation81_spill] sm:$0xff] %v10344_v0  ;;  %v63_v30 = vld [vmem:[%s14081_s0 + $0x188] sm:$0xff]  ;;  %v315_v43 = vsel %vm169_vm1, %v62_v16, 0 }
  0x54   :  { %v1068_v49 = vsub.f32 %v10272_v14, %v14744_v40  ;;  %14745 = vst [vmem:[#allocation78_spill] sm:$0xff] %v10327_v26  ;;  %14747 = vst [vmem:[#allocation79_spill] sm:$0xff] %v10337_v54  ;;  %v312_v40 = vsel %vm169_vm1, %v61_v42, 0  ;;  %v10342_v14 = vsub.f32 %v303_v61, %v10316_v37  ;;  %v1088_v61 = vsub.f32 %v10300_v3, %v14750_v50 }
  0x55   :  { %8338 = vmatmul.mubr.f32.gmra.mxu0 %v1029_v41  ;;  %v64_v41 = vld [vmem:[%s14081_s0 + $0x190] sm:$0xff]  ;;  %v10358_v42 = vsub.f32 %v306_v35, %v10327_v26  ;;  %v10360_v58 = vand.u32 4294901760, %v312_v40  ;;  %v14221_v52 = vand.u32 4294901760, %v10337_v54  ;;  %v318_v6 = vsel %vm169_vm1, %v63_v30, 0 }
  0x56   :  { %8340 = vmatprep.mubr.f32.mxu0 %v1039_v1  ;;  %8559 = vmatmul.mubr.f32.gmra.mxu1 %v10169_v15  ;;  %14748 = vst [vmem:[#allocation80_spill] sm:$0xff] %v10342_v14  ;;  %v1069_v1 = vand.u32 4294901760, %v1068_v49  ;;  %v1079_v15 = vand.u32 4294901760, %v1078_v20  ;;  %v10370_v35 = vsub.f32 %v309_v47, %v10344_v0  ;;  %v10372_v50 = vand.u32 4294901760, %v315_v43 }
  0x57   :  { %8561 = vmatprep.mubr.f32.mxu1 %v10176_v18  ;;  %14751 = vst [vmem:[#allocation82_spill] sm:$0xff] %v10358_v42  ;;  %14752 = vst [vmem:[#allocation83_spill] sm:$0xff] %v10360_v58  ;;  %v14753_v18 = vand.u32 4294901760, %v10307_v36  ;;  %v321_v20 = vsel %vm169_vm1, %v64_v41, 0  ;;  %v10384_v47 = vsub.f32 %v312_v40, %v10360_v58  ;;  %v10386_v49 = vand.u32 4294901760, %v318_v6 }
  0x58   :  { %14754 = vst [vmem:[#allocation84_spill] sm:$0xff] %v10370_v35  ;;  %14755 = vst [vmem:[#allocation85_spill] sm:$0xff] %v10372_v50 }
  0x59   :  { %8341 = vmatmul.mubr.f32.gmra.mxu0 %v1049_v13  ;;  %v1098_v16 = vsub.f32 %v10307_v36, %v14753_v18  ;;  %v65_v18 = vld [vmem:[%s14081_s0 + $0x198] sm:$0xff]  ;;  %v66_v13 = vld [vmem:[%s14081_s0 + $0x1a0] sm:$0xff]  ;;  %14756 = vst [vmem:[#allocation86_spill] sm:$0xff] %v10384_v47  ;;  %14757 = vst [vmem:[#allocation87_spill] sm:$0xff] %v10386_v49  ;;  %v10391_v36 = vand.u32 4294901760, %v321_v20 }
  0x5a   :  { %8343 = vmatprep.mubr.f32.mxu0 %v1059_v55  ;;  %8562 = vmatmul.mubr.f32.gmra.mxu1 %v10187_v60  ;;  %v1089_v55 = vand.u32 4294901760, %v1088_v61  ;;  %v1108_v60 = vsub.f32 %v10337_v54, %v14221_v52  ;;  %v14759_v61 = vand.u32 4294901760, %v10342_v14 }
  0x5b   :  { %8564 = vmatprep.mubr.f32.mxu1 %v10204_v12  ;;  %v1099_v41 = vand.u32 4294901760, %v1098_v16  ;;  %14758 = vst [vmem:[#allocation88_spill] sm:$0xff] %v10391_v36  ;;  %v324_v12 = vsel %vm169_vm1, %v65_v18, 0  ;;  %v327_v16 = vsel %vm169_vm1, %v66_v13, 0  ;;  %v67_v18 = vld [vmem:[%s14081_s0 + $0x1a8] sm:$0xff] }
  0x5c   :  { %v1118_v40 = vsub.f32 %v10342_v14, %v14759_v61  ;;  %v10412_v61 = vsub.f32 %v318_v6, %v10386_v49  ;;  %v10414_v30 = vand.u32 4294901760, %v324_v12  ;;  %v1109_v13 = vand.u32 4294901760, %v1108_v60  ;;  %v69_v60 = vld [vmem:[%s14081_s0 + $0x1b8] sm:$0xff] }
  0x5d   :  { %8344 = vmatmul.mubr.f32.gmra.mxu0 %v1069_v1  ;;  %v10400_v1 = vsub.f32 %v315_v43, %v10372_v50  ;;  %v68_v43 = vld [vmem:[%s14081_s0 + $0x1b0] sm:$0xff]  ;;  %v10422_v14 = vand.u32 4294901760, %v327_v16  ;;  %v14766_v6 = vand.u32 4294901760, %v10370_v35  ;;  %v330_v54 = vsel %vm169_vm1, %v67_v18, 0  ;;  %v70_v18 = vld [vmem:[%s14081_s0 + $0x1c0] sm:$0xff] }
  0x5e   :  { %8346 = vmatprep.mubr.f32.mxu0 %v1079_v15  ;;  %8565 = vmatmul.mubr.f32.gmra.mxu1 %v10220_v17  ;;  %v14761_v15 = vand.u32 4294901760, %v10358_v42  ;;  %14762 = vst [vmem:[#allocation90_spill] sm:$0xff] %v10412_v61  ;;  %14763 = vst [vmem:[#allocation91_spill] sm:$0xff] %v10414_v30 }
  0x5f   :  { %14760 = vst [vmem:[#allocation89_spill] sm:$0xff] %v10400_v1  ;;  %8567 = vmatprep.mubr.f32.mxu1 %v10232_v53  ;;  %v10420_v53 = vsub.f32 %v321_v20, %v10391_v36  ;;  %14765 = vst [vmem:[#allocation93_spill] sm:$0xff] %v10422_v14  ;;  %v1138_v17 = vsub.f32 %v10370_v35, %v14766_v6  ;;  %v333_v20 = vsel %vm169_vm1, %v68_v43, 0  ;;  %v336_v43 = vsel %vm169_vm1, %v69_v60, 0 }
  0x60   :  { %v1128_v52 = vsub.f32 %v10358_v42, %v14761_v15  ;;  %v1119_v15 = vand.u32 4294901760, %v1118_v40  ;;  %v10440_v6 = vsub.f32 %v324_v12, %v10414_v30  ;;  %v14771_v12 = vand.u32 4294901760, %v10400_v1 }
  0x61   :  { %8347 = vmatmul.mubr.f32.gmra.mxu0 %v1089_v55  ;;  %14764 = vst [vmem:[#allocation92_spill] sm:$0xff] %v10420_v53 }
  0x62   :  { %8349 = vmatprep.mubr.f32.mxu0 %v1099_v41  ;;  %8568 = vmatmul.mubr.f32.gmra.mxu1 %v10246_v59  ;;  %v1129_v55 = vand.u32 4294901760, %v1128_v52  ;;  %v14767_v41 = vand.u32 4294901760, %v10384_v47  ;;  %14768 = vst [vmem:[#allocation94_spill] sm:$0xff] %v10440_v6  ;;  %v10449_v52 = vand.u32 4294901760, %v330_v54  ;;  %v1158_v59 = vsub.f32 %v10400_v1, %v14771_v12  ;;  %v72_v12 = vld [vmem:[%s14081_s0 + $0x1d0] sm:$0xff] }
  0x63   :  { %8570 = vmatprep.mubr.f32.mxu1 %v10251_v32  ;;  %v10447_v32 = vsub.f32 %v327_v16, %v10422_v14  ;;  %v339_v16 = vsel %vm169_vm1, %v70_v18, 0  ;;  %v14775_v1 = vand.u32 4294901760, %v10420_v53 }
  0x64   :  { %v1148_v40 = vsub.f32 %v10384_v47, %v14767_v41  ;;  %14770 = vst [vmem:[#allocation96_spill] sm:$0xff] %v10449_v52  ;;  %v1139_v41 = vand.u32 4294901760, %v1138_v17  ;;  %v10456_v47 = vand.u32 4294901760, %v333_v20  ;;  %v1159_v17 = vand.u32 4294901760, %v1158_v59 }
  0x65   :  { %8350 = vmatmul.mubr.f32.gmra.mxu0 %v1109_v13  ;;  %14769 = vst [vmem:[#allocation95_spill] sm:$0xff] %v10447_v32  ;;  %v71_v13 = vld [vmem:[%s14081_s0 + $0x1c8] sm:$0xff]  ;;  %v10484_v35 = vand.u32 4294901760, %v339_v16  ;;  %v14779_v59 = vand.u32 4294901760, %v10440_v6 }
  0x66   :  { %8352 = vmatprep.mubr.f32.mxu0 %v1119_v15  ;;  %8571 = vmatmul.mubr.f32.gmra.mxu1 %v10274_v31  ;;  %14772 = vst [vmem:[#allocation97_spill] sm:$0xff] %v10456_v47  ;;  %v1149_v42 = vand.u32 4294901760, %v1148_v40  ;;  %v14773_v15 = vand.u32 4294901760, %v10412_v61  ;;  %v10467_v31 = vand.u32 4294901760, %v336_v43  ;;  %v10477_v40 = vsub.f32 %v330_v54, %v10449_v52 }
  0x67   :  { %8573 = vmatprep.mubr.f32.mxu1 %v10282_v63  ;;  %v1178_v63 = vsub.f32 %v10420_v53, %v14775_v1  ;;  %14778 = vst [vmem:[#allocation101_spill] sm:$0xff] %v10484_v35  ;;  %v73_v1 = vld [vmem:[%s14081_s0 + $0x1d8] sm:$0xff]  ;;  %v345_v54 = vsel %vm169_vm1, %v72_v12, 0 }
  0x68   :  { %v1168_v60 = vsub.f32 %v10412_v61, %v14773_v15  ;;  %14774 = vst [vmem:[#allocation98_spill] sm:$0xff] %v10467_v31  ;;  %14776 = vst [vmem:[#allocation99_spill] sm:$0xff] %v10477_v40  ;;  %v342_v15 = vsel %vm169_vm1, %v71_v13, 0  ;;  %v10482_v61 = vsub.f32 %v333_v20, %v10456_v47  ;;  %v1188_v20 = vsub.f32 %v10440_v6, %v14779_v59 }
  0x69   :  { %8353 = vmatmul.mubr.f32.gmra.mxu0 %v1129_v55  ;;  %v74_v55 = vld [vmem:[%s14081_s0 + $0x1e0] sm:$0xff]  ;;  %v10498_v13 = vsub.f32 %v336_v43, %v10467_v31  ;;  %v10500_v18 = vand.u32 4294901760, %v342_v15  ;;  %v14262_v53 = vand.u32 4294901760, %v10477_v40  ;;  %v348_v3 = vsel %vm169_vm1, %v73_v1, 0 }
  0x6a   :  { %8355 = vmatprep.mubr.f32.mxu0 %v1139_v41  ;;  %8574 = vmatmul.mubr.f32.gmra.mxu1 %v10309_v51  ;;  %14777 = vst [vmem:[#allocation100_spill] sm:$0xff] %v10482_v61  ;;  %v1169_v41 = vand.u32 4294901760, %v1168_v60  ;;  %v1179_v51 = vand.u32 4294901760, %v1178_v63  ;;  %v10510_v43 = vsub.f32 %v339_v16, %v10484_v35  ;;  %v10512_v59 = vand.u32 4294901760, %v345_v54 }
  0x6b   :  { %8576 = vmatprep.mubr.f32.mxu1 %v10316_v37  ;;  %14780 = vst [vmem:[#allocation102_spill] sm:$0xff] %v10498_v13  ;;  %14781 = vst [vmem:[#allocation103_spill] sm:$0xff] %v10500_v18  ;;  %v14782_v37 = vand.u32 4294901760, %v10447_v32  ;;  %v351_v63 = vsel %vm169_vm1, %v74_v55, 0  ;;  %v10524_v16 = vsub.f32 %v342_v15, %v10500_v18  ;;  %v10526_v60 = vand.u32 4294901760, %v348_v3 }
  0x6c   :  { %14783 = vst [vmem:[#allocation104_spill] sm:$0xff] %v10510_v43  ;;  %14784 = vst [vmem:[#allocation105_spill] sm:$0xff] %v10512_v59 }
  0x6d   :  { %8356 = vmatmul.mubr.f32.gmra.mxu0 %v1149_v42  ;;  %v1198_v12 = vsub.f32 %v10447_v32, %v14782_v37  ;;  %v75_v37 = vld [vmem:[%s14081_s0 + $0x1e8] sm:$0xff]  ;;  %v76_v42 = vld [vmem:[%s14081_s0 + $0x1f0] sm:$0xff]  ;;  %14785 = vst [vmem:[#allocation106_spill] sm:$0xff] %v10524_v16  ;;  %14786 = vst [vmem:[#allocation107_spill] sm:$0xff] %v10526_v60  ;;  %v10531_v32 = vand.u32 4294901760, %v351_v63 }
  0x6e   :  { %8358 = vmatprep.mubr.f32.mxu0 %v1159_v17  ;;  %8577 = vmatmul.mubr.f32.gmra.mxu1 %v10327_v26  ;;  %v1189_v17 = vand.u32 4294901760, %v1188_v20  ;;  %v1208_v26 = vsub.f32 %v10477_v40, %v14262_v53  ;;  %v14788_v20 = vand.u32 4294901760, %v10482_v61  ;;  %v77_v53 = vld [vmem:[%s14081_s0 + $0x1f8] sm:$0xff]  ;;  %v80_v40 = vld [vmem:[%s14081_s0 + $0x210] sm:$0xff] }
  0x6f   :  { %8579 = vmatprep.mubr.f32.mxu1 %v10344_v0  ;;  %v1199_v55 = vand.u32 4294901760, %v1198_v12  ;;  %14787 = vst [vmem:[#allocation108_spill] sm:$0xff] %v10531_v32  ;;  %v354_v0 = vsel %vm169_vm1, %v75_v37, 0  ;;  %v357_v12 = vsel %vm169_vm1, %v76_v42, 0 }
  0x70   :  { %v1218_v15 = vsub.f32 %v10482_v61, %v14788_v20  ;;  %v10552_v20 = vsub.f32 %v348_v3, %v10526_v60  ;;  %v10554_v1 = vand.u32 4294901760, %v354_v0  ;;  %v1209_v42 = vand.u32 4294901760, %v1208_v26 }
  0x71   :  { %8359 = vmatmul.mubr.f32.gmra.mxu0 %v1169_v41  ;;  %v10540_v41 = vsub.f32 %v345_v54, %v10512_v59  ;;  %v78_v54 = vld [vmem:[%s14081_s0 + $0x200] sm:$0xff]  ;;  %v10560_v61 = vsub.f32 %v351_v63, %v10531_v32  ;;  %v79_v63 = vld [vmem:[%s14081_s0 + $0x208] sm:$0xff] }
  0x72   :  { %8361 = vmatprep.mubr.f32.mxu0 %v1179_v51  ;;  %8580 = vmatmul.mubr.f32.gmra.mxu1 %v10360_v58  ;;  %v14790_v51 = vand.u32 4294901760, %v10498_v13  ;;  %14791 = vst [vmem:[#allocation110_spill] sm:$0xff] %v10552_v20  ;;  %14792 = vst [vmem:[#allocation111_spill] sm:$0xff] %v10554_v1  ;;  %v1219_v3 = vand.u32 4294901760, %v1218_v15  ;;  %v14795_v58 = vand.u32 4294901760, %v10510_v43  ;;  %v363_v26 = vsel %vm169_vm1, %v78_v54, 0 }
  0x73   :  { %14789 = vst [vmem:[#allocation109_spill] sm:$0xff] %v10540_v41  ;;  %8582 = vmatprep.mubr.f32.mxu1 %v10372_v50  ;;  %14793 = vst [vmem:[#allocation112_spill] sm:$0xff] %v10560_v61  ;;  %v10562_v50 = vand.u32 4294901760, %v357_v12  ;;  %v10580_v15 = vsub.f32 %v354_v0, %v10554_v1  ;;  %v14800_v0 = vand.u32 4294901760, %v10540_v41 }
  0x74   :  { %v1228_v37 = vsub.f32 %v10498_v13, %v14790_v51  ;;  %v360_v51 = vsel %vm169_vm1, %v77_v53, 0  ;;  %v1238_v13 = vsub.f32 %v10510_v43, %v14795_v58  ;;  %v14796_v53 = vand.u32 4294901760, %v10524_v16 }
  0x75   :  { %8362 = vmatmul.mubr.f32.gmra.mxu0 %v1189_v17  ;;  %14794 = vst [vmem:[#allocation113_spill] sm:$0xff] %v10562_v50  ;;  %14797 = vst [vmem:[#allocation114_spill] sm:$0xff] %v10580_v15  ;;  %v10582_v58 = vand.u32 4294901760, %v360_v51  ;;  %v366_v43 = vsel %vm169_vm1, %v79_v63, 0  ;;  %v82_v63 = vld [vmem:[%s14081_s0 + $0x220] sm:$0xff] }
  0x76   :  { %8364 = vmatprep.mubr.f32.mxu0 %v1199_v55  ;;  %8583 = vmatmul.mubr.f32.gmra.mxu1 %v10386_v49  ;;  %v1248_v17 = vsub.f32 %v10524_v16, %v14796_v53  ;;  %v1229_v54 = vand.u32 4294901760, %v1228_v37  ;;  %v10589_v49 = vsub.f32 %v357_v12, %v10562_v50  ;;  %v1239_v53 = vand.u32 4294901760, %v1238_v13  ;;  %v81_v37 = vld [vmem:[%s14081_s0 + $0x218] sm:$0xff] }
  0x77   :  { %8585 = vmatprep.mubr.f32.mxu1 %v10391_v36  ;;  %14798 = vst [vmem:[#allocation115_spill] sm:$0xff] %v10582_v58  ;;  %v1258_v55 = vsub.f32 %v10540_v41, %v14800_v0  ;;  %v10595_v16 = vand.u32 4294901760, %v363_v26  ;;  %v369_v12 = vsel %vm169_vm1, %v80_v40, 0  ;;  %v10608_v0 = vsub.f32 %v360_v51, %v10582_v58 }
  0x78   :  { %14799 = vst [vmem:[#allocation116_spill] sm:$0xff] %v10589_v49  ;;  %v14810_v41 = vand.u32 4294901760, %v10589_v49 }
  0x79   :  { %8365 = vmatmul.mubr.f32.gmra.mxu0 %v1209_v42  ;;  %14801 = vst [vmem:[#allocation117_spill] sm:$0xff] %v10595_v16  ;;  %v1249_v42 = vand.u32 4294901760, %v1248_v17  ;;  %14803 = vst [vmem:[#allocation118_spill] sm:$0xff] %v10608_v0  ;;  %v10617_v17 = vand.u32 4294901760, %v366_v43  ;;  %v1259_v51 = vand.u32 4294901760, %v1258_v55  ;;  %v10622_v36 = vsub.f32 %v363_v26, %v10595_v16 }
  0x7a   :  { %8367 = vmatprep.mubr.f32.mxu0 %v1219_v3  ;;  %8586 = vmatmul.mubr.f32.gmra.mxu1 %v10414_v30  ;;  %v14802_v3 = vand.u32 4294901760, %v10552_v20  ;;  %v14804_v30 = vand.u32 4294901760, %v10560_v61  ;;  %v14808_v55 = vand.u32 4294901760, %v10580_v15 }
  0x7b   :  { %8588 = vmatprep.mubr.f32.mxu1 %v10422_v14  ;;  %14805 = vst [vmem:[#allocation119_spill] sm:$0xff] %v10617_v17  ;;  %14806 = vst [vmem:[#allocation120_spill] sm:$0xff] %v10622_v36 }
  0x7c   :  { %v1268_v13 = vsub.f32 %v10552_v20, %v14802_v3  ;;  %v1278_v14 = vsub.f32 %v10560_v61, %v14804_v30  ;;  %v372_v3 = vsel %vm169_vm1, %v81_v37, 0  ;;  %v10624_v20 = vand.u32 4294901760, %v369_v12 }
  0x7d   :  { %8368 = vmatmul.mubr.f32.gmra.mxu0 %v1229_v54  ;;  %v83_v54 = vld [vmem:[%s14081_s0 + $0x228] sm:$0xff]  ;;  %v375_v30 = vsel %vm169_vm1, %v82_v63, 0  ;;  %v1288_v26 = vsub.f32 %v10580_v15, %v14808_v55  ;;  %v10644_v63 = vsub.f32 %v366_v43, %v10617_v17  ;;  %v86_v43 = vld [vmem:[%s14081_s0 + $0x240] sm:$0xff] }
  0x7e   :  { %8370 = vmatprep.mubr.f32.mxu0 %v1239_v53  ;;  %8589 = vmatmul.mubr.f32.gmra.mxu1 %v10449_v52  ;;  %14807 = vst [vmem:[#allocation121_spill] sm:$0xff] %v10624_v20  ;;  %v84_v53 = vld [vmem:[%s14081_s0 + $0x230] sm:$0xff]  ;;  %v1269_v37 = vand.u32 4294901760, %v1268_v13  ;;  %v10638_v52 = vand.u32 4294901760, %v372_v3  ;;  %v1279_v61 = vand.u32 4294901760, %v1278_v14  ;;  %v378_v6 = vsel %vm169_vm1, %v83_v54, 0 }
  0x7f   :  { %8591 = vmatprep.mubr.f32.mxu1 %v10456_v47  ;;  %v1298_v47 = vsub.f32 %v10589_v49, %v14810_v41  ;;  %14811 = vst [vmem:[#allocation123_spill] sm:$0xff] %v10644_v63  ;;  %v10650_v55 = vsub.f32 %v369_v12, %v10624_v20  ;;  %v10652_v40 = vand.u32 4294901760, %v375_v30  ;;  %v381_v14 = vsel %vm169_vm1, %v84_v53, 0  ;;  %v85_v41 = vld [vmem:[%s14081_s0 + $0x238] sm:$0xff] }
  0x80   :  { %14809 = vst [vmem:[#allocation122_spill] sm:$0xff] %v10638_v52  ;;  %v10666_v54 = vsub.f32 %v372_v3, %v10638_v52  ;;  %v10668_v13 = vand.u32 4294901760, %v378_v6  ;;  %v10671_v49 = vand.u32 4294901760, %v381_v14 }
  0x81   :  { %8371 = vmatmul.mubr.f32.gmra.mxu0 %v1249_v42  ;;  %14812 = vst [vmem:[#allocation124_spill] sm:$0xff] %v10650_v55  ;;  %14813 = vst [vmem:[#allocation125_spill] sm:$0xff] %v10652_v40  ;;  %v1289_v42 = vand.u32 4294901760, %v1288_v26  ;;  %v1299_v53 = vand.u32 4294901760, %v1298_v47  ;;  %v14818_v26 = vand.u32 4294901760, %v10622_v36  ;;  %v387_v47 = vsel %vm169_vm1, %v86_v43, 0 }
  0x82   :  { %8373 = vmatprep.mubr.f32.mxu0 %v1259_v51  ;;  %8592 = vmatmul.mubr.f32.gmra.mxu1 %v10467_v31  ;;  %v14814_v51 = vand.u32 4294901760, %v10608_v0  ;;  %14815 = vst [vmem:[#allocation126_spill] sm:$0xff] %v10666_v54  ;;  %14816 = vst [vmem:[#allocation127_spill] sm:$0xff] %v10668_v13  ;;  %v10689_v31 = vsub.f32 %v378_v6, %v10668_v13  ;;  %v14822_v43 = vand.u32 4294901760, %v10644_v63 }
  0x83   :  { %8594 = vmatprep.mubr.f32.mxu1 %v10484_v35  ;;  %14817 = vst [vmem:[#allocation128_spill] sm:$0xff] %v10671_v49  ;;  %v384_v35 = vsel %vm169_vm1, %v85_v41, 0 }
  0x84   :  { %v1308_v12 = vsub.f32 %v10608_v0, %v14814_v51  ;;  %v1318_v51 = vsub.f32 %v10622_v36, %v14818_v26  ;;  %v10680_v0 = vsub.f32 %v375_v30, %v10652_v40  ;;  %14820 = vst [vmem:[#allocation130_spill] sm:$0xff] %v10689_v31  ;;  %v10691_v26 = vand.u32 4294901760, %v384_v35  ;;  %v88_v30 = vld [vmem:[%s14081_s0 + $0x250] sm:$0xff] }
  0x85   :  { %8374 = vmatmul.mubr.f32.gmra.mxu0 %v1269_v37  ;;  %v87_v37 = vld [vmem:[%s14081_s0 + $0x248] sm:$0xff]  ;;  %v1328_v3 = vsub.f32 %v10644_v63, %v14822_v43  ;;  %v393_v43 = vsel %vm169_vm1, %v88_v30, 0 }
  0x86   :  { %8376 = vmatprep.mubr.f32.mxu0 %v1279_v61  ;;  %8595 = vmatmul.mubr.f32.gmra.mxu1 %v10500_v18  ;;  %14819 = vst [vmem:[#allocation129_spill] sm:$0xff] %v10680_v0  ;;  %v1309_v61 = vand.u32 4294901760, %v1308_v12  ;;  %14821 = vst [vmem:[#allocation131_spill] sm:$0xff] %v10691_v26  ;;  %v10700_v18 = vsub.f32 %v381_v14, %v10671_v49  ;;  %v10702_v12 = vand.u32 4294901760, %v387_v47  ;;  %v390_v41 = vsel %vm169_vm1, %v87_v37, 0  ;;  %v89_v14 = vld [vmem:[%s14081_s0 + $0x258] sm:$0xff] }
  0x87   :  { %8597 = vmatprep.mubr.f32.mxu1 %v10512_v59  ;;  %v1319_v6 = vand.u32 4294901760, %v1318_v51  ;;  %v14825_v59 = vand.u32 4294901760, %v10650_v55  ;;  %v14826_v37 = vand.u32 4294901760, %v10666_v54  ;;  %v1329_v30 = vand.u32 4294901760, %v1328_v3  ;;  %v91_v3 = vld [vmem:[%s14081_s0 + $0x268] sm:$0xff] }
  0x88   :  { %14823 = vst [vmem:[#allocation132_spill] sm:$0xff] %v10700_v18  ;;  %14824 = vst [vmem:[#allocation133_spill] sm:$0xff] %v10702_v12  ;;  %v396_v63 = vsel %vm169_vm1, %v89_v14, 0  ;;  %v92_v14 = vld [vmem:[%s14081_s0 + $0x270] sm:$0xff] }
  0x89   :  { %8377 = vmatmul.mubr.f32.gmra.mxu0 %v1289_v42  ;;  %v1338_v36 = vsub.f32 %v10650_v55, %v14825_v59  ;;  %v10722_v59 = vand.u32 4294901760, %v390_v41  ;;  %v90_v42 = vld [vmem:[%s14081_s0 + $0x260] sm:$0xff]  ;;  %v10729_v55 = vsub.f32 %v387_v47, %v10702_v12 }
  0x8a   :  { %8379 = vmatprep.mubr.f32.mxu0 %v1299_v53  ;;  %8598 = vmatmul.mubr.f32.gmra.mxu1 %v10526_v60  ;;  %v1348_v53 = vsub.f32 %v10666_v54, %v14826_v37  ;;  %v10720_v60 = vsub.f32 %v384_v35, %v10691_v26  ;;  %v14830_v35 = vand.u32 4294901760, %v10680_v0  ;;  %v10735_v54 = vand.u32 4294901760, %v393_v43 }
  0x8b   :  { %8600 = vmatprep.mubr.f32.mxu1 %v10531_v32  ;;  %14828 = vst [vmem:[#allocation135_spill] sm:$0xff] %v10722_v59  ;;  %14829 = vst [vmem:[#allocation136_spill] sm:$0xff] %v10729_v55  ;;  %v1339_v37 = vand.u32 4294901760, %v1338_v36  ;;  %v399_v47 = vsel %vm169_vm1, %v90_v42, 0 }
  0x8c   :  { %14827 = vst [vmem:[#allocation134_spill] sm:$0xff] %v10720_v60  ;;  %v1358_v51 = vsub.f32 %v10680_v0, %v14830_v35  ;;  %14831 = vst [vmem:[#allocation137_spill] sm:$0xff] %v10735_v54  ;;  %v10748_v35 = vsub.f32 %v390_v41, %v10722_v59  ;;  %v10762_v32 = vsub.f32 %v393_v43, %v10735_v54  ;;  %v14840_v0 = vand.u32 4294901760, %v10729_v55 }
  0x8d   :  { %8380 = vmatmul.mubr.f32.gmra.mxu0 %v1309_v61  ;;  %v1349_v61 = vand.u32 4294901760, %v1348_v53  ;;  %v10757_v53 = vand.u32 4294901760, %v396_v63 }
  0x8e   :  { %8382 = vmatprep.mubr.f32.mxu0 %v1319_v6  ;;  %8601 = vmatmul.mubr.f32.gmra.mxu1 %v10554_v1  ;;  %v14832_v6 = vand.u32 4294901760, %v10689_v31  ;;  %14833 = vst [vmem:[#allocation138_spill] sm:$0xff] %v10748_v35  ;;  %v14834_v1 = vand.u32 4294901760, %v10700_v18  ;;  %v1359_v41 = vand.u32 4294901760, %v1358_v51  ;;  %14836 = vst [vmem:[#allocation140_spill] sm:$0xff] %v10762_v32  ;;  %v14838_v51 = vand.u32 4294901760, %v10720_v60 }
  0x8f   :  { %8603 = vmatprep.mubr.f32.mxu1 %v10562_v50  ;;  %14835 = vst [vmem:[#allocation139_spill] sm:$0xff] %v10757_v53 }
  0x90   :  { %v1368_v36 = vsub.f32 %v10689_v31, %v14832_v6  ;;  %v1378_v50 = vsub.f32 %v10700_v18, %v14834_v1  ;;  %v402_v6 = vsel %vm169_vm1, %v91_v3, 0  ;;  %v10764_v31 = vand.u32 4294901760, %v399_v47 }
  0x91   :  { %8383 = vmatmul.mubr.f32.gmra.mxu0 %v1329_v30  ;;  %v93_v30 = vld [vmem:[%s14081_s0 + $0x278] sm:$0xff]  ;;  %v405_v1 = vsel %vm169_vm1, %v92_v14, 0  ;;  %v1388_v43 = vsub.f32 %v10720_v60, %v14838_v51  ;;  %v10784_v14 = vsub.f32 %v396_v63, %v10757_v53  ;;  %v96_v63 = vld [vmem:[%s14081_s0 + $0x290] sm:$0xff] }
  0x92   :  { %8385 = vmatprep.mubr.f32.mxu0 %v1339_v37  ;;  %8604 = vmatmul.mubr.f32.gmra.mxu1 %v10582_v58  ;;  %14837 = vst [vmem:[#allocation141_spill] sm:$0xff] %v10764_v31  ;;  %v94_v37 = vld [vmem:[%s14081_s0 + $0x280] sm:$0xff]  ;;  %v1369_v3 = vand.u32 4294901760, %v1368_v36  ;;  %v10778_v58 = vand.u32 4294901760, %v402_v6  ;;  %v1379_v18 = vand.u32 4294901760, %v1378_v50  ;;  %v408_v15 = vsel %vm169_vm1, %v93_v30, 0 }
  0x93   :  { %8606 = vmatprep.mubr.f32.mxu1 %v10595_v16  ;;  %v1398_v16 = vsub.f32 %v10729_v55, %v14840_v0  ;;  %14841 = vst [vmem:[#allocation143_spill] sm:$0xff] %v10784_v14  ;;  %v10790_v51 = vsub.f32 %v399_v47, %v10764_v31  ;;  %v10792_v42 = vand.u32 4294901760, %v405_v1  ;;  %v411_v50 = vsel %vm169_vm1, %v94_v37, 0  ;;  %v95_v0 = vld [vmem:[%s14081_s0 + $0x288] sm:$0xff] }
  0x94   :  { %14839 = vst [vmem:[#allocation142_spill] sm:$0xff] %v10778_v58  ;;  %v10806_v30 = vsub.f32 %v402_v6, %v10778_v58  ;;  %v10808_v36 = vand.u32 4294901760, %v408_v15  ;;  %v414_v55 = vsel %vm169_vm1, %v95_v0, 0  ;;  %v417_v60 = vsel %vm169_vm1, %v96_v63, 0  ;;  %v97_v0 = vld [vmem:[%s14081_s0 + $0x298] sm:$0xff] }
  0x95   :  { %8386 = vmatmul.mubr.f32.gmra.mxu0 %v1349_v61  ;;  %14842 = vst [vmem:[#allocation144_spill] sm:$0xff] %v10790_v51  ;;  %14843 = vst [vmem:[#allocation145_spill] sm:$0xff] %v10792_v42  ;;  %v1389_v61 = vand.u32 4294901760, %v1388_v43  ;;  %v1399_v43 = vand.u32 4294901760, %v1398_v16  ;;  %v10831_v16 = vand.u32 4294901760, %v414_v55  ;;  %v10833_v37 = vand.u32 4294901760, %v417_v60 }
  0x96   :  { %8388 = vmatprep.mubr.f32.mxu0 %v1359_v41  ;;  %8607 = vmatmul.mubr.f32.gmra.mxu1 %v10617_v17  ;;  %v14844_v41 = vand.u32 4294901760, %v10748_v35  ;;  %14845 = vst [vmem:[#allocation146_spill] sm:$0xff] %v10806_v30  ;;  %14846 = vst [vmem:[#allocation147_spill] sm:$0xff] %v10808_v36  ;;  %v10811_v17 = vand.u32 4294901760, %v411_v50  ;;  %v10829_v63 = vsub.f32 %v408_v15, %v10808_v36 }
  0x97   :  { %8609 = vmatprep.mubr.f32.mxu1 %v10624_v20  ;;  %14851 = vst [vmem:[#allocation151_spill] sm:$0xff] %v10831_v16  ;;  %14852 = vst [vmem:[#allocation152_spill] sm:$0xff] %v10833_v37  ;;  %v14853_v20 = vand.u32 4294901760, %v10784_v14 }
  0x98   :  { %v1408_v47 = vsub.f32 %v10748_v35, %v14844_v41  ;;  %14847 = vst [vmem:[#allocation148_spill] sm:$0xff] %v10811_v17  ;;  %v14848_v41 = vand.u32 4294901760, %v10762_v32  ;;  %14850 = vst [vmem:[#allocation150_spill] sm:$0xff] %v10829_v63  ;;  %v10863_v35 = vsub.f32 %v417_v60, %v10833_v37 }
  0x99   :  { %8389 = vmatmul.mubr.f32.gmra.mxu0 %v1369_v3  ;;  %v10821_v3 = vsub.f32 %v405_v1, %v10792_v42  ;;  %v98_v1 = vld [vmem:[%s14081_s0 + $0x2a0] sm:$0xff] }
  0x9a   :  { %8391 = vmatprep.mubr.f32.mxu0 %v1379_v18  ;;  %8610 = vmatmul.mubr.f32.gmra.mxu1 %v10638_v52  ;;  %v1418_v6 = vsub.f32 %v10762_v32, %v14848_v41  ;;  %v1409_v41 = vand.u32 4294901760, %v1408_v47  ;;  %v10842_v52 = vsub.f32 %v411_v50, %v10811_v17  ;;  %v14855_v18 = vand.u32 4294901760, %v10790_v51  ;;  %14858 = vst [vmem:[#allocation155_spill] sm:$0xff] %v10863_v35 }
  0x9b   :  { %14849 = vst [vmem:[#allocation149_spill] sm:$0xff] %v10821_v3  ;;  %8612 = vmatprep.mubr.f32.mxu1 %v10652_v40  ;;  %v1428_v40 = vsub.f32 %v10784_v14, %v14853_v20  ;;  %v423_v47 = vsel %vm169_vm1, %v98_v1, 0  ;;  %v99_v20 = vld [vmem:[%s14081_s0 + $0x2a8] sm:$0xff]  ;;  %v14856_v50 = vand.u32 4294901760, %v10806_v30 }
  0x9c   :  { %14854 = vst [vmem:[#allocation153_spill] sm:$0xff] %v10842_v52  ;;  %v1419_v15 = vand.u32 4294901760, %v1418_v6  ;;  %v1438_v32 = vsub.f32 %v10790_v51, %v14855_v18  ;;  %v10860_v18 = vsub.f32 %v414_v55, %v10831_v16  ;;  %v14860_v55 = vand.u32 4294901760, %v10821_v3 }
  0x9d   :  { %8392 = vmatmul.mubr.f32.gmra.mxu0 %v1389_v61  ;;  %v420_v61 = vsel %vm169_vm1, %v97_v0, 0  ;;  %v100_v0 = vld [vmem:[%s14081_s0 + $0x2b0] sm:$0xff]  ;;  %v1429_v1 = vand.u32 4294901760, %v1428_v40  ;;  %v10875_v60 = vand.u32 4294901760, %v423_v47  ;;  %v101_v40 = vld [vmem:[%s14081_s0 + $0x2b8] sm:$0xff] }
  0x9e   :  { %8394 = vmatprep.mubr.f32.mxu0 %v1399_v43  ;;  %8613 = vmatmul.mubr.f32.gmra.mxu1 %v10668_v13  ;;  %v1448_v43 = vsub.f32 %v10806_v30, %v14856_v50  ;;  %14857 = vst [vmem:[#allocation154_spill] sm:$0xff] %v10860_v18  ;;  %v10869_v13 = vand.u32 4294901760, %v420_v61  ;;  %v1439_v50 = vand.u32 4294901760, %v1438_v32  ;;  %v1458_v6 = vsub.f32 %v10821_v3, %v14860_v55 }
  0x9f   :  { %8615 = vmatprep.mubr.f32.mxu1 %v10671_v49  ;;  %14861 = vst [vmem:[#allocation157_spill] sm:$0xff] %v10875_v60  ;;  %v426_v30 = vsel %vm169_vm1, %v99_v20, 0  ;;  %v14862_v49 = vand.u32 4294901760, %v10829_v63  ;;  %v102_v20 = vld [vmem:[%s14081_s0 + $0x2c0] sm:$0xff]  ;;  %v14863_v3 = vand.u32 4294901760, %v10842_v52 }
  0xa0   :  { %14859 = vst [vmem:[#allocation156_spill] sm:$0xff] %v10869_v13  ;;  %v1459_v55 = vand.u32 4294901760, %v1458_v6  ;;  %v14868_v6 = vand.u32 4294901760, %v10860_v18 }
  0xa1   :  { %8395 = vmatmul.mubr.f32.gmra.mxu0 %v1409_v41  ;;  %v429_v41 = vsel %vm169_vm1, %v100_v0, 0  ;;  %v1468_v32 = vsub.f32 %v10829_v63, %v14862_v49  ;;  %v10895_v0 = vsub.f32 %v420_v61, %v10869_v13  ;;  %v432_v49 = vsel %vm169_vm1, %v101_v40, 0 }
  0xa2   :  { %8397 = vmatprep.mubr.f32.mxu0 %v1419_v15  ;;  %8616 = vmatmul.mubr.f32.gmra.mxu1 %v10691_v26  ;;  %v1449_v15 = vand.u32 4294901760, %v1448_v43  ;;  %v10897_v43 = vand.u32 4294901760, %v426_v30  ;;  %v10902_v26 = vsub.f32 %v423_v47, %v10875_v60  ;;  %v10904_v63 = vand.u32 4294901760, %v429_v41 }
  0xa3   :  { %8618 = vmatprep.mubr.f32.mxu1 %v10702_v12  ;;  %v1478_v12 = vsub.f32 %v10842_v52, %v14863_v3  ;;  %14864 = vst [vmem:[#allocation158_spill] sm:$0xff] %v10895_v0  ;;  %v103_v3 = vld [vmem:[%s14081_s0 + $0x2c8] sm:$0xff]  ;;  %v435_v61 = vsel %vm169_vm1, %v102_v20, 0  ;;  %v1488_v47 = vsub.f32 %v10860_v18, %v14868_v6  ;;  %v14869_v40 = vand.u32 4294901760, %v10863_v35 }
  0xa4   :  { %14865 = vst [vmem:[#allocation159_spill] sm:$0xff] %v10897_v43  ;;  %14866 = vst [vmem:[#allocation160_spill] sm:$0xff] %v10902_v26  ;;  %v10920_v52 = vand.u32 4294901760, %v432_v49  ;;  %v10924_v20 = vsub.f32 %v426_v30, %v10897_v43  ;;  %v438_v14 = vsel %vm169_vm1, %v103_v3, 0  ;;  %v10930_v6 = vsub.f32 %v429_v41, %v10904_v63  ;;  %v106_v30 = vld [vmem:[%s14081_s0 + $0x2e0] sm:$0xff] }
  0xa5   :  { %8398 = vmatmul.mubr.f32.gmra.mxu0 %v1429_v1  ;;  %14867 = vst [vmem:[#allocation161_spill] sm:$0xff] %v10904_v63  ;;  %v104_v1 = vld [vmem:[%s14081_s0 + $0x2d0] sm:$0xff]  ;;  %v1479_v51 = vand.u32 4294901760, %v1478_v12  ;;  %v105_v12 = vld [vmem:[%s14081_s0 + $0x2d8] sm:$0xff]  ;;  %v10945_v41 = vand.u32 4294901760, %v438_v14 }
  0xa6   :  { %8400 = vmatprep.mubr.f32.mxu0 %v1439_v50  ;;  %8619 = vmatmul.mubr.f32.gmra.mxu1 %v10722_v59  ;;  %v1469_v50 = vand.u32 4294901760, %v1468_v32  ;;  %v1498_v59 = vsub.f32 %v10863_v35, %v14869_v40  ;;  %14870 = vst [vmem:[#allocation162_spill] sm:$0xff] %v10920_v52  ;;  %14871 = vst [vmem:[#allocation163_spill] sm:$0xff] %v10924_v20  ;;  %v10932_v40 = vand.u32 4294901760, %v435_v61 }
  0xa7   :  { %8621 = vmatprep.mubr.f32.mxu1 %v10735_v54  ;;  %v14383_v54 = vand.u32 4294901760, %v10895_v0  ;;  %14872 = vst [vmem:[#allocation164_spill] sm:$0xff] %v10930_v6  ;;  %v10943_v32 = vsub.f32 %v432_v49, %v10920_v52  ;;  %14875 = vst [vmem:[#allocation167_spill] sm:$0xff] %v10945_v41 }
  0xa8   :  { %14873 = vst [vmem:[#allocation165_spill] sm:$0xff] %v10932_v40  ;;  %v1499_v3 = vand.u32 4294901760, %v1498_v59  ;;  %v14877_v59 = vand.u32 4294901760, %v10902_v26 }
  0xa9   :  { %8401 = vmatmul.mubr.f32.gmra.mxu0 %v1449_v15  ;;  %v441_v15 = vsel %vm169_vm1, %v104_v1, 0  ;;  %14874 = vst [vmem:[#allocation166_spill] sm:$0xff] %v10943_v32  ;;  %v1508_v1 = vsub.f32 %v10895_v0, %v14383_v54  ;;  %v447_v54 = vsel %vm169_vm1, %v106_v30, 0  ;;  %v14881_v30 = vand.u32 4294901760, %v10924_v20 }
  0xaa   :  { %8403 = vmatprep.mubr.f32.mxu0 %v1459_v55  ;;  %8622 = vmatmul.mubr.f32.gmra.mxu1 %v10757_v53  ;;  %v1489_v55 = vand.u32 4294901760, %v1488_v47  ;;  %v10951_v35 = vand.u32 4294901760, %v441_v15  ;;  %v1518_v49 = vsub.f32 %v10902_v26, %v14877_v59  ;;  %v10969_v53 = vsub.f32 %v438_v14, %v10945_v41  ;;  %v109_v14 = vld [vmem:[%s14081_s0 + $0x2f8] sm:$0xff] }
  0xab   :  { %8624 = vmatprep.mubr.f32.mxu1 %v10764_v31  ;;  %v444_v31 = vsel %vm169_vm1, %v105_v12, 0  ;;  %v107_v12 = vld [vmem:[%s14081_s0 + $0x2e8] sm:$0xff]  ;;  %v1509_v59 = vand.u32 4294901760, %v1508_v1  ;;  %v1528_v47 = vsub.f32 %v10924_v20, %v14881_v30  ;;  %v10982_v26 = vand.u32 4294901760, %v447_v54 }
  0xac   :  { %14876 = vst [vmem:[#allocation168_spill] sm:$0xff] %v10951_v35  ;;  %14879 = vst [vmem:[#allocation170_spill] sm:$0xff] %v10969_v53  ;;  %v450_v30 = vsel %vm169_vm1, %v107_v12, 0  ;;  %v14885_v20 = vand.u32 4294901760, %v10943_v32  ;;  %v14892_v0 = vand.u32 4294901760, %v10969_v53 }
  0xad   :  { %8404 = vmatmul.mubr.f32.gmra.mxu0 %v1469_v50  ;;  %v10960_v50 = vsub.f32 %v435_v61, %v10932_v40  ;;  %v108_v61 = vld [vmem:[%s14081_s0 + $0x2f0] sm:$0xff]  ;;  %14883 = vst [vmem:[#allocation173_spill] sm:$0xff] %v10982_v26  ;;  %v1529_v12 = vand.u32 4294901760, %v1528_v47  ;;  %v111_v47 = vld [vmem:[%s14081_s0 + $0x308] sm:$0xff] }
  0xae   :  { %8406 = vmatprep.mubr.f32.mxu0 %v1479_v51  ;;  %8625 = vmatmul.mubr.f32.gmra.mxu1 %v10778_v58  ;;  %v10971_v58 = vand.u32 4294901760, %v444_v31  ;;  %v1519_v51 = vand.u32 4294901760, %v1518_v49  ;;  %v1548_v18 = vsub.f32 %v10943_v32, %v14885_v20 }
  0xaf   :  { %14878 = vst [vmem:[#allocation169_spill] sm:$0xff] %v10960_v50  ;;  %8627 = vmatprep.mubr.f32.mxu1 %v10792_v42  ;;  %v10980_v42 = vsub.f32 %v441_v15, %v10951_v35  ;;  %v453_v15 = vsel %vm169_vm1, %v108_v61, 0  ;;  %v11008_v61 = vsub.f32 %v447_v54, %v10982_v26  ;;  %v14889_v20 = vand.u32 4294901760, %v10960_v50 }
  0xb0   :  { %14880 = vst [vmem:[#allocation171_spill] sm:$0xff] %v10971_v58  ;;  %v11000_v49 = vsub.f32 %v444_v31, %v10971_v58 }
  0xb1   :  { %8407 = vmatmul.mubr.f32.gmra.mxu0 %v1489_v55  ;;  %14882 = vst [vmem:[#allocation172_spill] sm:$0xff] %v10980_v42  ;;  %v14884_v55 = vand.u32 4294901760, %v10930_v6  ;;  %14887 = vst [vmem:[#allocation175_spill] sm:$0xff] %v11008_v61 }
  0xb2   :  { %8409 = vmatprep.mubr.f32.mxu0 %v1499_v3  ;;  %8628 = vmatmul.mubr.f32.gmra.mxu1 %v10808_v36  ;;  %14886 = vst [vmem:[#allocation174_spill] sm:$0xff] %v11000_v49  ;;  %v456_v36 = vsel %vm169_vm1, %v109_v14, 0  ;;  %v1558_v14 = vsub.f32 %v10960_v50, %v14889_v20  ;;  %v11016_v3 = vand.u32 4294901760, %v453_v15  ;;  %v112_v20 = vld [vmem:[%s14081_s0 + $0x310] sm:$0xff]  ;;  %v14893_v50 = vand.u32 4294901760, %v10980_v42 }
  0xb3   :  { %v1538_v1 = vsub.f32 %v10930_v6, %v14884_v55  ;;  %8630 = vmatprep.mubr.f32.mxu1 %v10811_v17  ;;  %v110_v55 = vld [vmem:[%s14081_s0 + $0x300] sm:$0xff]  ;;  %v11010_v17 = vand.u32 4294901760, %v450_v30  ;;  %v11022_v54 = vand.u32 4294901760, %v456_v36 }
  0xb4   :  { %14890 = vst [vmem:[#allocation177_spill] sm:$0xff] %v11016_v3 }
  0xb5   :  { %8410 = vmatmul.mubr.f32.gmra.mxu0 %v1509_v59  ;;  %14888 = vst [vmem:[#allocation176_spill] sm:$0xff] %v11010_v17  ;;  %v1539_v31 = vand.u32 4294901760, %v1538_v1  ;;  %14891 = vst [vmem:[#allocation178_spill] sm:$0xff] %v11022_v54  ;;  %v459_v59 = vsel %vm169_vm1, %v110_v55, 0  ;;  %v1568_v1 = vsub.f32 %v10969_v53, %v14892_v0  ;;  %v11037_v55 = vsub.f32 %v450_v30, %v11010_v17 }
  0xb6   :  { %8412 = vmatprep.mubr.f32.mxu0 %v1519_v51  ;;  %8631 = vmatmul.mubr.f32.gmra.mxu1 %v10831_v16  ;;  %v1549_v51 = vand.u32 4294901760, %v1548_v18  ;;  %v462_v18 = vsel %vm169_vm1, %v111_v47, 0  ;;  %v1559_v0 = vand.u32 4294901760, %v1558_v14  ;;  %v11042_v16 = vsub.f32 %v453_v15, %v11016_v3 }
  0xb7   :  { %8633 = vmatprep.mubr.f32.mxu1 %v10833_v37  ;;  %v1578_v37 = vsub.f32 %v10980_v42, %v14893_v50  ;;  %14894 = vst [vmem:[#allocation179_spill] sm:$0xff] %v11037_v55  ;;  %v11044_v53 = vand.u32 4294901760, %v459_v59  ;;  %v113_v50 = vld [vmem:[%s14081_s0 + $0x318] sm:$0xff]  ;;  %v11051_v30 = vsub.f32 %v456_v36, %v11022_v54  ;;  %v1569_v14 = vand.u32 4294901760, %v1568_v1 }
  0xb8   :  { %14895 = vst [vmem:[#allocation180_spill] sm:$0xff] %v11042_v16  ;;  %v14898_v15 = vand.u32 4294901760, %v11000_v49  ;;  %v11060_v32 = vand.u32 4294901760, %v462_v18  ;;  %v14424_v42 = vand.u32 4294901760, %v11037_v55 }
  0xb9   :  { %8413 = vmatmul.mubr.f32.gmra.mxu0 %v1529_v12  ;;  %14896 = vst [vmem:[#allocation181_spill] sm:$0xff] %v11044_v53  ;;  %14897 = vst [vmem:[#allocation182_spill] sm:$0xff] %v11051_v30  ;;  %v465_v12 = vsel %vm169_vm1, %v112_v20, 0  ;;  %v468_v20 = vsel %vm169_vm1, %v113_v50, 0  ;;  %v11070_v6 = vsub.f32 %v459_v59, %v11044_v53 }
  0xba   :  { %8415 = vmatprep.mubr.f32.mxu0 %v1539_v31  ;;  %8634 = vmatmul.mubr.f32.gmra.mxu1 %v10869_v13  ;;  %v114_v31 = vld [vmem:[%s14081_s0 + $0x320] sm:$0xff]  ;;  %v1588_v47 = vsub.f32 %v11000_v49, %v14898_v15  ;;  %14899 = vst [vmem:[#allocation183_spill] sm:$0xff] %v11060_v32  ;;  %v1579_v13 = vand.u32 4294901760, %v1578_v37  ;;  %v11072_v15 = vand.u32 4294901760, %v465_v12  ;;  %v11084_v59 = vsub.f32 %v462_v18, %v11060_v32 }
  0xbb   :  { %8636 = vmatprep.mubr.f32.mxu1 %v10875_v60  ;;  %v14900_v60 = vand.u32 4294901760, %v11008_v61  ;;  %14901 = vst [vmem:[#allocation184_spill] sm:$0xff] %v11070_v6  ;;  %v471_v37 = vsel %vm169_vm1, %v114_v31, 0  ;;  %v11086_v1 = vand.u32 4294901760, %v468_v20 }
  0xbc   :  { %14902 = vst [vmem:[#allocation185_spill] sm:$0xff] %v11072_v15  ;;  %v1589_v50 = vand.u32 4294901760, %v1588_v47  ;;  %14903 = vst [vmem:[#allocation186_spill] sm:$0xff] %v11084_v59  ;;  %v14906_v47 = vand.u32 4294901760, %v11042_v16 }
  0xbd   :  { %8416 = vmatmul.mubr.f32.gmra.mxu0 %v1549_v51  ;;  %v1598_v36 = vsub.f32 %v11008_v61, %v14900_v60  ;;  %v115_v60 = vld [vmem:[%s14081_s0 + $0x328] sm:$0xff]  ;;  %14904 = vst [vmem:[#allocation187_spill] sm:$0xff] %v11086_v1  ;;  %v11091_v61 = vand.u32 4294901760, %v471_v37 }
  0xbe   :  { %8418 = vmatprep.mubr.f32.mxu0 %v1559_v0  ;;  %8637 = vmatmul.mubr.f32.gmra.mxu1 %v10897_v43  ;;  %v116_v0 = vld [vmem:[%s14081_s0 + $0x330] sm:$0xff]  ;;  %v1608_v43 = vsub.f32 %v11037_v55, %v14424_v42  ;;  %v474_v51 = vsel %vm169_vm1, %v115_v60, 0  ;;  %v1618_v18 = vsub.f32 %v11042_v16, %v14906_v47  ;;  %v117_v42 = vld [vmem:[%s14081_s0 + $0x338] sm:$0xff]  ;;  %v118_v47 = vld [vmem:[%s14081_s0 + $0x340] sm:$0xff] }
  0xbf   :  { %8639 = vmatprep.mubr.f32.mxu1 %v10904_v63  ;;  %v1599_v31 = vand.u32 4294901760, %v1598_v36  ;;  %14905 = vst [vmem:[#allocation188_spill] sm:$0xff] %v11091_v61  ;;  %v477_v36 = vsel %vm169_vm1, %v116_v0, 0  ;;  %v11117_v0 = vand.u32 4294901760, %v474_v51  ;;  %v11123_v16 = vsub.f32 %v471_v37, %v11091_v61 }
  0xc0   :  { %v14913_v63 = vand.u32 4294901760, %v11070_v6 }
  0xc1   :  { %8419 = vmatmul.mubr.f32.gmra.mxu0 %v1569_v14  ;;  %v11100_v14 = vsub.f32 %v465_v12, %v11072_v15  ;;  %v11115_v12 = vsub.f32 %v468_v20, %v11086_v1  ;;  %14910 = vst [vmem:[#allocation191_spill] sm:$0xff] %v11117_v0  ;;  %14911 = vst [vmem:[#allocation192_spill] sm:$0xff] %v11123_v16  ;;  %v1619_v20 = vand.u32 4294901760, %v1618_v18 }
  0xc2   :  { %8421 = vmatprep.mubr.f32.mxu0 %v1579_v13  ;;  %8640 = vmatmul.mubr.f32.gmra.mxu1 %v10920_v52  ;;  %v14908_v13 = vand.u32 4294901760, %v11051_v30  ;;  %v119_v52 = vld [vmem:[%s14081_s0 + $0x348] sm:$0xff]  ;;  %v1638_v55 = vsub.f32 %v11070_v6, %v14913_v63  ;;  %v11144_v63 = vsub.f32 %v474_v51, %v11117_v0 }
  0xc3   :  { %14907 = vst [vmem:[#allocation189_spill] sm:$0xff] %v11100_v14  ;;  %8642 = vmatprep.mubr.f32.mxu1 %v10932_v40  ;;  %14909 = vst [vmem:[#allocation190_spill] sm:$0xff] %v11115_v12  ;;  %v1609_v40 = vand.u32 4294901760, %v1608_v43  ;;  %v120_v43 = vld [vmem:[%s14081_s0 + $0x350] sm:$0xff] }
  0xc4   :  { %v1628_v60 = vsub.f32 %v11051_v30, %v14908_v13  ;;  %v11125_v13 = vand.u32 4294901760, %v477_v36  ;;  %v480_v30 = vsel %vm169_vm1, %v117_v42, 0  ;;  %v486_v42 = vsel %vm169_vm1, %v119_v52, 0  ;;  %14915 = vst [vmem:[#allocation194_spill] sm:$0xff] %v11144_v63 }
  0xc5   :  { %8422 = vmatmul.mubr.f32.gmra.mxu0 %v1589_v50  ;;  %v483_v50 = vsel %vm169_vm1, %v118_v47, 0  ;;  %v11146_v49 = vand.u32 4294901760, %v480_v30  ;;  %v121_v47 = vld [vmem:[%s14081_s0 + $0x358] sm:$0xff]  ;;  %v1639_v51 = vand.u32 4294901760, %v1638_v55  ;;  %v11162_v6 = vand.u32 4294901760, %v486_v42 }
  0xc6   :  { %14912 = vst [vmem:[#allocation193_spill] sm:$0xff] %v11125_v13  ;;  %8424 = vmatprep.mubr.f32.mxu0 %v1599_v31  ;;  %8643 = vmatmul.mubr.f32.gmra.mxu1 %v10945_v41  ;;  %v1629_v37 = vand.u32 4294901760, %v1628_v60  ;;  %v14914_v31 = vand.u32 4294901760, %v11084_v59  ;;  %v11153_v52 = vsub.f32 %v477_v36, %v11125_v13  ;;  %v14919_v41 = vand.u32 4294901760, %v11100_v14 }
  0xc7   :  { %8645 = vmatprep.mubr.f32.mxu1 %v10951_v35  ;;  %14916 = vst [vmem:[#allocation195_spill] sm:$0xff] %v11146_v49  ;;  %v11155_v35 = vand.u32 4294901760, %v483_v50  ;;  %14920 = vst [vmem:[#allocation198_spill] sm:$0xff] %v11162_v6  ;;  %v14921_v36 = vand.u32 4294901760, %v11115_v12 }
  0xc8   :  { %v1648_v18 = vsub.f32 %v11084_v59, %v14914_v31  ;;  %14917 = vst [vmem:[#allocation196_spill] sm:$0xff] %v11153_v52  ;;  %v489_v31 = vsel %vm169_vm1, %v120_v43, 0  ;;  %v1658_v59 = vsub.f32 %v11100_v14, %v14919_v41  ;;  %v122_v41 = vld [vmem:[%s14081_s0 + $0x360] sm:$0xff]  ;;  %v11187_v43 = vsub.f32 %v486_v42, %v11162_v6 }
  0xc9   :  { %8425 = vmatmul.mubr.f32.gmra.mxu0 %v1609_v40  ;;  %14918 = vst [vmem:[#allocation197_spill] sm:$0xff] %v11155_v35  ;;  %v492_v40 = vsel %vm169_vm1, %v121_v47, 0  ;;  %v1668_v60 = vsub.f32 %v11115_v12, %v14921_v36  ;;  %v11173_v55 = vand.u32 4294901760, %v489_v31  ;;  %v11183_v36 = vsub.f32 %v483_v50, %v11155_v35  ;;  %v124_v50 = vld [vmem:[%s14081_s0 + $0x370] sm:$0xff] }
  0xca   :  { %8427 = vmatprep.mubr.f32.mxu0 %v1619_v20  ;;  %8646 = vmatmul.mubr.f32.gmra.mxu1 %v10971_v58  ;;  %v11171_v20 = vsub.f32 %v480_v30, %v11146_v49  ;;  %v1649_v58 = vand.u32 4294901760, %v1648_v18  ;;  %v1659_v30 = vand.u32 4294901760, %v1658_v59  ;;  %14926 = vst [vmem:[#allocation202_spill] sm:$0xff] %v11187_v43  ;;  %v11189_v12 = vand.u32 4294901760, %v492_v40  ;;  %v11202_v59 = vld [vmem:[%s14082_s2] ss:$0 sm:$0xff] }
  0xcb   :  { %8648 = vmatprep.mubr.f32.mxu1 %v10982_v26  ;;  %14923 = vst [vmem:[#allocation200_spill] sm:$0xff] %v11173_v55  ;;  %v14924_v26 = vand.u32 4294901760, %v11123_v16  ;;  %14925 = vst [vmem:[#allocation201_spill] sm:$0xff] %v11183_v36  ;;  %v1669_v42 = vand.u32 4294901760, %v1668_v60 }
  0xcc   :  { %14922 = vst [vmem:[#allocation199_spill] sm:$0xff] %v11171_v20  ;;  %14927 = vst [vmem:[#allocation203_spill] sm:$0xff] %v11189_v12 }
  0xcd   :  { %8428 = vmatmul.mubr.f32.gmra.mxu0 %v1629_v37  ;;  %v1678_v47 = vsub.f32 %v11123_v16, %v14924_v26  ;;  %v123_v37 = vld [vmem:[%s14081_s0 + $0x368] sm:$0xff]  ;;  %v495_v26 = vsel %vm169_vm1, %v122_v41, 0  ;;  %v14930_v16 = vand.u32 4294901760, %v11153_v52 }
  0xce   :  { %8430 = vmatprep.mubr.f32.mxu0 %v1639_v51  ;;  %8649 = vmatmul.mubr.f32.gmra.mxu1 %v11010_v17  ;;  %v14928_v51 = vand.u32 4294901760, %v11144_v63  ;;  %v498_v62 = vsel %vm169_vm1, %v123_v37, 0  ;;  %v11219_v17 = vsub.f32 %v492_v40, %v11189_v12  ;;  %v14933_v37 = vand.u32 4294901760, %v11171_v20 }
  0xcf   :  { %8651 = vmatprep.mubr.f32.mxu1 %v11016_v3  ;;  %v11209_v3 = vsub.f32 %v489_v31, %v11173_v55  ;;  %v1679_v41 = vand.u32 4294901760, %v1678_v47  ;;  %v1698_v46 = vsub.f32 %v11153_v52, %v14930_v16  ;;  %v11221_v31 = vand.u32 4294901760, %v495_v26  ;;  %v125_v16 = vld [vmem:[%s14081_s0 + $0x378] sm:$0xff] }
  0xd0   :  { %v8288_v18 = vpop.f32.mrf.mxu0  ;;  %v1688_v14 = vsub.f32 %v11144_v63, %v14928_v51  ;;  %14931 = vst [vmem:[#allocation205_spill] sm:$0xff] %v11219_v17  ;;  %v1708_v51 = vsub.f32 %v11171_v20, %v14933_v37  ;;  %v11233_v19 = vand.u32 4294901760, %v498_v62  ;;  %v14936_v37 = vand.u32 4294901760, %v11183_v36 }
  0xd1   :  { %14929 = vst [vmem:[#allocation204_spill] sm:$0xff] %v11209_v3  ;;  %8431 = vmatmul.mubr.f32.gmra.mxu0 %v1649_v58  ;;  %14932 = vst [vmem:[#allocation206_spill] sm:$0xff] %v11221_v31  ;;  %v501_v58 = vsel %vm169_vm1, %v124_v50, 0  ;;  %v692_v47 = vadd.f32 %v8288_v18, %v11202_v59  ;;  %v126_v50 = vld [vmem:[%s14081_s0 + $0x380] sm:$0xff]  ;;  %v1699_v52 = vand.u32 4294901760, %v1698_v46  ;;  %v504_v18 = vsel %vm169_vm1, %v125_v16, 0 }
  0xd2   :  { %v681_v60 = vpop.f32.mrf.mxu0  ;;  %8433 = vmatprep.mubr.f32.mxu0 %v1659_v30  ;;  %8652 = vmatmul.mubr.f32.gmra.mxu1 %v11022_v54  ;;  %14934 = vst [vmem:[#allocation207_spill] sm:$0xff] %v11233_v19  ;;  %v1689_v54 = vand.u32 4294901760, %v1688_v14  ;;  %v11238_v63 = vand.u32 4294901760, %v501_v58  ;;  %v1718_v40 = vsub.f32 %v11183_v36, %v14936_v37  ;;  %v14937_v20 = vand.u32 4294901760, %v11187_v43 }
  0xd3   :  { %8654 = vmatprep.mubr.f32.mxu1 %v11044_v53  ;;  %v11252_v14 = vsub.f32 %v495_v26, %v11221_v31  ;;  %v682_v16 = vadd.f32 %v11202_v59, %v681_v60  ;;  %v1709_v46 = vand.u32 4294901760, %v1708_v51  ;;  %v11270_v21 = vsub.f32 %v498_v62, %v11233_v19 }
  0xd4   :  { %v8291_v30 = vpop.f32.mrf.mxu0  ;;  %14935 = vst [vmem:[#allocation208_spill] sm:$0xff] %v11238_v63  ;;  %v11248_v7 = vsub.f32 %v11187_v43, %v14937_v20  ;;  %v507_v20 = vsel %vm169_vm1, %v126_v50, 0  ;;  %v14940_v43 = vand.u32 4294901760, %v11209_v3  ;;  %v11272_v8 = vand.u32 4294901760, %v504_v18 }
  0xd5   :  { %8434 = vmatmul.mubr.f32.gmra.mxu0 %v1669_v42  ;;  %v8512_v44 = vpop.f32.mrf.mxu1  ;;  %14938 = vst [vmem:[#allocation209_spill] sm:$0xff] %v11252_v14  ;;  %v127_v42 = vld [vmem:[%s14081_s0 + $0x388] sm:$0xff]  ;;  %v712_v37 = vadd.f32 %v8291_v30, %v11202_v59  ;;  %14941 = vst [vmem:[#allocation211_spill] sm:$0xff] %v11270_v21  ;;  %v14945_v62 = vand.u32 4294901760, %v11219_v17 }
  0xd6   :  { %v701_v53 = vpop.f32.mrf.mxu0  ;;  %8436 = vmatprep.mubr.f32.mxu0 %v1679_v41  ;;  %8655 = vmatmul.mubr.f32.gmra.mxu1 %v11060_v32  ;;  %v128_v41 = vld [vmem:[%s14081_s0 + $0x390] sm:$0xff]  ;;  %v11262_v32 = vadd.f32 %v8512_v44, %v692_v47  ;;  %v1738_v36 = vsub.f32 %v11209_v3, %v14940_v43  ;;  %14942 = vst [vmem:[#allocation212_spill] sm:$0xff] %v11272_v8  ;;  %v510_v47 = vsel %vm169_vm1, %v127_v42, 0  ;;  %v1719_v43 = vand.u32 4294901760, %v1718_v40 }
  0xd7   :  { %8657 = vmatprep.mubr.f32.mxu1 %v11072_v15  ;;  %v2202_v26 = vpop.f32.mrf.mxu1  ;;  %v11277_v44 = vsub.f32 %v501_v58, %v11238_v63  ;;  %v513_v51 = vsel %vm169_vm1, %v128_v41, 0  ;;  %v11285_v15 = vsub.f32 %v11219_v17, %v14945_v62  ;;  %v129_v58 = vld [vmem:[%s14081_s0 + $0x398] sm:$0xff]  ;;  %v702_v42 = vadd.f32 %v11202_v59, %v701_v53  ;;  %v130_v62 = vld [vmem:[%s14081_s0 + $0x3a0] sm:$0xff] }
  0xd8   :  { %14939 = vst [vmem:[#allocation210_spill] sm:$0xff] %v11262_v32  ;;  %v8294_v60 = vpop.f32.mrf.mxu0  ;;  %v11274_v30 = vadd.f32 %v2202_v26, %v682_v16  ;;  %v11288_v16 = vand.u32 4294901760, %v507_v20  ;;  %v1729_v40 = vand.u32 4294901760, %v11248_v7  ;;  %v11303_v17 = vsub.f32 %v504_v18, %v11272_v8 }
  0xd9   :  { %8437 = vmatmul.mubr.f32.gmra.mxu0 %v1689_v54  ;;  %14944 = vst [vmem:[#allocation214_spill] sm:$0xff] %v11277_v44  ;;  %v11305_v3 = vand.u32 4294901760, %v510_v47  ;;  %v11307_v53 = vand.u32 4294901760, %v513_v51 }
  0xda   :  { %14943 = vst [vmem:[#allocation213_spill] sm:$0xff] %v11274_v30  ;;  %8439 = vmatprep.mubr.f32.mxu0 %v1699_v52  ;;  %v8515_v50 = vpop.f32.mrf.mxu1  ;;  %8658 = vmatmul.mubr.f32.gmra.mxu1 %v11086_v1  ;;  %14946 = vst [vmem:[#allocation215_spill] sm:$0xff] %v11288_v16  ;;  %v732_v52 = vadd.f32 %v8294_v60, %v11202_v59  ;;  %v721_v41 = vpop.f32.mrf.mxu0  ;;  %v1739_v1 = vand.u32 4294901760, %v1738_v36  ;;  %v516_v36 = vsel %vm169_vm1, %v129_v58, 0  ;;  %v14952_v30 = vand.u32 4294901760, %v11252_v14 }
  0xdb   :  { %v11295_v26 = vadd.f32 %v8515_v50, %v712_v37  ;;  %8660 = vmatprep.mubr.f32.mxu1 %v11091_v61  ;;  %14948 = vst [vmem:[#allocation217_spill] sm:$0xff] %v11303_v17  ;;  %14949 = vst [vmem:[#allocation218_spill] sm:$0xff] %v11305_v3  ;;  %v131_v37 = vld [vmem:[%s14081_s0 + $0x3a8] sm:$0xff] }
  0xdc   :  { %v2214_v54 = vpop.f32.mrf.mxu1  ;;  %14950 = vst [vmem:[#allocation219_spill] sm:$0xff] %v11307_v53  ;;  %v8297_v60 = vpop.f32.mrf.mxu0  ;;  %v1758_v32 = vsub.f32 %v11252_v14, %v14952_v30  ;;  %v132_v30 = vld [vmem:[%s14081_s0 + $0x3b0] sm:$0xff] }
  0xdd   :  { %14947 = vst [vmem:[#allocation216_spill] sm:$0xff] %v11295_v26  ;;  %8440 = vmatmul.mubr.f32.gmra.mxu0 %v1709_v46  ;;  %v11312_v7 = vadd.f32 %v2214_v54, %v702_v42  ;;  %v1749_v26 = vand.u32 4294901760, %v11285_v15  ;;  %v11323_v46 = vsub.f32 %v507_v20, %v11288_v16  ;;  %v519_v54 = vsel %vm169_vm1, %v130_v62, 0 }
  0xde   :  { %8442 = vmatprep.mubr.f32.mxu0 %v1719_v43  ;;  %v8518_v18 = vpop.f32.mrf.mxu1  ;;  %8661 = vmatmul.mubr.f32.gmra.mxu1 %v11117_v0  ;;  %v722_v42 = vadd.f32 %v11202_v59, %v721_v41  ;;  %v752_v61 = vadd.f32 %v8297_v60, %v11202_v59  ;;  %v741_v58 = vpop.f32.mrf.mxu0  ;;  %v522_v15 = vsel %vm169_vm1, %v131_v37, 0  ;;  %v11337_v62 = vsub.f32 %v510_v47, %v11305_v3 }
  0xdf   :  { %14951 = vst [vmem:[#allocation220_spill] sm:$0xff] %v11312_v7  ;;  %14953 = vst [vmem:[#allocation221_spill] sm:$0xff] %v11323_v46  ;;  %v11328_v43 = vadd.f32 %v8518_v18, %v732_v52  ;;  %8663 = vmatprep.mubr.f32.mxu1 %v11125_v13  ;;  %v11340_v41 = vsub.f32 %v513_v51, %v11307_v53  ;;  %v11342_v60 = vand.u32 4294901760, %v516_v36  ;;  %v133_v52 = vld [vmem:[%s14081_s0 + $0x3b8] sm:$0xff]  ;;  %v14959_v13 = vand.u32 4294901760, %v11270_v21 }
  0xe0   :  { %v2226_v50 = vpop.f32.mrf.mxu1  ;;  %14955 = vst [vmem:[#allocation223_spill] sm:$0xff] %v11337_v62  ;;  %v14960_v47 = vand.u32 4294901760, %v11277_v44  ;;  %v11355_v51 = vand.u32 4294901760, %v519_v54  ;;  %v14964_v7 = vand.u32 4294901760, %v11303_v17 }
  0xe1   :  { %14954 = vst [vmem:[#allocation222_spill] sm:$0xff] %v11328_v43  ;;  %14956 = vst [vmem:[#allocation224_spill] sm:$0xff] %v11340_v41  ;;  %v8300_v37 = vpop.f32.mrf.mxu0  ;;  %8443 = vmatmul.mubr.f32.gmra.mxu0 %v1729_v40  ;;  %v11347_v18 = vadd.f32 %v2226_v50, %v722_v42  ;;  %v1768_v20 = vsub.f32 %v11270_v21, %v14959_v13  ;;  %v1759_v43 = vand.u32 4294901760, %v1758_v32  ;;  %v11359_v40 = vand.u32 4294901760, %v522_v15  ;;  %v134_v32 = vld [vmem:[%s14081_s0 + $0x3c0] sm:$0xff] }
  0xe2   :  { %14957 = vst [vmem:[#allocation225_spill] sm:$0xff] %v11342_v60  ;;  %v1778_v0 = vsub.f32 %v11277_v44, %v14960_v47  ;;  %14961 = vst [vmem:[#allocation227_spill] sm:$0xff] %v11355_v51  ;;  %8445 = vmatprep.mubr.f32.mxu0 %v1739_v1  ;;  %v8521_v14 = vpop.f32.mrf.mxu1  ;;  %8664 = vmatmul.mubr.f32.gmra.mxu1 %v11146_v49  ;;  %v525_v50 = vsel %vm169_vm1, %v132_v30, 0  ;;  %v742_v42 = vadd.f32 %v11202_v59, %v741_v58 }
  0xe3   :  { %14958 = vst [vmem:[#allocation226_spill] sm:$0xff] %v11347_v18  ;;  %14962 = vst [vmem:[#allocation228_spill] sm:$0xff] %v11359_v40  ;;  %v772_v13 = vadd.f32 %v8300_v37, %v11202_v59  ;;  %v761_v21 = vpop.f32.mrf.mxu0  ;;  %v11364_v18 = vadd.f32 %v8521_v14, %v752_v61  ;;  %8666 = vmatprep.mubr.f32.mxu1 %v11155_v35  ;;  %v528_v1 = vsel %vm169_vm1, %v133_v52, 0  ;;  %v1769_v52 = vand.u32 4294901760, %v1768_v20 }
  0xe4   :  { %v2238_v47 = vpop.f32.mrf.mxu1  ;;  %v1788_v30 = vsub.f32 %v11303_v17, %v14964_v7  ;;  %v11377_v61 = vsub.f32 %v516_v36, %v11342_v60  ;;  %v1779_v49 = vand.u32 4294901760, %v1778_v0  ;;  %v11382_v44 = vsub.f32 %v519_v54, %v11355_v51  ;;  %v135_v0 = vld [vmem:[%s14081_s0 + $0x3c8] sm:$0xff]  ;;  %v136_v54 = vld [vmem:[%s14081_s0 + $0x3d0] sm:$0xff] }
  0xe5   :  { %14963 = vst [vmem:[#allocation229_spill] sm:$0xff] %v11364_v18  ;;  %v8303_v14 = vpop.f32.mrf.mxu0  ;;  %8446 = vmatmul.mubr.f32.gmra.mxu0 %v1749_v26  ;;  %v11379_v35 = vadd.f32 %v2238_v47, %v742_v42  ;;  %v14968_v7 = vand.u32 4294901760, %v11323_v46  ;;  %v11388_v58 = vand.u32 4294901760, %v525_v50  ;;  %v11390_v36 = vand.u32 4294901760, %v528_v1 }
  0xe6   :  { %14965 = vst [vmem:[#allocation230_spill] sm:$0xff] %v11377_v61  ;;  %14967 = vst [vmem:[#allocation232_spill] sm:$0xff] %v11382_v44  ;;  %8448 = vmatprep.mubr.f32.mxu0 %v1759_v43  ;;  %v8524_v18 = vpop.f32.mrf.mxu1  ;;  %8667 = vmatmul.mubr.f32.gmra.mxu1 %v11162_v6  ;;  %v531_v26 = vsel %vm169_vm1, %v134_v32, 0  ;;  %v762_v43 = vadd.f32 %v11202_v59, %v761_v21  ;;  %v792_v20 = vadd.f32 %v8303_v14, %v11202_v59 }
  0xe7   :  { %14966 = vst [vmem:[#allocation231_spill] sm:$0xff] %v11379_v35  ;;  %v1798_v37 = vsub.f32 %v11323_v46, %v14968_v7  ;;  %14969 = vst [vmem:[#allocation233_spill] sm:$0xff] %v11388_v58  ;;  %v781_v42 = vpop.f32.mrf.mxu0  ;;  %v11401_v47 = vadd.f32 %v8524_v18, %v772_v13  ;;  %8669 = vmatprep.mubr.f32.mxu1 %v11173_v55  ;;  %v11405_v7 = vsub.f32 %v522_v15, %v11359_v40 }
  0xe8   :  { %14970 = vst [vmem:[#allocation234_spill] sm:$0xff] %v11390_v36  ;;  %v2250_v32 = vpop.f32.mrf.mxu1  ;;  %v1789_v6 = vand.u32 4294901760, %v1788_v30  ;;  %v14972_v46 = vand.u32 4294901760, %v11337_v62  ;;  %v14973_v35 = vand.u32 4294901760, %v11340_v41  ;;  %v14531_v14 = vand.u32 4294901760, %v11377_v61 }
  0xe9   :  { %14971 = vst [vmem:[#allocation235_spill] sm:$0xff] %v11405_v7  ;;  %v8306_v56 = vpop.f32.mrf.mxu0  ;;  %8449 = vmatmul.mubr.f32.gmra.mxu0 %v1769_v52  ;;  %v11414_v18 = vadd.f32 %v2250_v32, %v762_v43  ;;  %v534_v15 = vsel %vm169_vm1, %v135_v0, 0  ;;  %v537_v30 = vsel %vm169_vm1, %v136_v54, 0  ;;  %v11426_v52 = vand.u32 4294901760, %v531_v26  ;;  %v137_v43 = vld [vmem:[%s14081_s0 + $0x3d8] sm:$0xff] }
  0xea   :  { %v1808_v17 = vsub.f32 %v11337_v62, %v14972_v46  ;;  %v1818_v21 = vsub.f32 %v11340_v41, %v14973_v35  ;;  %8451 = vmatprep.mubr.f32.mxu0 %v1779_v49  ;;  %v8527_v55 = vpop.f32.mrf.mxu1  ;;  %8670 = vmatmul.mubr.f32.gmra.mxu1 %v11189_v12  ;;  %v1799_v46 = vand.u32 4294901760, %v1798_v37  ;;  %v11421_v62 = vsub.f32 %v525_v50, %v11388_v58 }
  0xeb   :  { %14974 = vst [vmem:[#allocation236_spill] sm:$0xff] %v11414_v18  ;;  %v11424_v35 = vsub.f32 %v528_v1, %v11390_v36  ;;  %14977 = vst [vmem:[#allocation239_spill] sm:$0xff] %v11426_v52  ;;  %v782_v0 = vadd.f32 %v11202_v59, %v781_v42  ;;  %v812_v49 = vadd.f32 %v8306_v56, %v11202_v59  ;;  %v801_v54 = vpop.f32.mrf.mxu0  ;;  %8672 = vmatprep.mubr.f32.mxu1 %v11221_v31  ;;  %v138_v1 = vld [vmem:[%s14081_s0 + $0x3e0] sm:$0xff] }
  0xec   :  { %14975 = vst [vmem:[#allocation237_spill] sm:$0xff] %v11421_v62  ;;  %v11433_v32 = vadd.f32 %v8527_v55, %v792_v20  ;;  %v2262_v37 = vpop.f32.mrf.mxu1  ;;  %v1809_v13 = vand.u32 4294901760, %v1808_v17  ;;  %v1828_v12 = vsub.f32 %v11377_v61, %v14531_v14  ;;  %v11443_v42 = vand.u32 4294901760, %v534_v15 }
  0xed   :  { %14976 = vst [vmem:[#allocation238_spill] sm:$0xff] %v11424_v35  ;;  %v11445_v56 = vand.u32 4294901760, %v537_v30  ;;  %v8309_v55 = vpop.f32.mrf.mxu0  ;;  %8452 = vmatmul.mubr.f32.gmra.mxu0 %v1789_v6  ;;  %v11447_v20 = vadd.f32 %v2262_v37, %v782_v0  ;;  %v1819_v31 = vand.u32 4294901760, %v1818_v21  ;;  %v14982_v50 = vand.u32 4294901760, %v11382_v44  ;;  %v139_v21 = vld [vmem:[%s14081_s0 + $0x3e8] sm:$0xff] }
  0xee   :  { %14978 = vst [vmem:[#allocation240_spill] sm:$0xff] %v11433_v32  ;;  %14979 = vst [vmem:[#allocation241_spill] sm:$0xff] %v11443_v42  ;;  %v540_v32 = vsel %vm169_vm1, %v137_v43, 0  ;;  %8454 = vmatprep.mubr.f32.mxu0 %v1799_v46  ;;  %v8530_v17 = vpop.f32.mrf.mxu1  ;;  %8673 = vmatmul.mubr.f32.gmra.mxu1 %v11233_v19  ;;  %v11457_v18 = vsub.f32 %v531_v26, %v11426_v52  ;;  %v543_v6 = vsel %vm169_vm1, %v138_v1, 0  ;;  %v140_v46 = vld [vmem:[%s14081_s0 + $0x3f0] sm:$0xff]  ;;  %v14985_v26 = vand.u32 4294901760, %v11405_v7 }
  0xef   :  { %14980 = vst [vmem:[#allocation242_spill] sm:$0xff] %v11445_v56  ;;  %14981 = vst [vmem:[#allocation243_spill] sm:$0xff] %v11447_v20  ;;  %v1838_v41 = vsub.f32 %v11382_v44, %v14982_v50  ;;  %v802_v43 = vadd.f32 %v11202_v59, %v801_v54  ;;  %v832_v0 = vadd.f32 %v8309_v55, %v11202_v59  ;;  %v821_v50 = vpop.f32.mrf.mxu0  ;;  %8675 = vmatprep.mubr.f32.mxu1 %v11238_v63 }
  0xf0   :  { %14983 = vst [vmem:[#allocation244_spill] sm:$0xff] %v11457_v18  ;;  %v11468_v37 = vadd.f32 %v8530_v17, %v812_v49  ;;  %v1848_v1 = vsub.f32 %v11405_v7, %v14985_v26  ;;  %v2274_v61 = vpop.f32.mrf.mxu1  ;;  %v1829_v14 = vand.u32 4294901760, %v1828_v12  ;;  %v11475_v19 = vsub.f32 %v534_v15, %v11443_v42 }
  0xf1   :  { %v11478_v44 = vsub.f32 %v537_v30, %v11445_v56  ;;  %v11480_v54 = vand.u32 4294901760, %v540_v32  ;;  %v8312_v55 = vpop.f32.mrf.mxu0  ;;  %8455 = vmatmul.mubr.f32.gmra.mxu0 %v1809_v13  ;;  %v11482_v49 = vadd.f32 %v2274_v61, %v802_v43  ;;  %v11484_v17 = vand.u32 4294901760, %v543_v6 }
  0xf2   :  { %14984 = vst [vmem:[#allocation245_spill] sm:$0xff] %v11468_v37  ;;  %14986 = vst [vmem:[#allocation246_spill] sm:$0xff] %v11475_v19  ;;  %v546_v63 = vsel %vm169_vm1, %v139_v21, 0  ;;  %v549_v26 = vsel %vm169_vm1, %v140_v46, 0  ;;  %8457 = vmatprep.mubr.f32.mxu0 %v1819_v31  ;;  %v8533_v12 = vpop.f32.mrf.mxu1  ;;  %8676 = vmatmul.mubr.f32.gmra.mxu1 %v11272_v8  ;;  %v1839_v15 = vand.u32 4294901760, %v1838_v41  ;;  %v14991_v30 = vand.u32 4294901760, %v11421_v62 }
  0xf3   :  { %14987 = vst [vmem:[#allocation247_spill] sm:$0xff] %v11478_v44  ;;  %14988 = vst [vmem:[#allocation248_spill] sm:$0xff] %v11480_v54  ;;  %v14992_v37 = vand.u32 4294901760, %v11424_v35  ;;  %v141_v21 = vld [vmem:[%s14081_s0 + $0x3f8] sm:$0xff]  ;;  %v822_v31 = vadd.f32 %v11202_v59, %v821_v50  ;;  %v852_v46 = vadd.f32 %v8312_v55, %v11202_v59  ;;  %v841_v41 = vpop.f32.mrf.mxu0  ;;  %v11503_v43 = vadd.f32 %v8533_v12, %v832_v0  ;;  %v143_v0 = vld [vmem:[%s14081_s0 + $0x408] sm:$0xff] }
  0xf4   :  { %14989 = vst [vmem:[#allocation249_spill] sm:$0xff] %v11482_v49  ;;  %14990 = vst [vmem:[#allocation250_spill] sm:$0xff] %v11484_v17  ;;  %v1858_v7 = vsub.f32 %v11421_v62, %v14991_v30  ;;  %8678 = vmatprep.mubr.f32.mxu1 %v11288_v16  ;;  %v1849_v30 = vand.u32 4294901760, %v1848_v1  ;;  %v2286_v8 = vpop.f32.mrf.mxu1  ;;  %v11513_v62 = vand.u32 4294901760, %v546_v63  ;;  %v11515_v50 = vand.u32 4294901760, %v549_v26 }
  0xf5   :  { %v11495_v61 = vsub.f32 %v11424_v35, %v14992_v37  ;;  %14993 = vst [vmem:[#allocation251_spill] sm:$0xff] %v11503_v43  ;;  %v142_v37 = vld [vmem:[%s14081_s0 + $0x400] sm:$0xff]  ;;  %v11511_v35 = vsub.f32 %v540_v32, %v11480_v54  ;;  %v8315_v55 = vpop.f32.mrf.mxu0  ;;  %8458 = vmatmul.mubr.f32.gmra.mxu0 %v1829_v14  ;;  %v11520_v1 = vadd.f32 %v2286_v8, %v822_v31  ;;  %v552_v32 = vsel %vm169_vm1, %v141_v21, 0 }
  0xf6   :  { %14995 = vst [vmem:[#allocation253_spill] sm:$0xff] %v11513_v62  ;;  %14996 = vst [vmem:[#allocation254_spill] sm:$0xff] %v11515_v50  ;;  %v11524_v16 = vsub.f32 %v543_v6, %v11484_v17  ;;  %8460 = vmatprep.mubr.f32.mxu0 %v1839_v15  ;;  %v8536_v13 = vpop.f32.mrf.mxu1  ;;  %8679 = vmatmul.mubr.f32.gmra.mxu1 %v11305_v3  ;;  %v1859_v43 = vand.u32 4294901760, %v1858_v7  ;;  %v14999_v20 = vand.u32 4294901760, %v11457_v18  ;;  %v555_v8 = vsel %vm169_vm1, %v142_v37, 0 }
  0xf7   :  { %14994 = vst [vmem:[#allocation252_spill] sm:$0xff] %v11511_v35  ;;  %14997 = vst [vmem:[#allocation255_spill] sm:$0xff] %v11520_v1  ;;  %v1869_v49 = vand.u32 4294901760, %v11495_v61  ;;  %v842_v31 = vadd.f32 %v11202_v59, %v841_v41  ;;  %v872_v6 = vadd.f32 %v8315_v55, %v11202_v59  ;;  %v861_v12 = vpop.f32.mrf.mxu0  ;;  %v11535_v1 = vadd.f32 %v8536_v13, %v852_v46  ;;  %v144_v13 = vld [vmem:[%s14081_s0 + $0x410] sm:$0xff] }
  0xf8   :  { %14998 = vst [vmem:[#allocation256_spill] sm:$0xff] %v11524_v16  ;;  %v1878_v14 = vsub.f32 %v11457_v18, %v14999_v20  ;;  %8681 = vmatprep.mubr.f32.mxu1 %v11307_v53  ;;  %v558_v15 = vsel %vm169_vm1, %v143_v0, 0  ;;  %v2298_v7 = vpop.f32.mrf.mxu1  ;;  %v11541_v21 = vsub.f32 %v546_v63, %v11513_v62  ;;  %v11544_v20 = vsub.f32 %v549_v26, %v11515_v50 }
  0xf9   :  { %15000 = vst [vmem:[#allocation257_spill] sm:$0xff] %v11535_v1  ;;  %v11546_v37 = vand.u32 4294901760, %v552_v32  ;;  %v8318_v46 = vpop.f32.mrf.mxu0  ;;  %8461 = vmatmul.mubr.f32.gmra.mxu0 %v1849_v30  ;;  %v11551_v41 = vadd.f32 %v2298_v7, %v842_v31  ;;  %v15005_v0 = vand.u32 4294901760, %v11475_v19  ;;  %v15006_v63 = vand.u32 4294901760, %v11478_v44 }
  0xfa   :  { %15001 = vst [vmem:[#allocation258_spill] sm:$0xff] %v11541_v21  ;;  %15002 = vst [vmem:[#allocation259_spill] sm:$0xff] %v11544_v20  ;;  %8463 = vmatprep.mubr.f32.mxu0 %v1859_v43  ;;  %v8539_v53 = vpop.f32.mrf.mxu1  ;;  %8682 = vmatmul.mubr.f32.gmra.mxu1 %v11342_v60  ;;  %v1879_v3 = vand.u32 4294901760, %v1878_v14  ;;  %v11561_v18 = vand.u32 4294901760, %v555_v8  ;;  %v11563_v30 = vand.u32 4294901760, %v558_v15  ;;  %v862_v31 = vadd.f32 %v11202_v59, %v861_v12  ;;  %v145_v43 = vld [vmem:[%s14081_s0 + $0x418] sm:$0xff] }
  0xfb   :  { %15003 = vst [vmem:[#allocation260_spill] sm:$0xff] %v11546_v37  ;;  %15004 = vst [vmem:[#allocation261_spill] sm:$0xff] %v11551_v41  ;;  %v1888_v55 = vsub.f32 %v11475_v19, %v15005_v0  ;;  %v1898_v61 = vsub.f32 %v11478_v44, %v15006_v63  ;;  %v892_v7 = vadd.f32 %v8318_v46, %v11202_v59  ;;  %v881_v0 = vpop.f32.mrf.mxu0  ;;  %8684 = vmatprep.mubr.f32.mxu1 %v11355_v51 }
  0xfc   :  { %15007 = vst [vmem:[#allocation262_spill] sm:$0xff] %v11561_v18  ;;  %15008 = vst [vmem:[#allocation263_spill] sm:$0xff] %v11563_v30  ;;  %v11567_v19 = vadd.f32 %v8539_v53, %v872_v6  ;;  %v561_v63 = vsel %vm169_vm1, %v144_v13, 0  ;;  %v2310_v14 = vpop.f32.mrf.mxu1  ;;  %v15010_v26 = vand.u32 4294901760, %v11511_v35  ;;  %v11580_v53 = vsub.f32 %v552_v32, %v11546_v37  ;;  %v146_v6 = vld [vmem:[%s14081_s0 + $0x420] sm:$0xff] }
  0xfd   :  { %v8321_v13 = vpop.f32.mrf.mxu0  ;;  %8464 = vmatmul.mubr.f32.gmra.mxu0 %v1869_v49  ;;  %v11585_v51 = vadd.f32 %v2310_v14, %v862_v31  ;;  %v1889_v44 = vand.u32 4294901760, %v1888_v55  ;;  %v15013_v41 = vand.u32 4294901760, %v11524_v16  ;;  %v11592_v32 = vsub.f32 %v555_v8, %v11561_v18 }
  0xfe   :  { %15009 = vst [vmem:[#allocation264_spill] sm:$0xff] %v11567_v19  ;;  %v1908_v60 = vsub.f32 %v11511_v35, %v15010_v26  ;;  %15011 = vst [vmem:[#allocation265_spill] sm:$0xff] %v11580_v53  ;;  %v1899_v19 = vand.u32 4294901760, %v1898_v61  ;;  %8466 = vmatprep.mubr.f32.mxu0 %v1879_v3  ;;  %v8542_v12 = vpop.f32.mrf.mxu1  ;;  %8685 = vmatmul.mubr.f32.gmra.mxu1 %v11359_v40  ;;  %v11595_v46 = vsub.f32 %v558_v15, %v11563_v30  ;;  %v147_v61 = vld [vmem:[%s14081_s0 + $0x428] sm:$0xff]  ;;  %v148_v3 = vld [vmem:[%s14081_s0 + $0x430] sm:$0xff] }
  0xff   :  { %15012 = vst [vmem:[#allocation266_spill] sm:$0xff] %v11585_v51  ;;  %v1918_v26 = vsub.f32 %v11524_v16, %v15013_v41  ;;  %15014 = vst [vmem:[#allocation267_spill] sm:$0xff] %v11592_v32  ;;  %v11597_v35 = vand.u32 4294901760, %v561_v63  ;;  %v564_v49 = vsel %vm169_vm1, %v145_v43, 0  ;;  %v882_v41 = vadd.f32 %v11202_v59, %v881_v0  ;;  %v901_v55 = vpop.f32.mrf.mxu0  ;;  %8687 = vmatprep.mubr.f32.mxu1 %v11388_v58 }
 0x100   :  { %15015 = vst [vmem:[#allocation268_spill] sm:$0xff] %v11595_v46  ;;  %v912_v8 = vadd.f32 %v8321_v13, %v11202_v59  ;;  %v11608_v31 = vadd.f32 %v8542_v12, %v892_v7  ;;  %v567_v15 = vsel %vm169_vm1, %v146_v6, 0  ;;  %v2322_v43 = vpop.f32.mrf.mxu1  ;;  %v1909_v14 = vand.u32 4294901760, %v1908_v60 }
 0x101   :  { %15016 = vst [vmem:[#allocation269_spill] sm:$0xff] %v11597_v35  ;;  %v15017_v40 = vand.u32 4294901760, %v11541_v21  ;;  %v15018_v51 = vand.u32 4294901760, %v11544_v20  ;;  %v8324_v13 = vpop.f32.mrf.mxu0  ;;  %8467 = vmatmul.mubr.f32.gmra.mxu0 %v1889_v44  ;;  %v11619_v7 = vadd.f32 %v2322_v43, %v882_v41  ;;  %v11621_v12 = vand.u32 4294901760, %v564_v49  ;;  %v149_v44 = vld [vmem:[%s14081_s0 + $0x438] sm:$0xff] }
 0x102   :  { %v570_v6 = vsel %vm169_vm1, %v147_v61, 0  ;;  %v573_v60 = vsel %vm169_vm1, %v148_v3, 0  ;;  %8469 = vmatprep.mubr.f32.mxu0 %v1899_v19  ;;  %v8545_v58 = vpop.f32.mrf.mxu1  ;;  %8688 = vmatmul.mubr.f32.gmra.mxu1 %v11390_v36  ;;  %v11630_v0 = vand.u32 4294901760, %v567_v15  ;;  %v902_v61 = vadd.f32 %v11202_v59, %v901_v55 }
 0x103   :  { %v1928_v16 = vsub.f32 %v11541_v21, %v15017_v40  ;;  %v1938_v1 = vsub.f32 %v11544_v20, %v15018_v51  ;;  %15019 = vst [vmem:[#allocation270_spill] sm:$0xff] %v11619_v7  ;;  %15020 = vst [vmem:[#allocation271_spill] sm:$0xff] %v11621_v12  ;;  %v1919_v40 = vand.u32 4294901760, %v1918_v26  ;;  %v11628_v51 = vsub.f32 %v561_v63, %v11597_v35  ;;  %v921_v19 = vpop.f32.mrf.mxu0  ;;  %v150_v63 = vld [vmem:[%s14081_s0 + $0x440] sm:$0xff] }
 0x104   :  { %15022 = vst [vmem:[#allocation273_spill] sm:$0xff] %v11630_v0  ;;  %v932_v3 = vadd.f32 %v8324_v13, %v11202_v59  ;;  %v11637_v41 = vadd.f32 %v8545_v58, %v912_v8  ;;  %8690 = vmatprep.mubr.f32.mxu1 %v11426_v52  ;;  %v2334_v43 = vpop.f32.mrf.mxu1  ;;  %v15024_v36 = vand.u32 4294901760, %v11580_v53  ;;  %v11647_v55 = vand.u32 4294901760, %v570_v6 }
 0x105   :  { %15021 = vst [vmem:[#allocation272_spill] sm:$0xff] %v11628_v51  ;;  %v1929_v21 = vand.u32 4294901760, %v1928_v16  ;;  %v11649_v13 = vand.u32 4294901760, %v573_v60  ;;  %v8327_v58 = vpop.f32.mrf.mxu0  ;;  %8470 = vmatmul.mubr.f32.gmra.mxu0 %v1909_v14  ;;  %v11651_v8 = vadd.f32 %v2334_v43, %v902_v61  ;;  %v1939_v52 = vand.u32 4294901760, %v1938_v1 }
 0x106   :  { %15023 = vst [vmem:[#allocation274_spill] sm:$0xff] %v11637_v41  ;;  %v1948_v20 = vsub.f32 %v11580_v53, %v15024_v36  ;;  %15025 = vst [vmem:[#allocation275_spill] sm:$0xff] %v11647_v55  ;;  %v11654_v26 = vsub.f32 %v564_v49, %v11621_v12  ;;  %v576_v41 = vsel %vm169_vm1, %v149_v44, 0  ;;  %8472 = vmatprep.mubr.f32.mxu0 %v1919_v40  ;;  %v8548_v16 = vpop.f32.mrf.mxu1  ;;  %8691 = vmatmul.mubr.f32.gmra.mxu1 %v11443_v42  ;;  %v151_v49 = vld [vmem:[%s14081_s0 + $0x448] sm:$0xff] }
 0x107   :  { %15026 = vst [vmem:[#allocation276_spill] sm:$0xff] %v11649_v13  ;;  %15027 = vst [vmem:[#allocation277_spill] sm:$0xff] %v11651_v8  ;;  %v15029_v36 = vand.u32 4294901760, %v11592_v32  ;;  %v11663_v14 = vsub.f32 %v567_v15, %v11630_v0  ;;  %v579_v1 = vsel %vm169_vm1, %v150_v63, 0  ;;  %v922_v40 = vadd.f32 %v11202_v59, %v921_v19  ;;  %v941_v61 = vpop.f32.mrf.mxu0  ;;  %8693 = vmatprep.mubr.f32.mxu1 %v11445_v56 }
 0x108   :  { %15028 = vst [vmem:[#allocation278_spill] sm:$0xff] %v11654_v26  ;;  %v952_v44 = vadd.f32 %v8327_v58, %v11202_v59  ;;  %v11671_v43 = vadd.f32 %v8548_v16, %v932_v3  ;;  %v2346_v7 = vpop.f32.mrf.mxu1  ;;  %v1949_v42 = vand.u32 4294901760, %v1948_v20  ;;  %v11678_v63 = vsub.f32 %v570_v6, %v11647_v55  ;;  %v152_v3 = vld [vmem:[%s14081_s0 + $0x450] sm:$0xff] }
 0x109   :  { %v1958_v53 = vsub.f32 %v11592_v32, %v15029_v36  ;;  %15030 = vst [vmem:[#allocation279_spill] sm:$0xff] %v11663_v14  ;;  %v15032_v36 = vand.u32 4294901760, %v11595_v46  ;;  %v11681_v32 = vsub.f32 %v573_v60, %v11649_v13  ;;  %v11683_v19 = vand.u32 4294901760, %v576_v41  ;;  %v8330_v58 = vpop.f32.mrf.mxu0  ;;  %8473 = vmatmul.mubr.f32.gmra.mxu0 %v1929_v21 }
 0x10a   :  { %15031 = vst [vmem:[#allocation280_spill] sm:$0xff] %v11671_v43  ;;  %15033 = vst [vmem:[#allocation281_spill] sm:$0xff] %v11678_v63  ;;  %v11688_v16 = vadd.f32 %v2346_v7, %v922_v40  ;;  %v11691_v56 = vand.u32 4294901760, %v579_v1  ;;  %v582_v20 = vsel %vm169_vm1, %v151_v49, 0  ;;  %8475 = vmatprep.mubr.f32.mxu0 %v1939_v52  ;;  %v8551_v6 = vpop.f32.mrf.mxu1  ;;  %8694 = vmatmul.mubr.f32.gmra.mxu1 %v11480_v54  ;;  %v585_v52 = vsel %vm169_vm1, %v152_v3, 0 }
 0x10b   :  { %v1968_v15 = vsub.f32 %v11595_v46, %v15032_v36  ;;  %15034 = vst [vmem:[#allocation282_spill] sm:$0xff] %v11681_v32  ;;  %15035 = vst [vmem:[#allocation283_spill] sm:$0xff] %v11683_v19  ;;  %v1959_v60 = vand.u32 4294901760, %v1958_v53  ;;  %v15038_v46 = vand.u32 4294901760, %v11628_v51  ;;  %v942_v21 = vadd.f32 %v11202_v59, %v941_v61  ;;  %v961_v40 = vpop.f32.mrf.mxu0  ;;  %8696 = vmatprep.mubr.f32.mxu1 %v11484_v17  ;;  %v153_v53 = vld [vmem:[%s14081_s0 + $0x458] sm:$0xff] }
 0x10c   :  { %15036 = vst [vmem:[#allocation284_spill] sm:$0xff] %v11688_v16  ;;  %15037 = vst [vmem:[#allocation285_spill] sm:$0xff] %v11691_v56  ;;  %v972_v7 = vadd.f32 %v8330_v58, %v11202_v59  ;;  %v11701_v36 = vadd.f32 %v8551_v6, %v952_v44  ;;  %v2358_v49 = vpop.f32.mrf.mxu1  ;;  %v11711_v61 = vsub.f32 %v576_v41, %v11683_v19  ;;  %v11713_v58 = vand.u32 4294901760, %v582_v20  ;;  %v154_v44 = vld [vmem:[%s14081_s0 + $0x460] sm:$0xff] }
 0x10d   :  { %v1978_v43 = vsub.f32 %v11628_v51, %v15038_v46  ;;  %v8333_v6 = vpop.f32.mrf.mxu0  ;;  %8476 = vmatmul.mubr.f32.gmra.mxu0 %v1949_v42  ;;  %v11718_v3 = vadd.f32 %v2358_v49, %v942_v21  ;;  %v1969_v17 = vand.u32 4294901760, %v1968_v15  ;;  %v15042_v54 = vand.u32 4294901760, %v11654_v26 }
 0x10e   :  { %15039 = vst [vmem:[#allocation286_spill] sm:$0xff] %v11701_v36  ;;  %15040 = vst [vmem:[#allocation287_spill] sm:$0xff] %v11711_v61  ;;  %v11724_v8 = vsub.f32 %v579_v1, %v11691_v56  ;;  %8478 = vmatprep.mubr.f32.mxu0 %v1959_v60  ;;  %v8554_v41 = vpop.f32.mrf.mxu1  ;;  %8697 = vmatmul.mubr.f32.gmra.mxu1 %v11513_v62  ;;  %v15044_v36 = vand.u32 4294901760, %v11663_v14  ;;  %v11730_v42 = vand.u32 4294901760, %v585_v52  ;;  %v588_v15 = vsel %vm169_vm1, %v153_v53, 0 }
 0x10f   :  { %15041 = vst [vmem:[#allocation288_spill] sm:$0xff] %v11713_v58  ;;  %v1988_v46 = vsub.f32 %v11654_v26, %v15042_v54  ;;  %v1979_v51 = vand.u32 4294901760, %v1978_v43  ;;  %v962_v21 = vadd.f32 %v11202_v59, %v961_v40  ;;  %v992_v54 = vadd.f32 %v8333_v6, %v11202_v59  ;;  %v981_v49 = vpop.f32.mrf.mxu0  ;;  %8699 = vmatprep.mubr.f32.mxu1 %v11515_v50  ;;  %v155_v43 = vld [vmem:[%s14081_s0 + $0x468] sm:$0xff] }
 0x110   :  { %15043 = vst [vmem:[#allocation289_spill] sm:$0xff] %v11724_v8  ;;  %v1998_v16 = vsub.f32 %v11663_v14, %v15044_v36  ;;  %15045 = vst [vmem:[#allocation290_spill] sm:$0xff] %v11730_v42  ;;  %v11735_v1 = vadd.f32 %v8554_v41, %v972_v7  ;;  %v591_v60 = vsel %vm169_vm1, %v154_v44, 0  ;;  %v2370_v36 = vpop.f32.mrf.mxu1  ;;  %v15047_v62 = vand.u32 4294901760, %v11678_v63  ;;  %v156_v44 = vld [vmem:[%s14081_s0 + $0x470] sm:$0xff] }
 0x111   :  { %v15048_v40 = vand.u32 4294901760, %v11681_v32  ;;  %v11750_v41 = vsub.f32 %v582_v20, %v11713_v58  ;;  %v8336_v50 = vpop.f32.mrf.mxu0  ;;  %8479 = vmatmul.mubr.f32.gmra.mxu0 %v1969_v17  ;;  %v11755_v14 = vadd.f32 %v2370_v36, %v962_v21  ;;  %v1989_v26 = vand.u32 4294901760, %v1988_v46 }
 0x112   :  { %15046 = vst [vmem:[#allocation291_spill] sm:$0xff] %v11735_v1  ;;  %v2008_v53 = vsub.f32 %v11678_v63, %v15047_v62  ;;  %v11758_v63 = vand.u32 4294901760, %v588_v15  ;;  %8481 = vmatprep.mubr.f32.mxu0 %v1979_v51  ;;  %8700 = vmatmul.mubr.f32.gmra.mxu1 %v11546_v37  ;;  %v1999_v7 = vand.u32 4294901760, %v1998_v16  ;;  %v11762_v20 = vsub.f32 %v585_v52, %v11730_v42  ;;  %v157_v16 = vld [vmem:[%s14081_s0 + $0x478] sm:$0xff] }
 0x113   :  { %v2018_v6 = vsub.f32 %v11681_v32, %v15048_v40  ;;  %15049 = vst [vmem:[#allocation292_spill] sm:$0xff] %v11750_v41  ;;  %15050 = vst [vmem:[#allocation293_spill] sm:$0xff] %v11755_v14  ;;  %v8557_v40 = vpop.f32.mrf.mxu1  ;;  %v11764_v32 = vand.u32 4294901760, %v591_v60  ;;  %v594_v1 = vsel %vm169_vm1, %v155_v43, 0  ;;  %v982_v17 = vadd.f32 %v11202_v59, %v981_v49  ;;  %v1001_v21 = vpop.f32.mrf.mxu0  ;;  %8702 = vmatprep.mubr.f32.mxu1 %v11561_v18 }
 0x114   :  { %15051 = vst [vmem:[#allocation294_spill] sm:$0xff] %v11758_v63  ;;  %v1012_v46 = vadd.f32 %v8336_v50, %v11202_v59  ;;  %v11769_v36 = vadd.f32 %v8557_v40, %v992_v54  ;;  %v597_v51 = vsel %vm169_vm1, %v156_v44, 0  ;;  %v2009_v62 = vand.u32 4294901760, %v2008_v53 }
 0x115   :  { %15052 = vst [vmem:[#allocation295_spill] sm:$0xff] %v11764_v32  ;;  %v2382_v52 = vpop.f32.mrf.mxu1  ;;  %v2019_v37 = vand.u32 4294901760, %v2018_v6  ;;  %v15054_v43 = vand.u32 4294901760, %v11711_v61  ;;  %v8339_v14 = vpop.f32.mrf.mxu0  ;;  %8482 = vmatmul.mubr.f32.gmra.mxu0 %v1989_v26  ;;  %v15055_v40 = vand.u32 4294901760, %v11724_v8  ;;  %v11786_v18 = vsub.f32 %v588_v15, %v11758_v63 }
 0x116   :  { %15053 = vst [vmem:[#allocation296_spill] sm:$0xff] %v11769_v36  ;;  %v11780_v54 = vadd.f32 %v2382_v52, %v982_v17  ;;  %v11788_v36 = vand.u32 4294901760, %v594_v1  ;;  %8484 = vmatprep.mubr.f32.mxu0 %v1999_v7  ;;  %8703 = vmatmul.mubr.f32.gmra.mxu1 %v11563_v30  ;;  %v11795_v26 = vand.u32 4294901760, %v597_v51  ;;  %v600_v17 = vsel %vm169_vm1, %v157_v16, 0 }
 0x117   :  { %v2028_v49 = vsub.f32 %v11711_v61, %v15054_v43  ;;  %v2038_v44 = vsub.f32 %v11724_v8, %v15055_v40  ;;  %v8560_v53 = vpop.f32.mrf.mxu1  ;;  %v11793_v43 = vsub.f32 %v591_v60, %v11764_v32  ;;  %v1002_v52 = vadd.f32 %v11202_v59, %v1001_v21  ;;  %v1021_v40 = vpop.f32.mrf.mxu0  ;;  %8705 = vmatprep.mubr.f32.mxu1 %v11597_v35 }
 0x118   :  { %15056 = vst [vmem:[#allocation297_spill] sm:$0xff] %v11788_v36  ;;  %15057 = vst [vmem:[#allocation298_spill] sm:$0xff] %v11795_v26  ;;  %v1032_v15 = vadd.f32 %v8339_v14, %v11202_v59  ;;  %v11800_v50 = vadd.f32 %v8560_v53, %v1012_v46  ;;  %v15058_v6 = vand.u32 4294901760, %v11750_v41  ;;  %v11810_v21 = vsub.f32 %v594_v1, %v11788_v36 }
 0x119   :  { %v2394_v7 = vpop.f32.mrf.mxu1  ;;  %v2029_v30 = vand.u32 4294901760, %v2028_v49  ;;  %v8342_v8 = vpop.f32.mrf.mxu0  ;;  %8485 = vmatmul.mubr.f32.gmra.mxu0 %v2009_v62  ;;  %v11812_v14 = vand.u32 4294901760, %v600_v17  ;;  %v2039_v49 = vand.u32 4294901760, %v2038_v44  ;;  %v15060_v53 = vand.u32 4294901760, %v11762_v20 }
 0x11a   :  { %v2048_v60 = vsub.f32 %v11750_v41, %v15058_v6  ;;  %v11806_v61 = vadd.f32 %v2394_v7, %v1002_v52  ;;  %8487 = vmatprep.mubr.f32.mxu0 %v2019_v37  ;;  %8706 = vmatmul.mubr.f32.gmra.mxu1 %v11621_v12  ;;  %v11820_v52 = vsub.f32 %v597_v51, %v11795_v26 }
 0x11b   :  { %15059 = vst [vmem:[#allocation299_spill] sm:$0xff] %v11812_v14  ;;  %v8563_v46 = vpop.f32.mrf.mxu1  ;;  %v2058_v6 = vsub.f32 %v11762_v20, %v15060_v53  ;;  %v1022_v7 = vadd.f32 %v11202_v59, %v1021_v40  ;;  %v1052_v1 = vadd.f32 %v8342_v8, %v11202_v59  ;;  %v1041_v16 = vpop.f32.mrf.mxu0  ;;  %8708 = vmatprep.mubr.f32.mxu1 %v11630_v0  ;;  %v15061_v53 = vand.u32 4294901760, %v11786_v18 }
 0x11c   :  { %v11824_v35 = vadd.f32 %v8563_v46, %v1032_v15  ;;  %v2049_v44 = vand.u32 4294901760, %v2048_v60  ;;  %v11834_v40 = vsub.f32 %v600_v17, %v11812_v14  ;;  %v15062_v60 = vand.u32 4294901760, %v11793_v43 }
 0x11d   :  { %v2406_v37 = vpop.f32.mrf.mxu1  ;;  %v8345_v12 = vpop.f32.mrf.mxu0  ;;  %8488 = vmatmul.mubr.f32.gmra.mxu0 %v2029_v30  ;;  %v2068_v51 = vsub.f32 %v11786_v18, %v15061_v53  ;;  %v2059_v15 = vand.u32 4294901760, %v2058_v6  ;;  %v15063_v0 = vand.u32 4294901760, %v11810_v21 }
 0x11e   :  { %v11827_v41 = vadd.f32 %v2406_v37, %v1022_v7  ;;  %8490 = vmatprep.mubr.f32.mxu0 %v2039_v49  ;;  %8709 = vmatmul.mubr.f32.gmra.mxu1 %v11647_v55  ;;  %v2078_v30 = vsub.f32 %v11793_v43, %v15062_v60  ;;  %v1042_v7 = vadd.f32 %v11202_v59, %v1041_v16 }
 0x11f   :  { %v8566_v8 = vpop.f32.mrf.mxu1  ;;  %v1072_v37 = vadd.f32 %v8345_v12, %v11202_v59  ;;  %v1061_v53 = vpop.f32.mrf.mxu0  ;;  %8711 = vmatprep.mubr.f32.mxu1 %v11649_v13  ;;  %v2069_v6 = vand.u32 4294901760, %v2068_v51  ;;  %v2088_v60 = vsub.f32 %v11810_v21, %v15063_v0 }
 0x120   :  { %v11843_v62 = vadd.f32 %v8566_v8, %v1052_v1  ;;  %v2079_v12 = vand.u32 4294901760, %v2078_v30  ;;  %v15064_v1 = vand.u32 4294901760, %v11820_v52  ;;  %v15065_v30 = vand.u32 4294901760, %v11834_v40 }
 0x121   :  { %v2418_v17 = vpop.f32.mrf.mxu1  ;;  %v8348_v49 = vpop.f32.mrf.mxu0  ;;  %8491 = vmatmul.mubr.f32.gmra.mxu0 %v2049_v44  ;;  %v1062_v44 = vadd.f32 %v11202_v59, %v1061_v53 }
 0x122   :  { %v11846_v55 = vadd.f32 %v2418_v17, %v1042_v7  ;;  %8493 = vmatprep.mubr.f32.mxu0 %v2059_v15  ;;  %8712 = vmatmul.mubr.f32.gmra.mxu1 %v11683_v19  ;;  %v2098_v8 = vsub.f32 %v11820_v52, %v15064_v1  ;;  %v1092_v7 = vadd.f32 %v8348_v49, %v11202_v59  ;;  %v2089_v19 = vand.u32 4294901760, %v2088_v60 }
 0x123   :  { %v8569_v16 = vpop.f32.mrf.mxu1  ;;  %v1081_v51 = vpop.f32.mrf.mxu0  ;;  %8714 = vmatprep.mubr.f32.mxu1 %v11691_v56  ;;  %v2108_v13 = vsub.f32 %v11834_v40, %v15065_v30 }
 0x124   :  { %v11858_v17 = vadd.f32 %v8569_v16, %v1072_v37  ;;  %v2099_v59 = vand.u32 4294901760, %v2098_v8  ;;  %v11870_v37 = vld [vmem:[%s14082_s2] ss:$0 sm:$0xff] }
 0x125   :  { %v2430_v0 = vpop.f32.mrf.mxu1  ;;  %v8351_v46 = vpop.f32.mrf.mxu0  ;;  %8494 = vmatmul.mubr.f32.gmra.mxu0 %v2069_v6  ;;  %v1082_v53 = vadd.f32 %v11870_v37, %v1081_v51  ;;  %v2109_v8 = vand.u32 4294901760, %v2108_v13 }
 0x126   :  { %v11861_v15 = vadd.f32 %v2430_v0, %v1062_v44  ;;  %8496 = vmatprep.mubr.f32.mxu0 %v2079_v12  ;;  %8715 = vmatmul.mubr.f32.gmra.mxu1 %v11713_v58  ;;  %v1112_v49 = vadd.f32 %v11870_v37, %v8351_v46 }
 0x127   :  { %v8572_v1 = vpop.f32.mrf.mxu1  ;;  %v1101_v6 = vpop.f32.mrf.mxu0  ;;  %8717 = vmatprep.mubr.f32.mxu1 %v11730_v42  ;;  %v15097_v42 = vld [vmem:[#allocation35_spill] sm:$0xff] }
 0x128   :  { %v11874_v60 = vadd.f32 %v8572_v1, %v1092_v7  ;;  %v1102_v30 = vadd.f32 %v11870_v37, %v1101_v6 }
 0x129   :  { %v2442_v16 = vpop.f32.mrf.mxu1  ;;  %v8354_v12 = vpop.f32.mrf.mxu0  ;;  %8497 = vmatmul.mubr.f32.gmra.mxu0 %v2089_v19 }
 0x12a   :  { %v11877_v44 = vadd.f32 %v2442_v16, %v1082_v53  ;;  %8499 = vmatprep.mubr.f32.mxu0 %v2099_v59  ;;  %8718 = vmatmul.mubr.f32.gmra.mxu1 %v11758_v63  ;;  %v1132_v51 = vadd.f32 %v11870_v37, %v8354_v12 }
 0x12b   :  { %v8575_v0 = vpop.f32.mrf.mxu1  ;;  %v1121_v46 = vpop.f32.mrf.mxu0  ;;  %8720 = vmatprep.mubr.f32.mxu1 %v11764_v32  ;;  %v15091_v32 = vld [vmem:[#allocation32_spill] sm:$0xff] }
 0x12c   :  { %v11882_v58 = vadd.f32 %v8575_v0, %v1112_v49  ;;  %v1122_v13 = vadd.f32 %v11870_v37, %v1121_v46 }
 0x12d   :  { %v2454_v7 = vpop.f32.mrf.mxu1  ;;  %v8357_v1 = vpop.f32.mrf.mxu0  ;;  %8500 = vmatmul.mubr.f32.gmra.mxu0 %v2109_v8 }
 0x12e   :  { %v11885_v19 = vadd.f32 %v2454_v7, %v1102_v30  ;;  %8721 = vmatmul.mubr.f32.gmra.mxu1 %v11788_v36  ;;  %8734 = vmatprep.mubr.f32.mxu0 %v9698_v23  ;;  %v1152_v59 = vadd.f32 %v11870_v37, %v8357_v1  ;;  %v15066_v1 = vand.u32 4294901760, %v9698_v23 }
 0x12f   :  { %v8578_v53 = vpop.f32.mrf.mxu1  ;;  %v1141_v6 = vpop.f32.mrf.mxu0  ;;  %8723 = vmatprep.mubr.f32.mxu1 %v11795_v26  ;;  %v15087_v26 = vld [vmem:[#allocation27_spill] sm:$0xff] }
 0x130   :  { %v11891_v16 = vadd.f32 %v8578_v53, %v1132_v51  ;;  %v1142_v30 = vadd.f32 %v11870_v37, %v1141_v6  ;;  %v15067_v6 = vand.u32 4294901760, %v9701_v24 }
 0x131   :  { %v2466_v49 = vpop.f32.mrf.mxu1  ;;  %v8360_v12 = vpop.f32.mrf.mxu0  ;;  %8735 = vmatmul.mubr.f32.vlgmr.msra.gmra.mxu0 %v9701_v24 }
 0x132   :  { %v11895_v8 = vadd.f32 %v2466_v49, %v1122_v13  ;;  %8724 = vmatmul.mubr.f32.gmra.mxu1 %v11812_v14  ;;  %8737 = vmatprep.mubr.f32.mxu0 %v9714_v28  ;;  %v1172_v46 = vadd.f32 %v11870_v37, %v8360_v12 }
 0x133   :  { %v8581_v0 = vpop.f32.mrf.mxu1  ;;  %v1161_v7 = vpop.f32.mrf.mxu0  ;;  %8958 = vmatprep.mubr.f32.mxu1 %v15066_v1  ;;  %9175 = vmatpush3.msra.mxu0 %v9711_v27 }
 0x134   :  { %v11901_v51 = vadd.f32 %v8581_v0, %v1152_v59  ;;  %9176 = vmatprep.subr.mxu0 %v9704_v25  ;;  %v1162_v59 = vadd.f32 %v11870_v37, %v1161_v7  ;;  %v15068_v0 = vand.u32 4294901760, %v9714_v28 }
 0x135   :  { %v2478_v53 = vpop.f32.mrf.mxu1  ;;  %v8363_v13 = vpop.f32.mrf.mxu0  ;;  %8738 = vmatmul.mubr.f32.gmra.mxu0 %v9728_v34 }
 0x136   :  { %v11908_v49 = vadd.f32 %v2478_v53, %v1142_v30  ;;  %8740 = vmatprep.mubr.f32.mxu0 %v9788_v2  ;;  %8959 = vmatmul.mubr.f32.vlgmr.msra.gmra.mxu1 %v15067_v6  ;;  %v1192_v23 = vadd.f32 %v11870_v37, %v8363_v13  ;;  %v15070_v53 = vand.u32 4294901760, %v9788_v2  ;;  %v15071_v2 = vand.u32 4294901760, %v9799_v11 }
 0x137   :  { %v8584_v14 = vpop.f32.mrf.mxu1  ;;  %v1181_v12 = vpop.f32.mrf.mxu0  ;;  %9399 = vmatpush3.msra.mxu1 %v9666_v9  ;;  %8961 = vmatprep.mubr.f32.mxu1 %v15068_v0  ;;  %v15069_v9 = vand.u32 4294901760, %v9728_v34  ;;  %v15072_v0 = vand.u32 4294901760, %v9808_v22 }
 0x138   :  { %v11915_v27 = vadd.f32 %v8584_v14, %v1172_v46  ;;  %9177 = vmatpush3.msra.mxu0 %v9704_v25  ;;  %9400 = vmatprep.subr.mxu1 %v9653_v4  ;;  %v1182_v28 = vadd.f32 %v11870_v37, %v1181_v12 }
 0x139   :  { %v2490_v30 = vpop.f32.mrf.mxu1  ;;  %v8366_v1 = vpop.f32.mrf.mxu0  ;;  %8741 = vmatmul.mubr.f32.gmra.mxu0 %v9799_v11  ;;  %9401 = vmatpush3.msra.mxu1 %v9653_v4 }
 0x13a   :  { %v11923_v24 = vadd.f32 %v2490_v30, %v1162_v59  ;;  %8743 = vmatprep.mubr.f32.mxu0 %v9808_v22  ;;  %8962 = vmatmul.mubr.f32.gmra.mxu1 %v15069_v9  ;;  %v1212_v14 = vadd.f32 %v11870_v37, %v8366_v1  ;;  %v15073_v22 = vand.u32 4294901760, %v9811_v33 }
 0x13b   :  { %v8587_v7 = vpop.f32.mrf.mxu1  ;;  %v1201_v25 = vpop.f32.mrf.mxu0  ;;  %8964 = vmatprep.mubr.f32.mxu1 %v15070_v53  ;;  %9178 = vmatprep.subr.mxu0 %v9717_v29 }
 0x13c   :  { %v11931_v46 = vadd.f32 %v8587_v7, %v1192_v23  ;;  %9179 = vmatpush3.msra.mxu0 %v9717_v29  ;;  %9402 = vmatprep.subr.mxu1 %v9655_v5  ;;  %v1202_v59 = vadd.f32 %v11870_v37, %v1201_v25 }
 0x13d   :  { %v2502_v13 = vpop.f32.mrf.mxu1  ;;  %v8369_v4 = vpop.f32.mrf.mxu0  ;;  %8744 = vmatmul.mubr.f32.gmra.mxu0 %v9811_v33  ;;  %9403 = vmatpush3.msra.mxu1 %v9655_v5  ;;  %v15076_v33 = vand.u32 4294901760, %v9829_v45 }
 0x13e   :  { %v11939_v34 = vadd.f32 %v2502_v13, %v1182_v28  ;;  %8746 = vmatprep.mubr.f32.mxu0 %v9817_v39  ;;  %8965 = vmatmul.mubr.f32.gmra.mxu1 %v15071_v2  ;;  %v1232_v23 = vadd.f32 %v11870_v37, %v8369_v4  ;;  %v15075_v4 = vld [vmem:[#allocation15_spill] sm:$0xff] }
 0x13f   :  { %v8590_v6 = vpop.f32.mrf.mxu1  ;;  %v1221_v29 = vpop.f32.mrf.mxu0  ;;  %8967 = vmatprep.mubr.f32.mxu1 %v15072_v0  ;;  %9180 = vmatprep.subr.mxu0 %v9737_v38 }
 0x140   :  { %v11947_v12 = vadd.f32 %v8590_v6, %v1212_v14  ;;  %9181 = vmatpush3.msra.mxu0 %v9737_v38  ;;  %9404 = vmatprep.subr.mxu1 %v9668_v10  ;;  %v1222_v7 = vadd.f32 %v11870_v37, %v1221_v29  ;;  %v15074_v14 = vand.u32 4294901760, %v9817_v39  ;;  %v15077_v39 = vand.u32 4294901760, %v9836_v48 }
 0x141   :  { %v2514_v30 = vpop.f32.mrf.mxu1  ;;  %v8372_v5 = vpop.f32.mrf.mxu0  ;;  %8747 = vmatmul.mubr.f32.gmra.mxu0 %v9829_v45  ;;  %9405 = vmatpush3.msra.mxu1 %v9668_v10  ;;  %v15080_v45 = vand.u32 4294901760, %v9860_v57 }
 0x142   :  { %v11955_v11 = vadd.f32 %v2514_v30, %v1202_v59  ;;  %8749 = vmatprep.mubr.f32.mxu0 %v9836_v48  ;;  %8968 = vmatmul.mubr.f32.gmra.mxu1 %v15073_v22  ;;  %v1252_v9 = vadd.f32 %v11870_v37, %v8372_v5  ;;  %v15078_v30 = vld [vmem:[#allocation19_spill] sm:$0xff]  ;;  %v15079_v22 = vld [vmem:[#allocation21_spill] sm:$0xff]  ;;  %v15081_v48 = vand.u32 4294901760, %v15075_v4 }
 0x143   :  { %v8593_v1 = vpop.f32.mrf.mxu1  ;;  %v1241_v38 = vpop.f32.mrf.mxu0  ;;  %8970 = vmatprep.mubr.f32.mxu1 %v15074_v14 }
 0x144   :  { %v11963_v28 = vadd.f32 %v8593_v1, %v1232_v23  ;;  %v1242_v6 = vadd.f32 %v11870_v37, %v1241_v38 }
 0x145   :  { %v2526_v25 = vpop.f32.mrf.mxu1  ;;  %v8375_v53 = vpop.f32.mrf.mxu0  ;;  %8750 = vmatmul.mubr.f32.gmra.mxu0 %v9860_v57  ;;  %v15084_v57 = vand.u32 4294901760, %v15078_v30 }
 0x146   :  { %v11968_v10 = vadd.f32 %v2526_v25, %v1222_v7  ;;  %8752 = vmatprep.mubr.f32.mxu0 %v15075_v4  ;;  %8971 = vmatmul.mubr.f32.gmra.mxu1 %v15076_v33  ;;  %v1272_v2 = vadd.f32 %v11870_v37, %v8375_v53  ;;  %v15085_v4 = vand.u32 4294901760, %v15079_v22 }
 0x147   :  { %v8596_v13 = vpop.f32.mrf.mxu1  ;;  %v1261_v59 = vpop.f32.mrf.mxu0  ;;  %8973 = vmatprep.mubr.f32.mxu1 %v15077_v39  ;;  %v15083_v39 = vld [vmem:[#allocation24_spill] sm:$0xff] }
 0x148   :  { %v11975_v23 = vadd.f32 %v8596_v13, %v1252_v9  ;;  %v1262_v7 = vadd.f32 %v11870_v37, %v1261_v59  ;;  %v15082_v13 = vld [vmem:[#allocation22_spill] sm:$0xff] }
 0x149   :  { %v2538_v29 = vpop.f32.mrf.mxu1  ;;  %v8378_v0 = vpop.f32.mrf.mxu0  ;;  %8753 = vmatmul.mubr.f32.gmra.mxu0 %v15078_v30  ;;  %v15088_v30 = vand.u32 4294901760, %v15082_v13 }
 0x14a   :  { %v11980_v5 = vadd.f32 %v2538_v29, %v1242_v6  ;;  %8755 = vmatprep.mubr.f32.mxu0 %v15079_v22  ;;  %8974 = vmatmul.mubr.f32.gmra.mxu1 %v15080_v45  ;;  %v1292_v9 = vadd.f32 %v11870_v37, %v8378_v0  ;;  %v15089_v22 = vand.u32 4294901760, %v15083_v39 }
 0x14b   :  { %v8599_v1 = vpop.f32.mrf.mxu1  ;;  %v1281_v38 = vpop.f32.mrf.mxu0  ;;  %8976 = vmatprep.mubr.f32.mxu1 %v15081_v48 }
 0x14c   :  { %v11987_v14 = vadd.f32 %v8599_v1, %v1272_v2  ;;  %v1282_v59 = vadd.f32 %v11870_v37, %v1281_v38 }
 0x14d   :  { %v2550_v25 = vpop.f32.mrf.mxu1  ;;  %v8381_v53 = vpop.f32.mrf.mxu0  ;;  %8756 = vmatmul.mubr.f32.gmra.mxu0 %v15082_v13 }
 0x14e   :  { %v11992_v33 = vadd.f32 %v2550_v25, %v1262_v7  ;;  %8758 = vmatprep.mubr.f32.mxu0 %v15083_v39  ;;  %8977 = vmatmul.mubr.f32.gmra.mxu1 %v15084_v57  ;;  %v1312_v2 = vadd.f32 %v11870_v37, %v8381_v53  ;;  %v15086_v7 = vld [vmem:[#allocation26_spill] sm:$0xff]  ;;  %v15094_v39 = vand.u32 4294901760, %v15087_v26 }
 0x14f   :  { %v8602_v6 = vpop.f32.mrf.mxu1  ;;  %v1301_v29 = vpop.f32.mrf.mxu0  ;;  %8979 = vmatprep.mubr.f32.mxu1 %v15085_v4  ;;  %v15092_v13 = vand.u32 4294901760, %v15086_v7 }
 0x150   :  { %v11999_v0 = vadd.f32 %v8602_v6, %v1292_v9  ;;  %v1302_v38 = vadd.f32 %v11870_v37, %v1301_v29 }
 0x151   :  { %v2562_v1 = vpop.f32.mrf.mxu1  ;;  %v8384_v45 = vpop.f32.mrf.mxu0  ;;  %8759 = vmatmul.mubr.f32.gmra.mxu0 %v15086_v7 }
 0x152   :  { %v12004_v48 = vadd.f32 %v2562_v1, %v1282_v59  ;;  %8761 = vmatprep.mubr.f32.mxu0 %v15087_v26  ;;  %8980 = vmatmul.mubr.f32.gmra.mxu1 %v15088_v30  ;;  %v1332_v9 = vadd.f32 %v11870_v37, %v8384_v45  ;;  %v15090_v59 = vld [vmem:[#allocation29_spill] sm:$0xff]  ;;  %v15100_v26 = vand.u32 4294901760, %v15091_v32 }
 0x153   :  { %v8605_v25 = vpop.f32.mrf.mxu1  ;;  %v1321_v53 = vpop.f32.mrf.mxu0  ;;  %8982 = vmatprep.mubr.f32.mxu1 %v15089_v22  ;;  %v15098_v7 = vand.u32 4294901760, %v15090_v59 }
 0x154   :  { %v12011_v6 = vadd.f32 %v8605_v25, %v1312_v2  ;;  %v1322_v29 = vadd.f32 %v11870_v37, %v1321_v53 }
 0x155   :  { %v2574_v57 = vpop.f32.mrf.mxu1  ;;  %v8387_v4 = vpop.f32.mrf.mxu0  ;;  %8762 = vmatmul.mubr.f32.gmra.mxu0 %v15090_v59 }
 0x156   :  { %v12016_v1 = vadd.f32 %v2574_v57, %v1302_v38  ;;  %8764 = vmatprep.mubr.f32.mxu0 %v15091_v32  ;;  %8983 = vmatmul.mubr.f32.gmra.mxu1 %v15092_v13  ;;  %v1352_v2 = vadd.f32 %v11870_v37, %v8387_v4  ;;  %v15095_v38 = vld [vmem:[#allocation34_spill] sm:$0xff]  ;;  %v15106_v32 = vand.u32 4294901760, %v15097_v42 }
 0x157   :  { %v8608_v36 = vpop.f32.mrf.mxu1  ;;  %v1341_v45 = vpop.f32.mrf.mxu0  ;;  %8985 = vmatprep.mubr.f32.mxu1 %v15094_v39  ;;  %v15104_v59 = vand.u32 4294901760, %v15095_v38 }
 0x158   :  { %v12023_v25 = vadd.f32 %v8608_v36, %v1332_v9  ;;  %v1342_v53 = vadd.f32 %v11870_v37, %v1341_v45 }
 0x159   :  { %v2586_v30 = vpop.f32.mrf.mxu1  ;;  %v8390_v22 = vpop.f32.mrf.mxu0  ;;  %8765 = vmatmul.mubr.f32.gmra.mxu0 %v15095_v38 }
 0x15a   :  { %15093 = vst [vmem:[#allocation15_spill] sm:$0xff] %v12023_v25  ;;  %v12028_v57 = vadd.f32 %v2586_v30, %v1322_v29  ;;  %8767 = vmatprep.mubr.f32.mxu0 %v15097_v42  ;;  %8986 = vmatmul.mubr.f32.gmra.mxu1 %v15098_v7  ;;  %v1372_v36 = vadd.f32 %v11870_v37, %v8390_v22  ;;  %v15101_v29 = vld [vmem:[#allocation39_spill] sm:$0xff] }
 0x15b   :  { %v8611_v63 = vpop.f32.mrf.mxu1  ;;  %v1361_v9 = vpop.f32.mrf.mxu0  ;;  %8988 = vmatprep.mubr.f32.mxu1 %v15100_v26  ;;  %v15110_v38 = vand.u32 4294901760, %v15101_v29 }
 0x15c   :  { %15096 = vst [vmem:[#allocation19_spill] sm:$0xff] %v12028_v57  ;;  %v12035_v4 = vadd.f32 %v8611_v63, %v1352_v2  ;;  %v15103_v57 = vld [vmem:[#allocation40_spill] sm:$0xff]  ;;  %v1362_v45 = vadd.f32 %v11870_v37, %v1361_v9 }
 0x15d   :  { %v2598_v13 = vpop.f32.mrf.mxu1  ;;  %v8393_v39 = vpop.f32.mrf.mxu0  ;;  %8768 = vmatmul.mubr.f32.gmra.mxu0 %v15101_v29  ;;  %v15112_v42 = vand.u32 4294901760, %v15103_v57 }
 0x15e   :  { %15099 = vst [vmem:[#allocation21_spill] sm:$0xff] %v12035_v4  ;;  %v12040_v30 = vadd.f32 %v2598_v13, %v1342_v53  ;;  %8770 = vmatprep.mubr.f32.mxu0 %v15103_v57  ;;  %8989 = vmatmul.mubr.f32.gmra.mxu1 %v15104_v59  ;;  %v1392_v63 = vadd.f32 %v11870_v37, %v8393_v39  ;;  %v15107_v53 = vld [vmem:[#allocation42_spill] sm:$0xff]  ;;  %v15109_v4 = vld [vmem:[#allocation44_spill] sm:$0xff] }
 0x15f   :  { %v8614_v56 = vpop.f32.mrf.mxu1  ;;  %v1381_v2 = vpop.f32.mrf.mxu0  ;;  %8991 = vmatprep.mubr.f32.mxu1 %v15106_v32  ;;  %v15116_v29 = vand.u32 4294901760, %v15107_v53  ;;  %v15118_v57 = vand.u32 4294901760, %v15109_v4 }
 0x160   :  { %15102 = vst [vmem:[#allocation22_spill] sm:$0xff] %v12040_v30  ;;  %v12047_v22 = vadd.f32 %v8614_v56, %v1372_v36  ;;  %v1382_v9 = vadd.f32 %v11870_v37, %v1381_v2 }
 0x161   :  { %v2610_v7 = vpop.f32.mrf.mxu1  ;;  %v8396_v26 = vpop.f32.mrf.mxu0  ;;  %8771 = vmatmul.mubr.f32.gmra.mxu0 %v15107_v53 }
 0x162   :  { %15105 = vst [vmem:[#allocation24_spill] sm:$0xff] %v12047_v22  ;;  %v12052_v13 = vadd.f32 %v2610_v7, %v1362_v45  ;;  %8773 = vmatprep.mubr.f32.mxu0 %v15109_v4  ;;  %8992 = vmatmul.mubr.f32.gmra.mxu1 %v15110_v38  ;;  %v1412_v56 = vadd.f32 %v11870_v37, %v8396_v26  ;;  %v15113_v45 = vld [vmem:[#allocation46_spill] sm:$0xff]  ;;  %v15115_v22 = vld [vmem:[#allocation49_spill] sm:$0xff] }
 0x163   :  { %v8617_v30 = vpop.f32.mrf.mxu1  ;;  %v1401_v36 = vpop.f32.mrf.mxu0  ;;  %8994 = vmatprep.mubr.f32.mxu1 %v15112_v42  ;;  %v15122_v53 = vand.u32 4294901760, %v15113_v45  ;;  %v15124_v4 = vand.u32 4294901760, %v15115_v22 }
 0x164   :  { %15108 = vst [vmem:[#allocation26_spill] sm:$0xff] %v12052_v13  ;;  %v12059_v39 = vadd.f32 %v8617_v30, %v1392_v63  ;;  %v1402_v2 = vadd.f32 %v11870_v37, %v1401_v36 }
 0x165   :  { %v2622_v59 = vpop.f32.mrf.mxu1  ;;  %v8399_v32 = vpop.f32.mrf.mxu0  ;;  %8774 = vmatmul.mubr.f32.gmra.mxu0 %v15113_v45 }
 0x166   :  { %15111 = vst [vmem:[#allocation27_spill] sm:$0xff] %v12059_v39  ;;  %v12064_v7 = vadd.f32 %v2622_v59, %v1382_v9  ;;  %8776 = vmatprep.mubr.f32.mxu0 %v15115_v22  ;;  %8995 = vmatmul.mubr.f32.gmra.mxu1 %v15116_v29  ;;  %v1432_v30 = vadd.f32 %v11870_v37, %v8399_v32  ;;  %v15119_v9 = vld [vmem:[#allocation50_spill] sm:$0xff]  ;;  %v15121_v39 = vld [vmem:[#allocation52_spill] sm:$0xff] }
 0x167   :  { %v8620_v13 = vpop.f32.mrf.mxu1  ;;  %v1421_v63 = vpop.f32.mrf.mxu0  ;;  %8997 = vmatprep.mubr.f32.mxu1 %v15118_v57  ;;  %v15128_v45 = vand.u32 4294901760, %v15119_v9  ;;  %v15130_v22 = vand.u32 4294901760, %v15121_v39 }
 0x168   :  { %15114 = vst [vmem:[#allocation29_spill] sm:$0xff] %v12064_v7  ;;  %v12071_v26 = vadd.f32 %v8620_v13, %v1412_v56  ;;  %v1422_v36 = vadd.f32 %v11870_v37, %v1421_v63 }
 0x169   :  { %v2634_v38 = vpop.f32.mrf.mxu1  ;;  %v8402_v42 = vpop.f32.mrf.mxu0  ;;  %8777 = vmatmul.mubr.f32.gmra.mxu0 %v15119_v9 }
 0x16a   :  { %15117 = vst [vmem:[#allocation32_spill] sm:$0xff] %v12071_v26  ;;  %v12076_v59 = vadd.f32 %v2634_v38, %v1402_v2  ;;  %8779 = vmatprep.mubr.f32.mxu0 %v15121_v39  ;;  %8998 = vmatmul.mubr.f32.gmra.mxu1 %v15122_v53  ;;  %v1452_v13 = vadd.f32 %v11870_v37, %v8402_v42  ;;  %v15125_v2 = vld [vmem:[#allocation54_spill] sm:$0xff]  ;;  %v15127_v26 = vld [vmem:[#allocation55_spill] sm:$0xff] }
 0x16b   :  { %v8623_v7 = vpop.f32.mrf.mxu1  ;;  %v1441_v56 = vpop.f32.mrf.mxu0  ;;  %9000 = vmatprep.mubr.f32.mxu1 %v15124_v4  ;;  %v15134_v9 = vand.u32 4294901760, %v15125_v2  ;;  %v15136_v39 = vand.u32 4294901760, %v15127_v26 }
 0x16c   :  { %15120 = vst [vmem:[#allocation34_spill] sm:$0xff] %v12076_v59  ;;  %v12083_v32 = vadd.f32 %v8623_v7, %v1432_v30  ;;  %v1442_v63 = vadd.f32 %v11870_v37, %v1441_v56 }
 0x16d   :  { %v2646_v29 = vpop.f32.mrf.mxu1  ;;  %v8405_v57 = vpop.f32.mrf.mxu0  ;;  %8780 = vmatmul.mubr.f32.gmra.mxu0 %v15125_v2 }
 0x16e   :  { %15123 = vst [vmem:[#allocation35_spill] sm:$0xff] %v12083_v32  ;;  %v12088_v38 = vadd.f32 %v2646_v29, %v1422_v36  ;;  %8782 = vmatprep.mubr.f32.mxu0 %v15127_v26  ;;  %9001 = vmatmul.mubr.f32.gmra.mxu1 %v15128_v45  ;;  %v1472_v7 = vadd.f32 %v11870_v37, %v8405_v57  ;;  %v15131_v36 = vld [vmem:[#allocation59_spill] sm:$0xff]  ;;  %v15133_v32 = vld [vmem:[#allocation60_spill] sm:$0xff] }
 0x16f   :  { %v8626_v59 = vpop.f32.mrf.mxu1  ;;  %v1461_v30 = vpop.f32.mrf.mxu0  ;;  %9003 = vmatprep.mubr.f32.mxu1 %v15130_v22  ;;  %v15140_v2 = vand.u32 4294901760, %v15131_v36  ;;  %v15142_v26 = vand.u32 4294901760, %v15133_v32 }
 0x170   :  { %15126 = vst [vmem:[#allocation39_spill] sm:$0xff] %v12088_v38  ;;  %v12095_v42 = vadd.f32 %v8626_v59, %v1452_v13  ;;  %v1462_v56 = vadd.f32 %v11870_v37, %v1461_v30 }
 0x171   :  { %v2658_v53 = vpop.f32.mrf.mxu1  ;;  %v8408_v4 = vpop.f32.mrf.mxu0  ;;  %8783 = vmatmul.mubr.f32.gmra.mxu0 %v15131_v36 }
 0x172   :  { %15129 = vst [vmem:[#allocation40_spill] sm:$0xff] %v12095_v42  ;;  %v12100_v29 = vadd.f32 %v2658_v53, %v1442_v63  ;;  %8785 = vmatprep.mubr.f32.mxu0 %v15133_v32  ;;  %9004 = vmatmul.mubr.f32.gmra.mxu1 %v15134_v9  ;;  %v1492_v59 = vadd.f32 %v11870_v37, %v8408_v4  ;;  %v15137_v63 = vld [vmem:[#allocation62_spill] sm:$0xff]  ;;  %v15139_v42 = vld [vmem:[#allocation64_spill] sm:$0xff] }
 0x173   :  { %v8629_v38 = vpop.f32.mrf.mxu1  ;;  %v1481_v13 = vpop.f32.mrf.mxu0  ;;  %9006 = vmatprep.mubr.f32.mxu1 %v15136_v39  ;;  %v15146_v36 = vand.u32 4294901760, %v15137_v63  ;;  %v15148_v32 = vand.u32 4294901760, %v15139_v42 }
 0x174   :  { %15132 = vst [vmem:[#allocation42_spill] sm:$0xff] %v12100_v29  ;;  %v12107_v57 = vadd.f32 %v8629_v38, %v1472_v7  ;;  %v1482_v30 = vadd.f32 %v11870_v37, %v1481_v13 }
 0x175   :  { %v2670_v45 = vpop.f32.mrf.mxu1  ;;  %v8411_v22 = vpop.f32.mrf.mxu0  ;;  %8786 = vmatmul.mubr.f32.gmra.mxu0 %v15137_v63 }
 0x176   :  { %15135 = vst [vmem:[#allocation44_spill] sm:$0xff] %v12107_v57  ;;  %v12112_v53 = vadd.f32 %v2670_v45, %v1462_v56  ;;  %8788 = vmatprep.mubr.f32.mxu0 %v15139_v42  ;;  %9007 = vmatmul.mubr.f32.gmra.mxu1 %v15140_v2  ;;  %v1512_v38 = vadd.f32 %v11870_v37, %v8411_v22  ;;  %v15143_v56 = vld [vmem:[#allocation66_spill] sm:$0xff]  ;;  %v15145_v57 = vld [vmem:[#allocation69_spill] sm:$0xff] }
 0x177   :  { %v8632_v29 = vpop.f32.mrf.mxu1  ;;  %v1501_v7 = vpop.f32.mrf.mxu0  ;;  %9009 = vmatprep.mubr.f32.mxu1 %v15142_v26  ;;  %v15152_v63 = vand.u32 4294901760, %v15143_v56  ;;  %v15154_v42 = vand.u32 4294901760, %v15145_v57 }
 0x178   :  { %15138 = vst [vmem:[#allocation46_spill] sm:$0xff] %v12112_v53  ;;  %v12119_v4 = vadd.f32 %v8632_v29, %v1492_v59  ;;  %v1502_v13 = vadd.f32 %v11870_v37, %v1501_v7 }
 0x179   :  { %v2682_v9 = vpop.f32.mrf.mxu1  ;;  %v8414_v39 = vpop.f32.mrf.mxu0  ;;  %8789 = vmatmul.mubr.f32.gmra.mxu0 %v15143_v56 }
 0x17a   :  { %15141 = vst [vmem:[#allocation49_spill] sm:$0xff] %v12119_v4  ;;  %v12124_v45 = vadd.f32 %v2682_v9, %v1482_v30  ;;  %8791 = vmatprep.mubr.f32.mxu0 %v15145_v57  ;;  %9010 = vmatmul.mubr.f32.gmra.mxu1 %v15146_v36  ;;  %v1532_v29 = vadd.f32 %v11870_v37, %v8414_v39  ;;  %v15149_v30 = vld [vmem:[#allocation70_spill] sm:$0xff]  ;;  %v15151_v4 = vld [vmem:[#allocation72_spill] sm:$0xff] }
 0x17b   :  { %v8635_v53 = vpop.f32.mrf.mxu1  ;;  %v1521_v59 = vpop.f32.mrf.mxu0  ;;  %9012 = vmatprep.mubr.f32.mxu1 %v15148_v32  ;;  %v15158_v56 = vand.u32 4294901760, %v15149_v30  ;;  %v15160_v57 = vand.u32 4294901760, %v15151_v4 }
 0x17c   :  { %15144 = vst [vmem:[#allocation50_spill] sm:$0xff] %v12124_v45  ;;  %v12131_v22 = vadd.f32 %v8635_v53, %v1512_v38  ;;  %v1522_v7 = vadd.f32 %v11870_v37, %v1521_v59 }
 0x17d   :  { %v2694_v2 = vpop.f32.mrf.mxu1  ;;  %v8417_v26 = vpop.f32.mrf.mxu0  ;;  %8792 = vmatmul.mubr.f32.gmra.mxu0 %v15149_v30 }
 0x17e   :  { %15147 = vst [vmem:[#allocation52_spill] sm:$0xff] %v12131_v22  ;;  %v12136_v9 = vadd.f32 %v2694_v2, %v1502_v13  ;;  %8794 = vmatprep.mubr.f32.mxu0 %v15151_v4  ;;  %9013 = vmatmul.mubr.f32.gmra.mxu1 %v15152_v63  ;;  %v1552_v53 = vadd.f32 %v11870_v37, %v8417_v26  ;;  %v15155_v13 = vld [vmem:[#allocation74_spill] sm:$0xff]  ;;  %v15157_v22 = vld [vmem:[#allocation75_spill] sm:$0xff] }
 0x17f   :  { %v8638_v45 = vpop.f32.mrf.mxu1  ;;  %v1541_v38 = vpop.f32.mrf.mxu0  ;;  %9015 = vmatprep.mubr.f32.mxu1 %v15154_v42  ;;  %v15164_v30 = vand.u32 4294901760, %v15155_v13  ;;  %v15166_v4 = vand.u32 4294901760, %v15157_v22 }
 0x180   :  { %15150 = vst [vmem:[#allocation54_spill] sm:$0xff] %v12136_v9  ;;  %v12143_v39 = vadd.f32 %v8638_v45, %v1532_v29  ;;  %v1542_v59 = vadd.f32 %v11870_v37, %v1541_v38 }
 0x181   :  { %v2706_v36 = vpop.f32.mrf.mxu1  ;;  %v8420_v32 = vpop.f32.mrf.mxu0  ;;  %8795 = vmatmul.mubr.f32.gmra.mxu0 %v15155_v13 }
 0x182   :  { %15153 = vst [vmem:[#allocation55_spill] sm:$0xff] %v12143_v39  ;;  %v12148_v2 = vadd.f32 %v2706_v36, %v1522_v7  ;;  %8797 = vmatprep.mubr.f32.mxu0 %v15157_v22  ;;  %9016 = vmatmul.mubr.f32.gmra.mxu1 %v15158_v56  ;;  %v1572_v45 = vadd.f32 %v11870_v37, %v8420_v32  ;;  %v15161_v7 = vld [vmem:[#allocation79_spill] sm:$0xff]  ;;  %v15163_v39 = vld [vmem:[#allocation80_spill] sm:$0xff] }
 0x183   :  { %v8641_v9 = vpop.f32.mrf.mxu1  ;;  %v1561_v29 = vpop.f32.mrf.mxu0  ;;  %9018 = vmatprep.mubr.f32.mxu1 %v15160_v57  ;;  %v15170_v13 = vand.u32 4294901760, %v15161_v7  ;;  %v15172_v22 = vand.u32 4294901760, %v15163_v39 }
 0x184   :  { %15156 = vst [vmem:[#allocation59_spill] sm:$0xff] %v12148_v2  ;;  %v12155_v26 = vadd.f32 %v8641_v9, %v1552_v53  ;;  %v1562_v38 = vadd.f32 %v11870_v37, %v1561_v29 }
 0x185   :  { %v2718_v63 = vpop.f32.mrf.mxu1  ;;  %v8423_v42 = vpop.f32.mrf.mxu0  ;;  %8798 = vmatmul.mubr.f32.gmra.mxu0 %v15161_v7 }
 0x186   :  { %15159 = vst [vmem:[#allocation60_spill] sm:$0xff] %v12155_v26  ;;  %v12160_v36 = vadd.f32 %v2718_v63, %v1542_v59  ;;  %8800 = vmatprep.mubr.f32.mxu0 %v15163_v39  ;;  %9019 = vmatmul.mubr.f32.gmra.mxu1 %v15164_v30  ;;  %v1592_v9 = vadd.f32 %v11870_v37, %v8423_v42  ;;  %v15167_v59 = vld [vmem:[#allocation82_spill] sm:$0xff]  ;;  %v15169_v26 = vld [vmem:[#allocation84_spill] sm:$0xff] }
 0x187   :  { %v8644_v2 = vpop.f32.mrf.mxu1  ;;  %v1581_v53 = vpop.f32.mrf.mxu0  ;;  %9021 = vmatprep.mubr.f32.mxu1 %v15166_v4  ;;  %v15176_v7 = vand.u32 4294901760, %v15167_v59  ;;  %v15178_v39 = vand.u32 4294901760, %v15169_v26 }
 0x188   :  { %15162 = vst [vmem:[#allocation62_spill] sm:$0xff] %v12160_v36  ;;  %v12167_v32 = vadd.f32 %v8644_v2, %v1572_v45  ;;  %v1582_v29 = vadd.f32 %v11870_v37, %v1581_v53 }
 0x189   :  { %v2730_v56 = vpop.f32.mrf.mxu1  ;;  %v8426_v57 = vpop.f32.mrf.mxu0  ;;  %8801 = vmatmul.mubr.f32.gmra.mxu0 %v15167_v59 }
 0x18a   :  { %15165 = vst [vmem:[#allocation64_spill] sm:$0xff] %v12167_v32  ;;  %v12172_v63 = vadd.f32 %v2730_v56, %v1562_v38  ;;  %8803 = vmatprep.mubr.f32.mxu0 %v15169_v26  ;;  %9022 = vmatmul.mubr.f32.gmra.mxu1 %v15170_v13  ;;  %v1612_v2 = vadd.f32 %v11870_v37, %v8426_v57  ;;  %v15173_v38 = vld [vmem:[#allocation86_spill] sm:$0xff]  ;;  %v15175_v32 = vld [vmem:[#allocation89_spill] sm:$0xff] }
 0x18b   :  { %v8647_v36 = vpop.f32.mrf.mxu1  ;;  %v1601_v45 = vpop.f32.mrf.mxu0  ;;  %9024 = vmatprep.mubr.f32.mxu1 %v15172_v22  ;;  %v15182_v59 = vand.u32 4294901760, %v15173_v38  ;;  %v15184_v26 = vand.u32 4294901760, %v15175_v32 }
 0x18c   :  { %15168 = vst [vmem:[#allocation66_spill] sm:$0xff] %v12172_v63  ;;  %v12179_v42 = vadd.f32 %v8647_v36, %v1592_v9  ;;  %v1602_v53 = vadd.f32 %v11870_v37, %v1601_v45 }
 0x18d   :  { %v2742_v30 = vpop.f32.mrf.mxu1  ;;  %v8429_v4 = vpop.f32.mrf.mxu0  ;;  %8804 = vmatmul.mubr.f32.gmra.mxu0 %v15173_v38 }
 0x18e   :  { %15171 = vst [vmem:[#allocation69_spill] sm:$0xff] %v12179_v42  ;;  %v12184_v56 = vadd.f32 %v2742_v30, %v1582_v29  ;;  %8806 = vmatprep.mubr.f32.mxu0 %v15175_v32  ;;  %9025 = vmatmul.mubr.f32.gmra.mxu1 %v15176_v7  ;;  %v1632_v36 = vadd.f32 %v11870_v37, %v8429_v4  ;;  %v15179_v29 = vld [vmem:[#allocation90_spill] sm:$0xff]  ;;  %v15181_v42 = vld [vmem:[#allocation92_spill] sm:$0xff] }
 0x18f   :  { %v8650_v63 = vpop.f32.mrf.mxu1  ;;  %v1621_v9 = vpop.f32.mrf.mxu0  ;;  %9027 = vmatprep.mubr.f32.mxu1 %v15178_v39  ;;  %v15188_v38 = vand.u32 4294901760, %v15179_v29  ;;  %v15190_v32 = vand.u32 4294901760, %v15181_v42 }
 0x190   :  { %15174 = vst [vmem:[#allocation70_spill] sm:$0xff] %v12184_v56  ;;  %v12191_v57 = vadd.f32 %v8650_v63, %v1612_v2  ;;  %v1622_v45 = vadd.f32 %v11870_v37, %v1621_v9 }
 0x191   :  { %v2754_v13 = vpop.f32.mrf.mxu1  ;;  %v8432_v22 = vpop.f32.mrf.mxu0  ;;  %8807 = vmatmul.mubr.f32.gmra.mxu0 %v15179_v29 }
 0x192   :  { %15177 = vst [vmem:[#allocation72_spill] sm:$0xff] %v12191_v57  ;;  %v12196_v30 = vadd.f32 %v2754_v13, %v1602_v53  ;;  %8809 = vmatprep.mubr.f32.mxu0 %v15181_v42  ;;  %9028 = vmatmul.mubr.f32.gmra.mxu1 %v15182_v59  ;;  %v1652_v63 = vadd.f32 %v11870_v37, %v8432_v22  ;;  %v15185_v53 = vld [vmem:[#allocation94_spill] sm:$0xff]  ;;  %v15187_v57 = vld [vmem:[#allocation95_spill] sm:$0xff] }
 0x193   :  { %v8653_v56 = vpop.f32.mrf.mxu1  ;;  %v1641_v2 = vpop.f32.mrf.mxu0  ;;  %9030 = vmatprep.mubr.f32.mxu1 %v15184_v26  ;;  %v15194_v29 = vand.u32 4294901760, %v15185_v53  ;;  %v15196_v42 = vand.u32 4294901760, %v15187_v57 }
 0x194   :  { %15180 = vst [vmem:[#allocation74_spill] sm:$0xff] %v12196_v30  ;;  %v12203_v4 = vadd.f32 %v8653_v56, %v1632_v36  ;;  %v1642_v9 = vadd.f32 %v11870_v37, %v1641_v2 }
 0x195   :  { %v2766_v7 = vpop.f32.mrf.mxu1  ;;  %v8435_v39 = vpop.f32.mrf.mxu0  ;;  %8810 = vmatmul.mubr.f32.gmra.mxu0 %v15185_v53 }
 0x196   :  { %15183 = vst [vmem:[#allocation75_spill] sm:$0xff] %v12203_v4  ;;  %v12208_v13 = vadd.f32 %v2766_v7, %v1622_v45  ;;  %8812 = vmatprep.mubr.f32.mxu0 %v15187_v57  ;;  %9031 = vmatmul.mubr.f32.gmra.mxu1 %v15188_v38  ;;  %v1672_v56 = vadd.f32 %v11870_v37, %v8435_v39  ;;  %v15191_v45 = vld [vmem:[#allocation99_spill] sm:$0xff]  ;;  %v15193_v4 = vld [vmem:[#allocation100_spill] sm:$0xff] }
 0x197   :  { %v8656_v30 = vpop.f32.mrf.mxu1  ;;  %v1661_v36 = vpop.f32.mrf.mxu0  ;;  %9033 = vmatprep.mubr.f32.mxu1 %v15190_v32  ;;  %v15200_v53 = vand.u32 4294901760, %v15191_v45  ;;  %v15202_v57 = vand.u32 4294901760, %v15193_v4 }
 0x198   :  { %15186 = vst [vmem:[#allocation79_spill] sm:$0xff] %v12208_v13  ;;  %v12215_v22 = vadd.f32 %v8656_v30, %v1652_v63  ;;  %v1662_v2 = vadd.f32 %v11870_v37, %v1661_v36 }
 0x199   :  { %v2778_v59 = vpop.f32.mrf.mxu1  ;;  %v8438_v26 = vpop.f32.mrf.mxu0  ;;  %8813 = vmatmul.mubr.f32.gmra.mxu0 %v15191_v45 }
 0x19a   :  { %15189 = vst [vmem:[#allocation80_spill] sm:$0xff] %v12215_v22  ;;  %v12220_v7 = vadd.f32 %v2778_v59, %v1642_v9  ;;  %8815 = vmatprep.mubr.f32.mxu0 %v15193_v4  ;;  %9034 = vmatmul.mubr.f32.gmra.mxu1 %v15194_v29  ;;  %v1692_v30 = vadd.f32 %v11870_v37, %v8438_v26  ;;  %v15197_v9 = vld [vmem:[#allocation102_spill] sm:$0xff]  ;;  %v15199_v22 = vld [vmem:[#allocation104_spill] sm:$0xff] }
 0x19b   :  { %v8659_v13 = vpop.f32.mrf.mxu1  ;;  %v1681_v63 = vpop.f32.mrf.mxu0  ;;  %9036 = vmatprep.mubr.f32.mxu1 %v15196_v42  ;;  %v15206_v45 = vand.u32 4294901760, %v15197_v9  ;;  %v15208_v4 = vand.u32 4294901760, %v15199_v22 }
 0x19c   :  { %15192 = vst [vmem:[#allocation82_spill] sm:$0xff] %v12220_v7  ;;  %v12227_v39 = vadd.f32 %v8659_v13, %v1672_v56  ;;  %v1682_v36 = vadd.f32 %v11870_v37, %v1681_v63 }
 0x19d   :  { %v2790_v38 = vpop.f32.mrf.mxu1  ;;  %v8441_v32 = vpop.f32.mrf.mxu0  ;;  %8816 = vmatmul.mubr.f32.gmra.mxu0 %v15197_v9 }
 0x19e   :  { %15195 = vst [vmem:[#allocation84_spill] sm:$0xff] %v12227_v39  ;;  %v12232_v59 = vadd.f32 %v2790_v38, %v1662_v2  ;;  %8818 = vmatprep.mubr.f32.mxu0 %v15199_v22  ;;  %9037 = vmatmul.mubr.f32.gmra.mxu1 %v15200_v53  ;;  %v1712_v13 = vadd.f32 %v11870_v37, %v8441_v32  ;;  %v15203_v2 = vld [vmem:[#allocation106_spill] sm:$0xff]  ;;  %v15205_v39 = vld [vmem:[#allocation109_spill] sm:$0xff] }
 0x19f   :  { %v8662_v7 = vpop.f32.mrf.mxu1  ;;  %v1701_v56 = vpop.f32.mrf.mxu0  ;;  %9039 = vmatprep.mubr.f32.mxu1 %v15202_v57  ;;  %v15212_v9 = vand.u32 4294901760, %v15203_v2  ;;  %v15214_v22 = vand.u32 4294901760, %v15205_v39 }
 0x1a0   :  { %15198 = vst [vmem:[#allocation86_spill] sm:$0xff] %v12232_v59  ;;  %v12239_v26 = vadd.f32 %v8662_v7, %v1692_v30  ;;  %v1702_v63 = vadd.f32 %v11870_v37, %v1701_v56 }
 0x1a1   :  { %v2802_v29 = vpop.f32.mrf.mxu1  ;;  %v8444_v42 = vpop.f32.mrf.mxu0  ;;  %8819 = vmatmul.mubr.f32.gmra.mxu0 %v15203_v2 }
 0x1a2   :  { %15201 = vst [vmem:[#allocation89_spill] sm:$0xff] %v12239_v26  ;;  %v12244_v38 = vadd.f32 %v2802_v29, %v1682_v36  ;;  %8821 = vmatprep.mubr.f32.mxu0 %v15205_v39  ;;  %9040 = vmatmul.mubr.f32.gmra.mxu1 %v15206_v45  ;;  %v1732_v7 = vadd.f32 %v11870_v37, %v8444_v42  ;;  %v15209_v36 = vld [vmem:[#allocation110_spill] sm:$0xff]  ;;  %v15211_v26 = vld [vmem:[#allocation112_spill] sm:$0xff] }
 0x1a3   :  { %v8665_v59 = vpop.f32.mrf.mxu1  ;;  %v1721_v30 = vpop.f32.mrf.mxu0  ;;  %9042 = vmatprep.mubr.f32.mxu1 %v15208_v4  ;;  %v15218_v2 = vand.u32 4294901760, %v15209_v36  ;;  %v15220_v39 = vand.u32 4294901760, %v15211_v26 }
 0x1a4   :  { %15204 = vst [vmem:[#allocation90_spill] sm:$0xff] %v12244_v38  ;;  %v12251_v32 = vadd.f32 %v8665_v59, %v1712_v13  ;;  %v1722_v56 = vadd.f32 %v11870_v37, %v1721_v30 }
 0x1a5   :  { %v2814_v53 = vpop.f32.mrf.mxu1  ;;  %v8447_v57 = vpop.f32.mrf.mxu0  ;;  %8822 = vmatmul.mubr.f32.gmra.mxu0 %v15209_v36 }
 0x1a6   :  { %15207 = vst [vmem:[#allocation92_spill] sm:$0xff] %v12251_v32  ;;  %v12256_v29 = vadd.f32 %v2814_v53, %v1702_v63  ;;  %8824 = vmatprep.mubr.f32.mxu0 %v15211_v26  ;;  %9043 = vmatmul.mubr.f32.gmra.mxu1 %v15212_v9  ;;  %v1752_v59 = vadd.f32 %v11870_v37, %v8447_v57  ;;  %v15215_v63 = vld [vmem:[#allocation114_spill] sm:$0xff]  ;;  %v15217_v32 = vld [vmem:[#allocation116_spill] sm:$0xff] }
 0x1a7   :  { %v8668_v38 = vpop.f32.mrf.mxu1  ;;  %v1741_v13 = vpop.f32.mrf.mxu0  ;;  %9045 = vmatprep.mubr.f32.mxu1 %v15214_v22  ;;  %v15224_v36 = vand.u32 4294901760, %v15215_v63  ;;  %v15226_v26 = vand.u32 4294901760, %v15217_v32 }
 0x1a8   :  { %15210 = vst [vmem:[#allocation94_spill] sm:$0xff] %v12256_v29  ;;  %v12263_v42 = vadd.f32 %v8668_v38, %v1732_v7  ;;  %v1742_v30 = vadd.f32 %v11870_v37, %v1741_v13 }
 0x1a9   :  { %v2826_v45 = vpop.f32.mrf.mxu1  ;;  %v8450_v4 = vpop.f32.mrf.mxu0  ;;  %8825 = vmatmul.mubr.f32.gmra.mxu0 %v15215_v63 }
 0x1aa   :  { %15213 = vst [vmem:[#allocation95_spill] sm:$0xff] %v12263_v42  ;;  %v12268_v53 = vadd.f32 %v2826_v45, %v1722_v56  ;;  %8827 = vmatprep.mubr.f32.mxu0 %v15217_v32  ;;  %9046 = vmatmul.mubr.f32.gmra.mxu1 %v15218_v2  ;;  %v1772_v38 = vadd.f32 %v11870_v37, %v8450_v4  ;;  %v15221_v56 = vld [vmem:[#allocation118_spill] sm:$0xff]  ;;  %v15223_v42 = vld [vmem:[#allocation120_spill] sm:$0xff] }
 0x1ab   :  { %v8671_v29 = vpop.f32.mrf.mxu1  ;;  %v1761_v7 = vpop.f32.mrf.mxu0  ;;  %9048 = vmatprep.mubr.f32.mxu1 %v15220_v39  ;;  %v15230_v63 = vand.u32 4294901760, %v15221_v56  ;;  %v15232_v32 = vand.u32 4294901760, %v15223_v42 }
 0x1ac   :  { %15216 = vst [vmem:[#allocation99_spill] sm:$0xff] %v12268_v53  ;;  %v12275_v57 = vadd.f32 %v8671_v29, %v1752_v59  ;;  %v1762_v13 = vadd.f32 %v11870_v37, %v1761_v7 }
 0x1ad   :  { %v2838_v9 = vpop.f32.mrf.mxu1  ;;  %v8453_v22 = vpop.f32.mrf.mxu0  ;;  %8828 = vmatmul.mubr.f32.gmra.mxu0 %v15221_v56 }
 0x1ae   :  { %15219 = vst [vmem:[#allocation100_spill] sm:$0xff] %v12275_v57  ;;  %v12280_v45 = vadd.f32 %v2838_v9, %v1742_v30  ;;  %8830 = vmatprep.mubr.f32.mxu0 %v15223_v42  ;;  %9049 = vmatmul.mubr.f32.gmra.mxu1 %v15224_v36  ;;  %v1792_v29 = vadd.f32 %v11870_v37, %v8453_v22  ;;  %v15227_v30 = vld [vmem:[#allocation123_spill] sm:$0xff]  ;;  %v15229_v57 = vld [vmem:[#allocation124_spill] sm:$0xff] }
 0x1af   :  { %v8674_v53 = vpop.f32.mrf.mxu1  ;;  %v1781_v59 = vpop.f32.mrf.mxu0  ;;  %9051 = vmatprep.mubr.f32.mxu1 %v15226_v26  ;;  %v15236_v56 = vand.u32 4294901760, %v15227_v30  ;;  %v15238_v42 = vand.u32 4294901760, %v15229_v57 }
 0x1b0   :  { %15222 = vst [vmem:[#allocation102_spill] sm:$0xff] %v12280_v45  ;;  %v12287_v4 = vadd.f32 %v8674_v53, %v1772_v38  ;;  %v1782_v7 = vadd.f32 %v11870_v37, %v1781_v59 }
 0x1b1   :  { %v2850_v2 = vpop.f32.mrf.mxu1  ;;  %v8456_v39 = vpop.f32.mrf.mxu0  ;;  %8831 = vmatmul.mubr.f32.gmra.mxu0 %v15227_v30 }
 0x1b2   :  { %15225 = vst [vmem:[#allocation104_spill] sm:$0xff] %v12287_v4  ;;  %v12292_v9 = vadd.f32 %v2850_v2, %v1762_v13  ;;  %8833 = vmatprep.mubr.f32.mxu0 %v15229_v57  ;;  %9052 = vmatmul.mubr.f32.gmra.mxu1 %v15230_v63  ;;  %v1812_v53 = vadd.f32 %v11870_v37, %v8456_v39  ;;  %v15233_v13 = vld [vmem:[#allocation126_spill] sm:$0xff]  ;;  %v15235_v4 = vld [vmem:[#allocation129_spill] sm:$0xff] }
 0x1b3   :  { %v8677_v45 = vpop.f32.mrf.mxu1  ;;  %v1801_v38 = vpop.f32.mrf.mxu0  ;;  %9054 = vmatprep.mubr.f32.mxu1 %v15232_v32  ;;  %v15242_v30 = vand.u32 4294901760, %v15233_v13  ;;  %v15244_v57 = vand.u32 4294901760, %v15235_v4 }
 0x1b4   :  { %15228 = vst [vmem:[#allocation106_spill] sm:$0xff] %v12292_v9  ;;  %v12299_v22 = vadd.f32 %v8677_v45, %v1792_v29  ;;  %v1802_v59 = vadd.f32 %v11870_v37, %v1801_v38 }
 0x1b5   :  { %v2862_v36 = vpop.f32.mrf.mxu1  ;;  %v8459_v26 = vpop.f32.mrf.mxu0  ;;  %8834 = vmatmul.mubr.f32.gmra.mxu0 %v15233_v13 }
 0x1b6   :  { %15231 = vst [vmem:[#allocation109_spill] sm:$0xff] %v12299_v22  ;;  %v12304_v2 = vadd.f32 %v2862_v36, %v1782_v7  ;;  %8836 = vmatprep.mubr.f32.mxu0 %v15235_v4  ;;  %9055 = vmatmul.mubr.f32.gmra.mxu1 %v15236_v56  ;;  %v1832_v45 = vadd.f32 %v11870_v37, %v8459_v26  ;;  %v15239_v7 = vld [vmem:[#allocation130_spill] sm:$0xff]  ;;  %v15241_v22 = vld [vmem:[#allocation132_spill] sm:$0xff] }
 0x1b7   :  { %v8680_v9 = vpop.f32.mrf.mxu1  ;;  %v1821_v29 = vpop.f32.mrf.mxu0  ;;  %9057 = vmatprep.mubr.f32.mxu1 %v15238_v42  ;;  %v15248_v13 = vand.u32 4294901760, %v15239_v7  ;;  %v15250_v4 = vand.u32 4294901760, %v15241_v22 }
 0x1b8   :  { %15234 = vst [vmem:[#allocation110_spill] sm:$0xff] %v12304_v2  ;;  %v12311_v39 = vadd.f32 %v8680_v9, %v1812_v53  ;;  %v1822_v38 = vadd.f32 %v11870_v37, %v1821_v29 }
 0x1b9   :  { %v2874_v63 = vpop.f32.mrf.mxu1  ;;  %v8462_v32 = vpop.f32.mrf.mxu0  ;;  %8837 = vmatmul.mubr.f32.gmra.mxu0 %v15239_v7 }
 0x1ba   :  { %15237 = vst [vmem:[#allocation112_spill] sm:$0xff] %v12311_v39  ;;  %v12316_v36 = vadd.f32 %v2874_v63, %v1802_v59  ;;  %8839 = vmatprep.mubr.f32.mxu0 %v15241_v22  ;;  %9058 = vmatmul.mubr.f32.gmra.mxu1 %v15242_v30  ;;  %v1852_v9 = vadd.f32 %v11870_v37, %v8462_v32  ;;  %v15245_v59 = vld [vmem:[#allocation134_spill] sm:$0xff]  ;;  %v15247_v39 = vld [vmem:[#allocation136_spill] sm:$0xff] }
 0x1bb   :  { %v8683_v2 = vpop.f32.mrf.mxu1  ;;  %v1841_v53 = vpop.f32.mrf.mxu0  ;;  %9060 = vmatprep.mubr.f32.mxu1 %v15244_v57  ;;  %v15254_v7 = vand.u32 4294901760, %v15245_v59  ;;  %v15256_v22 = vand.u32 4294901760, %v15247_v39 }
 0x1bc   :  { %15240 = vst [vmem:[#allocation114_spill] sm:$0xff] %v12316_v36  ;;  %v12323_v26 = vadd.f32 %v8683_v2, %v1832_v45  ;;  %v1842_v29 = vadd.f32 %v11870_v37, %v1841_v53 }
 0x1bd   :  { %v2886_v56 = vpop.f32.mrf.mxu1  ;;  %v8465_v42 = vpop.f32.mrf.mxu0  ;;  %8840 = vmatmul.mubr.f32.gmra.mxu0 %v15245_v59 }
 0x1be   :  { %15243 = vst [vmem:[#allocation116_spill] sm:$0xff] %v12323_v26  ;;  %v12328_v63 = vadd.f32 %v2886_v56, %v1822_v38  ;;  %8842 = vmatprep.mubr.f32.mxu0 %v15247_v39  ;;  %9061 = vmatmul.mubr.f32.gmra.mxu1 %v15248_v13  ;;  %v1872_v2 = vadd.f32 %v11870_v37, %v8465_v42  ;;  %v15251_v38 = vld [vmem:[#allocation138_spill] sm:$0xff]  ;;  %v15253_v26 = vld [vmem:[#allocation140_spill] sm:$0xff] }
 0x1bf   :  { %v8686_v36 = vpop.f32.mrf.mxu1  ;;  %v1861_v45 = vpop.f32.mrf.mxu0  ;;  %9063 = vmatprep.mubr.f32.mxu1 %v15250_v4  ;;  %v15260_v59 = vand.u32 4294901760, %v15251_v38  ;;  %v15262_v39 = vand.u32 4294901760, %v15253_v26 }
 0x1c0   :  { %15246 = vst [vmem:[#allocation118_spill] sm:$0xff] %v12328_v63  ;;  %v12335_v32 = vadd.f32 %v8686_v36, %v1852_v9  ;;  %v1862_v53 = vadd.f32 %v11870_v37, %v1861_v45 }
 0x1c1   :  { %v2898_v30 = vpop.f32.mrf.mxu1  ;;  %v8468_v57 = vpop.f32.mrf.mxu0  ;;  %8843 = vmatmul.mubr.f32.gmra.mxu0 %v15251_v38 }
 0x1c2   :  { %15249 = vst [vmem:[#allocation120_spill] sm:$0xff] %v12335_v32  ;;  %v12340_v56 = vadd.f32 %v2898_v30, %v1842_v29  ;;  %8845 = vmatprep.mubr.f32.mxu0 %v15253_v26  ;;  %9064 = vmatmul.mubr.f32.gmra.mxu1 %v15254_v7  ;;  %v1892_v36 = vadd.f32 %v11870_v37, %v8468_v57  ;;  %v15257_v29 = vld [vmem:[#allocation143_spill] sm:$0xff]  ;;  %v15259_v32 = vld [vmem:[#allocation144_spill] sm:$0xff] }
 0x1c3   :  { %v8689_v63 = vpop.f32.mrf.mxu1  ;;  %v1881_v9 = vpop.f32.mrf.mxu0  ;;  %9066 = vmatprep.mubr.f32.mxu1 %v15256_v22  ;;  %v15266_v38 = vand.u32 4294901760, %v15257_v29  ;;  %v15268_v26 = vand.u32 4294901760, %v15259_v32 }
 0x1c4   :  { %15252 = vst [vmem:[#allocation123_spill] sm:$0xff] %v12340_v56  ;;  %v12347_v42 = vadd.f32 %v8689_v63, %v1872_v2  ;;  %v1882_v45 = vadd.f32 %v11870_v37, %v1881_v9 }
 0x1c5   :  { %v2910_v13 = vpop.f32.mrf.mxu1  ;;  %v8471_v4 = vpop.f32.mrf.mxu0  ;;  %8846 = vmatmul.mubr.f32.gmra.mxu0 %v15257_v29 }
 0x1c6   :  { %15255 = vst [vmem:[#allocation124_spill] sm:$0xff] %v12347_v42  ;;  %v12352_v30 = vadd.f32 %v2910_v13, %v1862_v53  ;;  %8848 = vmatprep.mubr.f32.mxu0 %v15259_v32  ;;  %9067 = vmatmul.mubr.f32.gmra.mxu1 %v15260_v59  ;;  %v1912_v63 = vadd.f32 %v11870_v37, %v8471_v4  ;;  %v15263_v53 = vld [vmem:[#allocation146_spill] sm:$0xff]  ;;  %v15265_v42 = vld [vmem:[#allocation149_spill] sm:$0xff] }
 0x1c7   :  { %v8692_v56 = vpop.f32.mrf.mxu1  ;;  %v1901_v2 = vpop.f32.mrf.mxu0  ;;  %9069 = vmatprep.mubr.f32.mxu1 %v15262_v39  ;;  %v15272_v29 = vand.u32 4294901760, %v15263_v53 }
 0x1c8   :  { %15258 = vst [vmem:[#allocation126_spill] sm:$0xff] %v12352_v30  ;;  %v12359_v57 = vadd.f32 %v8692_v56, %v1892_v36  ;;  %v1902_v9 = vadd.f32 %v11870_v37, %v1901_v2 }
 0x1c9   :  { %v2922_v7 = vpop.f32.mrf.mxu1  ;;  %v8474_v22 = vpop.f32.mrf.mxu0  ;;  %8849 = vmatmul.mubr.f32.gmra.mxu0 %v15263_v53 }
 0x1ca   :  { %15261 = vst [vmem:[#allocation129_spill] sm:$0xff] %v12359_v57  ;;  %v12364_v13 = vadd.f32 %v2922_v7, %v1882_v45  ;;  %8851 = vmatprep.mubr.f32.mxu0 %v15265_v42  ;;  %9070 = vmatmul.mubr.f32.gmra.mxu1 %v15266_v38  ;;  %v1932_v56 = vadd.f32 %v11870_v37, %v8474_v22  ;;  %v15269_v45 = vld [vmem:[#allocation150_spill] sm:$0xff]  ;;  %v15271_v57 = vld [vmem:[#allocation153_spill] sm:$0xff]  ;;  %v15274_v22 = vand.u32 4294901760, %v15265_v42 }
 0x1cb   :  { %v8695_v30 = vpop.f32.mrf.mxu1  ;;  %v1921_v36 = vpop.f32.mrf.mxu0  ;;  %9072 = vmatprep.mubr.f32.mxu1 %v15268_v26  ;;  %v12384_v37 = vld [vmem:[%s14082_s2] ss:$0 sm:$0xff]  ;;  %v15280_v42 = vand.u32 4294901760, %v15271_v57 }
 0x1cc   :  { %15264 = vst [vmem:[#allocation130_spill] sm:$0xff] %v12364_v13  ;;  %v12371_v4 = vadd.f32 %v8695_v30, %v1912_v63  ;;  %v1922_v32 = vadd.f32 %v12384_v37, %v1921_v36  ;;  %v15275_v26 = vld [vmem:[#allocation154_spill] sm:$0xff] }
 0x1cd   :  { %v2934_v59 = vpop.f32.mrf.mxu1  ;;  %v8477_v39 = vpop.f32.mrf.mxu0  ;;  %8852 = vmatmul.mubr.f32.gmra.mxu0 %v15269_v45 }
 0x1ce   :  { %15267 = vst [vmem:[#allocation132_spill] sm:$0xff] %v12371_v4  ;;  %v12376_v7 = vadd.f32 %v2934_v59, %v1902_v9  ;;  %8854 = vmatprep.mubr.f32.mxu0 %v15271_v57  ;;  %9073 = vmatmul.mubr.f32.gmra.mxu1 %v15272_v29  ;;  %v1952_v30 = vadd.f32 %v12384_v37, %v8477_v39  ;;  %v15277_v29 = vld [vmem:[#allocation155_spill] sm:$0xff]  ;;  %v15283_v4 = vld [vmem:[#allocation160_spill] sm:$0xff] }
 0x1cf   :  { %v8698_v13 = vpop.f32.mrf.mxu1  ;;  %v1941_v63 = vpop.f32.mrf.mxu0  ;;  %9075 = vmatprep.mubr.f32.mxu1 %v15274_v22  ;;  %v15286_v57 = vand.u32 4294901760, %v15277_v29 }
 0x1d0   :  { %15270 = vst [vmem:[#allocation134_spill] sm:$0xff] %v12376_v7  ;;  %v12388_v2 = vadd.f32 %v8698_v13, %v1932_v56  ;;  %v15278_v7 = vand.u32 4294901760, %v15269_v45  ;;  %v1942_v36 = vadd.f32 %v12384_v37, %v1941_v63  ;;  %v15284_v45 = vand.u32 4294901760, %v15275_v26 }
 0x1d1   :  { %v2946_v38 = vpop.f32.mrf.mxu1  ;;  %v8480_v9 = vpop.f32.mrf.mxu0  ;;  %8855 = vmatmul.mubr.f32.gmra.mxu0 %v15275_v26 }
 0x1d2   :  { %15273 = vst [vmem:[#allocation136_spill] sm:$0xff] %v12388_v2  ;;  %v12393_v53 = vadd.f32 %v2946_v38, %v1922_v32  ;;  %8857 = vmatprep.mubr.f32.mxu0 %v15277_v29  ;;  %9076 = vmatmul.mubr.f32.gmra.mxu1 %v15278_v7  ;;  %v1972_v13 = vadd.f32 %v12384_v37, %v8480_v9  ;;  %v15281_v32 = vld [vmem:[#allocation158_spill] sm:$0xff]  ;;  %v15292_v29 = vand.u32 4294901760, %v15283_v4 }
 0x1d3   :  { %v8701_v59 = vpop.f32.mrf.mxu1  ;;  %v1961_v56 = vpop.f32.mrf.mxu0  ;;  %9078 = vmatprep.mubr.f32.mxu1 %v15280_v42  ;;  %v15290_v26 = vand.u32 4294901760, %v15281_v32 }
 0x1d4   :  { %15276 = vst [vmem:[#allocation138_spill] sm:$0xff] %v12393_v53  ;;  %v12400_v39 = vadd.f32 %v8701_v59, %v1952_v30  ;;  %v1962_v7 = vadd.f32 %v12384_v37, %v1961_v56 }
 0x1d5   :  { %v2958_v22 = vpop.f32.mrf.mxu1  ;;  %v8483_v2 = vpop.f32.mrf.mxu0  ;;  %8858 = vmatmul.mubr.f32.gmra.mxu0 %v15281_v32 }
 0x1d6   :  { %15279 = vst [vmem:[#allocation140_spill] sm:$0xff] %v12400_v39  ;;  %v12405_v38 = vadd.f32 %v2958_v22, %v1942_v36  ;;  %8860 = vmatprep.mubr.f32.mxu0 %v15283_v4  ;;  %9079 = vmatmul.mubr.f32.gmra.mxu1 %v15284_v45  ;;  %v1992_v30 = vadd.f32 %v12384_v37, %v8483_v2  ;;  %v15287_v36 = vld [vmem:[#allocation163_spill] sm:$0xff]  ;;  %v15289_v39 = vld [vmem:[#allocation164_spill] sm:$0xff] }
 0x1d7   :  { %v8704_v53 = vpop.f32.mrf.mxu1  ;;  %v1981_v63 = vpop.f32.mrf.mxu0  ;;  %9081 = vmatprep.mubr.f32.mxu1 %v15286_v57  ;;  %v15296_v32 = vand.u32 4294901760, %v15287_v36  ;;  %v15298_v4 = vand.u32 4294901760, %v15289_v39 }
 0x1d8   :  { %15282 = vst [vmem:[#allocation143_spill] sm:$0xff] %v12405_v38  ;;  %v12412_v9 = vadd.f32 %v8704_v53, %v1972_v13  ;;  %v1982_v2 = vadd.f32 %v12384_v37, %v1981_v63 }
 0x1d9   :  { %v2970_v59 = vpop.f32.mrf.mxu1  ;;  %v8486_v42 = vpop.f32.mrf.mxu0  ;;  %8861 = vmatmul.mubr.f32.gmra.mxu0 %v15287_v36 }
 0x1da   :  { %15285 = vst [vmem:[#allocation144_spill] sm:$0xff] %v12412_v9  ;;  %v12417_v22 = vadd.f32 %v2970_v59, %v1962_v7  ;;  %8863 = vmatprep.mubr.f32.mxu0 %v15289_v39  ;;  %9082 = vmatmul.mubr.f32.gmra.mxu1 %v15290_v26  ;;  %v2012_v53 = vadd.f32 %v12384_v37, %v8486_v42  ;;  %v15293_v7 = vld [vmem:[#allocation166_spill] sm:$0xff]  ;;  %v15295_v9 = vld [vmem:[#allocation169_spill] sm:$0xff] }
 0x1db   :  { %v8707_v38 = vpop.f32.mrf.mxu1  ;;  %v2001_v13 = vpop.f32.mrf.mxu0  ;;  %9084 = vmatprep.mubr.f32.mxu1 %v15292_v29  ;;  %v15302_v36 = vand.u32 4294901760, %v15293_v7  ;;  %v15304_v39 = vand.u32 4294901760, %v15295_v9 }
 0x1dc   :  { %15288 = vst [vmem:[#allocation146_spill] sm:$0xff] %v12417_v22  ;;  %v12424_v56 = vadd.f32 %v8707_v38, %v1992_v30  ;;  %v2002_v63 = vadd.f32 %v12384_v37, %v2001_v13 }
 0x1dd   :  { %v2982_v45 = vpop.f32.mrf.mxu1  ;;  %v8489_v57 = vpop.f32.mrf.mxu0  ;;  %8864 = vmatmul.mubr.f32.gmra.mxu0 %v15293_v7 }
 0x1de   :  { %15291 = vst [vmem:[#allocation149_spill] sm:$0xff] %v12424_v56  ;;  %v12429_v59 = vadd.f32 %v2982_v45, %v1982_v2  ;;  %8866 = vmatprep.mubr.f32.mxu0 %v15295_v9  ;;  %9085 = vmatmul.mubr.f32.gmra.mxu1 %v15296_v32  ;;  %v2032_v38 = vadd.f32 %v12384_v37, %v8489_v57  ;;  %v15299_v2 = vld [vmem:[#allocation170_spill] sm:$0xff]  ;;  %v15301_v56 = vld [vmem:[#allocation172_spill] sm:$0xff] }
 0x1df   :  { %v8710_v22 = vpop.f32.mrf.mxu1  ;;  %v2021_v30 = vpop.f32.mrf.mxu0  ;;  %9087 = vmatprep.mubr.f32.mxu1 %v15298_v4  ;;  %v15308_v7 = vand.u32 4294901760, %v15299_v2  ;;  %v15310_v9 = vand.u32 4294901760, %v15301_v56 }
 0x1e0   :  { %15294 = vst [vmem:[#allocation150_spill] sm:$0xff] %v12429_v59  ;;  %v12436_v42 = vadd.f32 %v8710_v22, %v2012_v53  ;;  %v2022_v13 = vadd.f32 %v12384_v37, %v2021_v30 }
 0x1e1   :  { %v2994_v26 = vpop.f32.mrf.mxu1  ;;  %v8492_v29 = vpop.f32.mrf.mxu0  ;;  %8867 = vmatmul.mubr.f32.gmra.mxu0 %v15299_v2 }
 0x1e2   :  { %15297 = vst [vmem:[#allocation153_spill] sm:$0xff] %v12436_v42  ;;  %v12441_v45 = vadd.f32 %v2994_v26, %v2002_v63  ;;  %8869 = vmatprep.mubr.f32.mxu0 %v15301_v56  ;;  %9088 = vmatmul.mubr.f32.gmra.mxu1 %v15302_v36  ;;  %v2052_v22 = vadd.f32 %v12384_v37, %v8492_v29  ;;  %v15305_v63 = vld [vmem:[#allocation174_spill] sm:$0xff]  ;;  %v15307_v42 = vld [vmem:[#allocation175_spill] sm:$0xff] }
 0x1e3   :  { %v8713_v59 = vpop.f32.mrf.mxu1  ;;  %v2041_v53 = vpop.f32.mrf.mxu0  ;;  %9090 = vmatprep.mubr.f32.mxu1 %v15304_v39  ;;  %v15314_v2 = vand.u32 4294901760, %v15305_v63  ;;  %v15316_v56 = vand.u32 4294901760, %v15307_v42 }
 0x1e4   :  { %15300 = vst [vmem:[#allocation154_spill] sm:$0xff] %v12441_v45  ;;  %v12448_v57 = vadd.f32 %v8713_v59, %v2032_v38  ;;  %v2042_v30 = vadd.f32 %v12384_v37, %v2041_v53 }
 0x1e5   :  { %v3006_v32 = vpop.f32.mrf.mxu1  ;;  %v8495_v4 = vpop.f32.mrf.mxu0  ;;  %8870 = vmatmul.mubr.f32.gmra.mxu0 %v15305_v63 }
 0x1e6   :  { %15303 = vst [vmem:[#allocation155_spill] sm:$0xff] %v12448_v57  ;;  %v12453_v26 = vadd.f32 %v3006_v32, %v2022_v13  ;;  %8872 = vmatprep.mubr.f32.mxu0 %v15307_v42  ;;  %9091 = vmatmul.mubr.f32.gmra.mxu1 %v15308_v7  ;;  %v2072_v59 = vadd.f32 %v12384_v37, %v8495_v4  ;;  %v15311_v13 = vld [vmem:[#allocation179_spill] sm:$0xff]  ;;  %v15313_v57 = vld [vmem:[#allocation180_spill] sm:$0xff] }
 0x1e7   :  { %v8716_v45 = vpop.f32.mrf.mxu1  ;;  %v2061_v38 = vpop.f32.mrf.mxu0  ;;  %9093 = vmatprep.mubr.f32.mxu1 %v15310_v9  ;;  %v15320_v63 = vand.u32 4294901760, %v15311_v13  ;;  %v15322_v42 = vand.u32 4294901760, %v15313_v57 }
 0x1e8   :  { %15306 = vst [vmem:[#allocation158_spill] sm:$0xff] %v12453_v26  ;;  %v12460_v29 = vadd.f32 %v8716_v45, %v2052_v22  ;;  %v2062_v53 = vadd.f32 %v12384_v37, %v2061_v38 }
 0x1e9   :  { %v3018_v36 = vpop.f32.mrf.mxu1  ;;  %v8498_v39 = vpop.f32.mrf.mxu0  ;;  %8873 = vmatmul.mubr.f32.gmra.mxu0 %v15311_v13 }
 0x1ea   :  { %15309 = vst [vmem:[#allocation160_spill] sm:$0xff] %v12460_v29  ;;  %v12465_v32 = vadd.f32 %v3018_v36, %v2042_v30  ;;  %8875 = vmatprep.mubr.f32.mxu0 %v15313_v57  ;;  %9094 = vmatmul.mubr.f32.gmra.mxu1 %v15314_v2  ;;  %v2092_v45 = vadd.f32 %v12384_v37, %v8498_v39  ;;  %v15317_v30 = vld [vmem:[#allocation182_spill] sm:$0xff]  ;;  %v15319_v29 = vld [vmem:[#allocation184_spill] sm:$0xff] }
 0x1eb   :  { %v8719_v26 = vpop.f32.mrf.mxu1  ;;  %v2081_v22 = vpop.f32.mrf.mxu0  ;;  %9096 = vmatprep.mubr.f32.mxu1 %v15316_v56  ;;  %v15328_v57 = vand.u32 4294901760, %v15319_v29 }
 0x1ec   :  { %15312 = vst [vmem:[#allocation163_spill] sm:$0xff] %v12465_v32  ;;  %v12472_v4 = vadd.f32 %v8719_v26, %v2072_v59  ;;  %v2082_v38 = vadd.f32 %v12384_v37, %v2081_v22  ;;  %v15327_v22 = vand.u32 4294901760, %v15317_v30 }
 0x1ed   :  { %v3030_v7 = vpop.f32.mrf.mxu1  ;;  %v8501_v9 = vpop.f32.mrf.mxu0  ;;  %8876 = vmatmul.mubr.f32.gmra.mxu0 %v15317_v30  ;;  %v15333_v30 = vld [vmem:[#allocation192_spill] sm:$0xff] }
 0x1ee   :  { %15315 = vst [vmem:[#allocation164_spill] sm:$0xff] %v12472_v4  ;;  %v12477_v36 = vadd.f32 %v3030_v7, %v2062_v53  ;;  %8878 = vmatprep.mubr.f32.mxu0 %v15319_v29  ;;  %9097 = vmatmul.mubr.f32.gmra.mxu1 %v15320_v63  ;;  %v2112_v26 = vadd.f32 %v12384_v37, %v8501_v9  ;;  %v15323_v53 = vld [vmem:[#allocation186_spill] sm:$0xff]  ;;  %v15326_v63 = vld [vmem:[#allocation189_spill] sm:$0xff] }
 0x1ef   :  { %v8722_v32 = vpop.f32.mrf.mxu1  ;;  %v2101_v59 = vpop.f32.mrf.mxu0  ;;  %9099 = vmatprep.mubr.f32.mxu1 %v15322_v42  ;;  %v15329_v42 = vld [vmem:[#allocation213_spill] sm:$0xff]  ;;  %v15336_v29 = vand.u32 4294901760, %v15326_v63 }
 0x1f0   :  { %15318 = vst [vmem:[#allocation166_spill] sm:$0xff] %v12477_v36  ;;  %v12484_v39 = vadd.f32 %v8722_v32, %v2092_v45  ;;  %v15325_v36 = vld [vmem:[#allocation210_spill] sm:$0xff]  ;;  %v2102_v32 = vadd.f32 %v12384_v37, %v2101_v59  ;;  %v15334_v37 = vand.u32 4294901760, %v15323_v53 }
 0x1f1   :  { %v3042_v2 = vpop.f32.mrf.mxu1  ;;  %v8736_v56 = vpop.f32.mrf.mxu0  ;;  %8879 = vmatmul.mubr.f32.gmra.mxu0 %v15323_v53 }
 0x1f2   :  { %15321 = vst [vmem:[#allocation169_spill] sm:$0xff] %v12484_v39  ;;  %v12489_v7 = vadd.f32 %v3042_v2, %v2082_v38  ;;  %v3148_v4 = vadd.f32 %v8736_v56, %v15325_v36  ;;  %8881 = vmatprep.mubr.f32.mxu0 %v15326_v63  ;;  %9100 = vmatmul.mubr.f32.gmra.mxu1 %v15327_v22  ;;  %v15332_v56 = vld [vmem:[#allocation216_spill] sm:$0xff]  ;;  %v15344_v63 = vand.u32 4294901760, %v15333_v30 }
 0x1f3   :  { %v8725_v13 = vpop.f32.mrf.mxu1  ;;  %v3140_v45 = vpop.f32.mrf.mxu0  ;;  %9102 = vmatprep.mubr.f32.mxu1 %v15328_v57 }
 0x1f4   :  { %15324 = vst [vmem:[#allocation170_spill] sm:$0xff] %v12489_v7  ;;  %v12496_v9 = vadd.f32 %v8725_v13, %v2112_v26  ;;  %v3141_v39 = vadd.f32 %v3140_v45, %v15329_v42  ;;  %v15330_v7 = vld [vmem:[#allocation190_spill] sm:$0xff]  ;;  %v15337_v13 = vld [vmem:[#allocation220_spill] sm:$0xff] }
 0x1f5   :  { %v3054_v38 = vpop.f32.mrf.mxu1  ;;  %v8739_v2 = vpop.f32.mrf.mxu0  ;;  %8882 = vmatmul.mubr.f32.gmra.mxu0 %v15330_v7 }
 0x1f6   :  { %v12502_v36 = vadd.f32 %v3054_v38, %v2102_v32  ;;  %v3162_v25 = vadd.f32 %v8739_v2, %v15332_v56  ;;  %8884 = vmatprep.mubr.f32.mxu0 %v15333_v30  ;;  %9103 = vmatmul.mubr.f32.gmra.mxu1 %v15334_v37  ;;  %v15338_v32 = vld [vmem:[#allocation194_spill] sm:$0xff]  ;;  %v15342_v37 = vand.u32 4294901760, %v15330_v7 }
 0x1f7   :  { %v8960_v22 = vpop.f32.mrf.mxu1  ;;  %v3154_v26 = vpop.f32.mrf.mxu0  ;;  %9105 = vmatprep.mubr.f32.mxu1 %v15336_v29  ;;  %v15340_v2 = vld [vmem:[#allocation222_spill] sm:$0xff] }
 0x1f8   :  { %15331 = vst [vmem:[#allocation172_spill] sm:$0xff] %v12502_v36  ;;  %v12508_v59 = vadd.f32 %v8960_v22, %v3148_v4  ;;  %v3155_v45 = vadd.f32 %v3154_v26, %v15337_v13  ;;  %v15341_v36 = vld [vmem:[#allocation196_spill] sm:$0xff]  ;;  %v15345_v26 = vld [vmem:[#allocation226_spill] sm:$0xff] }
 0x1f9   :  { %v4218_v57 = vpop.f32.mrf.mxu1  ;;  %v8742_v42 = vpop.f32.mrf.mxu0  ;;  %8885 = vmatmul.mubr.f32.gmra.mxu0 %v15338_v32  ;;  %v15351_v30 = vand.u32 4294901760, %v15341_v36 }
 0x1fa   :  { %15335 = vst [vmem:[#allocation174_spill] sm:$0xff] %v12508_v59  ;;  %v12514_v38 = vadd.f32 %v4218_v57, %v3141_v39  ;;  %v3176_v56 = vadd.f32 %v8742_v42, %v15340_v2  ;;  %8887 = vmatprep.mubr.f32.mxu0 %v15341_v36  ;;  %9106 = vmatmul.mubr.f32.gmra.mxu1 %v15342_v37  ;;  %v15346_v39 = vld [vmem:[#allocation199_spill] sm:$0xff]  ;;  %v15347_v42 = vld [vmem:[#allocation229_spill] sm:$0xff]  ;;  %v15349_v37 = vand.u32 4294901760, %v15338_v32 }
 0x1fb   :  { %v8963_v53 = vpop.f32.mrf.mxu1  ;;  %v3168_v4 = vpop.f32.mrf.mxu0  ;;  %9108 = vmatprep.mubr.f32.mxu1 %v15344_v63 }
 0x1fc   :  { %15339 = vst [vmem:[#allocation175_spill] sm:$0xff] %v12514_v38  ;;  %v12520_v22 = vadd.f32 %v8963_v53, %v3162_v25  ;;  %v3169_v29 = vadd.f32 %v3168_v4, %v15345_v26  ;;  %v15348_v38 = vld [vmem:[#allocation201_spill] sm:$0xff]  ;;  %v15352_v4 = vld [vmem:[#allocation231_spill] sm:$0xff] }
 0x1fd   :  { %v4234_v13 = vpop.f32.mrf.mxu1  ;;  %v8745_v59 = vpop.f32.mrf.mxu0  ;;  %8888 = vmatmul.mubr.f32.gmra.mxu0 %v15346_v39  ;;  %v15358_v36 = vand.u32 4294901760, %v15348_v38 }
 0x1fe   :  { %15343 = vst [vmem:[#allocation179_spill] sm:$0xff] %v12520_v22  ;;  %v12526_v57 = vadd.f32 %v4234_v13, %v3155_v45  ;;  %v3190_v2 = vadd.f32 %v8745_v59, %v15347_v42  ;;  %8890 = vmatprep.mubr.f32.mxu0 %v15348_v38  ;;  %9109 = vmatmul.mubr.f32.gmra.mxu1 %v15349_v37  ;;  %v15353_v45 = vld [vmem:[#allocation202_spill] sm:$0xff]  ;;  %v15355_v42 = vld [vmem:[#allocation204_spill] sm:$0xff]  ;;  %v15356_v37 = vand.u32 4294901760, %v15346_v39 }
 0x1ff   :  { %v8966_v7 = vpop.f32.mrf.mxu1  ;;  %v3182_v25 = vpop.f32.mrf.mxu0  ;;  %9111 = vmatprep.mubr.f32.mxu1 %v15351_v30  ;;  %v15366_v38 = vand.u32 4294901760, %v15355_v42 }
 0x200   :  { %v12532_v53 = vadd.f32 %v8966_v7, %v3176_v56  ;;  %v3183_v63 = vadd.f32 %v3182_v25, %v15352_v4  ;;  %v15359_v25 = vld [vmem:[#allocation236_spill] sm:$0xff] }
 0x201   :  { %v4250_v26 = vpop.f32.mrf.mxu1  ;;  %v8748_v22 = vpop.f32.mrf.mxu0  ;;  %8891 = vmatmul.mubr.f32.gmra.mxu0 %v15353_v45 }
 0x202   :  { %15350 = vst [vmem:[#allocation180_spill] sm:$0xff] %v12532_v53  ;;  %v12538_v13 = vadd.f32 %v4250_v26, %v3169_v29  ;;  %v3204_v59 = vadd.f32 %v8748_v22, %v11401_v47  ;;  %8893 = vmatprep.mubr.f32.mxu0 %v15355_v42  ;;  %9112 = vmatmul.mubr.f32.gmra.mxu1 %v15356_v37  ;;  %v15360_v29 = vld [vmem:[#allocation205_spill] sm:$0xff]  ;;  %v15362_v47 = vld [vmem:[#allocation240_spill] sm:$0xff]  ;;  %v15364_v37 = vand.u32 4294901760, %v15353_v45 }
 0x203   :  { %v8969_v32 = vpop.f32.mrf.mxu1  ;;  %v3196_v56 = vpop.f32.mrf.mxu0  ;;  %9114 = vmatprep.mubr.f32.mxu1 %v15358_v36 }
 0x204   :  { %15354 = vst [vmem:[#allocation182_spill] sm:$0xff] %v12538_v13  ;;  %v12544_v7 = vadd.f32 %v8969_v32, %v3190_v2  ;;  %v3197_v30 = vadd.f32 %v3196_v56, %v15359_v25  ;;  %v15363_v13 = vld [vmem:[#allocation209_spill] sm:$0xff]  ;;  %v15367_v56 = vld [vmem:[#allocation243_spill] sm:$0xff] }
 0x205   :  { %v4266_v4 = vpop.f32.mrf.mxu1  ;;  %v8751_v53 = vpop.f32.mrf.mxu0  ;;  %8894 = vmatmul.mubr.f32.gmra.mxu0 %v15360_v29  ;;  %v15374_v42 = vand.u32 4294901760, %v15363_v13 }
 0x206   :  { %15357 = vst [vmem:[#allocation184_spill] sm:$0xff] %v12544_v7  ;;  %v12550_v26 = vadd.f32 %v4266_v4, %v3183_v63  ;;  %v3218_v22 = vadd.f32 %v8751_v53, %v15362_v47  ;;  %8896 = vmatprep.mubr.f32.mxu0 %v15363_v13  ;;  %9115 = vmatmul.mubr.f32.gmra.mxu1 %v15364_v37  ;;  %v15368_v63 = vld [vmem:[#allocation211_spill] sm:$0xff]  ;;  %v15370_v53 = vld [vmem:[#allocation245_spill] sm:$0xff]  ;;  %v15372_v37 = vand.u32 4294901760, %v15360_v29 }
 0x207   :  { %v8972_v39 = vpop.f32.mrf.mxu1  ;;  %v3210_v2 = vpop.f32.mrf.mxu0  ;;  %9117 = vmatprep.mubr.f32.mxu1 %v15366_v38 }
 0x208   :  { %15361 = vst [vmem:[#allocation186_spill] sm:$0xff] %v12550_v26  ;;  %v12556_v32 = vadd.f32 %v8972_v39, %v3204_v59  ;;  %v3211_v36 = vadd.f32 %v3210_v2, %v15367_v56  ;;  %v15371_v26 = vld [vmem:[#allocation214_spill] sm:$0xff]  ;;  %v15375_v2 = vld [vmem:[#allocation249_spill] sm:$0xff] }
 0x209   :  { %v4282_v25 = vpop.f32.mrf.mxu1  ;;  %v8754_v7 = vpop.f32.mrf.mxu0  ;;  %8897 = vmatmul.mubr.f32.gmra.mxu0 %v15368_v63  ;;  %v15382_v13 = vand.u32 4294901760, %v15371_v26 }
 0x20a   :  { %15365 = vst [vmem:[#allocation210_spill] sm:$0xff] %v12556_v32  ;;  %v12562_v4 = vadd.f32 %v4282_v25, %v3197_v30  ;;  %v3232_v47 = vadd.f32 %v8754_v7, %v15370_v53  ;;  %8899 = vmatprep.mubr.f32.mxu0 %v15371_v26  ;;  %9118 = vmatmul.mubr.f32.gmra.mxu1 %v15372_v37  ;;  %v15376_v30 = vld [vmem:[#allocation217_spill] sm:$0xff]  ;;  %v15378_v7 = vld [vmem:[#allocation251_spill] sm:$0xff]  ;;  %v15380_v37 = vand.u32 4294901760, %v15368_v63 }
 0x20b   :  { %v8975_v45 = vpop.f32.mrf.mxu1  ;;  %v3224_v59 = vpop.f32.mrf.mxu0  ;;  %9120 = vmatprep.mubr.f32.mxu1 %v15374_v42 }
 0x20c   :  { %15369 = vst [vmem:[#allocation189_spill] sm:$0xff] %v12562_v4  ;;  %v12568_v39 = vadd.f32 %v8975_v45, %v3218_v22  ;;  %v3225_v38 = vadd.f32 %v3224_v59, %v15375_v2  ;;  %v15379_v4 = vld [vmem:[#allocation221_spill] sm:$0xff]  ;;  %v15383_v59 = vld [vmem:[#allocation255_spill] sm:$0xff] }
 0x20d   :  { %v4298_v56 = vpop.f32.mrf.mxu1  ;;  %v8757_v32 = vpop.f32.mrf.mxu0  ;;  %8900 = vmatmul.mubr.f32.gmra.mxu0 %v15376_v30  ;;  %v15390_v26 = vand.u32 4294901760, %v15379_v4 }
 0x20e   :  { %15373 = vst [vmem:[#allocation213_spill] sm:$0xff] %v12568_v39  ;;  %v12574_v25 = vadd.f32 %v4298_v56, %v3211_v36  ;;  %v3246_v53 = vadd.f32 %v8757_v32, %v15378_v7  ;;  %8902 = vmatprep.mubr.f32.mxu0 %v15379_v4  ;;  %9121 = vmatmul.mubr.f32.gmra.mxu1 %v15380_v37  ;;  %v15384_v36 = vld [vmem:[#allocation223_spill] sm:$0xff]  ;;  %v15386_v32 = vld [vmem:[#allocation257_spill] sm:$0xff]  ;;  %v15388_v37 = vand.u32 4294901760, %v15376_v30 }
 0x20f   :  { %v8978_v29 = vpop.f32.mrf.mxu1  ;;  %v3238_v22 = vpop.f32.mrf.mxu0  ;;  %9123 = vmatprep.mubr.f32.mxu1 %v15382_v13 }
 0x210   :  { %15377 = vst [vmem:[#allocation190_spill] sm:$0xff] %v12574_v25  ;;  %v12580_v45 = vadd.f32 %v8978_v29, %v3232_v47  ;;  %v3239_v42 = vadd.f32 %v3238_v22, %v15383_v59  ;;  %v15387_v25 = vld [vmem:[#allocation224_spill] sm:$0xff]  ;;  %v15391_v22 = vld [vmem:[#allocation261_spill] sm:$0xff] }
 0x211   :  { %v4314_v2 = vpop.f32.mrf.mxu1  ;;  %v8760_v39 = vpop.f32.mrf.mxu0  ;;  %8903 = vmatmul.mubr.f32.gmra.mxu0 %v15384_v36  ;;  %v15397_v4 = vand.u32 4294901760, %v15387_v25 }
 0x212   :  { %15381 = vst [vmem:[#allocation216_spill] sm:$0xff] %v12580_v45  ;;  %v12586_v56 = vadd.f32 %v4314_v2, %v3225_v38  ;;  %v3260_v7 = vadd.f32 %v8760_v39, %v15386_v32  ;;  %8905 = vmatprep.mubr.f32.mxu0 %v15387_v25  ;;  %9124 = vmatmul.mubr.f32.gmra.mxu1 %v15388_v37  ;;  %v15392_v38 = vld [vmem:[#allocation230_spill] sm:$0xff]  ;;  %v15393_v39 = vld [vmem:[#allocation264_spill] sm:$0xff]  ;;  %v15395_v37 = vand.u32 4294901760, %v15384_v36 }
 0x213   :  { %v8981_v63 = vpop.f32.mrf.mxu1  ;;  %v3252_v47 = vpop.f32.mrf.mxu0  ;;  %9126 = vmatprep.mubr.f32.mxu1 %v15390_v26 }
 0x214   :  { %15385 = vst [vmem:[#allocation192_spill] sm:$0xff] %v12586_v56  ;;  %v12592_v29 = vadd.f32 %v8981_v63, %v3246_v53  ;;  %v3253_v13 = vadd.f32 %v3252_v47, %v15391_v22  ;;  %v15394_v56 = vld [vmem:[#allocation232_spill] sm:$0xff]  ;;  %v15398_v47 = vld [vmem:[#allocation266_spill] sm:$0xff] }
 0x215   :  { %v4330_v59 = vpop.f32.mrf.mxu1  ;;  %v8763_v45 = vpop.f32.mrf.mxu0  ;;  %8906 = vmatmul.mubr.f32.gmra.mxu0 %v15392_v38  ;;  %v15404_v25 = vand.u32 4294901760, %v15394_v56 }
 0x216   :  { %15389 = vst [vmem:[#allocation220_spill] sm:$0xff] %v12592_v29  ;;  %v12598_v2 = vadd.f32 %v4330_v59, %v3239_v42  ;;  %v3274_v32 = vadd.f32 %v8763_v45, %v15393_v39  ;;  %8908 = vmatprep.mubr.f32.mxu0 %v15394_v56  ;;  %9127 = vmatmul.mubr.f32.gmra.mxu1 %v15395_v37  ;;  %v15399_v42 = vld [vmem:[#allocation235_spill] sm:$0xff]  ;;  %v15401_v39 = vld [vmem:[#allocation237_spill] sm:$0xff]  ;;  %v15402_v37 = vand.u32 4294901760, %v15392_v38 }
 0x217   :  { %v8984_v30 = vpop.f32.mrf.mxu1  ;;  %v3266_v53 = vpop.f32.mrf.mxu0  ;;  %9129 = vmatprep.mubr.f32.mxu1 %v15397_v4  ;;  %v15412_v56 = vand.u32 4294901760, %v15401_v39 }
 0x218   :  { %v12604_v63 = vadd.f32 %v8984_v30, %v3260_v7  ;;  %v3267_v26 = vadd.f32 %v3266_v53, %v15398_v47  ;;  %v15405_v53 = vld [vmem:[#allocation270_spill] sm:$0xff] }
 0x219   :  { %v4346_v22 = vpop.f32.mrf.mxu1  ;;  %v8766_v29 = vpop.f32.mrf.mxu0  ;;  %8909 = vmatmul.mubr.f32.gmra.mxu0 %v15399_v42 }
 0x21a   :  { %15396 = vst [vmem:[#allocation194_spill] sm:$0xff] %v12604_v63  ;;  %v12610_v59 = vadd.f32 %v4346_v22, %v3253_v13  ;;  %v3288_v45 = vadd.f32 %v8766_v29, %v11608_v31  ;;  %8911 = vmatprep.mubr.f32.mxu0 %v15401_v39  ;;  %9130 = vmatmul.mubr.f32.gmra.mxu1 %v15402_v37  ;;  %v15406_v13 = vld [vmem:[#allocation238_spill] sm:$0xff]  ;;  %v15410_v37 = vand.u32 4294901760, %v15399_v42 }
 0x21b   :  { %v8987_v36 = vpop.f32.mrf.mxu1  ;;  %v3280_v7 = vpop.f32.mrf.mxu0  ;;  %9132 = vmatprep.mubr.f32.mxu1 %v15404_v25  ;;  %v15408_v31 = vld [vmem:[#allocation274_spill] sm:$0xff] }
 0x21c   :  { %15400 = vst [vmem:[#allocation222_spill] sm:$0xff] %v12610_v59  ;;  %v12616_v30 = vadd.f32 %v8987_v36, %v3274_v32  ;;  %v3281_v4 = vadd.f32 %v3280_v7, %v15405_v53  ;;  %v15409_v59 = vld [vmem:[#allocation244_spill] sm:$0xff]  ;;  %v15413_v7 = vld [vmem:[#allocation277_spill] sm:$0xff] }
 0x21d   :  { %v4362_v47 = vpop.f32.mrf.mxu1  ;;  %v8769_v63 = vpop.f32.mrf.mxu0  ;;  %8912 = vmatmul.mubr.f32.gmra.mxu0 %v15406_v13  ;;  %v15419_v39 = vand.u32 4294901760, %v15409_v59 }
 0x21e   :  { %15403 = vst [vmem:[#allocation196_spill] sm:$0xff] %v12616_v30  ;;  %v12622_v22 = vadd.f32 %v4362_v47, %v3267_v26  ;;  %v3302_v29 = vadd.f32 %v8769_v63, %v15408_v31  ;;  %8914 = vmatprep.mubr.f32.mxu0 %v15409_v59  ;;  %9133 = vmatmul.mubr.f32.gmra.mxu1 %v15410_v37  ;;  %v15414_v26 = vld [vmem:[#allocation246_spill] sm:$0xff]  ;;  %v15416_v63 = vld [vmem:[#allocation280_spill] sm:$0xff]  ;;  %v15418_v37 = vand.u32 4294901760, %v15406_v13 }
 0x21f   :  { %v8990_v38 = vpop.f32.mrf.mxu1  ;;  %v3294_v32 = vpop.f32.mrf.mxu0  ;;  %9135 = vmatprep.mubr.f32.mxu1 %v15412_v56 }
 0x220   :  { %15407 = vst [vmem:[#allocation226_spill] sm:$0xff] %v12622_v22  ;;  %v12628_v36 = vadd.f32 %v8990_v38, %v3288_v45  ;;  %v3295_v25 = vadd.f32 %v3294_v32, %v15413_v7  ;;  %v15417_v22 = vld [vmem:[#allocation247_spill] sm:$0xff]  ;;  %v15420_v32 = vld [vmem:[#allocation284_spill] sm:$0xff] }
 0x221   :  { %v4378_v53 = vpop.f32.mrf.mxu1  ;;  %v8772_v30 = vpop.f32.mrf.mxu0  ;;  %8915 = vmatmul.mubr.f32.gmra.mxu0 %v15414_v26  ;;  %v15427_v59 = vand.u32 4294901760, %v15417_v22 }
 0x222   :  { %15411 = vst [vmem:[#allocation199_spill] sm:$0xff] %v12628_v36  ;;  %v12634_v47 = vadd.f32 %v4378_v53, %v3281_v4  ;;  %v3316_v31 = vadd.f32 %v8772_v30, %v15416_v63  ;;  %8917 = vmatprep.mubr.f32.mxu0 %v15417_v22  ;;  %9136 = vmatmul.mubr.f32.gmra.mxu1 %v15418_v37  ;;  %v15421_v4 = vld [vmem:[#allocation252_spill] sm:$0xff]  ;;  %v15423_v30 = vld [vmem:[#allocation286_spill] sm:$0xff]  ;;  %v15425_v37 = vand.u32 4294901760, %v15414_v26 }
 0x223   :  { %v8993_v42 = vpop.f32.mrf.mxu1  ;;  %v3308_v45 = vpop.f32.mrf.mxu0  ;;  %9138 = vmatprep.mubr.f32.mxu1 %v15419_v39 }
 0x224   :  { %15415 = vst [vmem:[#allocation229_spill] sm:$0xff] %v12634_v47  ;;  %v12640_v38 = vadd.f32 %v8993_v42, %v3302_v29  ;;  %v3309_v56 = vadd.f32 %v3308_v45, %v15420_v32  ;;  %v15424_v47 = vld [vmem:[#allocation256_spill] sm:$0xff] }
 0x225   :  { %v4394_v7 = vpop.f32.mrf.mxu1  ;;  %v8775_v36 = vpop.f32.mrf.mxu0  ;;  %8918 = vmatmul.mubr.f32.gmra.mxu0 %v15421_v4  ;;  %v15433_v22 = vand.u32 4294901760, %v15424_v47 }
 0x226   :  { %v12646_v53 = vadd.f32 %v4394_v7, %v3295_v25  ;;  %v3330_v63 = vadd.f32 %v8775_v36, %v15423_v30  ;;  %8920 = vmatprep.mubr.f32.mxu0 %v15424_v47  ;;  %9139 = vmatmul.mubr.f32.gmra.mxu1 %v15425_v37  ;;  %v15428_v25 = vld [vmem:[#allocation258_spill] sm:$0xff]  ;;  %v15430_v36 = vld [vmem:[#allocation291_spill] sm:$0xff]  ;;  %v15432_v37 = vand.u32 4294901760, %v15421_v4 }
 0x227   :  { %v8996_v13 = vpop.f32.mrf.mxu1  ;;  %v3322_v29 = vpop.f32.mrf.mxu0  ;;  %9141 = vmatprep.mubr.f32.mxu1 %v15427_v59 }
 0x228   :  { %15422 = vst [vmem:[#allocation201_spill] sm:$0xff] %v12646_v53  ;;  %v12652_v42 = vadd.f32 %v8996_v13, %v3316_v31  ;;  %v3323_v45 = vadd.f32 %v3322_v29, %v11718_v3  ;;  %v15431_v53 = vld [vmem:[#allocation259_spill] sm:$0xff]  ;;  %v15434_v3 = vld [vmem:[#allocation293_spill] sm:$0xff] }
 0x229   :  { %v4410_v39 = vpop.f32.mrf.mxu1  ;;  %v8778_v32 = vpop.f32.mrf.mxu0  ;;  %8921 = vmatmul.mubr.f32.gmra.mxu0 %v15428_v25  ;;  %v15439_v47 = vand.u32 4294901760, %v15431_v53 }
 0x22a   :  { %15426 = vst [vmem:[#allocation231_spill] sm:$0xff] %v12652_v42  ;;  %v12658_v7 = vadd.f32 %v4410_v39, %v3309_v56  ;;  %v3344_v30 = vadd.f32 %v8778_v32, %v15430_v36  ;;  %8923 = vmatprep.mubr.f32.mxu0 %v15431_v53  ;;  %9142 = vmatmul.mubr.f32.gmra.mxu1 %v15432_v37  ;;  %v15435_v56 = vld [vmem:[#allocation265_spill] sm:$0xff]  ;;  %v15436_v32 = vld [vmem:[#allocation296_spill] sm:$0xff]  ;;  %v15438_v37 = vand.u32 4294901760, %v15428_v25 }
 0x22b   :  { %v8999_v26 = vpop.f32.mrf.mxu1  ;;  %v3336_v31 = vpop.f32.mrf.mxu0  ;;  %9144 = vmatprep.mubr.f32.mxu1 %v15433_v22 }
 0x22c   :  { %15429 = vst [vmem:[#allocation202_spill] sm:$0xff] %v12658_v7  ;;  %v12664_v13 = vadd.f32 %v8999_v26, %v3330_v63  ;;  %v3337_v29 = vadd.f32 %v3336_v31, %v15434_v3  ;;  %v15437_v7 = vld [vmem:[#allocation267_spill] sm:$0xff] }
 0x22d   :  { %v4426_v59 = vpop.f32.mrf.mxu1  ;;  %v8781_v42 = vpop.f32.mrf.mxu0  ;;  %8924 = vmatmul.mubr.f32.gmra.mxu0 %v15435_v56  ;;  %v15443_v53 = vand.u32 4294901760, %v15437_v7 }
 0x22e   :  { %v12670_v39 = vadd.f32 %v4426_v59, %v3323_v45  ;;  %v3358_v36 = vadd.f32 %v8781_v42, %v15436_v32  ;;  %8926 = vmatprep.mubr.f32.mxu0 %v15437_v7  ;;  %9145 = vmatmul.mubr.f32.gmra.mxu1 %v15438_v37  ;;  %v15440_v45 = vld [vmem:[#allocation268_spill] sm:$0xff]  ;;  %v15442_v37 = vand.u32 4294901760, %v15435_v56 }
 0x22f   :  { %v9002_v4 = vpop.f32.mrf.mxu1  ;;  %v3350_v63 = vpop.f32.mrf.mxu0  ;;  %9147 = vmatprep.mubr.f32.mxu1 %v15439_v47  ;;  %v15441_v32 = vld [vmem:[#allocation272_spill] sm:$0xff] }
 0x230   :  { %v12676_v26 = vadd.f32 %v9002_v4, %v3344_v30  ;;  %v3351_v31 = vadd.f32 %v3350_v63, %v11780_v54  ;;  %v15447_v7 = vand.u32 4294901760, %v15441_v32 }
 0x231   :  { %v4442_v22 = vpop.f32.mrf.mxu1  ;;  %v8784_v3 = vpop.f32.mrf.mxu0  ;;  %8927 = vmatmul.mubr.f32.gmra.mxu0 %v15440_v45 }
 0x232   :  { %v12682_v59 = vadd.f32 %v4442_v22, %v3337_v29  ;;  %v3372_v42 = vadd.f32 %v8784_v3, %v11800_v50  ;;  %8929 = vmatprep.mubr.f32.mxu0 %v15441_v32  ;;  %9148 = vmatmul.mubr.f32.gmra.mxu1 %v15442_v37  ;;  %v15444_v29 = vld [vmem:[#allocation278_spill] sm:$0xff]  ;;  %v15445_v3 = vld [vmem:[#allocation279_spill] sm:$0xff]  ;;  %v15446_v37 = vand.u32 4294901760, %v15440_v45 }
 0x233   :  { %v9005_v25 = vpop.f32.mrf.mxu1  ;;  %v3364_v30 = vpop.f32.mrf.mxu0  ;;  %9150 = vmatprep.mubr.f32.mxu1 %v15443_v53  ;;  %v15451_v32 = vand.u32 4294901760, %v15445_v3 }
 0x234   :  { %v12688_v4 = vadd.f32 %v9005_v25, %v3358_v36  ;;  %v3365_v54 = vadd.f32 %v3364_v30, %v11806_v61 }
 0x235   :  { %v4458_v63 = vpop.f32.mrf.mxu1  ;;  %v8787_v47 = vpop.f32.mrf.mxu0  ;;  %8930 = vmatmul.mubr.f32.gmra.mxu0 %v15444_v29 }
 0x236   :  { %v12694_v22 = vadd.f32 %v4458_v63, %v3351_v31  ;;  %v3386_v50 = vadd.f32 %v8787_v47, %v11824_v35  ;;  %8932 = vmatprep.mubr.f32.mxu0 %v15445_v3  ;;  %9151 = vmatmul.mubr.f32.gmra.mxu1 %v15446_v37  ;;  %v15448_v31 = vld [vmem:[#allocation281_spill] sm:$0xff]  ;;  %v15449_v47 = vld [vmem:[#allocation282_spill] sm:$0xff]  ;;  %v15450_v37 = vand.u32 4294901760, %v15444_v29 }
 0x237   :  { %v9008_v56 = vpop.f32.mrf.mxu1  ;;  %v3378_v36 = vpop.f32.mrf.mxu0  ;;  %9153 = vmatprep.mubr.f32.mxu1 %v15447_v7  ;;  %v15455_v3 = vand.u32 4294901760, %v15449_v47 }
 0x238   :  { %v12700_v25 = vadd.f32 %v9008_v56, %v3372_v42  ;;  %v3379_v61 = vadd.f32 %v3378_v36, %v11827_v41 }
 0x239   :  { %v4474_v30 = vpop.f32.mrf.mxu1  ;;  %v8790_v53 = vpop.f32.mrf.mxu0  ;;  %8933 = vmatmul.mubr.f32.gmra.mxu0 %v15448_v31 }
 0x23a   :  { %v12706_v63 = vadd.f32 %v4474_v30, %v3365_v54  ;;  %v3400_v35 = vadd.f32 %v8790_v53, %v11843_v62  ;;  %8935 = vmatprep.mubr.f32.mxu0 %v15449_v47  ;;  %9154 = vmatmul.mubr.f32.gmra.mxu1 %v15450_v37  ;;  %v15452_v54 = vld [vmem:[#allocation287_spill] sm:$0xff]  ;;  %v15453_v53 = vld [vmem:[#allocation289_spill] sm:$0xff]  ;;  %v15454_v37 = vand.u32 4294901760, %v15448_v31 }
 0x23b   :  { %v9011_v45 = vpop.f32.mrf.mxu1  ;;  %v3392_v42 = vpop.f32.mrf.mxu0  ;;  %9156 = vmatprep.mubr.f32.mxu1 %v15451_v32  ;;  %v15458_v47 = vand.u32 4294901760, %v15453_v53 }
 0x23c   :  { %v12712_v56 = vadd.f32 %v9011_v45, %v3386_v50  ;;  %v3393_v41 = vadd.f32 %v3392_v42, %v11846_v55 }
 0x23d   :  { %v4490_v36 = vpop.f32.mrf.mxu1  ;;  %v8793_v7 = vpop.f32.mrf.mxu0  ;;  %8936 = vmatmul.mubr.f32.gmra.mxu0 %v15452_v54 }
 0x23e   :  { %v12718_v30 = vadd.f32 %v4490_v36, %v3379_v61  ;;  %v3414_v62 = vadd.f32 %v8793_v7, %v11858_v17  ;;  %8938 = vmatprep.mubr.f32.mxu0 %v15453_v53  ;;  %9157 = vmatmul.mubr.f32.gmra.mxu1 %v15454_v37  ;;  %v15456_v61 = vld [vmem:[#allocation292_spill] sm:$0xff]  ;;  %v15457_v7 = vand.u32 4294901760, %v15452_v54  ;;  %v15460_v53 = vand.u32 4294901760, %v11762_v20 }
 0x23f   :  { %v9014_v29 = vpop.f32.mrf.mxu1  ;;  %v3406_v50 = vpop.f32.mrf.mxu0  ;;  %9159 = vmatprep.mubr.f32.mxu1 %v15455_v3  ;;  %v15459_v3 = vand.u32 4294901760, %v15456_v61 }
 0x240   :  { %v12724_v45 = vadd.f32 %v9014_v29, %v3400_v35  ;;  %v3407_v55 = vadd.f32 %v3406_v50, %v11861_v15 }
 0x241   :  { %v4506_v42 = vpop.f32.mrf.mxu1  ;;  %v8796_v32 = vpop.f32.mrf.mxu0  ;;  %8939 = vmatmul.mubr.f32.gmra.mxu0 %v15456_v61 }
 0x242   :  { %v12730_v36 = vadd.f32 %v4506_v42, %v3393_v41  ;;  %v3428_v17 = vadd.f32 %v8796_v32, %v11874_v60  ;;  %8941 = vmatprep.mubr.f32.mxu0 %v11762_v20  ;;  %9160 = vmatmul.mubr.f32.gmra.mxu1 %v15457_v7  ;;  %v15461_v7 = vand.u32 4294901760, %v11786_v18  ;;  %v15462_v20 = vand.u32 4294901760, %v11793_v43 }
 0x243   :  { %v9017_v31 = vpop.f32.mrf.mxu1  ;;  %v3420_v35 = vpop.f32.mrf.mxu0  ;;  %9162 = vmatprep.mubr.f32.mxu1 %v15458_v47 }
 0x244   :  { %v12736_v29 = vadd.f32 %v9017_v31, %v3414_v62  ;;  %v3421_v15 = vadd.f32 %v3420_v35, %v11877_v44 }
 0x245   :  { %v4522_v37 = vpop.f32.mrf.mxu1  ;;  %v8799_v50 = vpop.f32.mrf.mxu0  ;;  %8942 = vmatmul.mubr.f32.gmra.mxu0 %v11786_v18  ;;  %v15463_v18 = vand.u32 4294901760, %v11810_v21 }
 0x246   :  { %v12742_v41 = vadd.f32 %v4522_v37, %v3407_v55  ;;  %v3442_v60 = vadd.f32 %v8799_v50, %v11882_v58  ;;  %8944 = vmatprep.mubr.f32.mxu0 %v11793_v43  ;;  %9163 = vmatmul.mubr.f32.gmra.mxu1 %v15459_v3  ;;  %v15465_v43 = vand.u32 4294901760, %v11820_v52 }
 0x247   :  { %v9020_v54 = vpop.f32.mrf.mxu1  ;;  %v3434_v62 = vpop.f32.mrf.mxu0  ;;  %9165 = vmatprep.mubr.f32.mxu1 %v15460_v53 }
 0x248   :  { %v12748_v42 = vadd.f32 %v9020_v54, %v3428_v17  ;;  %v3435_v44 = vadd.f32 %v3434_v62, %v11885_v19  ;;  %v15464_v54 = vld [vmem:[#allocation2_spill] sm:$0xff] }
 0x249   :  { %v4538_v32 = vpop.f32.mrf.mxu1  ;;  %v8802_v31 = vpop.f32.mrf.mxu0  ;;  %8945 = vmatmul.mubr.f32.gmra.mxu0 %v11810_v21 }
 0x24a   :  { %v12754_v55 = vadd.f32 %v4538_v32, %v3421_v15  ;;  %v3456_v58 = vadd.f32 %v8802_v31, %v11891_v16  ;;  %8947 = vmatprep.mubr.f32.mxu0 %v11820_v52  ;;  %9166 = vmatmul.mubr.f32.gmra.mxu1 %v15461_v7  ;;  %v15467_v31 = vand.u32 4294901760, %v11834_v40 }
 0x24b   :  { %v9023_v61 = vpop.f32.mrf.mxu1  ;;  %v3448_v17 = vpop.f32.mrf.mxu0  ;;  %9168 = vmatprep.mubr.f32.mxu1 %v15462_v20  ;;  %v15469_v20 = vld [vmem:[#allocation5_spill] sm:$0xff] }
 0x24c   :  { %v12760_v35 = vadd.f32 %v9023_v61, %v3442_v60  ;;  %v3449_v19 = vadd.f32 %v3448_v17, %v11895_v8  ;;  %v15468_v61 = vld [vmem:[#allocation4_spill] sm:$0xff] }
 0x24d   :  { %v4554_v47 = vpop.f32.mrf.mxu1  ;;  %v8805_v37 = vpop.f32.mrf.mxu0  ;;  %8948 = vmatmul.mubr.f32.gmra.mxu0 %v11834_v40  ;;  %v15470_v40 = vld [vmem:[#allocation6_spill] sm:$0xff] }
 0x24e   :  { %v12766_v15 = vadd.f32 %v4554_v47, %v3435_v44  ;;  %v3470_v16 = vadd.f32 %v8805_v37, %v11901_v51  ;;  %9169 = vmatmul.mubr.f32.gmra.mxu1 %v15463_v18  ;;  %9182 = vmatprep.mubr.f32.mxu0 %v15464_v54  ;;  %v15466_v44 = vld [vmem:[#allocation3_spill] sm:$0xff] }
 0x24f   :  { %v9026_v50 = vpop.f32.mrf.mxu1  ;;  %v3462_v60 = vpop.f32.mrf.mxu0  ;;  %9171 = vmatprep.mubr.f32.mxu1 %v15465_v43 }
 0x250   :  { %v12772_v3 = vadd.f32 %v9026_v50, %v3456_v58  ;;  %v3463_v8 = vadd.f32 %v3462_v60, %v11908_v49 }
 0x251   :  { %v4570_v62 = vpop.f32.mrf.mxu1  ;;  %v8808_v53 = vpop.f32.mrf.mxu0  ;;  %9183 = vmatmul.mubr.f32.vlgmr.msra.gmra.mxu0 %v15466_v44 }
 0x252   :  { %v12778_v32 = vadd.f32 %v4570_v62, %v3449_v19  ;;  %v3484_v51 = vadd.f32 %v8808_v53, %v11915_v27  ;;  %9172 = vmatmul.mubr.f32.gmra.mxu1 %v15467_v31  ;;  %9185 = vmatprep.mubr.f32.mxu0 %v15468_v61 }
 0x253   :  { %v9029_v21 = vpop.f32.mrf.mxu1  ;;  %v3476_v58 = vpop.f32.mrf.mxu0  ;;  %9406 = vmatprep.mubr.f32.mxu1 %v15464_v54  ;;  %v15471_v54 = vld [vmem:[#allocation7_spill] sm:$0xff] }
 0x254   :  { %v12784_v7 = vadd.f32 %v9029_v21, %v3470_v16  ;;  %v3477_v52 = vadd.f32 %v3476_v58, %v11923_v24  ;;  %v15473_v21 = vld [vmem:[#allocation9_spill] sm:$0xff]  ;;  %v15474_v58 = vld [vmem:[#allocation10_spill] sm:$0xff] }
 0x255   :  { %v4586_v49 = vpop.f32.mrf.mxu1  ;;  %v8811_v17 = vpop.f32.mrf.mxu0  ;;  %9186 = vmatmul.mubr.f32.gmra.mxu0 %v15469_v20 }
 0x256   :  { %v12789_v19 = vadd.f32 %v4586_v49, %v3463_v8  ;;  %v3498_v27 = vadd.f32 %v8811_v17, %v11931_v46  ;;  %9188 = vmatprep.mubr.f32.mxu0 %v15470_v40  ;;  %9407 = vmatmul.mubr.f32.vlgmr.msra.gmra.mxu1 %v15466_v44  ;;  %v15472_v8 = vld [vmem:[#allocation8_spill] sm:$0xff] }
 0x257   :  { %v9032_v47 = vpop.f32.mrf.mxu1  ;;  %v3490_v37 = vpop.f32.mrf.mxu0  ;;  %9409 = vmatprep.mubr.f32.mxu1 %v15468_v61 }
 0x258   :  { %v12794_v16 = vadd.f32 %v9032_v47, %v3484_v51  ;;  %v3491_v24 = vadd.f32 %v3490_v37, %v11939_v34  ;;  %v15476_v37 = vld [vmem:[#allocation12_spill] sm:$0xff] }
 0x259   :  { %v4602_v50 = vpop.f32.mrf.mxu1  ;;  %v8814_v18 = vpop.f32.mrf.mxu0  ;;  %9189 = vmatmul.mubr.f32.gmra.mxu0 %v15471_v54 }
 0x25a   :  { %v12799_v60 = vadd.f32 %v4602_v50, %v3477_v52  ;;  %v3512_v46 = vadd.f32 %v8814_v18, %v11947_v12  ;;  %9191 = vmatprep.mubr.f32.mxu0 %v15472_v8  ;;  %9410 = vmatmul.mubr.f32.gmra.mxu1 %v15469_v20 }
 0x25b   :  { %v9035_v43 = vpop.f32.mrf.mxu1  ;;  %v3504_v62 = vpop.f32.mrf.mxu0  ;;  %9412 = vmatprep.mubr.f32.mxu1 %v15470_v40 }
 0x25c   :  { %v12804_v53 = vadd.f32 %v9035_v43, %v3498_v27  ;;  %v3505_v34 = vadd.f32 %v3504_v62, %v11955_v11  ;;  %v15475_v27 = vld [vmem:[#allocation11_spill] sm:$0xff]  ;;  %v15478_v62 = vld [vmem:[#allocation14_spill] sm:$0xff] }
 0x25d   :  { %v4618_v44 = vpop.f32.mrf.mxu1  ;;  %v8817_v51 = vpop.f32.mrf.mxu0  ;;  %9192 = vmatmul.mubr.f32.gmra.mxu0 %v15473_v21 }
 0x25e   :  { %v12809_v31 = vadd.f32 %v4618_v44, %v3491_v24  ;;  %v3526_v12 = vadd.f32 %v8817_v51, %v11963_v28  ;;  %9194 = vmatprep.mubr.f32.mxu0 %v15474_v58  ;;  %9413 = vmatmul.mubr.f32.gmra.mxu1 %v15471_v54 }
 0x25f   :  { %v9038_v61 = vpop.f32.mrf.mxu1  ;;  %v3518_v52 = vpop.f32.mrf.mxu0  ;;  %9415 = vmatprep.mubr.f32.mxu1 %v15472_v8 }
 0x260   :  { %v12814_v49 = vadd.f32 %v9038_v61, %v3512_v46  ;;  %v3519_v11 = vadd.f32 %v3518_v52, %v11968_v10  ;;  %v15477_v46 = vld [vmem:[#allocation13_spill] sm:$0xff] }
 0x261   :  { %v4634_v17 = vpop.f32.mrf.mxu1  ;;  %v8820_v20 = vpop.f32.mrf.mxu0  ;;  %9195 = vmatmul.mubr.f32.gmra.mxu0 %v15475_v27  ;;  %v15480_v52 = vld [vmem:[#allocation17_spill] sm:$0xff] }
 0x262   :  { %v12819_v47 = vadd.f32 %v4634_v17, %v3505_v34  ;;  %v3540_v28 = vadd.f32 %v8820_v20, %v11975_v23  ;;  %9197 = vmatprep.mubr.f32.mxu0 %v15476_v37  ;;  %9416 = vmatmul.mubr.f32.gmra.mxu1 %v15473_v21 }
 0x263   :  { %v9041_v40 = vpop.f32.mrf.mxu1  ;;  %v3532_v24 = vpop.f32.mrf.mxu0  ;;  %9418 = vmatprep.mubr.f32.mxu1 %v15474_v58 }
 0x264   :  { %v12824_v50 = vadd.f32 %v9041_v40, %v3526_v12  ;;  %v3533_v10 = vadd.f32 %v3532_v24, %v11980_v5  ;;  %v15479_v12 = vld [vmem:[#allocation16_spill] sm:$0xff] }
 0x265   :  { %v4650_v18 = vpop.f32.mrf.mxu1  ;;  %v8823_v54 = vpop.f32.mrf.mxu0  ;;  %9198 = vmatmul.mubr.f32.gmra.mxu0 %v15477_v46  ;;  %v15482_v24 = vld [vmem:[#allocation20_spill] sm:$0xff] }
 0x266   :  { %v12829_v43 = vadd.f32 %v4650_v18, %v3519_v11  ;;  %v3554_v23 = vadd.f32 %v8823_v54, %v11987_v14  ;;  %9200 = vmatprep.mubr.f32.mxu0 %v15478_v62  ;;  %9419 = vmatmul.mubr.f32.gmra.mxu1 %v15475_v27 }
 0x267   :  { %v9044_v8 = vpop.f32.mrf.mxu1  ;;  %v3546_v34 = vpop.f32.mrf.mxu0  ;;  %9421 = vmatprep.mubr.f32.mxu1 %v15476_v37 }
 0x268   :  { %v12834_v44 = vadd.f32 %v9044_v8, %v3540_v28  ;;  %v3547_v5 = vadd.f32 %v3546_v34, %v11992_v33  ;;  %v15481_v28 = vld [vmem:[#allocation18_spill] sm:$0xff] }
 0x269   :  { %v4666_v51 = vpop.f32.mrf.mxu1  ;;  %v8826_v21 = vpop.f32.mrf.mxu0  ;;  %9201 = vmatmul.mubr.f32.gmra.mxu0 %v15479_v12 }
 0x26a   :  { %v12839_v61 = vadd.f32 %v4666_v51, %v3533_v10  ;;  %v3568_v14 = vadd.f32 %v8826_v21, %v11999_v0  ;;  %9203 = vmatprep.mubr.f32.mxu0 %v15480_v52  ;;  %9422 = vmatmul.mubr.f32.gmra.mxu1 %v15477_v46 }
 0x26b   :  { %v9047_v58 = vpop.f32.mrf.mxu1  ;;  %v3560_v11 = vpop.f32.mrf.mxu0  ;;  %9424 = vmatprep.mubr.f32.mxu1 %v15478_v62  ;;  %v15484_v62 = vld [vmem:[#allocation15_spill] sm:$0xff] }
 0x26c   :  { %v12844_v17 = vadd.f32 %v9047_v58, %v3554_v23  ;;  %v3561_v33 = vadd.f32 %v3560_v11, %v12004_v48  ;;  %v15483_v23 = vld [vmem:[#allocation23_spill] sm:$0xff] }
 0x26d   :  { %v4682_v20 = vpop.f32.mrf.mxu1  ;;  %v8829_v27 = vpop.f32.mrf.mxu0  ;;  %9204 = vmatmul.mubr.f32.gmra.mxu0 %v15481_v28 }
 0x26e   :  { %v12849_v40 = vadd.f32 %v4682_v20, %v3547_v5  ;;  %v3582_v0 = vadd.f32 %v8829_v27, %v12011_v6  ;;  %9206 = vmatprep.mubr.f32.mxu0 %v15482_v24  ;;  %9425 = vmatmul.mubr.f32.gmra.mxu1 %v15479_v12  ;;  %v15485_v5 = vld [vmem:[#allocation25_spill] sm:$0xff]  ;;  %v15486_v12 = vld [vmem:[#allocation19_spill] sm:$0xff] }
 0x26f   :  { %v9050_v37 = vpop.f32.mrf.mxu1  ;;  %v3574_v10 = vpop.f32.mrf.mxu0  ;;  %9427 = vmatprep.mubr.f32.mxu1 %v15480_v52  ;;  %v15487_v52 = vld [vmem:[#allocation28_spill] sm:$0xff] }
 0x270   :  { %v12854_v18 = vadd.f32 %v9050_v37, %v3568_v14  ;;  %v3575_v48 = vadd.f32 %v3574_v10, %v12016_v1  ;;  %v15489_v37 = vld [vmem:[#allocation30_spill] sm:$0xff] }
 0x271   :  { %v4698_v54 = vpop.f32.mrf.mxu1  ;;  %v8832_v46 = vpop.f32.mrf.mxu0  ;;  %9207 = vmatmul.mubr.f32.gmra.mxu0 %v15483_v23 }
 0x272   :  { %v12859_v8 = vadd.f32 %v4698_v54, %v3561_v33  ;;  %v3596_v6 = vadd.f32 %v8832_v46, %v15484_v62  ;;  %9209 = vmatprep.mubr.f32.mxu0 %v15485_v5  ;;  %9428 = vmatmul.mubr.f32.gmra.mxu1 %v15481_v28  ;;  %v15488_v33 = vld [vmem:[#allocation21_spill] sm:$0xff]  ;;  %v15491_v62 = vld [vmem:[#allocation31_spill] sm:$0xff] }
 0x273   :  { %v9053_v34 = vpop.f32.mrf.mxu1  ;;  %v3588_v51 = vpop.f32.mrf.mxu0  ;;  %9430 = vmatprep.mubr.f32.mxu1 %v15482_v24  ;;  %v15490_v24 = vld [vmem:[#allocation22_spill] sm:$0xff] }
 0x274   :  { %v12864_v21 = vadd.f32 %v9053_v34, %v3582_v0  ;;  %v3589_v1 = vadd.f32 %v3588_v51, %v15486_v12  ;;  %v15492_v34 = vld [vmem:[#allocation24_spill] sm:$0xff] }
 0x275   :  { %v4714_v14 = vpop.f32.mrf.mxu1  ;;  %v8835_v58 = vpop.f32.mrf.mxu0  ;;  %9210 = vmatmul.mubr.f32.gmra.mxu0 %v15487_v52 }
 0x276   :  { %v12869_v11 = vadd.f32 %v4714_v14, %v3575_v48  ;;  %v3610_v20 = vadd.f32 %v8835_v58, %v15488_v33  ;;  %9212 = vmatprep.mubr.f32.mxu0 %v15489_v37  ;;  %9431 = vmatmul.mubr.f32.gmra.mxu1 %v15483_v23  ;;  %v15493_v14 = vld [vmem:[#allocation33_spill] sm:$0xff] }
 0x277   :  { %v9056_v27 = vpop.f32.mrf.mxu1  ;;  %v3602_v28 = vpop.f32.mrf.mxu0  ;;  %9433 = vmatprep.mubr.f32.mxu1 %v15485_v5  ;;  %v15495_v5 = vld [vmem:[#allocation26_spill] sm:$0xff] }
 0x278   :  { %v12874_v0 = vadd.f32 %v9056_v27, %v3596_v6  ;;  %v3603_v10 = vadd.f32 %v3602_v28, %v15490_v24  ;;  %v15496_v28 = vld [vmem:[#allocation36_spill] sm:$0xff]  ;;  %v15498_v24 = vld [vmem:[#allocation27_spill] sm:$0xff] }
 0x279   :  { %v4730_v54 = vpop.f32.mrf.mxu1  ;;  %v8838_v46 = vpop.f32.mrf.mxu0  ;;  %9213 = vmatmul.mubr.f32.gmra.mxu0 %v15491_v62 }
 0x27a   :  { %v12879_v48 = vadd.f32 %v4730_v54, %v3589_v1  ;;  %v3624_v51 = vadd.f32 %v8838_v46, %v15492_v34  ;;  %9215 = vmatprep.mubr.f32.mxu0 %v15493_v14  ;;  %9434 = vmatmul.mubr.f32.gmra.mxu1 %v15487_v52  ;;  %v15499_v34 = vld [vmem:[#allocation37_spill] sm:$0xff] }
 0x27b   :  { %v9059_v12 = vpop.f32.mrf.mxu1  ;;  %v3616_v23 = vpop.f32.mrf.mxu0  ;;  %9436 = vmatprep.mubr.f32.mxu1 %v15489_v37  ;;  %v15501_v37 = vld [vmem:[#allocation29_spill] sm:$0xff] }
 0x27c   :  { %v12884_v6 = vadd.f32 %v9059_v12, %v3610_v20  ;;  %v3617_v58 = vadd.f32 %v3616_v23, %v15495_v5 }
 0x27d   :  { %v4746_v33 = vpop.f32.mrf.mxu1  ;;  %v8841_v27 = vpop.f32.mrf.mxu0  ;;  %9216 = vmatmul.mubr.f32.gmra.mxu0 %v15496_v28 }
 0x27e   :  { %15494 = vst [vmem:[#allocation204_spill] sm:$0xff] %v12884_v6  ;;  %v12889_v1 = vadd.f32 %v4746_v33, %v3603_v10  ;;  %v3638_v54 = vadd.f32 %v8841_v27, %v15498_v24  ;;  %9218 = vmatprep.mubr.f32.mxu0 %v15499_v34  ;;  %9437 = vmatmul.mubr.f32.gmra.mxu1 %v15491_v62  ;;  %v15502_v6 = vld [vmem:[#allocation38_spill] sm:$0xff]  ;;  %v15504_v33 = vld [vmem:[#allocation32_spill] sm:$0xff] }
 0x27f   :  { %v9062_v46 = vpop.f32.mrf.mxu1  ;;  %v3630_v52 = vpop.f32.mrf.mxu0  ;;  %9439 = vmatprep.mubr.f32.mxu1 %v15493_v14  ;;  %v15507_v14 = vld [vmem:[#allocation34_spill] sm:$0xff] }
 0x280   :  { %15497 = vst [vmem:[#allocation236_spill] sm:$0xff] %v12889_v1  ;;  %v12894_v20 = vadd.f32 %v9062_v46, %v3624_v51  ;;  %v3631_v12 = vadd.f32 %v3630_v52, %v15501_v37  ;;  %v15505_v1 = vld [vmem:[#allocation41_spill] sm:$0xff] }
 0x281   :  { %v4762_v23 = vpop.f32.mrf.mxu1  ;;  %v8844_v5 = vpop.f32.mrf.mxu0  ;;  %9219 = vmatmul.mubr.f32.gmra.mxu0 %v15502_v6 }
 0x282   :  { %15500 = vst [vmem:[#allocation205_spill] sm:$0xff] %v12894_v20  ;;  %v12899_v10 = vadd.f32 %v4762_v23, %v3617_v58  ;;  %v3652_v27 = vadd.f32 %v8844_v5, %v15504_v33  ;;  %9221 = vmatprep.mubr.f32.mxu0 %v15505_v1  ;;  %9440 = vmatmul.mubr.f32.gmra.mxu1 %v15496_v28  ;;  %v15508_v20 = vld [vmem:[#allocation43_spill] sm:$0xff] }
 0x283   :  { %v9065_v24 = vpop.f32.mrf.mxu1  ;;  %v3644_v62 = vpop.f32.mrf.mxu0  ;;  %9442 = vmatprep.mubr.f32.mxu1 %v15499_v34  ;;  %v15510_v23 = vld [vmem:[#allocation35_spill] sm:$0xff] }
 0x284   :  { %15503 = vst [vmem:[#allocation240_spill] sm:$0xff] %v12899_v10  ;;  %v12904_v51 = vadd.f32 %v9065_v24, %v3638_v54  ;;  %v3645_v46 = vadd.f32 %v3644_v62, %v15507_v14  ;;  %v15511_v10 = vld [vmem:[#allocation45_spill] sm:$0xff]  ;;  %v15513_v34 = vld [vmem:[#allocation39_spill] sm:$0xff] }
 0x285   :  { %v4778_v52 = vpop.f32.mrf.mxu1  ;;  %v8847_v37 = vpop.f32.mrf.mxu0  ;;  %9222 = vmatmul.mubr.f32.gmra.mxu0 %v15508_v20 }
 0x286   :  { %15506 = vst [vmem:[#allocation209_spill] sm:$0xff] %v12904_v51  ;;  %v12909_v58 = vadd.f32 %v4778_v52, %v3631_v12  ;;  %v3666_v5 = vadd.f32 %v8847_v37, %v15510_v23  ;;  %9224 = vmatprep.mubr.f32.mxu0 %v15511_v10  ;;  %9443 = vmatmul.mubr.f32.gmra.mxu1 %v15502_v6  ;;  %v15514_v51 = vld [vmem:[#allocation47_spill] sm:$0xff]  ;;  %v15516_v52 = vld [vmem:[#allocation40_spill] sm:$0xff] }
 0x287   :  { %v9068_v33 = vpop.f32.mrf.mxu1  ;;  %v3658_v28 = vpop.f32.mrf.mxu0  ;;  %9445 = vmatprep.mubr.f32.mxu1 %v15505_v1  ;;  %v15519_v1 = vld [vmem:[#allocation42_spill] sm:$0xff] }
 0x288   :  { %15509 = vst [vmem:[#allocation243_spill] sm:$0xff] %v12909_v58  ;;  %v12914_v54 = vadd.f32 %v9068_v33, %v3652_v27  ;;  %v3659_v24 = vadd.f32 %v3658_v28, %v15513_v34  ;;  %v15517_v58 = vld [vmem:[#allocation48_spill] sm:$0xff] }
 0x289   :  { %v4794_v62 = vpop.f32.mrf.mxu1  ;;  %v8850_v14 = vpop.f32.mrf.mxu0  ;;  %9225 = vmatmul.mubr.f32.gmra.mxu0 %v15514_v51 }
 0x28a   :  { %15512 = vst [vmem:[#allocation211_spill] sm:$0xff] %v12914_v54  ;;  %v12919_v12 = vadd.f32 %v4794_v62, %v3645_v46  ;;  %v3680_v37 = vadd.f32 %v8850_v14, %v15516_v52  ;;  %9227 = vmatprep.mubr.f32.mxu0 %v15517_v58  ;;  %9446 = vmatmul.mubr.f32.gmra.mxu1 %v15508_v20  ;;  %v15520_v54 = vld [vmem:[#allocation51_spill] sm:$0xff]  ;;  %v15522_v62 = vld [vmem:[#allocation44_spill] sm:$0xff] }
 0x28b   :  { %v9071_v23 = vpop.f32.mrf.mxu1  ;;  %v3672_v6 = vpop.f32.mrf.mxu0  ;;  %9448 = vmatprep.mubr.f32.mxu1 %v15511_v10  ;;  %v15525_v10 = vld [vmem:[#allocation46_spill] sm:$0xff] }
 0x28c   :  { %15515 = vst [vmem:[#allocation245_spill] sm:$0xff] %v12919_v12  ;;  %v12924_v27 = vadd.f32 %v9071_v23, %v3666_v5  ;;  %v3673_v33 = vadd.f32 %v3672_v6, %v15519_v1  ;;  %v15523_v12 = vld [vmem:[#allocation53_spill] sm:$0xff] }
 0x28d   :  { %v4810_v28 = vpop.f32.mrf.mxu1  ;;  %v8853_v34 = vpop.f32.mrf.mxu0  ;;  %9228 = vmatmul.mubr.f32.gmra.mxu0 %v15520_v54 }
 0x28e   :  { %15518 = vst [vmem:[#allocation214_spill] sm:$0xff] %v12924_v27  ;;  %v12929_v46 = vadd.f32 %v4810_v28, %v3659_v24  ;;  %v3694_v14 = vadd.f32 %v8853_v34, %v15522_v62  ;;  %9230 = vmatprep.mubr.f32.mxu0 %v15523_v12  ;;  %9449 = vmatmul.mubr.f32.gmra.mxu1 %v15514_v51  ;;  %v15526_v27 = vld [vmem:[#allocation56_spill] sm:$0xff]  ;;  %v15528_v28 = vld [vmem:[#allocation49_spill] sm:$0xff] }
 0x28f   :  { %v9074_v52 = vpop.f32.mrf.mxu1  ;;  %v3686_v20 = vpop.f32.mrf.mxu0  ;;  %9451 = vmatprep.mubr.f32.mxu1 %v15517_v58  ;;  %v15531_v58 = vld [vmem:[#allocation50_spill] sm:$0xff] }
 0x290   :  { %15521 = vst [vmem:[#allocation249_spill] sm:$0xff] %v12929_v46  ;;  %v12934_v5 = vadd.f32 %v9074_v52, %v3680_v37  ;;  %v3687_v23 = vadd.f32 %v3686_v20, %v15525_v10  ;;  %v15529_v46 = vld [vmem:[#allocation57_spill] sm:$0xff] }
 0x291   :  { %v4826_v6 = vpop.f32.mrf.mxu1  ;;  %v8856_v1 = vpop.f32.mrf.mxu0  ;;  %9231 = vmatmul.mubr.f32.gmra.mxu0 %v15526_v27 }
 0x292   :  { %15524 = vst [vmem:[#allocation217_spill] sm:$0xff] %v12934_v5  ;;  %v12939_v24 = vadd.f32 %v4826_v6, %v3673_v33  ;;  %v3708_v34 = vadd.f32 %v8856_v1, %v15528_v28  ;;  %9233 = vmatprep.mubr.f32.mxu0 %v15529_v46  ;;  %9452 = vmatmul.mubr.f32.gmra.mxu1 %v15520_v54  ;;  %v15532_v5 = vld [vmem:[#allocation58_spill] sm:$0xff]  ;;  %v15534_v6 = vld [vmem:[#allocation52_spill] sm:$0xff] }
 0x293   :  { %v9077_v62 = vpop.f32.mrf.mxu1  ;;  %v3700_v51 = vpop.f32.mrf.mxu0  ;;  %9454 = vmatprep.mubr.f32.mxu1 %v15523_v12  ;;  %v15537_v12 = vld [vmem:[#allocation54_spill] sm:$0xff] }
 0x294   :  { %15527 = vst [vmem:[#allocation251_spill] sm:$0xff] %v12939_v24  ;;  %v12944_v37 = vadd.f32 %v9077_v62, %v3694_v14  ;;  %v3701_v52 = vadd.f32 %v3700_v51, %v15531_v58  ;;  %v15535_v24 = vld [vmem:[#allocation61_spill] sm:$0xff] }
 0x295   :  { %v4842_v20 = vpop.f32.mrf.mxu1  ;;  %v8859_v10 = vpop.f32.mrf.mxu0  ;;  %9234 = vmatmul.mubr.f32.gmra.mxu0 %v15532_v5 }
 0x296   :  { %15530 = vst [vmem:[#allocation221_spill] sm:$0xff] %v12944_v37  ;;  %v12949_v33 = vadd.f32 %v4842_v20, %v3687_v23  ;;  %v3722_v1 = vadd.f32 %v8859_v10, %v15534_v6  ;;  %9236 = vmatprep.mubr.f32.mxu0 %v15535_v24  ;;  %9455 = vmatmul.mubr.f32.gmra.mxu1 %v15526_v27  ;;  %v15538_v37 = vld [vmem:[#allocation63_spill] sm:$0xff] }
 0x297   :  { %v9080_v28 = vpop.f32.mrf.mxu1  ;;  %v3714_v54 = vpop.f32.mrf.mxu0  ;;  %9457 = vmatprep.mubr.f32.mxu1 %v15529_v46  ;;  %v15540_v20 = vld [vmem:[#allocation55_spill] sm:$0xff] }
 0x298   :  { %15533 = vst [vmem:[#allocation255_spill] sm:$0xff] %v12949_v33  ;;  %v12954_v14 = vadd.f32 %v9080_v28, %v3708_v34  ;;  %v3715_v62 = vadd.f32 %v3714_v54, %v15537_v12  ;;  %v15541_v33 = vld [vmem:[#allocation65_spill] sm:$0xff]  ;;  %v15543_v46 = vld [vmem:[#allocation59_spill] sm:$0xff] }
 0x299   :  { %v4858_v51 = vpop.f32.mrf.mxu1  ;;  %v8862_v58 = vpop.f32.mrf.mxu0  ;;  %9237 = vmatmul.mubr.f32.gmra.mxu0 %v15538_v37 }
 0x29a   :  { %15536 = vst [vmem:[#allocation223_spill] sm:$0xff] %v12954_v14  ;;  %v12959_v23 = vadd.f32 %v4858_v51, %v3701_v52  ;;  %v3736_v10 = vadd.f32 %v8862_v58, %v15540_v20  ;;  %9239 = vmatprep.mubr.f32.mxu0 %v15541_v33  ;;  %9458 = vmatmul.mubr.f32.gmra.mxu1 %v15532_v5  ;;  %v15544_v14 = vld [vmem:[#allocation67_spill] sm:$0xff]  ;;  %v15546_v51 = vld [vmem:[#allocation60_spill] sm:$0xff] }
 0x29b   :  { %v9083_v6 = vpop.f32.mrf.mxu1  ;;  %v3728_v27 = vpop.f32.mrf.mxu0  ;;  %9460 = vmatprep.mubr.f32.mxu1 %v15535_v24  ;;  %v15549_v24 = vld [vmem:[#allocation62_spill] sm:$0xff] }
 0x29c   :  { %15539 = vst [vmem:[#allocation257_spill] sm:$0xff] %v12959_v23  ;;  %v12964_v34 = vadd.f32 %v9083_v6, %v3722_v1  ;;  %v3729_v28 = vadd.f32 %v3728_v27, %v15543_v46  ;;  %v15547_v23 = vld [vmem:[#allocation68_spill] sm:$0xff] }
 0x29d   :  { %v4874_v54 = vpop.f32.mrf.mxu1  ;;  %v8865_v12 = vpop.f32.mrf.mxu0  ;;  %9240 = vmatmul.mubr.f32.gmra.mxu0 %v15544_v14 }
 0x29e   :  { %15542 = vst [vmem:[#allocation224_spill] sm:$0xff] %v12964_v34  ;;  %v12969_v52 = vadd.f32 %v4874_v54, %v3715_v62  ;;  %v3750_v58 = vadd.f32 %v8865_v12, %v15546_v51  ;;  %9242 = vmatprep.mubr.f32.mxu0 %v15547_v23  ;;  %9461 = vmatmul.mubr.f32.gmra.mxu1 %v15538_v37  ;;  %v15550_v34 = vld [vmem:[#allocation71_spill] sm:$0xff]  ;;  %v15552_v54 = vld [vmem:[#allocation64_spill] sm:$0xff] }
 0x29f   :  { %v9086_v20 = vpop.f32.mrf.mxu1  ;;  %v3742_v5 = vpop.f32.mrf.mxu0  ;;  %9463 = vmatprep.mubr.f32.mxu1 %v15541_v33  ;;  %v15555_v33 = vld [vmem:[#allocation66_spill] sm:$0xff] }
 0x2a0   :  { %15545 = vst [vmem:[#allocation261_spill] sm:$0xff] %v12969_v52  ;;  %v12974_v1 = vadd.f32 %v9086_v20, %v3736_v10  ;;  %v3743_v6 = vadd.f32 %v3742_v5, %v15549_v24  ;;  %v15553_v52 = vld [vmem:[#allocation73_spill] sm:$0xff] }
 0x2a1   :  { %v4890_v27 = vpop.f32.mrf.mxu1  ;;  %v8868_v46 = vpop.f32.mrf.mxu0  ;;  %9243 = vmatmul.mubr.f32.gmra.mxu0 %v15550_v34 }
 0x2a2   :  { %15548 = vst [vmem:[#allocation230_spill] sm:$0xff] %v12974_v1  ;;  %v12979_v62 = vadd.f32 %v4890_v27, %v3729_v28  ;;  %v3764_v12 = vadd.f32 %v8868_v46, %v15552_v54  ;;  %9245 = vmatprep.mubr.f32.mxu0 %v15553_v52  ;;  %9464 = vmatmul.mubr.f32.gmra.mxu1 %v15544_v14  ;;  %v15556_v1 = vld [vmem:[#allocation76_spill] sm:$0xff]  ;;  %v15558_v27 = vld [vmem:[#allocation69_spill] sm:$0xff] }
 0x2a3   :  { %v9089_v51 = vpop.f32.mrf.mxu1  ;;  %v3756_v37 = vpop.f32.mrf.mxu0  ;;  %9466 = vmatprep.mubr.f32.mxu1 %v15547_v23  ;;  %v15561_v23 = vld [vmem:[#allocation70_spill] sm:$0xff] }
 0x2a4   :  { %15551 = vst [vmem:[#allocation264_spill] sm:$0xff] %v12979_v62  ;;  %v12984_v10 = vadd.f32 %v9089_v51, %v3750_v58  ;;  %v3757_v20 = vadd.f32 %v3756_v37, %v15555_v33  ;;  %v15559_v62 = vld [vmem:[#allocation77_spill] sm:$0xff] }
 0x2a5   :  { %v4906_v5 = vpop.f32.mrf.mxu1  ;;  %v8871_v24 = vpop.f32.mrf.mxu0  ;;  %9246 = vmatmul.mubr.f32.gmra.mxu0 %v15556_v1 }
 0x2a6   :  { %15554 = vst [vmem:[#allocation232_spill] sm:$0xff] %v12984_v10  ;;  %v12989_v28 = vadd.f32 %v4906_v5, %v3743_v6  ;;  %v3778_v46 = vadd.f32 %v8871_v24, %v15558_v27  ;;  %9248 = vmatprep.mubr.f32.mxu0 %v15559_v62  ;;  %9467 = vmatmul.mubr.f32.gmra.mxu1 %v15550_v34  ;;  %v15562_v10 = vld [vmem:[#allocation78_spill] sm:$0xff]  ;;  %v15564_v5 = vld [vmem:[#allocation72_spill] sm:$0xff] }
 0x2a7   :  { %v9092_v54 = vpop.f32.mrf.mxu1  ;;  %v3770_v14 = vpop.f32.mrf.mxu0  ;;  %9469 = vmatprep.mubr.f32.mxu1 %v15553_v52  ;;  %v15567_v52 = vld [vmem:[#allocation74_spill] sm:$0xff] }
 0x2a8   :  { %15557 = vst [vmem:[#allocation266_spill] sm:$0xff] %v12989_v28  ;;  %v12994_v58 = vadd.f32 %v9092_v54, %v3764_v12  ;;  %v3771_v51 = vadd.f32 %v3770_v14, %v15561_v23  ;;  %v15565_v28 = vld [vmem:[#allocation81_spill] sm:$0xff] }
 0x2a9   :  { %v4922_v37 = vpop.f32.mrf.mxu1  ;;  %v8874_v33 = vpop.f32.mrf.mxu0  ;;  %9249 = vmatmul.mubr.f32.gmra.mxu0 %v15562_v10 }
 0x2aa   :  { %15560 = vst [vmem:[#allocation235_spill] sm:$0xff] %v12994_v58  ;;  %v12999_v6 = vadd.f32 %v4922_v37, %v3757_v20  ;;  %v3792_v24 = vadd.f32 %v8874_v33, %v15564_v5  ;;  %9251 = vmatprep.mubr.f32.mxu0 %v15565_v28  ;;  %9470 = vmatmul.mubr.f32.gmra.mxu1 %v15556_v1  ;;  %v15568_v58 = vld [vmem:[#allocation83_spill] sm:$0xff] }
 0x2ab   :  { %v9095_v27 = vpop.f32.mrf.mxu1  ;;  %v3784_v34 = vpop.f32.mrf.mxu0  ;;  %9472 = vmatprep.mubr.f32.mxu1 %v15559_v62  ;;  %v15570_v37 = vld [vmem:[#allocation75_spill] sm:$0xff] }
 0x2ac   :  { %15563 = vst [vmem:[#allocation237_spill] sm:$0xff] %v12999_v6  ;;  %v13004_v12 = vadd.f32 %v9095_v27, %v3778_v46  ;;  %v3785_v54 = vadd.f32 %v3784_v34, %v15567_v52  ;;  %v15571_v6 = vld [vmem:[#allocation85_spill] sm:$0xff]  ;;  %v15573_v62 = vld [vmem:[#allocation79_spill] sm:$0xff] }
 0x2ad   :  { %v4938_v14 = vpop.f32.mrf.mxu1  ;;  %v8877_v23 = vpop.f32.mrf.mxu0  ;;  %9252 = vmatmul.mubr.f32.gmra.mxu0 %v15568_v58 }
 0x2ae   :  { %15566 = vst [vmem:[#allocation270_spill] sm:$0xff] %v13004_v12  ;;  %v13009_v20 = vadd.f32 %v4938_v14, %v3771_v51  ;;  %v3806_v33 = vadd.f32 %v8877_v23, %v15570_v37  ;;  %9254 = vmatprep.mubr.f32.mxu0 %v15571_v6  ;;  %9473 = vmatmul.mubr.f32.gmra.mxu1 %v15562_v10  ;;  %v15574_v12 = vld [vmem:[#allocation87_spill] sm:$0xff]  ;;  %v15576_v14 = vld [vmem:[#allocation80_spill] sm:$0xff] }
 0x2af   :  { %v9098_v5 = vpop.f32.mrf.mxu1  ;;  %v3798_v1 = vpop.f32.mrf.mxu0  ;;  %9475 = vmatprep.mubr.f32.mxu1 %v15565_v28  ;;  %v15579_v28 = vld [vmem:[#allocation82_spill] sm:$0xff] }
 0x2b0   :  { %15569 = vst [vmem:[#allocation238_spill] sm:$0xff] %v13009_v20  ;;  %v13014_v46 = vadd.f32 %v9098_v5, %v3792_v24  ;;  %v3799_v27 = vadd.f32 %v3798_v1, %v15573_v62  ;;  %v15577_v20 = vld [vmem:[#allocation88_spill] sm:$0xff] }
 0x2b1   :  { %v4954_v34 = vpop.f32.mrf.mxu1  ;;  %v8880_v52 = vpop.f32.mrf.mxu0  ;;  %9255 = vmatmul.mubr.f32.gmra.mxu0 %v15574_v12 }
 0x2b2   :  { %15572 = vst [vmem:[#allocation274_spill] sm:$0xff] %v13014_v46  ;;  %v13019_v51 = vadd.f32 %v4954_v34, %v3785_v54  ;;  %v3820_v23 = vadd.f32 %v8880_v52, %v15576_v14  ;;  %9257 = vmatprep.mubr.f32.mxu0 %v15577_v20  ;;  %9476 = vmatmul.mubr.f32.gmra.mxu1 %v15568_v58  ;;  %v15580_v46 = vld [vmem:[#allocation91_spill] sm:$0xff]  ;;  %v15582_v34 = vld [vmem:[#allocation84_spill] sm:$0xff] }
 0x2b3   :  { %v9101_v37 = vpop.f32.mrf.mxu1  ;;  %v3812_v10 = vpop.f32.mrf.mxu0  ;;  %9478 = vmatprep.mubr.f32.mxu1 %v15571_v6  ;;  %v15585_v6 = vld [vmem:[#allocation86_spill] sm:$0xff] }
 0x2b4   :  { %15575 = vst [vmem:[#allocation244_spill] sm:$0xff] %v13019_v51  ;;  %v13024_v24 = vadd.f32 %v9101_v37, %v3806_v33  ;;  %v3813_v5 = vadd.f32 %v3812_v10, %v15579_v28  ;;  %v15583_v51 = vld [vmem:[#allocation93_spill] sm:$0xff] }
 0x2b5   :  { %v4970_v1 = vpop.f32.mrf.mxu1  ;;  %v8883_v62 = vpop.f32.mrf.mxu0  ;;  %9258 = vmatmul.mubr.f32.gmra.mxu0 %v15580_v46 }
 0x2b6   :  { %15578 = vst [vmem:[#allocation277_spill] sm:$0xff] %v13024_v24  ;;  %v13029_v54 = vadd.f32 %v4970_v1, %v3799_v27  ;;  %v3834_v52 = vadd.f32 %v8883_v62, %v15582_v34  ;;  %9260 = vmatprep.mubr.f32.mxu0 %v15583_v51  ;;  %9479 = vmatmul.mubr.f32.gmra.mxu1 %v15574_v12  ;;  %v15586_v24 = vld [vmem:[#allocation96_spill] sm:$0xff]  ;;  %v15588_v1 = vld [vmem:[#allocation89_spill] sm:$0xff] }
 0x2b7   :  { %v9104_v14 = vpop.f32.mrf.mxu1  ;;  %v3826_v58 = vpop.f32.mrf.mxu0  ;;  %9481 = vmatprep.mubr.f32.mxu1 %v15577_v20  ;;  %v15591_v20 = vld [vmem:[#allocation90_spill] sm:$0xff] }
 0x2b8   :  { %15581 = vst [vmem:[#allocation246_spill] sm:$0xff] %v13029_v54  ;;  %v13034_v33 = vadd.f32 %v9104_v14, %v3820_v23  ;;  %v3827_v37 = vadd.f32 %v3826_v58, %v15585_v6  ;;  %v15589_v54 = vld [vmem:[#allocation97_spill] sm:$0xff] }
 0x2b9   :  { %v4986_v10 = vpop.f32.mrf.mxu1  ;;  %v8886_v28 = vpop.f32.mrf.mxu0  ;;  %9261 = vmatmul.mubr.f32.gmra.mxu0 %v15586_v24 }
 0x2ba   :  { %15584 = vst [vmem:[#allocation280_spill] sm:$0xff] %v13034_v33  ;;  %v13039_v27 = vadd.f32 %v4986_v10, %v3813_v5  ;;  %v3848_v62 = vadd.f32 %v8886_v28, %v15588_v1  ;;  %9263 = vmatprep.mubr.f32.mxu0 %v15589_v54  ;;  %9482 = vmatmul.mubr.f32.gmra.mxu1 %v15580_v46  ;;  %v15592_v33 = vld [vmem:[#allocation98_spill] sm:$0xff]  ;;  %v15594_v10 = vld [vmem:[#allocation92_spill] sm:$0xff] }
 0x2bb   :  { %v9107_v34 = vpop.f32.mrf.mxu1  ;;  %v3840_v12 = vpop.f32.mrf.mxu0  ;;  %9484 = vmatprep.mubr.f32.mxu1 %v15583_v51  ;;  %v15597_v51 = vld [vmem:[#allocation94_spill] sm:$0xff] }
 0x2bc   :  { %15587 = vst [vmem:[#allocation247_spill] sm:$0xff] %v13039_v27  ;;  %v13044_v23 = vadd.f32 %v9107_v34, %v3834_v52  ;;  %v3841_v14 = vadd.f32 %v3840_v12, %v15591_v20  ;;  %v15595_v27 = vld [vmem:[#allocation101_spill] sm:$0xff] }
 0x2bd   :  { %v5002_v58 = vpop.f32.mrf.mxu1  ;;  %v8889_v6 = vpop.f32.mrf.mxu0  ;;  %9264 = vmatmul.mubr.f32.gmra.mxu0 %v15592_v33 }
 0x2be   :  { %15590 = vst [vmem:[#allocation284_spill] sm:$0xff] %v13044_v23  ;;  %v13049_v5 = vadd.f32 %v5002_v58, %v3827_v37  ;;  %v3862_v28 = vadd.f32 %v8889_v6, %v15594_v10  ;;  %9266 = vmatprep.mubr.f32.mxu0 %v15595_v27  ;;  %9485 = vmatmul.mubr.f32.gmra.mxu1 %v15586_v24  ;;  %v15598_v23 = vld [vmem:[#allocation103_spill] sm:$0xff] }
 0x2bf   :  { %v9110_v1 = vpop.f32.mrf.mxu1  ;;  %v3854_v46 = vpop.f32.mrf.mxu0  ;;  %9487 = vmatprep.mubr.f32.mxu1 %v15589_v54  ;;  %v15600_v58 = vld [vmem:[#allocation95_spill] sm:$0xff] }
 0x2c0   :  { %15593 = vst [vmem:[#allocation252_spill] sm:$0xff] %v13049_v5  ;;  %v13054_v52 = vadd.f32 %v9110_v1, %v3848_v62  ;;  %v3855_v34 = vadd.f32 %v3854_v46, %v15597_v51  ;;  %v15601_v5 = vld [vmem:[#allocation105_spill] sm:$0xff]  ;;  %v15603_v54 = vld [vmem:[#allocation99_spill] sm:$0xff] }
 0x2c1   :  { %v5018_v12 = vpop.f32.mrf.mxu1  ;;  %v8892_v20 = vpop.f32.mrf.mxu0  ;;  %9267 = vmatmul.mubr.f32.gmra.mxu0 %v15598_v23 }
 0x2c2   :  { %15596 = vst [vmem:[#allocation286_spill] sm:$0xff] %v13054_v52  ;;  %v13059_v37 = vadd.f32 %v5018_v12, %v3841_v14  ;;  %v3876_v6 = vadd.f32 %v8892_v20, %v15600_v58  ;;  %9269 = vmatprep.mubr.f32.mxu0 %v15601_v5  ;;  %9488 = vmatmul.mubr.f32.gmra.mxu1 %v15592_v33  ;;  %v15604_v52 = vld [vmem:[#allocation107_spill] sm:$0xff]  ;;  %v15606_v12 = vld [vmem:[#allocation100_spill] sm:$0xff] }
 0x2c3   :  { %v9113_v10 = vpop.f32.mrf.mxu1  ;;  %v3868_v24 = vpop.f32.mrf.mxu0  ;;  %9490 = vmatprep.mubr.f32.mxu1 %v15595_v27  ;;  %v15609_v27 = vld [vmem:[#allocation102_spill] sm:$0xff] }
 0x2c4   :  { %15599 = vst [vmem:[#allocation256_spill] sm:$0xff] %v13059_v37  ;;  %v13064_v62 = vadd.f32 %v9113_v10, %v3862_v28  ;;  %v3869_v1 = vadd.f32 %v3868_v24, %v15603_v54  ;;  %v15607_v37 = vld [vmem:[#allocation108_spill] sm:$0xff] }
 0x2c5   :  { %v5034_v46 = vpop.f32.mrf.mxu1  ;;  %v8895_v51 = vpop.f32.mrf.mxu0  ;;  %9270 = vmatmul.mubr.f32.gmra.mxu0 %v15604_v52 }
 0x2c6   :  { %15602 = vst [vmem:[#allocation258_spill] sm:$0xff] %v13064_v62  ;;  %v13069_v14 = vadd.f32 %v5034_v46, %v3855_v34  ;;  %v3890_v20 = vadd.f32 %v8895_v51, %v15606_v12  ;;  %9272 = vmatprep.mubr.f32.mxu0 %v15607_v37  ;;  %9491 = vmatmul.mubr.f32.gmra.mxu1 %v15598_v23  ;;  %v15610_v62 = vld [vmem:[#allocation111_spill] sm:$0xff]  ;;  %v15612_v46 = vld [vmem:[#allocation104_spill] sm:$0xff] }
 0x2c7   :  { %v9116_v58 = vpop.f32.mrf.mxu1  ;;  %v3882_v33 = vpop.f32.mrf.mxu0  ;;  %9493 = vmatprep.mubr.f32.mxu1 %v15601_v5  ;;  %v15615_v5 = vld [vmem:[#allocation106_spill] sm:$0xff] }
 0x2c8   :  { %15605 = vst [vmem:[#allocation291_spill] sm:$0xff] %v13069_v14  ;;  %v13074_v28 = vadd.f32 %v9116_v58, %v3876_v6  ;;  %v3883_v10 = vadd.f32 %v3882_v33, %v15609_v27  ;;  %v15613_v14 = vld [vmem:[#allocation113_spill] sm:$0xff] }
 0x2c9   :  { %v5050_v24 = vpop.f32.mrf.mxu1  ;;  %v8898_v54 = vpop.f32.mrf.mxu0  ;;  %9273 = vmatmul.mubr.f32.gmra.mxu0 %v15610_v62 }
 0x2ca   :  { %15608 = vst [vmem:[#allocation259_spill] sm:$0xff] %v13074_v28  ;;  %v13079_v34 = vadd.f32 %v5050_v24, %v3869_v1  ;;  %v3904_v51 = vadd.f32 %v8898_v54, %v15612_v46  ;;  %9275 = vmatprep.mubr.f32.mxu0 %v15613_v14  ;;  %9494 = vmatmul.mubr.f32.gmra.mxu1 %v15604_v52  ;;  %v15616_v28 = vld [vmem:[#allocation115_spill] sm:$0xff]  ;;  %v15618_v24 = vld [vmem:[#allocation109_spill] sm:$0xff] }
 0x2cb   :  { %v9119_v12 = vpop.f32.mrf.mxu1  ;;  %v3896_v23 = vpop.f32.mrf.mxu0  ;;  %9496 = vmatprep.mubr.f32.mxu1 %v15607_v37  ;;  %v15621_v37 = vld [vmem:[#allocation110_spill] sm:$0xff] }
 0x2cc   :  { %15611 = vst [vmem:[#allocation293_spill] sm:$0xff] %v13079_v34  ;;  %v13084_v6 = vadd.f32 %v9119_v12, %v3890_v20  ;;  %v3897_v58 = vadd.f32 %v3896_v23, %v15615_v5  ;;  %v15619_v34 = vld [vmem:[#allocation117_spill] sm:$0xff] }
 0x2cd   :  { %v5066_v33 = vpop.f32.mrf.mxu1  ;;  %v8901_v27 = vpop.f32.mrf.mxu0  ;;  %9276 = vmatmul.mubr.f32.gmra.mxu0 %v15616_v28 }
 0x2ce   :  { %15614 = vst [vmem:[#allocation265_spill] sm:$0xff] %v13084_v6  ;;  %v13089_v1 = vadd.f32 %v5066_v33, %v3883_v10  ;;  %v3918_v54 = vadd.f32 %v8901_v27, %v15618_v24  ;;  %9278 = vmatprep.mubr.f32.mxu0 %v15619_v34  ;;  %9497 = vmatmul.mubr.f32.gmra.mxu1 %v15610_v62  ;;  %v15622_v6 = vld [vmem:[#allocation119_spill] sm:$0xff]  ;;  %v15624_v33 = vld [vmem:[#allocation112_spill] sm:$0xff] }
 0x2cf   :  { %v9122_v46 = vpop.f32.mrf.mxu1  ;;  %v3910_v52 = vpop.f32.mrf.mxu0  ;;  %9499 = vmatprep.mubr.f32.mxu1 %v15613_v14  ;;  %v15627_v14 = vld [vmem:[#allocation114_spill] sm:$0xff] }
 0x2d0   :  { %15617 = vst [vmem:[#allocation296_spill] sm:$0xff] %v13089_v1  ;;  %v13094_v20 = vadd.f32 %v9122_v46, %v3904_v51  ;;  %v3911_v12 = vadd.f32 %v3910_v52, %v15621_v37  ;;  %v15625_v1 = vld [vmem:[#allocation121_spill] sm:$0xff] }
 0x2d1   :  { %v5082_v23 = vpop.f32.mrf.mxu1  ;;  %v8904_v5 = vpop.f32.mrf.mxu0  ;;  %9279 = vmatmul.mubr.f32.gmra.mxu0 %v15622_v6 }
 0x2d2   :  { %15620 = vst [vmem:[#allocation267_spill] sm:$0xff] %v13094_v20  ;;  %v13099_v10 = vadd.f32 %v5082_v23, %v3897_v58  ;;  %v3932_v27 = vadd.f32 %v8904_v5, %v15624_v33  ;;  %9281 = vmatprep.mubr.f32.mxu0 %v15625_v1  ;;  %9500 = vmatmul.mubr.f32.gmra.mxu1 %v15616_v28  ;;  %v15628_v20 = vld [vmem:[#allocation122_spill] sm:$0xff]  ;;  %v15630_v23 = vld [vmem:[#allocation116_spill] sm:$0xff] }
 0x2d3   :  { %v9125_v24 = vpop.f32.mrf.mxu1  ;;  %v3924_v62 = vpop.f32.mrf.mxu0  ;;  %9502 = vmatprep.mubr.f32.mxu1 %v15619_v34  ;;  %v15633_v34 = vld [vmem:[#allocation118_spill] sm:$0xff] }
 0x2d4   :  { %15623 = vst [vmem:[#allocation268_spill] sm:$0xff] %v13099_v10  ;;  %v13104_v51 = vadd.f32 %v9125_v24, %v3918_v54  ;;  %v3925_v46 = vadd.f32 %v3924_v62, %v15627_v14  ;;  %v15631_v10 = vld [vmem:[#allocation125_spill] sm:$0xff] }
 0x2d5   :  { %v5098_v52 = vpop.f32.mrf.mxu1  ;;  %v8907_v37 = vpop.f32.mrf.mxu0  ;;  %9282 = vmatmul.mubr.f32.gmra.mxu0 %v15628_v20 }
 0x2d6   :  { %15626 = vst [vmem:[#allocation272_spill] sm:$0xff] %v13104_v51  ;;  %v13109_v58 = vadd.f32 %v5098_v52, %v3911_v12  ;;  %v3946_v5 = vadd.f32 %v8907_v37, %v15630_v23  ;;  %9284 = vmatprep.mubr.f32.mxu0 %v15631_v10  ;;  %9503 = vmatmul.mubr.f32.gmra.mxu1 %v15622_v6  ;;  %v15634_v51 = vld [vmem:[#allocation127_spill] sm:$0xff]  ;;  %v15636_v52 = vld [vmem:[#allocation120_spill] sm:$0xff] }
 0x2d7   :  { %v9128_v33 = vpop.f32.mrf.mxu1  ;;  %v3938_v28 = vpop.f32.mrf.mxu0  ;;  %9505 = vmatprep.mubr.f32.mxu1 %v15625_v1  ;;  %v15639_v1 = vld [vmem:[#allocation123_spill] sm:$0xff] }
 0x2d8   :  { %15629 = vst [vmem:[#allocation278_spill] sm:$0xff] %v13109_v58  ;;  %v13114_v54 = vadd.f32 %v9128_v33, %v3932_v27  ;;  %v3939_v24 = vadd.f32 %v3938_v28, %v15633_v34  ;;  %v15637_v58 = vld [vmem:[#allocation128_spill] sm:$0xff] }
 0x2d9   :  { %v5114_v62 = vpop.f32.mrf.mxu1  ;;  %v8910_v14 = vpop.f32.mrf.mxu0  ;;  %9285 = vmatmul.mubr.f32.gmra.mxu0 %v15634_v51 }
 0x2da   :  { %15632 = vst [vmem:[#allocation279_spill] sm:$0xff] %v13114_v54  ;;  %v13119_v12 = vadd.f32 %v5114_v62, %v3925_v46  ;;  %v3960_v37 = vadd.f32 %v8910_v14, %v15636_v52  ;;  %9287 = vmatprep.mubr.f32.mxu0 %v15637_v58  ;;  %9506 = vmatmul.mubr.f32.gmra.mxu1 %v15628_v20  ;;  %v15640_v54 = vld [vmem:[#allocation131_spill] sm:$0xff]  ;;  %v15642_v62 = vld [vmem:[#allocation124_spill] sm:$0xff] }
 0x2db   :  { %v9131_v23 = vpop.f32.mrf.mxu1  ;;  %v3952_v6 = vpop.f32.mrf.mxu0  ;;  %9508 = vmatprep.mubr.f32.mxu1 %v15631_v10  ;;  %v15645_v10 = vld [vmem:[#allocation126_spill] sm:$0xff] }
 0x2dc   :  { %15635 = vst [vmem:[#allocation281_spill] sm:$0xff] %v13119_v12  ;;  %v13124_v27 = vadd.f32 %v9131_v23, %v3946_v5  ;;  %v3953_v33 = vadd.f32 %v3952_v6, %v15639_v1  ;;  %v15643_v12 = vld [vmem:[#allocation133_spill] sm:$0xff] }
 0x2dd   :  { %v5130_v28 = vpop.f32.mrf.mxu1  ;;  %v8913_v34 = vpop.f32.mrf.mxu0  ;;  %9288 = vmatmul.mubr.f32.gmra.mxu0 %v15640_v54 }
 0x2de   :  { %15638 = vst [vmem:[#allocation282_spill] sm:$0xff] %v13124_v27  ;;  %v13129_v46 = vadd.f32 %v5130_v28, %v3939_v24  ;;  %v3974_v14 = vadd.f32 %v8913_v34, %v15642_v62  ;;  %9290 = vmatprep.mubr.f32.mxu0 %v15643_v12  ;;  %9509 = vmatmul.mubr.f32.gmra.mxu1 %v15634_v51  ;;  %v15646_v27 = vld [vmem:[#allocation135_spill] sm:$0xff]  ;;  %v15648_v28 = vld [vmem:[#allocation129_spill] sm:$0xff] }
 0x2df   :  { %v9134_v52 = vpop.f32.mrf.mxu1  ;;  %v3966_v20 = vpop.f32.mrf.mxu0  ;;  %9511 = vmatprep.mubr.f32.mxu1 %v15637_v58  ;;  %v15651_v58 = vld [vmem:[#allocation130_spill] sm:$0xff] }
 0x2e0   :  { %15641 = vst [vmem:[#allocation287_spill] sm:$0xff] %v13129_v46  ;;  %v13134_v5 = vadd.f32 %v9134_v52, %v3960_v37  ;;  %v3967_v23 = vadd.f32 %v3966_v20, %v15645_v10  ;;  %v15649_v46 = vld [vmem:[#allocation137_spill] sm:$0xff] }
 0x2e1   :  { %v5146_v6 = vpop.f32.mrf.mxu1  ;;  %v8916_v1 = vpop.f32.mrf.mxu0  ;;  %9291 = vmatmul.mubr.f32.gmra.mxu0 %v15646_v27 }
 0x2e2   :  { %15644 = vst [vmem:[#allocation289_spill] sm:$0xff] %v13134_v5  ;;  %v13139_v24 = vadd.f32 %v5146_v6, %v3953_v33  ;;  %v3988_v34 = vadd.f32 %v8916_v1, %v15648_v28  ;;  %9293 = vmatprep.mubr.f32.mxu0 %v15649_v46  ;;  %9512 = vmatmul.mubr.f32.gmra.mxu1 %v15640_v54  ;;  %v15652_v5 = vld [vmem:[#allocation139_spill] sm:$0xff]  ;;  %v15654_v6 = vld [vmem:[#allocation132_spill] sm:$0xff] }
 0x2e3   :  { %v9137_v62 = vpop.f32.mrf.mxu1  ;;  %v3980_v51 = vpop.f32.mrf.mxu0  ;;  %9514 = vmatprep.mubr.f32.mxu1 %v15643_v12  ;;  %v15657_v12 = vld [vmem:[#allocation134_spill] sm:$0xff] }
 0x2e4   :  { %15647 = vst [vmem:[#allocation292_spill] sm:$0xff] %v13139_v24  ;;  %v13144_v37 = vadd.f32 %v9137_v62, %v3974_v14  ;;  %v3981_v52 = vadd.f32 %v3980_v51, %v15651_v58  ;;  %v15655_v24 = vld [vmem:[#allocation141_spill] sm:$0xff] }
 0x2e5   :  { %v5162_v20 = vpop.f32.mrf.mxu1  ;;  %v8919_v10 = vpop.f32.mrf.mxu0  ;;  %9294 = vmatmul.mubr.f32.gmra.mxu0 %v15652_v5 }
 0x2e6   :  { %15650 = vst [vmem:[#allocation2_spill] sm:$0xff] %v13144_v37  ;;  %v13149_v33 = vadd.f32 %v5162_v20, %v3967_v23  ;;  %v4002_v1 = vadd.f32 %v8919_v10, %v15654_v6  ;;  %9296 = vmatprep.mubr.f32.mxu0 %v15655_v24  ;;  %9515 = vmatmul.mubr.f32.gmra.mxu1 %v15646_v27  ;;  %v15658_v37 = vld [vmem:[#allocation142_spill] sm:$0xff]  ;;  %v15660_v20 = vld [vmem:[#allocation136_spill] sm:$0xff] }
 0x2e7   :  { %v9140_v28 = vpop.f32.mrf.mxu1  ;;  %v3994_v54 = vpop.f32.mrf.mxu0  ;;  %9517 = vmatprep.mubr.f32.mxu1 %v15649_v46  ;;  %v15663_v46 = vld [vmem:[#allocation138_spill] sm:$0xff] }
 0x2e8   :  { %15653 = vst [vmem:[#allocation3_spill] sm:$0xff] %v13149_v33  ;;  %v13154_v14 = vadd.f32 %v9140_v28, %v3988_v34  ;;  %v3995_v62 = vadd.f32 %v3994_v54, %v15657_v12  ;;  %v15661_v33 = vld [vmem:[#allocation145_spill] sm:$0xff] }
 0x2e9   :  { %v5178_v51 = vpop.f32.mrf.mxu1  ;;  %v8922_v58 = vpop.f32.mrf.mxu0  ;;  %9297 = vmatmul.mubr.f32.gmra.mxu0 %v15658_v37 }
 0x2ea   :  { %15656 = vst [vmem:[#allocation4_spill] sm:$0xff] %v13154_v14  ;;  %v13159_v23 = vadd.f32 %v5178_v51, %v3981_v52  ;;  %v4016_v10 = vadd.f32 %v8922_v58, %v15660_v20  ;;  %9299 = vmatprep.mubr.f32.mxu0 %v15661_v33  ;;  %9518 = vmatmul.mubr.f32.gmra.mxu1 %v15652_v5  ;;  %v15664_v14 = vld [vmem:[#allocation147_spill] sm:$0xff]  ;;  %v15666_v51 = vld [vmem:[#allocation140_spill] sm:$0xff] }
 0x2eb   :  { %v9143_v6 = vpop.f32.mrf.mxu1  ;;  %v4008_v27 = vpop.f32.mrf.mxu0  ;;  %9520 = vmatprep.mubr.f32.mxu1 %v15655_v24  ;;  %v15669_v24 = vld [vmem:[#allocation143_spill] sm:$0xff] }
 0x2ec   :  { %15659 = vst [vmem:[#allocation5_spill] sm:$0xff] %v13159_v23  ;;  %v13164_v34 = vadd.f32 %v9143_v6, %v4002_v1  ;;  %v4009_v28 = vadd.f32 %v4008_v27, %v15663_v46  ;;  %v15667_v23 = vld [vmem:[#allocation148_spill] sm:$0xff] }
 0x2ed   :  { %v5194_v54 = vpop.f32.mrf.mxu1  ;;  %v8925_v12 = vpop.f32.mrf.mxu0  ;;  %9300 = vmatmul.mubr.f32.gmra.mxu0 %v15664_v14 }
 0x2ee   :  { %15662 = vst [vmem:[#allocation6_spill] sm:$0xff] %v13164_v34  ;;  %v13169_v52 = vadd.f32 %v5194_v54, %v3995_v62  ;;  %v4030_v58 = vadd.f32 %v8925_v12, %v15666_v51  ;;  %9302 = vmatprep.mubr.f32.mxu0 %v15667_v23  ;;  %9521 = vmatmul.mubr.f32.gmra.mxu1 %v15658_v37  ;;  %v15670_v34 = vld [vmem:[#allocation151_spill] sm:$0xff]  ;;  %v15672_v54 = vld [vmem:[#allocation144_spill] sm:$0xff] }
 0x2ef   :  { %v9146_v20 = vpop.f32.mrf.mxu1  ;;  %v4022_v5 = vpop.f32.mrf.mxu0  ;;  %9523 = vmatprep.mubr.f32.mxu1 %v15661_v33  ;;  %v15675_v33 = vld [vmem:[#allocation146_spill] sm:$0xff] }
 0x2f0   :  { %15665 = vst [vmem:[#allocation7_spill] sm:$0xff] %v13169_v52  ;;  %v13174_v1 = vadd.f32 %v9146_v20, %v4016_v10  ;;  %v4023_v6 = vadd.f32 %v4022_v5, %v15669_v24  ;;  %v15673_v52 = vld [vmem:[#allocation152_spill] sm:$0xff] }
 0x2f1   :  { %v5210_v27 = vpop.f32.mrf.mxu1  ;;  %v8928_v46 = vpop.f32.mrf.mxu0  ;;  %9303 = vmatmul.mubr.f32.gmra.mxu0 %v15670_v34 }
 0x2f2   :  { %15668 = vst [vmem:[#allocation8_spill] sm:$0xff] %v13174_v1  ;;  %v13179_v62 = vadd.f32 %v5210_v27, %v4009_v28  ;;  %v4044_v12 = vadd.f32 %v8928_v46, %v15672_v54  ;;  %9305 = vmatprep.mubr.f32.mxu0 %v15673_v52  ;;  %9524 = vmatmul.mubr.f32.gmra.mxu1 %v15664_v14  ;;  %v15676_v1 = vld [vmem:[#allocation156_spill] sm:$0xff]  ;;  %v15678_v27 = vld [vmem:[#allocation149_spill] sm:$0xff] }
 0x2f3   :  { %v9149_v51 = vpop.f32.mrf.mxu1  ;;  %v4036_v37 = vpop.f32.mrf.mxu0  ;;  %9526 = vmatprep.mubr.f32.mxu1 %v15667_v23  ;;  %v15681_v23 = vld [vmem:[#allocation150_spill] sm:$0xff] }
 0x2f4   :  { %15671 = vst [vmem:[#allocation9_spill] sm:$0xff] %v13179_v62  ;;  %v13184_v10 = vadd.f32 %v9149_v51, %v4030_v58  ;;  %v4037_v20 = vadd.f32 %v4036_v37, %v15675_v33  ;;  %v15679_v62 = vld [vmem:[#allocation157_spill] sm:$0xff] }
 0x2f5   :  { %v5226_v5 = vpop.f32.mrf.mxu1  ;;  %v8931_v24 = vpop.f32.mrf.mxu0  ;;  %9306 = vmatmul.mubr.f32.gmra.mxu0 %v15676_v1 }
 0x2f6   :  { %15674 = vst [vmem:[#allocation10_spill] sm:$0xff] %v13184_v10  ;;  %v13189_v28 = vadd.f32 %v5226_v5, %v4023_v6  ;;  %v4058_v46 = vadd.f32 %v8931_v24, %v15678_v27  ;;  %9308 = vmatprep.mubr.f32.mxu0 %v15679_v62  ;;  %9527 = vmatmul.mubr.f32.gmra.mxu1 %v15670_v34  ;;  %v15682_v10 = vld [vmem:[#allocation159_spill] sm:$0xff]  ;;  %v15684_v5 = vld [vmem:[#allocation153_spill] sm:$0xff] }
 0x2f7   :  { %v9152_v54 = vpop.f32.mrf.mxu1  ;;  %v4050_v14 = vpop.f32.mrf.mxu0  ;;  %9529 = vmatprep.mubr.f32.mxu1 %v15673_v52  ;;  %v15687_v52 = vld [vmem:[#allocation154_spill] sm:$0xff] }
 0x2f8   :  { %15677 = vst [vmem:[#allocation11_spill] sm:$0xff] %v13189_v28  ;;  %v13194_v58 = vadd.f32 %v9152_v54, %v4044_v12  ;;  %v4051_v51 = vadd.f32 %v4050_v14, %v15681_v23  ;;  %v15685_v28 = vld [vmem:[#allocation161_spill] sm:$0xff] }
 0x2f9   :  { %v5242_v37 = vpop.f32.mrf.mxu1  ;;  %v8934_v33 = vpop.f32.mrf.mxu0  ;;  %9309 = vmatmul.mubr.f32.gmra.mxu0 %v15682_v10 }
 0x2fa   :  { %15680 = vst [vmem:[#allocation12_spill] sm:$0xff] %v13194_v58  ;;  %v13199_v6 = vadd.f32 %v5242_v37, %v4037_v20  ;;  %v4072_v24 = vadd.f32 %v8934_v33, %v15684_v5  ;;  %9311 = vmatprep.mubr.f32.mxu0 %v15685_v28  ;;  %9530 = vmatmul.mubr.f32.gmra.mxu1 %v15676_v1  ;;  %v15688_v58 = vld [vmem:[#allocation162_spill] sm:$0xff]  ;;  %v15690_v37 = vld [vmem:[#allocation155_spill] sm:$0xff] }
 0x2fb   :  { %v9155_v27 = vpop.f32.mrf.mxu1  ;;  %v4064_v34 = vpop.f32.mrf.mxu0  ;;  %9532 = vmatprep.mubr.f32.mxu1 %v15679_v62  ;;  %v15693_v62 = vld [vmem:[#allocation158_spill] sm:$0xff] }
 0x2fc   :  { %15683 = vst [vmem:[#allocation13_spill] sm:$0xff] %v13199_v6  ;;  %v13204_v12 = vadd.f32 %v9155_v27, %v4058_v46  ;;  %v4065_v54 = vadd.f32 %v4064_v34, %v15687_v52  ;;  %v15691_v6 = vld [vmem:[#allocation165_spill] sm:$0xff] }
 0x2fd   :  { %v5258_v14 = vpop.f32.mrf.mxu1  ;;  %v8937_v23 = vpop.f32.mrf.mxu0  ;;  %9312 = vmatmul.mubr.f32.gmra.mxu0 %v15688_v58 }
 0x2fe   :  { %15686 = vst [vmem:[#allocation14_spill] sm:$0xff] %v13204_v12  ;;  %v13209_v20 = vadd.f32 %v5258_v14, %v4051_v51  ;;  %v4086_v33 = vadd.f32 %v8937_v23, %v15690_v37  ;;  %9314 = vmatprep.mubr.f32.mxu0 %v15691_v6  ;;  %9533 = vmatmul.mubr.f32.gmra.mxu1 %v15682_v10  ;;  %v15694_v12 = vld [vmem:[#allocation167_spill] sm:$0xff]  ;;  %v15696_v14 = vld [vmem:[#allocation160_spill] sm:$0xff] }
 0x2ff   :  { %v9158_v5 = vpop.f32.mrf.mxu1  ;;  %v4078_v1 = vpop.f32.mrf.mxu0  ;;  %9535 = vmatprep.mubr.f32.mxu1 %v15685_v28  ;;  %v15699_v28 = vld [vmem:[#allocation163_spill] sm:$0xff] }
 0x300   :  { %15689 = vst [vmem:[#allocation16_spill] sm:$0xff] %v13209_v20  ;;  %v13214_v46 = vadd.f32 %v9158_v5, %v4072_v24  ;;  %v4079_v27 = vadd.f32 %v4078_v1, %v15693_v62  ;;  %v15697_v20 = vld [vmem:[#allocation168_spill] sm:$0xff] }
 0x301   :  { %v5274_v34 = vpop.f32.mrf.mxu1  ;;  %v8940_v52 = vpop.f32.mrf.mxu0  ;;  %9315 = vmatmul.mubr.f32.gmra.mxu0 %v15694_v12 }
 0x302   :  { %15692 = vst [vmem:[#allocation17_spill] sm:$0xff] %v13214_v46  ;;  %v13219_v51 = vadd.f32 %v5274_v34, %v4065_v54  ;;  %v4100_v23 = vadd.f32 %v8940_v52, %v15696_v14  ;;  %9317 = vmatprep.mubr.f32.mxu0 %v15697_v20  ;;  %9536 = vmatmul.mubr.f32.gmra.mxu1 %v15688_v58  ;;  %v15700_v46 = vld [vmem:[#allocation171_spill] sm:$0xff]  ;;  %v15702_v34 = vld [vmem:[#allocation164_spill] sm:$0xff] }
 0x303   :  { %v9161_v37 = vpop.f32.mrf.mxu1  ;;  %v4092_v10 = vpop.f32.mrf.mxu0  ;;  %9538 = vmatprep.mubr.f32.mxu1 %v15691_v6  ;;  %v15705_v6 = vld [vmem:[#allocation166_spill] sm:$0xff] }
 0x304   :  { %15695 = vst [vmem:[#allocation18_spill] sm:$0xff] %v13219_v51  ;;  %v13224_v24 = vadd.f32 %v9161_v37, %v4086_v33  ;;  %v4093_v5 = vadd.f32 %v4092_v10, %v15699_v28  ;;  %v15703_v51 = vld [vmem:[#allocation173_spill] sm:$0xff] }
 0x305   :  { %v5290_v1 = vpop.f32.mrf.mxu1  ;;  %v8943_v62 = vpop.f32.mrf.mxu0  ;;  %9318 = vmatmul.mubr.f32.gmra.mxu0 %v15700_v46 }
 0x306   :  { %15698 = vst [vmem:[#allocation20_spill] sm:$0xff] %v13224_v24  ;;  %v13229_v54 = vadd.f32 %v5290_v1, %v4079_v27  ;;  %v4114_v52 = vadd.f32 %v8943_v62, %v15702_v34  ;;  %9320 = vmatprep.mubr.f32.mxu0 %v15703_v51  ;;  %9539 = vmatmul.mubr.f32.gmra.mxu1 %v15694_v12  ;;  %v15706_v24 = vld [vmem:[#allocation176_spill] sm:$0xff]  ;;  %v15707_v1 = vld [vmem:[#allocation169_spill] sm:$0xff] }
 0x307   :  { %v9164_v14 = vpop.f32.mrf.mxu1  ;;  %v4106_v58 = vpop.f32.mrf.mxu0  ;;  %9541 = vmatprep.mubr.f32.mxu1 %v15697_v20  ;;  %v15710_v20 = vld [vmem:[#allocation170_spill] sm:$0xff] }
 0x308   :  { %15701 = vst [vmem:[#allocation23_spill] sm:$0xff] %v13229_v54  ;;  %v13234_v33 = vadd.f32 %v9164_v14, %v4100_v23  ;;  %v4107_v37 = vadd.f32 %v4106_v58, %v15705_v6  ;;  %v15708_v54 = vld [vmem:[#allocation177_spill] sm:$0xff] }
 0x309   :  { %v5306_v10 = vpop.f32.mrf.mxu1  ;;  %v8946_v28 = vpop.f32.mrf.mxu0  ;;  %9321 = vmatmul.mubr.f32.gmra.mxu0 %v15706_v24 }
 0x30a   :  { %15704 = vst [vmem:[#allocation15_spill] sm:$0xff] %v13234_v33  ;;  %v13239_v27 = vadd.f32 %v5306_v10, %v4093_v5  ;;  %v4128_v62 = vadd.f32 %v8946_v28, %v15707_v1  ;;  %9323 = vmatprep.mubr.f32.mxu0 %v15708_v54  ;;  %9542 = vmatmul.mubr.f32.gmra.mxu1 %v15700_v46  ;;  %v15711_v33 = vld [vmem:[#allocation178_spill] sm:$0xff]  ;;  %v15712_v1 = vld [vmem:[#allocation181_spill] sm:$0xff] }
 0x30b   :  { %v9167_v34 = vpop.f32.mrf.mxu1  ;;  %v4120_v12 = vpop.f32.mrf.mxu0  ;;  %9544 = vmatprep.mubr.f32.mxu1 %v15703_v51  ;;  %v15714_v51 = vld [vmem:[#allocation172_spill] sm:$0xff] }
 0x30c   :  { %v13244_v23 = vadd.f32 %v9167_v34, %v4114_v52  ;;  %v4121_v14 = vadd.f32 %v4120_v12, %v15710_v20 }
 0x30d   :  { %v5322_v58 = vpop.f32.mrf.mxu1  ;;  %v8949_v6 = vpop.f32.mrf.mxu0  ;;  %9324 = vmatmul.mubr.f32.gmra.mxu0 %v15711_v33 }
 0x30e   :  { %15709 = vst [vmem:[#allocation25_spill] sm:$0xff] %v13244_v23  ;;  %v13249_v5 = vadd.f32 %v5322_v58, %v4107_v37  ;;  %v4142_v10 = vadd.f32 %v8949_v6, %v12496_v9  ;;  %9326 = vmatprep.mubr.f32.mxu0 %v15712_v1  ;;  %9545 = vmatmul.mubr.f32.gmra.mxu1 %v15706_v24  ;;  %v15715_v23 = vld [vmem:[#allocation183_spill] sm:$0xff]  ;;  %v15717_v9 = vld [vmem:[#allocation185_spill] sm:$0xff] }
 0x30f   :  { %v9170_v28 = vpop.f32.mrf.mxu1  ;;  %v4134_v46 = vpop.f32.mrf.mxu0  ;;  %9547 = vmatprep.mubr.f32.mxu1 %v15708_v54  ;;  %v15719_v54 = vld [vmem:[#allocation174_spill] sm:$0xff] }
 0x310   :  { %v13254_v52 = vadd.f32 %v9170_v28, %v4128_v62  ;;  %v4135_v34 = vadd.f32 %v4134_v46, %v15714_v51  ;;  %v15720_v51 = vld [vmem:[#allocation187_spill] sm:$0xff] }
 0x311   :  { %v5338_v12 = vpop.f32.mrf.mxu1  ;;  %v9184_v20 = vpop.f32.mrf.mxu0  ;;  %9327 = vmatmul.mubr.f32.gmra.mxu0 %v15715_v23 }
 0x312   :  { %15713 = vst [vmem:[#allocation19_spill] sm:$0xff] %v13254_v52  ;;  %v13259_v37 = vadd.f32 %v5338_v12, %v4121_v14  ;;  %9329 = vmatprep.mubr.f32.mxu0 %v15717_v9  ;;  %9548 = vmatmul.mubr.f32.gmra.mxu1 %v15711_v33  ;;  %v5452_v28 = vadd.f32 %v9184_v20, %v15719_v54  ;;  %v15722_v14 = vld [vmem:[#allocation188_spill] sm:$0xff]  ;;  %v15723_v33 = vld [vmem:[#allocation175_spill] sm:$0xff] }
 0x313   :  { %v9173_v58 = vpop.f32.mrf.mxu1  ;;  %v5445_v6 = vpop.f32.mrf.mxu0  ;;  %9550 = vmatprep.mubr.f32.mxu1 %v15712_v1 }
 0x314   :  { %15716 = vst [vmem:[#allocation28_spill] sm:$0xff] %v13259_v37  ;;  %v13263_v24 = vadd.f32 %v9173_v58, %v4142_v10  ;;  %v5446_v37 = vadd.f32 %v5445_v6, %v15723_v33  ;;  %v15729_v33 = vld [vmem:[#allocation197_spill] sm:$0xff] }
 0x315   :  { %v5354_v62 = vpop.f32.mrf.mxu1  ;;  %v9187_v46 = vpop.f32.mrf.mxu0  ;;  %9330 = vmatmul.mubr.f32.gmra.mxu0 %v15720_v51 }
 0x316   :  { %15718 = vst [vmem:[#allocation21_spill] sm:$0xff] %v13263_v24  ;;  %v13268_v52 = vadd.f32 %v5354_v62, %v4135_v34  ;;  %9332 = vmatprep.mubr.f32.mxu0 %v15722_v14  ;;  %9551 = vmatmul.mubr.f32.gmra.mxu1 %v15715_v23  ;;  %v15724_v24 = vld [vmem:[#allocation179_spill] sm:$0xff] }
 0x317   :  { %v9408_v12 = vpop.f32.mrf.mxu1  ;;  %v5457_v10 = vpop.f32.mrf.mxu0  ;;  %9553 = vmatprep.mubr.f32.mxu1 %v15717_v9  ;;  %v5464_v20 = vadd.f32 %v9187_v46, %v15724_v24  ;;  %v15725_v62 = vld [vmem:[#allocation191_spill] sm:$0xff]  ;;  %v15727_v46 = vld [vmem:[#allocation180_spill] sm:$0xff] }
 0x318   :  { %15721 = vst [vmem:[#allocation30_spill] sm:$0xff] %v13268_v52  ;;  %v6385_v58 = vadd.f32 %v9408_v12, %v5452_v28  ;;  %v15726_v52 = vld [vmem:[#allocation193_spill] sm:$0xff]  ;;  %v5458_v6 = vadd.f32 %v5457_v10, %v12526_v57 }
 0x319   :  { %v6378_v1 = vpop.f32.mrf.mxu1  ;;  %v9190_v34 = vpop.f32.mrf.mxu0  ;;  %9333 = vmatmul.mubr.f32.gmra.mxu0 %v15725_v62 }
 0x31a   :  { %7242 = vst.msk [vmem:[%s14083_s3 + $0x8] sm:$0xff] %vm7240_vm2, %v6385_v58  ;;  %v6379_v54 = vadd.f32 %v6378_v1, %v5446_v37  ;;  %9335 = vmatprep.mubr.f32.mxu0 %v15726_v52  ;;  %9554 = vmatmul.mubr.f32.gmra.mxu1 %v15720_v51  ;;  %v5476_v12 = vadd.f32 %v9190_v34, %v15727_v46  ;;  %v15728_v51 = vld [vmem:[#allocation195_spill] sm:$0xff]  ;;  %v15730_v58 = vld [vmem:[#allocation182_spill] sm:$0xff] }
 0x31b   :  { %v9411_v23 = vpop.f32.mrf.mxu1  ;;  %v5469_v9 = vpop.f32.mrf.mxu0  ;;  %9556 = vmatprep.mubr.f32.mxu1 %v15722_v14  ;;  %v15734_v46 = vld [vmem:[#allocation186_spill] sm:$0xff] }
 0x31c   :  { %7241 = vst.msk [vmem:[%s14083_s3] sm:$0xff] %vm7240_vm2, %v6379_v54  ;;  %v6397_v24 = vadd.f32 %v9411_v23, %v5464_v20  ;;  %v5470_v1 = vadd.f32 %v5469_v9, %v15730_v58  ;;  %v15731_v54 = vld [vmem:[#allocation184_spill] sm:$0xff] }
 0x31d   :  { %v6390_v28 = vpop.f32.mrf.mxu1  ;;  %v9193_v37 = vpop.f32.mrf.mxu0  ;;  %9336 = vmatmul.mubr.f32.gmra.mxu0 %v15728_v51 }
 0x31e   :  { %7244 = vst.msk [vmem:[%s14083_s3 + $0x18] sm:$0xff] %vm7240_vm2, %v6397_v24  ;;  %v6391_v57 = vadd.f32 %v6390_v28, %v5458_v6  ;;  %9338 = vmatprep.mubr.f32.mxu0 %v15729_v33  ;;  %9557 = vmatmul.mubr.f32.gmra.mxu1 %v15725_v62  ;;  %v5488_v23 = vadd.f32 %v9193_v37, %v15731_v54  ;;  %v15732_v6 = vld [vmem:[#allocation198_spill] sm:$0xff]  ;;  %v15733_v24 = vld [vmem:[#allocation200_spill] sm:$0xff]  ;;  %v15738_v54 = vld [vmem:[#allocation189_spill] sm:$0xff] }
 0x31f   :  { %v9414_v10 = vpop.f32.mrf.mxu1  ;;  %v5481_v14 = vpop.f32.mrf.mxu0  ;;  %9559 = vmatprep.mubr.f32.mxu1 %v15726_v52 }
 0x320   :  { %7243 = vst.msk [vmem:[%s14083_s3 + $0x10] sm:$0xff] %vm7240_vm2, %v6391_v57  ;;  %v6409_v20 = vadd.f32 %v9414_v10, %v5476_v12  ;;  %v5482_v12 = vadd.f32 %v5481_v14, %v15734_v46  ;;  %v15735_v10 = vld [vmem:[#allocation210_spill] sm:$0xff] }
 0x321   :  { %v6402_v34 = vpop.f32.mrf.mxu1  ;;  %v9196_v62 = vpop.f32.mrf.mxu0  ;;  %9339 = vmatmul.mubr.f32.gmra.mxu0 %v15732_v6 }
 0x322   :  { %7246 = vst.msk [vmem:[%s14083_s3 + $0x28] sm:$0xff] %vm7240_vm2, %v6409_v20  ;;  %v6403_v9 = vadd.f32 %v6402_v34, %v5470_v1  ;;  %9341 = vmatprep.mubr.f32.mxu0 %v15733_v24  ;;  %9560 = vmatmul.mubr.f32.gmra.mxu1 %v15728_v51  ;;  %v5500_v58 = vadd.f32 %v9196_v62, %v15735_v10  ;;  %v15736_v1 = vld [vmem:[#allocation203_spill] sm:$0xff]  ;;  %v15737_v20 = vld [vmem:[#allocation206_spill] sm:$0xff] }
 0x323   :  { %v9417_v28 = vpop.f32.mrf.mxu1  ;;  %v5493_v52 = vpop.f32.mrf.mxu0  ;;  %9562 = vmatprep.mubr.f32.mxu1 %v15729_v33  ;;  %v15742_v10 = vld [vmem:[#allocation190_spill] sm:$0xff] }
 0x324   :  { %7245 = vst.msk [vmem:[%s14083_s3 + $0x20] sm:$0xff] %vm7240_vm2, %v6403_v9  ;;  %v6421_v37 = vadd.f32 %v9417_v28, %v5488_v23  ;;  %v5494_v23 = vadd.f32 %v5493_v52, %v15738_v54  ;;  %v15739_v28 = vld [vmem:[#allocation213_spill] sm:$0xff] }
 0x325   :  { %v6414_v57 = vpop.f32.mrf.mxu1  ;;  %v9199_v51 = vpop.f32.mrf.mxu0  ;;  %9342 = vmatmul.mubr.f32.gmra.mxu0 %v15736_v1 }
 0x326   :  { %7248 = vst.msk [vmem:[%s14083_s3 + $0x38] sm:$0xff] %vm7240_vm2, %v6421_v37  ;;  %v6415_v14 = vadd.f32 %v6414_v57, %v5482_v12  ;;  %9344 = vmatprep.mubr.f32.mxu0 %v15737_v20  ;;  %9563 = vmatmul.mubr.f32.gmra.mxu1 %v15732_v6  ;;  %v5512_v46 = vadd.f32 %v9199_v51, %v15739_v28  ;;  %v15740_v12 = vld [vmem:[#allocation207_spill] sm:$0xff]  ;;  %v15741_v37 = vld [vmem:[#allocation208_spill] sm:$0xff] }
 0x327   :  { %v9420_v34 = vpop.f32.mrf.mxu1  ;;  %v5505_v33 = vpop.f32.mrf.mxu0  ;;  %9565 = vmatprep.mubr.f32.mxu1 %v15733_v24  ;;  %v15746_v28 = vld [vmem:[#allocation192_spill] sm:$0xff] }
 0x328   :  { %7247 = vst.msk [vmem:[%s14083_s3 + $0x30] sm:$0xff] %vm7240_vm2, %v6415_v14  ;;  %v6433_v62 = vadd.f32 %v9420_v34, %v5500_v58  ;;  %v5506_v58 = vadd.f32 %v5505_v33, %v15742_v10  ;;  %v15743_v34 = vld [vmem:[#allocation216_spill] sm:$0xff] }
 0x329   :  { %v6426_v9 = vpop.f32.mrf.mxu1  ;;  %v9202_v6 = vpop.f32.mrf.mxu0  ;;  %9345 = vmatmul.mubr.f32.gmra.mxu0 %v15740_v12 }
 0x32a   :  { %7250 = vst.msk [vmem:[%s14083_s3 + $0x48] sm:$0xff] %vm7240_vm2, %v6433_v62  ;;  %v6427_v52 = vadd.f32 %v6426_v9, %v5494_v23  ;;  %9347 = vmatprep.mubr.f32.mxu0 %v15741_v37  ;;  %9566 = vmatmul.mubr.f32.gmra.mxu1 %v15736_v1  ;;  %v5524_v54 = vadd.f32 %v9202_v6, %v15743_v34  ;;  %v15744_v23 = vld [vmem:[#allocation212_spill] sm:$0xff]  ;;  %v15745_v62 = vld [vmem:[#allocation215_spill] sm:$0xff] }
 0x32b   :  { %v9423_v57 = vpop.f32.mrf.mxu1  ;;  %v5517_v24 = vpop.f32.mrf.mxu0  ;;  %9568 = vmatprep.mubr.f32.mxu1 %v15737_v20 }
 0x32c   :  { %7249 = vst.msk [vmem:[%s14083_s3 + $0x40] sm:$0xff] %vm7240_vm2, %v6427_v52  ;;  %v6445_v51 = vadd.f32 %v9423_v57, %v5512_v46  ;;  %v5518_v46 = vadd.f32 %v5517_v24, %v15746_v28  ;;  %v15747_v57 = vld [vmem:[#allocation220_spill] sm:$0xff]  ;;  %v15751_v28 = vld [vmem:[#allocation225_spill] sm:$0xff] }
 0x32d   :  { %v6438_v14 = vpop.f32.mrf.mxu1  ;;  %v9205_v1 = vpop.f32.mrf.mxu0  ;;  %9348 = vmatmul.mubr.f32.gmra.mxu0 %v15744_v23 }
 0x32e   :  { %7252 = vst.msk [vmem:[%s14083_s3 + $0x58] sm:$0xff] %vm7240_vm2, %v6445_v51  ;;  %v6439_v33 = vadd.f32 %v6438_v14, %v5506_v58  ;;  %9350 = vmatprep.mubr.f32.mxu0 %v15745_v62  ;;  %9569 = vmatmul.mubr.f32.gmra.mxu1 %v15740_v12  ;;  %v5536_v10 = vadd.f32 %v9205_v1, %v15747_v57  ;;  %v15748_v58 = vld [vmem:[#allocation218_spill] sm:$0xff]  ;;  %v15749_v51 = vld [vmem:[#allocation219_spill] sm:$0xff] }
 0x32f   :  { %v9426_v9 = vpop.f32.mrf.mxu1  ;;  %v5529_v20 = vpop.f32.mrf.mxu0  ;;  %9571 = vmatprep.mubr.f32.mxu1 %v15741_v37 }
 0x330   :  { %7251 = vst.msk [vmem:[%s14083_s3 + $0x50] sm:$0xff] %vm7240_vm2, %v6439_v33  ;;  %v6457_v6 = vadd.f32 %v9426_v9, %v5524_v54  ;;  %v5530_v34 = vadd.f32 %v5529_v20, %v12598_v2  ;;  %v15750_v33 = vld [vmem:[#allocation194_spill] sm:$0xff] }
 0x331   :  { %v6450_v52 = vpop.f32.mrf.mxu1  ;;  %v9208_v12 = vpop.f32.mrf.mxu0  ;;  %9351 = vmatmul.mubr.f32.gmra.mxu0 %v15748_v58 }
 0x332   :  { %7254 = vst.msk [vmem:[%s14083_s3 + $0x68] sm:$0xff] %vm7240_vm2, %v6457_v6  ;;  %v6451_v24 = vadd.f32 %v6450_v52, %v5518_v46  ;;  %9353 = vmatprep.mubr.f32.mxu0 %v15749_v51  ;;  %9572 = vmatmul.mubr.f32.gmra.mxu1 %v15744_v23  ;;  %v5548_v9 = vadd.f32 %v9208_v12, %v15750_v33  ;;  %v15752_v46 = vld [vmem:[#allocation227_spill] sm:$0xff]  ;;  %v15753_v6 = vld [vmem:[#allocation222_spill] sm:$0xff]  ;;  %v15754_v12 = vld [vmem:[#allocation196_spill] sm:$0xff] }
 0x333   :  { %v9429_v14 = vpop.f32.mrf.mxu1  ;;  %v5541_v37 = vpop.f32.mrf.mxu0  ;;  %9574 = vmatprep.mubr.f32.mxu1 %v15745_v62 }
 0x334   :  { %7253 = vst.msk [vmem:[%s14083_s3 + $0x60] sm:$0xff] %vm7240_vm2, %v6451_v24  ;;  %v6469_v54 = vadd.f32 %v9429_v14, %v5536_v10  ;;  %v5542_v52 = vadd.f32 %v5541_v37, %v15753_v6  ;;  %v15755_v14 = vld [vmem:[#allocation228_spill] sm:$0xff]  ;;  %v15756_v37 = vld [vmem:[#allocation233_spill] sm:$0xff]  ;;  %v15759_v6 = vld [vmem:[#allocation234_spill] sm:$0xff] }
 0x335   :  { %v6462_v1 = vpop.f32.mrf.mxu1  ;;  %v9211_v23 = vpop.f32.mrf.mxu0  ;;  %9354 = vmatmul.mubr.f32.gmra.mxu0 %v15751_v28 }
 0x336   :  { %7256 = vst.msk [vmem:[%s14083_s3 + $0x78] sm:$0xff] %vm7240_vm2, %v6469_v54  ;;  %v6463_v2 = vadd.f32 %v6462_v1, %v5530_v34  ;;  %9356 = vmatprep.mubr.f32.mxu0 %v15752_v46  ;;  %9575 = vmatmul.mubr.f32.gmra.mxu1 %v15748_v58  ;;  %v5560_v24 = vadd.f32 %v9211_v23, %v15754_v12  ;;  %v15757_v1 = vld [vmem:[#allocation226_spill] sm:$0xff] }
 0x337   :  { %v9432_v20 = vpop.f32.mrf.mxu1  ;;  %v5553_v62 = vpop.f32.mrf.mxu0  ;;  %9577 = vmatprep.mubr.f32.mxu1 %v15749_v51 }
 0x338   :  { %7255 = vst.msk [vmem:[%s14083_s3 + $0x70] sm:$0xff] %vm7240_vm2, %v6463_v2  ;;  %v6481_v57 = vadd.f32 %v9432_v20, %v5548_v9  ;;  %v5554_v33 = vadd.f32 %v5553_v62, %v15757_v1  ;;  %v15758_v2 = vld [vmem:[#allocation199_spill] sm:$0xff] }
 0x339   :  { %v6474_v10 = vpop.f32.mrf.mxu1  ;;  %v9214_v58 = vpop.f32.mrf.mxu0  ;;  %9357 = vmatmul.mubr.f32.gmra.mxu0 %v15755_v14  ;;  %v15760_v62 = vld [vmem:[#allocation239_spill] sm:$0xff] }
 0x33a   :  { %7258 = vst.msk [vmem:[%s14083_s3 + $0x88] sm:$0xff] %vm7240_vm2, %v6481_v57  ;;  %v6475_v34 = vadd.f32 %v6474_v10, %v5542_v52  ;;  %9359 = vmatprep.mubr.f32.mxu0 %v15756_v37  ;;  %9578 = vmatmul.mubr.f32.gmra.mxu1 %v15751_v28  ;;  %v5572_v20 = vadd.f32 %v9214_v58, %v15758_v2  ;;  %v15761_v10 = vld [vmem:[#allocation229_spill] sm:$0xff] }
 0x33b   :  { %v9435_v54 = vpop.f32.mrf.mxu1  ;;  %v5565_v51 = vpop.f32.mrf.mxu0  ;;  %9580 = vmatprep.mubr.f32.mxu1 %v15752_v46 }
 0x33c   :  { %7257 = vst.msk [vmem:[%s14083_s3 + $0x80] sm:$0xff] %vm7240_vm2, %v6475_v34  ;;  %v6493_v9 = vadd.f32 %v9435_v54, %v5560_v24  ;;  %v5566_v12 = vadd.f32 %v5565_v51, %v15761_v10  ;;  %v15762_v54 = vld [vmem:[#allocation241_spill] sm:$0xff]  ;;  %v15767_v10 = vld [vmem:[#allocation250_spill] sm:$0xff] }
 0x33d   :  { %v6486_v23 = vpop.f32.mrf.mxu1  ;;  %v9217_v28 = vpop.f32.mrf.mxu0  ;;  %9360 = vmatmul.mubr.f32.gmra.mxu0 %v15759_v6 }
 0x33e   :  { %7260 = vst.msk [vmem:[%s14083_s3 + $0x98] sm:$0xff] %vm7240_vm2, %v6493_v9  ;;  %v6487_v52 = vadd.f32 %v6486_v23, %v5554_v33  ;;  %9362 = vmatprep.mubr.f32.mxu0 %v15760_v62  ;;  %9581 = vmatmul.mubr.f32.gmra.mxu1 %v15755_v14  ;;  %v5584_v34 = vadd.f32 %v9217_v28, %v12640_v38  ;;  %v15763_v33 = vld [vmem:[#allocation242_spill] sm:$0xff]  ;;  %v15764_v9 = vld [vmem:[#allocation201_spill] sm:$0xff] }
 0x33f   :  { %v9438_v57 = vpop.f32.mrf.mxu1  ;;  %v5577_v46 = vpop.f32.mrf.mxu0  ;;  %9583 = vmatprep.mubr.f32.mxu1 %v15756_v37 }
 0x340   :  { %7259 = vst.msk [vmem:[%s14083_s3 + $0x90] sm:$0xff] %vm7240_vm2, %v6487_v52  ;;  %v6505_v24 = vadd.f32 %v9438_v57, %v5572_v20  ;;  %v5578_v23 = vadd.f32 %v5577_v46, %v15764_v9  ;;  %v15765_v20 = vld [vmem:[#allocation231_spill] sm:$0xff]  ;;  %v15766_v52 = vld [vmem:[#allocation248_spill] sm:$0xff]  ;;  %v15768_v46 = vld [vmem:[#allocation202_spill] sm:$0xff] }
 0x341   :  { %v6498_v58 = vpop.f32.mrf.mxu1  ;;  %v9220_v14 = vpop.f32.mrf.mxu0  ;;  %9363 = vmatmul.mubr.f32.gmra.mxu0 %v15762_v54  ;;  %v15770_v9 = vld [vmem:[#allocation254_spill] sm:$0xff] }
 0x342   :  { %7262 = vst.msk [vmem:[%s14083_s3 + $0xa8] sm:$0xff] %vm7240_vm2, %v6505_v24  ;;  %v6499_v1 = vadd.f32 %v6498_v58, %v5566_v12  ;;  %9365 = vmatprep.mubr.f32.mxu0 %v15763_v33  ;;  %9584 = vmatmul.mubr.f32.gmra.mxu1 %v15759_v6  ;;  %v5596_v28 = vadd.f32 %v9220_v14, %v15765_v20 }
 0x343   :  { %v9441_v51 = vpop.f32.mrf.mxu1  ;;  %v5589_v38 = vpop.f32.mrf.mxu0  ;;  %9586 = vmatprep.mubr.f32.mxu1 %v15760_v62 }
 0x344   :  { %7261 = vst.msk [vmem:[%s14083_s3 + $0xa0] sm:$0xff] %vm7240_vm2, %v6499_v1  ;;  %v6517_v37 = vadd.f32 %v9441_v51, %v5584_v34  ;;  %v5590_v24 = vadd.f32 %v5589_v38, %v15768_v46  ;;  %v15769_v1 = vld [vmem:[#allocation253_spill] sm:$0xff] }
 0x345   :  { %v6510_v2 = vpop.f32.mrf.mxu1  ;;  %v9223_v6 = vpop.f32.mrf.mxu0  ;;  %9366 = vmatmul.mubr.f32.gmra.mxu0 %v15766_v52 }
 0x346   :  { %7264 = vst.msk [vmem:[%s14083_s3 + $0xb8] sm:$0xff] %vm7240_vm2, %v6517_v37  ;;  %v6511_v57 = vadd.f32 %v6510_v2, %v5578_v23  ;;  %9368 = vmatprep.mubr.f32.mxu0 %v15767_v10  ;;  %9587 = vmatmul.mubr.f32.gmra.mxu1 %v15762_v54  ;;  %v5608_v14 = vadd.f32 %v9223_v6, %v12664_v13  ;;  %v15772_v6 = vld [vmem:[#allocation262_spill] sm:$0xff] }
 0x347   :  { %v9444_v12 = vpop.f32.mrf.mxu1  ;;  %v5601_v62 = vpop.f32.mrf.mxu0  ;;  %9589 = vmatprep.mubr.f32.mxu1 %v15763_v33 }
 0x348   :  { %7263 = vst.msk [vmem:[%s14083_s3 + $0xb0] sm:$0xff] %vm7240_vm2, %v6511_v57  ;;  %v6529_v58 = vadd.f32 %v9444_v12, %v5596_v28  ;;  %v5602_v38 = vadd.f32 %v5601_v62, %v12670_v39  ;;  %v15771_v28 = vld [vmem:[#allocation260_spill] sm:$0xff]  ;;  %v15773_v62 = vld [vmem:[#allocation263_spill] sm:$0xff] }
 0x349   :  { %v6522_v34 = vpop.f32.mrf.mxu1  ;;  %v9226_v54 = vpop.f32.mrf.mxu0  ;;  %9369 = vmatmul.mubr.f32.gmra.mxu0 %v15769_v1 }
 0x34a   :  { %7266 = vst.msk [vmem:[%s14083_s3 + $0xc8] sm:$0xff] %vm7240_vm2, %v6529_v58  ;;  %v6523_v51 = vadd.f32 %v6522_v34, %v5590_v24  ;;  %9371 = vmatprep.mubr.f32.mxu0 %v15770_v9  ;;  %9590 = vmatmul.mubr.f32.gmra.mxu1 %v15766_v52  ;;  %v5620_v2 = vadd.f32 %v9226_v54, %v12676_v26  ;;  %v15774_v58 = vld [vmem:[#allocation269_spill] sm:$0xff] }
 0x34b   :  { %v9447_v23 = vpop.f32.mrf.mxu1  ;;  %v5613_v13 = vpop.f32.mrf.mxu0  ;;  %9592 = vmatprep.mubr.f32.mxu1 %v15767_v10 }
 0x34c   :  { %7265 = vst.msk [vmem:[%s14083_s3 + $0xc0] sm:$0xff] %vm7240_vm2, %v6523_v51  ;;  %v6541_v33 = vadd.f32 %v9447_v23, %v5608_v14  ;;  %v5614_v57 = vadd.f32 %v5613_v13, %v12682_v59  ;;  %v15775_v23 = vld [vmem:[#allocation271_spill] sm:$0xff] }
 0x34d   :  { %v6534_v37 = vpop.f32.mrf.mxu1  ;;  %v9229_v20 = vpop.f32.mrf.mxu0  ;;  %9372 = vmatmul.mubr.f32.gmra.mxu0 %v15771_v28 }
 0x34e   :  { %7268 = vst.msk [vmem:[%s14083_s3 + $0xd8] sm:$0xff] %vm7240_vm2, %v6541_v33  ;;  %v6535_v39 = vadd.f32 %v6534_v37, %v5602_v38  ;;  %9374 = vmatprep.mubr.f32.mxu0 %v15772_v6  ;;  %9593 = vmatmul.mubr.f32.gmra.mxu1 %v15769_v1  ;;  %v5632_v46 = vadd.f32 %v9229_v20, %v12688_v4  ;;  %v15776_v38 = vld [vmem:[#allocation273_spill] sm:$0xff] }
 0x34f   :  { %v9450_v52 = vpop.f32.mrf.mxu1  ;;  %v5625_v26 = vpop.f32.mrf.mxu0  ;;  %9595 = vmatprep.mubr.f32.mxu1 %v15770_v9 }
 0x350   :  { %7267 = vst.msk [vmem:[%s14083_s3 + $0xd0] sm:$0xff] %vm7240_vm2, %v6535_v39  ;;  %v6553_v10 = vadd.f32 %v9450_v52, %v5620_v2  ;;  %v5626_v14 = vadd.f32 %v5625_v26, %v12694_v22  ;;  %v15777_v39 = vld [vmem:[#allocation275_spill] sm:$0xff] }
 0x351   :  { %v6546_v12 = vpop.f32.mrf.mxu1  ;;  %v9232_v24 = vpop.f32.mrf.mxu0  ;;  %9375 = vmatmul.mubr.f32.gmra.mxu0 %v15773_v62 }
 0x352   :  { %7270 = vst.msk [vmem:[%s14083_s3 + $0xe8] sm:$0xff] %vm7240_vm2, %v6553_v10  ;;  %v6547_v59 = vadd.f32 %v6546_v12, %v5614_v57  ;;  %9377 = vmatprep.mubr.f32.mxu0 %v15774_v58  ;;  %9596 = vmatmul.mubr.f32.gmra.mxu1 %v15771_v28  ;;  %v5644_v51 = vadd.f32 %v9232_v24, %v12700_v25  ;;  %v15779_v24 = vld [vmem:[#allocation283_spill] sm:$0xff] }
 0x353   :  { %v9453_v34 = vpop.f32.mrf.mxu1  ;;  %v5637_v4 = vpop.f32.mrf.mxu0  ;;  %9598 = vmatprep.mubr.f32.mxu1 %v15772_v6  ;;  %v15778_v6 = vld [vmem:[#allocation276_spill] sm:$0xff] }
 0x354   :  { %7269 = vst.msk [vmem:[%s14083_s3 + $0xe0] sm:$0xff] %vm7240_vm2, %v6547_v59  ;;  %v6565_v54 = vadd.f32 %v9453_v34, %v5632_v46  ;;  %v5638_v33 = vadd.f32 %v5637_v4, %v12706_v63 }
 0x355   :  { %v6558_v1 = vpop.f32.mrf.mxu1  ;;  %v9235_v9 = vpop.f32.mrf.mxu0  ;;  %9378 = vmatmul.mubr.f32.gmra.mxu0 %v15775_v23 }
 0x356   :  { %7272 = vst.msk [vmem:[%s14083_s3 + $0xf8] sm:$0xff] %vm7240_vm2, %v6565_v54  ;;  %v6559_v22 = vadd.f32 %v6558_v1, %v5626_v14  ;;  %9380 = vmatprep.mubr.f32.mxu0 %v15776_v38  ;;  %9599 = vmatmul.mubr.f32.gmra.mxu1 %v15773_v62  ;;  %v5656_v20 = vadd.f32 %v9235_v9, %v12712_v56  ;;  %v15780_v62 = vld [vmem:[#allocation285_spill] sm:$0xff]  ;;  %v15781_v1 = vld [vmem:[#allocation288_spill] sm:$0xff] }
 0x357   :  { %v9456_v13 = vpop.f32.mrf.mxu1  ;;  %v5649_v25 = vpop.f32.mrf.mxu0  ;;  %9601 = vmatprep.mubr.f32.mxu1 %v15774_v58 }
 0x358   :  { %7271 = vst.msk [vmem:[%s14083_s3 + $0xf0] sm:$0xff] %vm7240_vm2, %v6559_v22  ;;  %v6577_v37 = vadd.f32 %v9456_v13, %v5644_v51  ;;  %v5650_v57 = vadd.f32 %v5649_v25, %v12718_v30  ;;  %v15782_v51 = vld [vmem:[#allocation290_spill] sm:$0xff] }
 0x359   :  { %v6570_v2 = vpop.f32.mrf.mxu1  ;;  %v9238_v28 = vpop.f32.mrf.mxu0  ;;  %9381 = vmatmul.mubr.f32.gmra.mxu0 %v15777_v39  ;;  %v15783_v25 = vld [vmem:[#allocation294_spill] sm:$0xff] }
 0x35a   :  { %7274 = vst.msk [vmem:[%s14083_s3 + $0x108] sm:$0xff] %vm7240_vm2, %v6577_v37  ;;  %v6571_v63 = vadd.f32 %v6570_v2, %v5638_v33  ;;  %9383 = vmatprep.mubr.f32.mxu0 %v15778_v6  ;;  %9602 = vmatmul.mubr.f32.gmra.mxu1 %v15775_v23  ;;  %v5668_v12 = vadd.f32 %v9238_v28, %v12724_v45  ;;  %v15784_v37 = vld [vmem:[#allocation295_spill] sm:$0xff] }
 0x35b   :  { %v9459_v52 = vpop.f32.mrf.mxu1  ;;  %v5661_v56 = vpop.f32.mrf.mxu0  ;;  %9604 = vmatprep.mubr.f32.mxu1 %v15776_v38 }
 0x35c   :  { %7273 = vst.msk [vmem:[%s14083_s3 + $0x100] sm:$0xff] %vm7240_vm2, %v6571_v63  ;;  %v6589_v26 = vadd.f32 %v9459_v52, %v5656_v20  ;;  %v5662_v58 = vadd.f32 %v5661_v56, %v12730_v36  ;;  %v15785_v52 = vld [vmem:[#allocation297_spill] sm:$0xff] }
 0x35d   :  { %v6582_v10 = vpop.f32.mrf.mxu1  ;;  %v9241_v46 = vpop.f32.mrf.mxu0  ;;  %9384 = vmatmul.mubr.f32.gmra.mxu0 %v15779_v24 }
 0x35e   :  { %7276 = vst.msk [vmem:[%s14083_s3 + $0x118] sm:$0xff] %vm7240_vm2, %v6589_v26  ;;  %v6583_v30 = vadd.f32 %v6582_v10, %v5650_v57  ;;  %9386 = vmatprep.mubr.f32.mxu0 %v15780_v62  ;;  %9605 = vmatmul.mubr.f32.gmra.mxu1 %v15777_v39  ;;  %v5680_v4 = vadd.f32 %v9241_v46, %v12736_v29  ;;  %v15786_v57 = vld [vmem:[#allocation298_spill] sm:$0xff] }
 0x35f   :  { %v9462_v59 = vpop.f32.mrf.mxu1  ;;  %v5673_v45 = vpop.f32.mrf.mxu0  ;;  %9607 = vmatprep.mubr.f32.mxu1 %v15778_v6 }
 0x360   :  { %7275 = vst.msk [vmem:[%s14083_s3 + $0x110] sm:$0xff] %vm7240_vm2, %v6583_v30  ;;  %v6601_v34 = vadd.f32 %v9462_v59, %v5668_v12  ;;  %v5674_v23 = vadd.f32 %v5673_v45, %v12742_v41  ;;  %v15787_v30 = vld [vmem:[#allocation299_spill] sm:$0xff] }
 0x361   :  { %v6594_v14 = vpop.f32.mrf.mxu1  ;;  %v9244_v54 = vpop.f32.mrf.mxu0  ;;  %9387 = vmatmul.mubr.f32.gmra.mxu0 %v15781_v1 }
 0x362   :  { %7278 = vst.msk [vmem:[%s14083_s3 + $0x128] sm:$0xff] %vm7240_vm2, %v6601_v34  ;;  %v6595_v36 = vadd.f32 %v6594_v14, %v5662_v58  ;;  %9389 = vmatprep.mubr.f32.mxu0 %v15782_v51  ;;  %9608 = vmatmul.mubr.f32.gmra.mxu1 %v15779_v24  ;;  %v5692_v13 = vadd.f32 %v9244_v54, %v12748_v42 }
 0x363   :  { %v9465_v9 = vpop.f32.mrf.mxu1  ;;  %v5685_v29 = vpop.f32.mrf.mxu0  ;;  %9610 = vmatprep.mubr.f32.mxu1 %v15780_v62 }
 0x364   :  { %7277 = vst.msk [vmem:[%s14083_s3 + $0x120] sm:$0xff] %vm7240_vm2, %v6595_v36  ;;  %v6613_v22 = vadd.f32 %v9465_v9, %v5680_v4  ;;  %v5686_v20 = vadd.f32 %v5685_v29, %v12754_v55 }
 0x365   :  { %v6606_v38 = vpop.f32.mrf.mxu1  ;;  %v9247_v33 = vpop.f32.mrf.mxu0  ;;  %9390 = vmatmul.mubr.f32.gmra.mxu0 %v15783_v25 }
 0x366   :  { %7280 = vst.msk [vmem:[%s14083_s3 + $0x138] sm:$0xff] %vm7240_vm2, %v6613_v22  ;;  %v6607_v41 = vadd.f32 %v6606_v38, %v5674_v23  ;;  %9392 = vmatprep.mubr.f32.mxu0 %v15784_v37  ;;  %9611 = vmatmul.mubr.f32.gmra.mxu1 %v15781_v1  ;;  %v5704_v63 = vadd.f32 %v9247_v33, %v12760_v35 }
 0x367   :  { %v9468_v2 = vpop.f32.mrf.mxu1  ;;  %v5697_v42 = vpop.f32.mrf.mxu0  ;;  %9613 = vmatprep.mubr.f32.mxu1 %v15782_v51 }
 0x368   :  { %7279 = vst.msk [vmem:[%s14083_s3 + $0x130] sm:$0xff] %vm7240_vm2, %v6607_v41  ;;  %v6625_v28 = vadd.f32 %v9468_v2, %v5692_v13  ;;  %v5698_v26 = vadd.f32 %v5697_v42, %v12766_v15 }
 0x369   :  { %v6618_v39 = vpop.f32.mrf.mxu1  ;;  %v9250_v6 = vpop.f32.mrf.mxu0  ;;  %9393 = vmatmul.mubr.f32.gmra.mxu0 %v15785_v52 }
 0x36a   :  { %7282 = vst.msk [vmem:[%s14083_s3 + $0x148] sm:$0xff] %vm7240_vm2, %v6625_v28  ;;  %v6619_v55 = vadd.f32 %v6618_v39, %v5686_v20  ;;  %9395 = vmatprep.mubr.f32.mxu0 %v15786_v57  ;;  %9614 = vmatmul.mubr.f32.gmra.mxu1 %v15783_v25  ;;  %v5716_v46 = vadd.f32 %v9250_v6, %v12772_v3 }
 0x36b   :  { %v9471_v56 = vpop.f32.mrf.mxu1  ;;  %v5709_v35 = vpop.f32.mrf.mxu0  ;;  %9616 = vmatprep.mubr.f32.mxu1 %v15784_v37 }
 0x36c   :  { %7281 = vst.msk [vmem:[%s14083_s3 + $0x140] sm:$0xff] %vm7240_vm2, %v6619_v55  ;;  %v6637_v10 = vadd.f32 %v9471_v56, %v5704_v63  ;;  %v5710_v59 = vadd.f32 %v5709_v35, %v12778_v32 }
 0x36d   :  { %v6630_v12 = vpop.f32.mrf.mxu1  ;;  %v9253_v24 = vpop.f32.mrf.mxu0  ;;  %9396 = vmatmul.mubr.f32.gmra.mxu0 %v15787_v30 }
 0x36e   :  { %7284 = vst.msk [vmem:[%s14083_s3 + $0x158] sm:$0xff] %vm7240_vm2, %v6637_v10  ;;  %v6631_v15 = vadd.f32 %v6630_v12, %v5698_v26  ;;  %9617 = vmatmul.mubr.f32.gmra.mxu1 %v15785_v52  ;;  %v5728_v34 = vadd.f32 %v9253_v24, %v12784_v7 }
 0x36f   :  { %v9474_v62 = vpop.f32.mrf.mxu1  ;;  %v5721_v3 = vpop.f32.mrf.mxu0  ;;  %9619 = vmatprep.mubr.f32.mxu1 %v15786_v57 }
 0x370   :  { %7283 = vst.msk [vmem:[%s14083_s3 + $0x150] sm:$0xff] %vm7240_vm2, %v6631_v15  ;;  %v6649_v58 = vadd.f32 %v9474_v62, %v5716_v46  ;;  %v5722_v54 = vadd.f32 %v5721_v3, %v12789_v19 }
 0x371   :  { %v6642_v45 = vpop.f32.mrf.mxu1  ;;  %v9256_v14 = vpop.f32.mrf.mxu0 }
 0x372   :  { %7286 = vst.msk [vmem:[%s14083_s3 + $0x168] sm:$0xff] %vm7240_vm2, %v6649_v58  ;;  %v6643_v4 = vadd.f32 %v6642_v45, %v5710_v59  ;;  %9620 = vmatmul.mubr.f32.gmra.mxu1 %v15787_v30  ;;  %v5740_v51 = vadd.f32 %v9256_v14, %v12794_v16 }
 0x373   :  { %v9477_v32 = vpop.f32.mrf.mxu1  ;;  %v5733_v1 = vpop.f32.mrf.mxu0 }
 0x374   :  { %7285 = vst.msk [vmem:[%s14083_s3 + $0x160] sm:$0xff] %vm7240_vm2, %v6643_v4  ;;  %v6661_v36 = vadd.f32 %v9477_v32, %v5728_v34  ;;  %v5734_v19 = vadd.f32 %v5733_v1, %v12799_v60 }
 0x375   :  { %v6654_v7 = vpop.f32.mrf.mxu1  ;;  %v9259_v9 = vpop.f32.mrf.mxu0 }
 0x376   :  { %7288 = vst.msk [vmem:[%s14083_s3 + $0x178] sm:$0xff] %vm7240_vm2, %v6661_v36  ;;  %v6655_v23 = vadd.f32 %v6654_v7, %v5722_v54  ;;  %v5752_v16 = vadd.f32 %v9259_v9, %v12804_v53 }
 0x377   :  { %v9480_v29 = vpop.f32.mrf.mxu1  ;;  %v5745_v22 = vpop.f32.mrf.mxu0 }
 0x378   :  { %7287 = vst.msk [vmem:[%s14083_s3 + $0x170] sm:$0xff] %vm7240_vm2, %v6655_v23  ;;  %v6673_v38 = vadd.f32 %v9480_v29, %v5740_v51  ;;  %v5746_v60 = vadd.f32 %v5745_v22, %v12809_v31 }
 0x379   :  { %v6666_v13 = vpop.f32.mrf.mxu1  ;;  %v9262_v33 = vpop.f32.mrf.mxu0 }
 0x37a   :  { %7290 = vst.msk [vmem:[%s14083_s3 + $0x188] sm:$0xff] %vm7240_vm2, %v6673_v38  ;;  %v6667_v25 = vadd.f32 %v6666_v13, %v5734_v19  ;;  %v5764_v53 = vadd.f32 %v9262_v33, %v12814_v49 }
 0x37b   :  { %v9483_v41 = vpop.f32.mrf.mxu1  ;;  %v5757_v37 = vpop.f32.mrf.mxu0 }
 0x37c   :  { %7289 = vst.msk [vmem:[%s14083_s3 + $0x180] sm:$0xff] %vm7240_vm2, %v6667_v25  ;;  %v6685_v2 = vadd.f32 %v9483_v41, %v5752_v16  ;;  %v5758_v31 = vadd.f32 %v5757_v37, %v12819_v47 }
 0x37d   :  { %v6678_v20 = vpop.f32.mrf.mxu1  ;;  %v9265_v42 = vpop.f32.mrf.mxu0 }
 0x37e   :  { %7292 = vst.msk [vmem:[%s14083_s3 + $0x198] sm:$0xff] %vm7240_vm2, %v6685_v2  ;;  %v6679_v28 = vadd.f32 %v6678_v20, %v5746_v60  ;;  %v5776_v49 = vadd.f32 %v9265_v42, %v12824_v50  ;;  %v15788_v60 = vld [vmem:[#allocation204_spill] sm:$0xff] }
 0x37f   :  { %v9486_v39 = vpop.f32.mrf.mxu1  ;;  %v5769_v63 = vpop.f32.mrf.mxu0 }
 0x380   :  { %7291 = vst.msk [vmem:[%s14083_s3 + $0x190] sm:$0xff] %vm7240_vm2, %v6679_v28  ;;  %v6697_v6 = vadd.f32 %v9486_v39, %v5764_v53  ;;  %v5770_v47 = vadd.f32 %v5769_v63, %v12829_v43  ;;  %v15789_v53 = vld [vmem:[#allocation236_spill] sm:$0xff] }
 0x381   :  { %v6690_v52 = vpop.f32.mrf.mxu1  ;;  %v9268_v55 = vpop.f32.mrf.mxu0 }
 0x382   :  { %7294 = vst.msk [vmem:[%s14083_s3 + $0x1a8] sm:$0xff] %vm7240_vm2, %v6697_v6  ;;  %v6691_v57 = vadd.f32 %v6690_v52, %v5758_v31  ;;  %v5788_v50 = vadd.f32 %v9268_v55, %v12834_v44  ;;  %v15790_v31 = vld [vmem:[#allocation205_spill] sm:$0xff]  ;;  %v15791_v55 = vld [vmem:[#allocation240_spill] sm:$0xff] }
 0x383   :  { %v9489_v56 = vpop.f32.mrf.mxu1  ;;  %v5781_v26 = vpop.f32.mrf.mxu0 }
 0x384   :  { %7293 = vst.msk [vmem:[%s14083_s3 + $0x1a0] sm:$0xff] %vm7240_vm2, %v6691_v57  ;;  %v6709_v35 = vadd.f32 %v9489_v56, %v5776_v49  ;;  %v5782_v43 = vadd.f32 %v5781_v26, %v12839_v61 }
 0x385   :  { %v6702_v10 = vpop.f32.mrf.mxu1  ;;  %v9271_v12 = vpop.f32.mrf.mxu0 }
 0x386   :  { %7296 = vst.msk [vmem:[%s14083_s3 + $0x1b8] sm:$0xff] %vm7240_vm2, %v6709_v35  ;;  %v6703_v46 = vadd.f32 %v6702_v10, %v5770_v47  ;;  %v5800_v44 = vadd.f32 %v9271_v12, %v12844_v17  ;;  %v15792_v35 = vld [vmem:[#allocation209_spill] sm:$0xff] }
 0x387   :  { %v9492_v24 = vpop.f32.mrf.mxu1  ;;  %v5793_v30 = vpop.f32.mrf.mxu0 }
 0x388   :  { %7295 = vst.msk [vmem:[%s14083_s3 + $0x1b0] sm:$0xff] %vm7240_vm2, %v6703_v46  ;;  %v6721_v15 = vadd.f32 %v9492_v24, %v5788_v50  ;;  %v5794_v61 = vadd.f32 %v5793_v30, %v12849_v40  ;;  %v15793_v24 = vld [vmem:[#allocation243_spill] sm:$0xff] }
 0x389   :  { %v6714_v62 = vpop.f32.mrf.mxu1  ;;  %v9274_v59 = vpop.f32.mrf.mxu0 }
 0x38a   :  { %7298 = vst.msk [vmem:[%s14083_s3 + $0x1c8] sm:$0xff] %vm7240_vm2, %v6721_v15  ;;  %v6715_v3 = vadd.f32 %v6714_v62, %v5782_v43  ;;  %v5812_v17 = vadd.f32 %v9274_v59, %v12854_v18 }
 0x38b   :  { %v9495_v58 = vpop.f32.mrf.mxu1  ;;  %v5805_v45 = vpop.f32.mrf.mxu0 }
 0x38c   :  { %7297 = vst.msk [vmem:[%s14083_s3 + $0x1c0] sm:$0xff] %vm7240_vm2, %v6715_v3  ;;  %v6733_v34 = vadd.f32 %v9495_v58, %v5800_v44  ;;  %v5806_v40 = vadd.f32 %v5805_v45, %v12859_v8  ;;  %v15794_v44 = vld [vmem:[#allocation211_spill] sm:$0xff]  ;;  %v15795_v45 = vld [vmem:[#allocation245_spill] sm:$0xff] }
 0x38d   :  { %v6726_v14 = vpop.f32.mrf.mxu1  ;;  %v9277_v4 = vpop.f32.mrf.mxu0 }
 0x38e   :  { %7300 = vst.msk [vmem:[%s14083_s3 + $0x1d8] sm:$0xff] %vm7240_vm2, %v6733_v34  ;;  %v6727_v32 = vadd.f32 %v6726_v14, %v5794_v61  ;;  %v5824_v18 = vadd.f32 %v9277_v4, %v12864_v21 }
 0x38f   :  { %v9498_v54 = vpop.f32.mrf.mxu1  ;;  %v5817_v1 = vpop.f32.mrf.mxu0 }
 0x390   :  { %7299 = vst.msk [vmem:[%s14083_s3 + $0x1d0] sm:$0xff] %vm7240_vm2, %v6727_v32  ;;  %v6745_v36 = vadd.f32 %v9498_v54, %v5812_v17  ;;  %v5818_v8 = vadd.f32 %v5817_v1, %v12869_v11  ;;  %v15796_v32 = vld [vmem:[#allocation214_spill] sm:$0xff] }
 0x391   :  { %v6738_v7 = vpop.f32.mrf.mxu1  ;;  %v9280_v51 = vpop.f32.mrf.mxu0 }
 0x392   :  { %7302 = vst.msk [vmem:[%s14083_s3 + $0x1e8] sm:$0xff] %vm7240_vm2, %v6745_v36  ;;  %v6739_v9 = vadd.f32 %v6738_v7, %v5806_v40  ;;  %v5836_v21 = vadd.f32 %v9280_v51, %v12874_v0  ;;  %v15797_v7 = vld [vmem:[#allocation249_spill] sm:$0xff] }
 0x393   :  { %v9501_v23 = vpop.f32.mrf.mxu1  ;;  %v5829_v29 = vpop.f32.mrf.mxu0 }
 0x394   :  { %7301 = vst.msk [vmem:[%s14083_s3 + $0x1e0] sm:$0xff] %vm7240_vm2, %v6739_v9  ;;  %v6757_v19 = vadd.f32 %v9501_v23, %v5824_v18  ;;  %v5830_v11 = vadd.f32 %v5829_v29, %v12879_v48 }
 0x395   :  { %v6750_v22 = vpop.f32.mrf.mxu1  ;;  %v9283_v38 = vpop.f32.mrf.mxu0 }
 0x396   :  { %7304 = vst.msk [vmem:[%s14083_s3 + $0x1f8] sm:$0xff] %vm7240_vm2, %v6757_v19  ;;  %v6751_v13 = vadd.f32 %v6750_v22, %v5818_v8  ;;  %v5848_v0 = vadd.f32 %v9283_v38, %v15788_v60  ;;  %v15798_v8 = vld [vmem:[#allocation217_spill] sm:$0xff]  ;;  %v15799_v38 = vld [vmem:[#allocation251_spill] sm:$0xff] }
 0x397   :  { %v9504_v16 = vpop.f32.mrf.mxu1  ;;  %v5841_v33 = vpop.f32.mrf.mxu0 }
 0x398   :  { %7303 = vst.msk [vmem:[%s14083_s3 + $0x1f0] sm:$0xff] %vm7240_vm2, %v6751_v13  ;;  %v6769_v25 = vadd.f32 %v9504_v16, %v5836_v21  ;;  %v5842_v48 = vadd.f32 %v5841_v33, %v15789_v53 }
 0x399   :  { %v6762_v41 = vpop.f32.mrf.mxu1  ;;  %v9286_v37 = vpop.f32.mrf.mxu0 }
 0x39a   :  { %7306 = vst.msk [vmem:[%s14083_s3 + $0x208] sm:$0xff] %vm7240_vm2, %v6769_v25  ;;  %v6763_v2 = vadd.f32 %v6762_v41, %v5830_v11  ;;  %v5860_v63 = vadd.f32 %v9286_v37, %v15790_v31  ;;  %v15800_v25 = vld [vmem:[#allocation221_spill] sm:$0xff] }
 0x39b   :  { %v9507_v20 = vpop.f32.mrf.mxu1  ;;  %v5853_v42 = vpop.f32.mrf.mxu0 }
 0x39c   :  { %7305 = vst.msk [vmem:[%s14083_s3 + $0x200] sm:$0xff] %vm7240_vm2, %v6763_v2  ;;  %v6781_v28 = vadd.f32 %v9507_v20, %v5848_v0  ;;  %v5854_v57 = vadd.f32 %v5853_v42, %v15791_v55  ;;  %v15801_v2 = vld [vmem:[#allocation255_spill] sm:$0xff] }
 0x39d   :  { %v6774_v39 = vpop.f32.mrf.mxu1  ;;  %v9289_v6 = vpop.f32.mrf.mxu0 }
 0x39e   :  { %7308 = vst.msk [vmem:[%s14083_s3 + $0x218] sm:$0xff] %vm7240_vm2, %v6781_v28  ;;  %v6775_v52 = vadd.f32 %v6774_v39, %v5842_v48  ;;  %v5872_v10 = vadd.f32 %v9289_v6, %v15792_v35  ;;  %v15802_v28 = vld [vmem:[#allocation223_spill] sm:$0xff] }
 0x39f   :  { %v9510_v49 = vpop.f32.mrf.mxu1  ;;  %v5865_v56 = vpop.f32.mrf.mxu0 }
 0x3a0   :  { %7307 = vst.msk [vmem:[%s14083_s3 + $0x210] sm:$0xff] %vm7240_vm2, %v6775_v52  ;;  %v6793_v47 = vadd.f32 %v9510_v49, %v5860_v63  ;;  %v5866_v43 = vadd.f32 %v5865_v56, %v15793_v24  ;;  %v15803_v52 = vld [vmem:[#allocation257_spill] sm:$0xff] }
 0x3a1   :  { %v6786_v26 = vpop.f32.mrf.mxu1  ;;  %v9292_v50 = vpop.f32.mrf.mxu0 }
 0x3a2   :  { %7310 = vst.msk [vmem:[%s14083_s3 + $0x228] sm:$0xff] %vm7240_vm2, %v6793_v47  ;;  %v6787_v12 = vadd.f32 %v6786_v26, %v5854_v57  ;;  %v5884_v59 = vadd.f32 %v9292_v50, %v15794_v44  ;;  %v15804_v47 = vld [vmem:[#allocation224_spill] sm:$0xff] }
 0x3a3   :  { %v9513_v46 = vpop.f32.mrf.mxu1  ;;  %v5877_v30 = vpop.f32.mrf.mxu0 }
 0x3a4   :  { %7309 = vst.msk [vmem:[%s14083_s3 + $0x220] sm:$0xff] %vm7240_vm2, %v6787_v12  ;;  %v6805_v15 = vadd.f32 %v9513_v46, %v5872_v10  ;;  %v5878_v34 = vadd.f32 %v5877_v30, %v15795_v45  ;;  %v15805_v12 = vld [vmem:[#allocation261_spill] sm:$0xff] }
 0x3a5   :  { %v6798_v62 = vpop.f32.mrf.mxu1  ;;  %v9295_v3 = vpop.f32.mrf.mxu0 }
 0x3a6   :  { %7312 = vst.msk [vmem:[%s14083_s3 + $0x238] sm:$0xff] %vm7240_vm2, %v6805_v15  ;;  %v6799_v58 = vadd.f32 %v6798_v62, %v5866_v43  ;;  %v5896_v54 = vadd.f32 %v9295_v3, %v15796_v32  ;;  %v15806_v15 = vld [vmem:[#allocation230_spill] sm:$0xff] }
 0x3a7   :  { %v9516_v61 = vpop.f32.mrf.mxu1  ;;  %v5889_v14 = vpop.f32.mrf.mxu0 }
 0x3a8   :  { %7311 = vst.msk [vmem:[%s14083_s3 + $0x230] sm:$0xff] %vm7240_vm2, %v6799_v58  ;;  %v6817_v17 = vadd.f32 %v9516_v61, %v5884_v59  ;;  %v5890_v18 = vadd.f32 %v5889_v14, %v15797_v7  ;;  %v15807_v58 = vld [vmem:[#allocation264_spill] sm:$0xff] }
 0x3a9   :  { %v6810_v4 = vpop.f32.mrf.mxu1  ;;  %v9298_v40 = vpop.f32.mrf.mxu0 }
 0x3aa   :  { %7314 = vst.msk [vmem:[%s14083_s3 + $0x248] sm:$0xff] %vm7240_vm2, %v6817_v17  ;;  %v6811_v1 = vadd.f32 %v6810_v4, %v5878_v34  ;;  %v5908_v29 = vadd.f32 %v9298_v40, %v15798_v8  ;;  %v15808_v17 = vld [vmem:[#allocation232_spill] sm:$0xff] }
 0x3ab   :  { %v9519_v36 = vpop.f32.mrf.mxu1  ;;  %v5901_v51 = vpop.f32.mrf.mxu0 }
 0x3ac   :  { %7313 = vst.msk [vmem:[%s14083_s3 + $0x240] sm:$0xff] %vm7240_vm2, %v6811_v1  ;;  %v6829_v9 = vadd.f32 %v9519_v36, %v5896_v54  ;;  %v5902_v13 = vadd.f32 %v5901_v51, %v15799_v38  ;;  %v15809_v1 = vld [vmem:[#allocation266_spill] sm:$0xff] }
 0x3ad   :  { %v6822_v23 = vpop.f32.mrf.mxu1  ;;  %v9301_v19 = vpop.f32.mrf.mxu0 }
 0x3ae   :  { %7316 = vst.msk [vmem:[%s14083_s3 + $0x258] sm:$0xff] %vm7240_vm2, %v6829_v9  ;;  %v6823_v22 = vadd.f32 %v6822_v23, %v5890_v18  ;;  %v5920_v41 = vadd.f32 %v9301_v19, %v15800_v25  ;;  %v15810_v9 = vld [vmem:[#allocation235_spill] sm:$0xff] }
 0x3af   :  { %v9522_v21 = vpop.f32.mrf.mxu1  ;;  %v5913_v16 = vpop.f32.mrf.mxu0 }
 0x3b0   :  { %7315 = vst.msk [vmem:[%s14083_s3 + $0x250] sm:$0xff] %vm7240_vm2, %v6823_v22  ;;  %v6841_v11 = vadd.f32 %v9522_v21, %v5908_v29  ;;  %v5914_v20 = vadd.f32 %v5913_v16, %v15801_v2  ;;  %v15811_v22 = vld [vmem:[#allocation237_spill] sm:$0xff] }
 0x3b1   :  { %v6834_v33 = vpop.f32.mrf.mxu1  ;;  %v9304_v60 = vpop.f32.mrf.mxu0 }
 0x3b2   :  { %7318 = vst.msk [vmem:[%s14083_s3 + $0x268] sm:$0xff] %vm7240_vm2, %v6841_v11  ;;  %v6835_v0 = vadd.f32 %v6834_v33, %v5902_v13  ;;  %v5932_v39 = vadd.f32 %v9304_v60, %v15802_v28  ;;  %v15812_v11 = vld [vmem:[#allocation270_spill] sm:$0xff] }
 0x3b3   :  { %v9525_v37 = vpop.f32.mrf.mxu1  ;;  %v5925_v53 = vpop.f32.mrf.mxu0 }
 0x3b4   :  { %7317 = vst.msk [vmem:[%s14083_s3 + $0x260] sm:$0xff] %vm7240_vm2, %v6835_v0  ;;  %v6853_v48 = vadd.f32 %v9525_v37, %v5920_v41  ;;  %v5926_v49 = vadd.f32 %v5925_v53, %v15803_v52  ;;  %v15813_v0 = vld [vmem:[#allocation238_spill] sm:$0xff] }
 0x3b5   :  { %v6846_v42 = vpop.f32.mrf.mxu1  ;;  %v9307_v31 = vpop.f32.mrf.mxu0 }
 0x3b6   :  { %7320 = vst.msk [vmem:[%s14083_s3 + $0x278] sm:$0xff] %vm7240_vm2, %v6853_v48  ;;  %v6847_v63 = vadd.f32 %v6846_v42, %v5914_v20  ;;  %v5944_v26 = vadd.f32 %v9307_v31, %v15804_v47  ;;  %v15814_v48 = vld [vmem:[#allocation274_spill] sm:$0xff] }
 0x3b7   :  { %v9528_v6 = vpop.f32.mrf.mxu1  ;;  %v5937_v55 = vpop.f32.mrf.mxu0 }
 0x3b8   :  { %7319 = vst.msk [vmem:[%s14083_s3 + $0x270] sm:$0xff] %vm7240_vm2, %v6847_v63  ;;  %v6865_v57 = vadd.f32 %v9528_v6, %v5932_v39  ;;  %v5938_v46 = vadd.f32 %v5937_v55, %v15805_v12  ;;  %v15815_v63 = vld [vmem:[#allocation244_spill] sm:$0xff] }
 0x3b9   :  { %v6858_v56 = vpop.f32.mrf.mxu1  ;;  %v9310_v35 = vpop.f32.mrf.mxu0 }
 0x3ba   :  { %7322 = vst.msk [vmem:[%s14083_s3 + $0x288] sm:$0xff] %vm7240_vm2, %v6865_v57  ;;  %v6859_v10 = vadd.f32 %v6858_v56, %v5926_v49  ;;  %v5956_v62 = vadd.f32 %v9310_v35, %v15806_v15  ;;  %v15816_v57 = vld [vmem:[#allocation277_spill] sm:$0xff] }
 0x3bb   :  { %v9531_v50 = vpop.f32.mrf.mxu1  ;;  %v5949_v24 = vpop.f32.mrf.mxu0 }
 0x3bc   :  { %7321 = vst.msk [vmem:[%s14083_s3 + $0x280] sm:$0xff] %vm7240_vm2, %v6859_v10  ;;  %v6877_v43 = vadd.f32 %v9531_v50, %v5944_v26  ;;  %v5950_v61 = vadd.f32 %v5949_v24, %v15807_v58  ;;  %v15817_v10 = vld [vmem:[#allocation246_spill] sm:$0xff] }
 0x3bd   :  { %v6870_v30 = vpop.f32.mrf.mxu1  ;;  %v9313_v44 = vpop.f32.mrf.mxu0 }
 0x3be   :  { %7324 = vst.msk [vmem:[%s14083_s3 + $0x298] sm:$0xff] %vm7240_vm2, %v6877_v43  ;;  %v6871_v59 = vadd.f32 %v6870_v30, %v5938_v46  ;;  %v5968_v4 = vadd.f32 %v9313_v44, %v15808_v17  ;;  %v15818_v43 = vld [vmem:[#allocation280_spill] sm:$0xff] }
 0x3bf   :  { %v9534_v3 = vpop.f32.mrf.mxu1  ;;  %v5961_v45 = vpop.f32.mrf.mxu0 }
 0x3c0   :  { %7323 = vst.msk [vmem:[%s14083_s3 + $0x290] sm:$0xff] %vm7240_vm2, %v6871_v59  ;;  %v6889_v34 = vadd.f32 %v9534_v3, %v5956_v62  ;;  %v5962_v36 = vadd.f32 %v5961_v45, %v15809_v1  ;;  %v15819_v59 = vld [vmem:[#allocation247_spill] sm:$0xff] }
 0x3c1   :  { %v6882_v14 = vpop.f32.mrf.mxu1  ;;  %v9316_v32 = vpop.f32.mrf.mxu0 }
 0x3c2   :  { %7326 = vst.msk [vmem:[%s14083_s3 + $0x2a8] sm:$0xff] %vm7240_vm2, %v6889_v34  ;;  %v6883_v54 = vadd.f32 %v6882_v14, %v5950_v61  ;;  %v5980_v23 = vadd.f32 %v9316_v32, %v15810_v9  ;;  %v15820_v34 = vld [vmem:[#allocation284_spill] sm:$0xff] }
 0x3c3   :  { %v9537_v40 = vpop.f32.mrf.mxu1  ;;  %v5973_v7 = vpop.f32.mrf.mxu0 }
 0x3c4   :  { %7325 = vst.msk [vmem:[%s14083_s3 + $0x2a0] sm:$0xff] %vm7240_vm2, %v6883_v54  ;;  %v6901_v18 = vadd.f32 %v9537_v40, %v5968_v4  ;;  %v5974_v21 = vadd.f32 %v5973_v7, %v15811_v22  ;;  %v15821_v54 = vld [vmem:[#allocation252_spill] sm:$0xff] }
 0x3c5   :  { %v6894_v51 = vpop.f32.mrf.mxu1  ;;  %v9319_v8 = vpop.f32.mrf.mxu0 }
 0x3c6   :  { %7328 = vst.msk [vmem:[%s14083_s3 + $0x2b8] sm:$0xff] %vm7240_vm2, %v6901_v18  ;;  %v6895_v29 = vadd.f32 %v6894_v51, %v5962_v36  ;;  %v5992_v33 = vadd.f32 %v9319_v8, %v15812_v11  ;;  %v15822_v18 = vld [vmem:[#allocation286_spill] sm:$0xff] }
 0x3c7   :  { %v9540_v19 = vpop.f32.mrf.mxu1  ;;  %v5985_v38 = vpop.f32.mrf.mxu0 }
 0x3c8   :  { %7327 = vst.msk [vmem:[%s14083_s3 + $0x2b0] sm:$0xff] %vm7240_vm2, %v6895_v29  ;;  %v6913_v13 = vadd.f32 %v9540_v19, %v5980_v23  ;;  %v5986_v37 = vadd.f32 %v5985_v38, %v15813_v0  ;;  %v15823_v29 = vld [vmem:[#allocation256_spill] sm:$0xff] }
 0x3c9   :  { %v6906_v16 = vpop.f32.mrf.mxu1  ;;  %v9322_v25 = vpop.f32.mrf.mxu0 }
 0x3ca   :  { %7330 = vst.msk [vmem:[%s14083_s3 + $0x2c8] sm:$0xff] %vm7240_vm2, %v6913_v13  ;;  %v6907_v41 = vadd.f32 %v6906_v16, %v5974_v21  ;;  %v6004_v42 = vadd.f32 %v9322_v25, %v15814_v48  ;;  %v15824_v13 = vld [vmem:[#allocation258_spill] sm:$0xff] }
 0x3cb   :  { %v9543_v60 = vpop.f32.mrf.mxu1  ;;  %v5997_v2 = vpop.f32.mrf.mxu0 }
 0x3cc   :  { %7329 = vst.msk [vmem:[%s14083_s3 + $0x2c0] sm:$0xff] %vm7240_vm2, %v6907_v41  ;;  %v6925_v20 = vadd.f32 %v9543_v60, %v5992_v33  ;;  %v5998_v6 = vadd.f32 %v5997_v2, %v15815_v63  ;;  %v15825_v41 = vld [vmem:[#allocation291_spill] sm:$0xff] }
 0x3cd   :  { %v6918_v53 = vpop.f32.mrf.mxu1  ;;  %v9325_v28 = vpop.f32.mrf.mxu0 }
 0x3ce   :  { %7332 = vst.msk [vmem:[%s14083_s3 + $0x2d8] sm:$0xff] %vm7240_vm2, %v6925_v20  ;;  %v6919_v39 = vadd.f32 %v6918_v53, %v5986_v37  ;;  %v6016_v56 = vadd.f32 %v9325_v28, %v15816_v57  ;;  %v15826_v20 = vld [vmem:[#allocation259_spill] sm:$0xff] }
 0x3cf   :  { %v9546_v31 = vpop.f32.mrf.mxu1  ;;  %v6009_v52 = vpop.f32.mrf.mxu0 }
 0x3d0   :  { %7331 = vst.msk [vmem:[%s14083_s3 + $0x2d0] sm:$0xff] %vm7240_vm2, %v6919_v39  ;;  %v6937_v49 = vadd.f32 %v9546_v31, %v6004_v42  ;;  %v6010_v50 = vadd.f32 %v6009_v52, %v15817_v10  ;;  %v15827_v39 = vld [vmem:[#allocation293_spill] sm:$0xff] }
 0x3d1   :  { %v6930_v55 = vpop.f32.mrf.mxu1  ;;  %v9328_v47 = vpop.f32.mrf.mxu0 }
 0x3d2   :  { %7334 = vst.msk [vmem:[%s14083_s3 + $0x2e8] sm:$0xff] %vm7240_vm2, %v6937_v49  ;;  %v6931_v26 = vadd.f32 %v6930_v55, %v5998_v6  ;;  %v6028_v30 = vadd.f32 %v9328_v47, %v15818_v43  ;;  %v15828_v49 = vld [vmem:[#allocation265_spill] sm:$0xff] }
 0x3d3   :  { %v9549_v35 = vpop.f32.mrf.mxu1  ;;  %v6021_v12 = vpop.f32.mrf.mxu0 }
 0x3d4   :  { %7333 = vst.msk [vmem:[%s14083_s3 + $0x2e0] sm:$0xff] %vm7240_vm2, %v6931_v26  ;;  %v6949_v46 = vadd.f32 %v9549_v35, %v6016_v56  ;;  %v6022_v3 = vadd.f32 %v6021_v12, %v15819_v59  ;;  %v15829_v26 = vld [vmem:[#allocation296_spill] sm:$0xff] }
 0x3d5   :  { %v6942_v24 = vpop.f32.mrf.mxu1  ;;  %v9331_v15 = vpop.f32.mrf.mxu0 }
 0x3d6   :  { %7336 = vst.msk [vmem:[%s14083_s3 + $0x2f8] sm:$0xff] %vm7240_vm2, %v6949_v46  ;;  %v6943_v62 = vadd.f32 %v6942_v24, %v6010_v50  ;;  %v6040_v14 = vadd.f32 %v9331_v15, %v15820_v34  ;;  %v15830_v46 = vld [vmem:[#allocation267_spill] sm:$0xff] }
 0x3d7   :  { %v9552_v44 = vpop.f32.mrf.mxu1  ;;  %v6033_v58 = vpop.f32.mrf.mxu0 }
 0x3d8   :  { %7335 = vst.msk [vmem:[%s14083_s3 + $0x2f0] sm:$0xff] %vm7240_vm2, %v6943_v62  ;;  %v6961_v61 = vadd.f32 %v9552_v44, %v6028_v30  ;;  %v6034_v40 = vadd.f32 %v6033_v58, %v15821_v54  ;;  %v15831_v62 = vld [vmem:[#allocation268_spill] sm:$0xff] }
 0x3d9   :  { %v6954_v45 = vpop.f32.mrf.mxu1  ;;  %v9334_v17 = vpop.f32.mrf.mxu0 }
 0x3da   :  { %7338 = vst.msk [vmem:[%s14083_s3 + $0x308] sm:$0xff] %vm7240_vm2, %v6961_v61  ;;  %v6955_v4 = vadd.f32 %v6954_v45, %v6022_v3  ;;  %v6052_v51 = vadd.f32 %v9334_v17, %v15822_v18  ;;  %v15832_v61 = vld [vmem:[#allocation272_spill] sm:$0xff] }
 0x3db   :  { %v9555_v32 = vpop.f32.mrf.mxu1  ;;  %v6045_v1 = vpop.f32.mrf.mxu0 }
 0x3dc   :  { %7337 = vst.msk [vmem:[%s14083_s3 + $0x300] sm:$0xff] %vm7240_vm2, %v6955_v4  ;;  %v6973_v36 = vadd.f32 %v9555_v32, %v6040_v14  ;;  %v6046_v19 = vadd.f32 %v6045_v1, %v15823_v29  ;;  %v15833_v4 = vld [vmem:[#allocation278_spill] sm:$0xff] }
 0x3dd   :  { %v6966_v7 = vpop.f32.mrf.mxu1  ;;  %v9337_v9 = vpop.f32.mrf.mxu0 }
 0x3de   :  { %7340 = vst.msk [vmem:[%s14083_s3 + $0x318] sm:$0xff] %vm7240_vm2, %v6973_v36  ;;  %v6967_v23 = vadd.f32 %v6966_v7, %v6034_v40  ;;  %v6064_v16 = vadd.f32 %v9337_v9, %v15824_v13  ;;  %v15834_v36 = vld [vmem:[#allocation279_spill] sm:$0xff] }
 0x3df   :  { %v9558_v8 = vpop.f32.mrf.mxu1  ;;  %v6057_v22 = vpop.f32.mrf.mxu0 }
 0x3e0   :  { %7339 = vst.msk [vmem:[%s14083_s3 + $0x310] sm:$0xff] %vm7240_vm2, %v6967_v23  ;;  %v6985_v21 = vadd.f32 %v9558_v8, %v6052_v51  ;;  %v6058_v60 = vadd.f32 %v6057_v22, %v15825_v41  ;;  %v15835_v23 = vld [vmem:[#allocation281_spill] sm:$0xff] }
 0x3e1   :  { %v6978_v38 = vpop.f32.mrf.mxu1  ;;  %v9340_v11 = vpop.f32.mrf.mxu0 }
 0x3e2   :  { %7342 = vst.msk [vmem:[%s14083_s3 + $0x328] sm:$0xff] %vm7240_vm2, %v6985_v21  ;;  %v6979_v33 = vadd.f32 %v6978_v38, %v6046_v19  ;;  %v6076_v53 = vadd.f32 %v9340_v11, %v15826_v20  ;;  %v15836_v21 = vld [vmem:[#allocation282_spill] sm:$0xff] }
 0x3e3   :  { %v9561_v25 = vpop.f32.mrf.mxu1  ;;  %v6069_v0 = vpop.f32.mrf.mxu0 }
 0x3e4   :  { %7341 = vst.msk [vmem:[%s14083_s3 + $0x320] sm:$0xff] %vm7240_vm2, %v6979_v33  ;;  %v6997_v37 = vadd.f32 %v9561_v25, %v6064_v16  ;;  %v6070_v31 = vadd.f32 %v6069_v0, %v15827_v39  ;;  %v15837_v33 = vld [vmem:[#allocation287_spill] sm:$0xff] }
 0x3e5   :  { %v6990_v2 = vpop.f32.mrf.mxu1  ;;  %v9343_v48 = vpop.f32.mrf.mxu0 }
 0x3e6   :  { %7344 = vst.msk [vmem:[%s14083_s3 + $0x338] sm:$0xff] %vm7240_vm2, %v6997_v37  ;;  %v6991_v42 = vadd.f32 %v6990_v2, %v6058_v60  ;;  %v6088_v55 = vadd.f32 %v9343_v48, %v15828_v49  ;;  %v15838_v37 = vld [vmem:[#allocation289_spill] sm:$0xff] }
 0x3e7   :  { %v9564_v28 = vpop.f32.mrf.mxu1  ;;  %v6081_v63 = vpop.f32.mrf.mxu0 }
 0x3e8   :  { %7343 = vst.msk [vmem:[%s14083_s3 + $0x330] sm:$0xff] %vm7240_vm2, %v6991_v42  ;;  %v7009_v6 = vadd.f32 %v9564_v28, %v6076_v53  ;;  %v6082_v35 = vadd.f32 %v6081_v63, %v15829_v26  ;;  %v15839_v42 = vld [vmem:[#allocation292_spill] sm:$0xff] }
 0x3e9   :  { %v7002_v52 = vpop.f32.mrf.mxu1  ;;  %v9346_v57 = vpop.f32.mrf.mxu0 }
 0x3ea   :  { %7346 = vst.msk [vmem:[%s14083_s3 + $0x348] sm:$0xff] %vm7240_vm2, %v7009_v6  ;;  %v7003_v56 = vadd.f32 %v7002_v52, %v6070_v31  ;;  %v6100_v24 = vadd.f32 %v9346_v57, %v15830_v46  ;;  %v15840_v6 = vld [vmem:[#allocation2_spill] sm:$0xff] }
 0x3eb   :  { %v9567_v47 = vpop.f32.mrf.mxu1  ;;  %v6093_v10 = vpop.f32.mrf.mxu0 }
 0x3ec   :  { %7345 = vst.msk [vmem:[%s14083_s3 + $0x340] sm:$0xff] %vm7240_vm2, %v7003_v56  ;;  %v7021_v50 = vadd.f32 %v9567_v47, %v6088_v55  ;;  %v6094_v44 = vadd.f32 %v6093_v10, %v15831_v62  ;;  %v15841_v56 = vld [vmem:[#allocation3_spill] sm:$0xff] }
 0x3ed   :  { %v7014_v12 = vpop.f32.mrf.mxu1  ;;  %v9349_v43 = vpop.f32.mrf.mxu0 }
 0x3ee   :  { %7348 = vst.msk [vmem:[%s14083_s3 + $0x358] sm:$0xff] %vm7240_vm2, %v7021_v50  ;;  %v7015_v30 = vadd.f32 %v7014_v12, %v6082_v35  ;;  %v6112_v45 = vadd.f32 %v9349_v43, %v15832_v61  ;;  %v15842_v50 = vld [vmem:[#allocation4_spill] sm:$0xff] }
 0x3ef   :  { %v9570_v15 = vpop.f32.mrf.mxu1  ;;  %v6105_v59 = vpop.f32.mrf.mxu0 }
 0x3f0   :  { %7347 = vst.msk [vmem:[%s14083_s3 + $0x350] sm:$0xff] %vm7240_vm2, %v7015_v30  ;;  %v7033_v3 = vadd.f32 %v9570_v15, %v6100_v24  ;;  %v6106_v32 = vadd.f32 %v6105_v59, %v15833_v4  ;;  %v15843_v30 = vld [vmem:[#allocation5_spill] sm:$0xff] }
 0x3f1   :  { %v7026_v58 = vpop.f32.mrf.mxu1  ;;  %v9352_v34 = vpop.f32.mrf.mxu0 }
 0x3f2   :  { %7350 = vst.msk [vmem:[%s14083_s3 + $0x368] sm:$0xff] %vm7240_vm2, %v7033_v3  ;;  %v7027_v14 = vadd.f32 %v7026_v58, %v6094_v44  ;;  %v6124_v7 = vadd.f32 %v9352_v34, %v15834_v36  ;;  %v15844_v3 = vld [vmem:[#allocation6_spill] sm:$0xff] }
 0x3f3   :  { %v9573_v17 = vpop.f32.mrf.mxu1  ;;  %v6117_v54 = vpop.f32.mrf.mxu0 }
 0x3f4   :  { %7349 = vst.msk [vmem:[%s14083_s3 + $0x360] sm:$0xff] %vm7240_vm2, %v7027_v14  ;;  %v7045_v40 = vadd.f32 %v9573_v17, %v6112_v45  ;;  %v6118_v8 = vadd.f32 %v6117_v54, %v15835_v23  ;;  %v15845_v14 = vld [vmem:[#allocation7_spill] sm:$0xff] }
 0x3f5   :  { %v7038_v1 = vpop.f32.mrf.mxu1  ;;  %v9355_v18 = vpop.f32.mrf.mxu0 }
 0x3f6   :  { %7352 = vst.msk [vmem:[%s14083_s3 + $0x378] sm:$0xff] %vm7240_vm2, %v7045_v40  ;;  %v7039_v51 = vadd.f32 %v7038_v1, %v6106_v32  ;;  %v6136_v38 = vadd.f32 %v9355_v18, %v15836_v21  ;;  %v15846_v40 = vld [vmem:[#allocation8_spill] sm:$0xff] }
 0x3f7   :  { %v9576_v9 = vpop.f32.mrf.mxu1  ;;  %v6129_v29 = vpop.f32.mrf.mxu0 }
 0x3f8   :  { %7351 = vst.msk [vmem:[%s14083_s3 + $0x370] sm:$0xff] %vm7240_vm2, %v7039_v51  ;;  %v7057_v19 = vadd.f32 %v9576_v9, %v6124_v7  ;;  %v6130_v25 = vadd.f32 %v6129_v29, %v15837_v33  ;;  %v15847_v51 = vld [vmem:[#allocation9_spill] sm:$0xff] }
 0x3f9   :  { %v7050_v22 = vpop.f32.mrf.mxu1  ;;  %v9358_v13 = vpop.f32.mrf.mxu0 }
 0x3fa   :  { %7354 = vst.msk [vmem:[%s14083_s3 + $0x388] sm:$0xff] %vm7240_vm2, %v7057_v19  ;;  %v7051_v16 = vadd.f32 %v7050_v22, %v6118_v8  ;;  %v6148_v2 = vadd.f32 %v9358_v13, %v15838_v37  ;;  %v15848_v19 = vld [vmem:[#allocation10_spill] sm:$0xff] }
 0x3fb   :  { %v9579_v11 = vpop.f32.mrf.mxu1  ;;  %v6141_v41 = vpop.f32.mrf.mxu0 }
 0x3fc   :  { %7353 = vst.msk [vmem:[%s14083_s3 + $0x380] sm:$0xff] %vm7240_vm2, %v7051_v16  ;;  %v7069_v60 = vadd.f32 %v9579_v11, %v6136_v38  ;;  %v6142_v28 = vadd.f32 %v6141_v41, %v15839_v42  ;;  %v15849_v16 = vld [vmem:[#allocation11_spill] sm:$0xff] }
 0x3fd   :  { %v7062_v0 = vpop.f32.mrf.mxu1  ;;  %v9361_v20 = vpop.f32.mrf.mxu0 }
 0x3fe   :  { %7356 = vst.msk [vmem:[%s14083_s3 + $0x398] sm:$0xff] %vm7240_vm2, %v7069_v60  ;;  %v7063_v53 = vadd.f32 %v7062_v0, %v6130_v25  ;;  %v6160_v52 = vadd.f32 %v9361_v20, %v15840_v6  ;;  %v15850_v60 = vld [vmem:[#allocation12_spill] sm:$0xff] }
 0x3ff   :  { %v9582_v48 = vpop.f32.mrf.mxu1  ;;  %v6153_v39 = vpop.f32.mrf.mxu0 }
 0x400   :  { %7355 = vst.msk [vmem:[%s14083_s3 + $0x390] sm:$0xff] %vm7240_vm2, %v7063_v53  ;;  %v7081_v31 = vadd.f32 %v9582_v48, %v6148_v2  ;;  %v6154_v47 = vadd.f32 %v6153_v39, %v15841_v56  ;;  %v15851_v53 = vld [vmem:[#allocation13_spill] sm:$0xff] }
 0x401   :  { %v7074_v63 = vpop.f32.mrf.mxu1  ;;  %v9364_v49 = vpop.f32.mrf.mxu0 }
 0x402   :  { %7358 = vst.msk [vmem:[%s14083_s3 + $0x3a8] sm:$0xff] %vm7240_vm2, %v7081_v31  ;;  %v7075_v55 = vadd.f32 %v7074_v63, %v6142_v28  ;;  %v6172_v12 = vadd.f32 %v9364_v49, %v15842_v50  ;;  %v15852_v31 = vld [vmem:[#allocation14_spill] sm:$0xff] }
 0x403   :  { %v9585_v57 = vpop.f32.mrf.mxu1  ;;  %v6165_v26 = vpop.f32.mrf.mxu0 }
 0x404   :  { %7357 = vst.msk [vmem:[%s14083_s3 + $0x3a0] sm:$0xff] %vm7240_vm2, %v7075_v55  ;;  %v7093_v35 = vadd.f32 %v9585_v57, %v6160_v52  ;;  %v6166_v15 = vadd.f32 %v6165_v26, %v15843_v30  ;;  %v15853_v55 = vld [vmem:[#allocation16_spill] sm:$0xff] }
 0x405   :  { %v7086_v10 = vpop.f32.mrf.mxu1  ;;  %v9367_v46 = vpop.f32.mrf.mxu0 }
 0x406   :  { %7360 = vst.msk [vmem:[%s14083_s3 + $0x3b8] sm:$0xff] %vm7240_vm2, %v7093_v35  ;;  %v7087_v24 = vadd.f32 %v7086_v10, %v6154_v47  ;;  %v6184_v58 = vadd.f32 %v9367_v46, %v15844_v3  ;;  %v15854_v35 = vld [vmem:[#allocation17_spill] sm:$0xff] }
 0x407   :  { %v9588_v43 = vpop.f32.mrf.mxu1  ;;  %v6177_v62 = vpop.f32.mrf.mxu0 }
 0x408   :  { %7359 = vst.msk [vmem:[%s14083_s3 + $0x3b0] sm:$0xff] %vm7240_vm2, %v7087_v24  ;;  %v7105_v44 = vadd.f32 %v9588_v43, %v6172_v12  ;;  %v6178_v17 = vadd.f32 %v6177_v62, %v15845_v14  ;;  %v15855_v24 = vld [vmem:[#allocation18_spill] sm:$0xff] }
 0x409   :  { %v7098_v59 = vpop.f32.mrf.mxu1  ;;  %v9370_v61 = vpop.f32.mrf.mxu0 }
 0x40a   :  { %7362 = vst.msk [vmem:[%s14083_s3 + $0x3c8] sm:$0xff] %vm7240_vm2, %v7105_v44  ;;  %v7099_v45 = vadd.f32 %v7098_v59, %v6166_v15  ;;  %v6196_v1 = vadd.f32 %v9370_v61, %v15846_v40  ;;  %v15856_v44 = vld [vmem:[#allocation20_spill] sm:$0xff] }
 0x40b   :  { %v9591_v34 = vpop.f32.mrf.mxu1  ;;  %v6189_v4 = vpop.f32.mrf.mxu0 }
 0x40c   :  { %7361 = vst.msk [vmem:[%s14083_s3 + $0x3c0] sm:$0xff] %vm7240_vm2, %v7099_v45  ;;  %v7117_v32 = vadd.f32 %v9591_v34, %v6184_v58  ;;  %v6190_v9 = vadd.f32 %v6189_v4, %v15847_v51  ;;  %v15857_v45 = vld [vmem:[#allocation23_spill] sm:$0xff] }
 0x40d   :  { %v7110_v54 = vpop.f32.mrf.mxu1  ;;  %v9373_v36 = vpop.f32.mrf.mxu0 }
 0x40e   :  { %7364 = vst.msk [vmem:[%s14083_s3 + $0x3d8] sm:$0xff] %vm7240_vm2, %v7117_v32  ;;  %v7111_v7 = vadd.f32 %v7110_v54, %v6178_v17  ;;  %v6208_v22 = vadd.f32 %v9373_v36, %v15848_v19  ;;  %v15858_v32 = vld [vmem:[#allocation15_spill] sm:$0xff] }
 0x40f   :  { %v9594_v18 = vpop.f32.mrf.mxu1  ;;  %v6201_v23 = vpop.f32.mrf.mxu0 }
 0x410   :  { %7363 = vst.msk [vmem:[%s14083_s3 + $0x3d0] sm:$0xff] %vm7240_vm2, %v7111_v7  ;;  %v7129_v8 = vadd.f32 %v9594_v18, %v6196_v1  ;;  %v6202_v11 = vadd.f32 %v6201_v23, %v15849_v16  ;;  %v15859_v23 = vld [vmem:[#allocation25_spill] sm:$0xff]  ;;  %v15860_v16 = vld [vmem:[#allocation19_spill] sm:$0xff] }
 0x411   :  { %v7122_v29 = vpop.f32.mrf.mxu1  ;;  %v9376_v21 = vpop.f32.mrf.mxu0 }
 0x412   :  { %7366 = vst.msk [vmem:[%s14083_s3 + $0x3e8] sm:$0xff] %vm7240_vm2, %v7129_v8  ;;  %v7123_v38 = vadd.f32 %v7122_v29, %v6190_v9  ;;  %v6220_v0 = vadd.f32 %v9376_v21, %v15850_v60  ;;  %v15861_v60 = vld [vmem:[#allocation28_spill] sm:$0xff] }
 0x413   :  { %v9597_v13 = vpop.f32.mrf.mxu1  ;;  %v6213_v33 = vpop.f32.mrf.mxu0 }
 0x414   :  { %7365 = vst.msk [vmem:[%s14083_s3 + $0x3e0] sm:$0xff] %vm7240_vm2, %v7123_v38  ;;  %v7141_v25 = vadd.f32 %v9597_v13, %v6208_v22  ;;  %v6214_v48 = vadd.f32 %v6213_v33, %v15851_v53 }
 0x415   :  { %v7134_v41 = vpop.f32.mrf.mxu1  ;;  %v9379_v37 = vpop.f32.mrf.mxu0 }
 0x416   :  { %7368 = vst.msk [vmem:[%s14083_s3 + $0x3f8] sm:$0xff] %vm7240_vm2, %v7141_v25  ;;  %v7135_v2 = vadd.f32 %v7134_v41, %v6202_v11  ;;  %v6232_v63 = vadd.f32 %v9379_v37, %v15852_v31 }
 0x417   :  { %v9600_v20 = vpop.f32.mrf.mxu1  ;;  %v6225_v42 = vpop.f32.mrf.mxu0 }
 0x418   :  { %7367 = vst.msk [vmem:[%s14083_s3 + $0x3f0] sm:$0xff] %vm7240_vm2, %v7135_v2  ;;  %v7153_v28 = vadd.f32 %v9600_v20, %v6220_v0  ;;  %v6226_v57 = vadd.f32 %v6225_v42, %v15853_v55  ;;  %v15862_v20 = vld [vmem:[#allocation21_spill] sm:$0xff] }
 0x419   :  { %v7146_v39 = vpop.f32.mrf.mxu1  ;;  %v9382_v6 = vpop.f32.mrf.mxu0 }
 0x41a   :  { %7370 = vst.msk [vmem:[%s14083_s3 + $0x408] sm:$0xff] %vm7240_vm2, %v7153_v28  ;;  %v7147_v52 = vadd.f32 %v7146_v39, %v6214_v48  ;;  %v6244_v10 = vadd.f32 %v9382_v6, %v15854_v35  ;;  %v15863_v28 = vld [vmem:[#allocation30_spill] sm:$0xff] }
 0x41b   :  { %v9603_v49 = vpop.f32.mrf.mxu1  ;;  %v6237_v56 = vpop.f32.mrf.mxu0 }
 0x41c   :  { %7369 = vst.msk [vmem:[%s14083_s3 + $0x400] sm:$0xff] %vm7240_vm2, %v7147_v52  ;;  %v7165_v47 = vadd.f32 %v9603_v49, %v6232_v63  ;;  %v6238_v43 = vadd.f32 %v6237_v56, %v15855_v24 }
 0x41d   :  { %v7158_v26 = vpop.f32.mrf.mxu1  ;;  %v9385_v50 = vpop.f32.mrf.mxu0 }
 0x41e   :  { %7372 = vst.msk [vmem:[%s14083_s3 + $0x418] sm:$0xff] %vm7240_vm2, %v7165_v47  ;;  %v7159_v12 = vadd.f32 %v7158_v26, %v6226_v57  ;;  %v6256_v59 = vadd.f32 %v9385_v50, %v15856_v44 }
 0x41f   :  { %v9606_v46 = vpop.f32.mrf.mxu1  ;;  %v6249_v30 = vpop.f32.mrf.mxu0 }
 0x420   :  { %7371 = vst.msk [vmem:[%s14083_s3 + $0x410] sm:$0xff] %vm7240_vm2, %v7159_v12  ;;  %v7177_v15 = vadd.f32 %v9606_v46, %v6244_v10  ;;  %v6250_v34 = vadd.f32 %v6249_v30, %v15857_v45 }
 0x421   :  { %v7170_v62 = vpop.f32.mrf.mxu1  ;;  %v9388_v3 = vpop.f32.mrf.mxu0 }
 0x422   :  { %7374 = vst.msk [vmem:[%s14083_s3 + $0x428] sm:$0xff] %vm7240_vm2, %v7177_v15  ;;  %v7171_v58 = vadd.f32 %v7170_v62, %v6238_v43  ;;  %v6268_v54 = vadd.f32 %v9388_v3, %v15858_v32 }
 0x423   :  { %v9609_v61 = vpop.f32.mrf.mxu1  ;;  %v6261_v14 = vpop.f32.mrf.mxu0 }
 0x424   :  { %7373 = vst.msk [vmem:[%s14083_s3 + $0x420] sm:$0xff] %vm7240_vm2, %v7171_v58  ;;  %v7189_v17 = vadd.f32 %v9609_v61, %v6256_v59  ;;  %v6262_v7 = vadd.f32 %v6261_v14, %v13239_v27 }
 0x425   :  { %v7182_v4 = vpop.f32.mrf.mxu1  ;;  %v9391_v40 = vpop.f32.mrf.mxu0 }
 0x426   :  { %7376 = vst.msk [vmem:[%s14083_s3 + $0x438] sm:$0xff] %vm7240_vm2, %v7189_v17  ;;  %v7183_v1 = vadd.f32 %v7182_v4, %v6250_v34  ;;  %v6280_v8 = vadd.f32 %v9391_v40, %v15859_v23 }
 0x427   :  { %v9612_v36 = vpop.f32.mrf.mxu1  ;;  %v6273_v18 = vpop.f32.mrf.mxu0 }
 0x428   :  { %7375 = vst.msk [vmem:[%s14083_s3 + $0x430] sm:$0xff] %vm7240_vm2, %v7183_v1  ;;  %v7201_v51 = vadd.f32 %v9612_v36, %v6268_v54  ;;  %v6274_v27 = vadd.f32 %v6273_v18, %v13249_v5 }
 0x429   :  { %v7194_v9 = vpop.f32.mrf.mxu1  ;;  %v9394_v29 = vpop.f32.mrf.mxu0 }
 0x42a   :  { %7378 = vst.msk [vmem:[%s14083_s3 + $0x448] sm:$0xff] %vm7240_vm2, %v7201_v51  ;;  %v7195_v19 = vadd.f32 %v7194_v9, %v6262_v7  ;;  %v6292_v11 = vadd.f32 %v9394_v29, %v15860_v16 }
 0x42b   :  { %v9615_v22 = vpop.f32.mrf.mxu1  ;;  %v6285_v21 = vpop.f32.mrf.mxu0 }
 0x42c   :  { %7377 = vst.msk [vmem:[%s14083_s3 + $0x440] sm:$0xff] %vm7240_vm2, %v7195_v19  ;;  %v7213_v38 = vadd.f32 %v9615_v22, %v6280_v8  ;;  %v6286_v5 = vadd.f32 %v6285_v21, %v15861_v60 }
 0x42d   :  { %v7206_v13 = vpop.f32.mrf.mxu1  ;;  %v9397_v33 = vpop.f32.mrf.mxu0 }
 0x42e   :  { %7380 = vst.msk [vmem:[%s14083_s3 + $0x458] sm:$0xff] %vm7240_vm2, %v7213_v38  ;;  %v7207_v25 = vadd.f32 %v7206_v13, %v6274_v27  ;;  %v6304_v53 = vadd.f32 %v9397_v33, %v15862_v20 }
 0x42f   :  { %v9618_v41 = vpop.f32.mrf.mxu1  ;;  %v6297_v37 = vpop.f32.mrf.mxu0 }
 0x430   :  { %7379 = vst.msk [vmem:[%s14083_s3 + $0x450] sm:$0xff] %vm7240_vm2, %v7207_v25  ;;  %v7225_v0 = vadd.f32 %v9618_v41, %v6292_v11  ;;  %v6298_v39 = vadd.f32 %v6297_v37, %v15863_v28 }
 0x431   :  { %v7218_v2 = vpop.f32.mrf.mxu1 }
 0x432   :  { %7382 = vst.msk [vmem:[%s14083_s3 + $0x468] sm:$0xff] %vm7240_vm2, %v7225_v0  ;;  %v7219_v48 = vadd.f32 %v7218_v2, %v6286_v5 }
 0x433   :  { %v9621_v42 = vpop.f32.mrf.mxu1 }
 0x434   :  { %7381 = vst.msk [vmem:[%s14083_s3 + $0x460] sm:$0xff] %vm7240_vm2, %v7219_v48  ;;  %v7237_v31 = vadd.f32 %v9621_v42, %v6304_v53 }
 0x435   :  { %v7230_v63 = vpop.f32.mrf.mxu1 }
 0x436   :  { %7384 = vst.msk [vmem:[%s14083_s3 + $0x478] sm:$0xff] %vm7240_vm2, %v7237_v31  ;;  %v7231_v6 = vadd.f32 %v7230_v63, %v6298_v39 }
 0x438   :  { %7383 = vst.msk [vmem:[%s14083_s3 + $0x470] sm:$0xff] %vm7240_vm2, %v7231_v6 }

</bundles_post_ra>
